<compile_context>
chip_gen: v7x
topology: tpu7x:2x2x1
jax: 0.10.0
libtpu: 0.0.40
codegen_flags: <defaults>
</compile_context>

<pallas_src>
import jax
import jax.numpy as jnp
from jax.experimental import pallas as pl
from jax.experimental.pallas import tpu as pltpu

# ----------------- efficient-kan spline constants (grid never updated) -------
GRID_SIZE = 5
SPLINE_ORDER = 3
H_STEP = 2.0 / GRID_SIZE                        # uniform knot spacing
NUM_BASES = GRID_SIZE + SPLINE_ORDER            # 8 cubic bases per feature
NUM_KNOTS = GRID_SIZE + 2 * SPLINE_ORDER + 1    # 12 knots of the extended grid
GRID = [-1.0 + (i - SPLINE_ORDER) * H_STEP for i in range(NUM_KNOTS)]
GRID0 = GRID[0]                                 # -2.2
INV_H = 1.0 / H_STEP

LANE = 128        # pooled positions per in-kernel chunk (TPU lane width)
CO_PAD = 16       # output channels padded to one bf16 sublane tile
MAX_CHUNKS = 16   # max chunks per grid step (2048 positions, ~2 MiB VMEM/step)


def _round_up(a, b):
    return (a + b - 1) // b * b


# ------------------------------ Pallas kernel --------------------------------

def _emit_branches(x, lhs_ref, slot, f_pad):
    """Write the SiLU block and the 8 cubic-B-spline basis blocks for one
    (f_pad, 128) chunk (features on sublanes, pooled positions on lanes) into
    lhs_ref[slot].  Uses the uniform-knot closed form instead of the 11-step
    Cox-de Boor recursion; keeps efficient-kan's half-open-interval semantics
    (all bases are exactly 0 for x outside [GRID[0], GRID[-1]))."""
    dt = lhs_ref.dtype
    # SiLU base branch: exp + approx reciprocal run on the EUP, off the VALU.
    silu = x * pl.reciprocal(1.0 + jnp.exp(-x), approx=True)
    lhs_ref[slot, 0:f_pad, :] = silu.astype(dt)

    # Cardinal cubic B-spline: interval index i = floor((x - g0)/h), local u.
    # TODO(synk): on v6e/v7x this could run in packed bf16 (2x VALU throughput);
    # kept f32 so the same kernel is numerically safe on v5e (no bf16 VPU/EUP).
    t = (x - GRID0) * INV_H
    it = jnp.floor(t)
    u = t - it
    u2 = u * u
    u3 = u2 * u
    om = 1.0 - u
    c3 = u3 * (1.0 / 6.0)                 # value of basis j when i == j
    c1 = 0.5 * u3 - u2 + (2.0 / 3.0)      # ... when i == j + 2
    c0 = om * om * om * (1.0 / 6.0)       # ... when i == j + 3
    c2 = 1.0 - c0 - c1 - c3               # ... when i == j + 1 (partition of 1)
    for j in range(NUM_BASES):
        bj = jnp.where(it == float(j), c3,
             jnp.where(it == float(j + 1), c2,
             jnp.where(it == float(j + 2), c1,
             jnp.where(it == float(j + 3), c0, 0.0))))
        r0 = (1 + j) * f_pad
        lhs_ref[slot, r0:r0 + f_pad, :] = bj.astype(dt)


def _make_kan_conv_pool_kernel(f_pad, k_pad, ncb):
    k_real = (1 + NUM_BASES) * f_pad

    def kernel(patches_ref, w_ref, out_ref, lhs_ref):
        # patches_ref: (4, ncb, f_pad, 128) bf16
        # w_ref      : (CO_PAD, k_pad) bf16 channel-major packed weights
        # out_ref    : (ncb, CO_PAD, 128) bf16
        # lhs_ref    : (2, k_pad, 128) bf16 scratch, double buffered so the dot
        #              of pool position p overlaps the VPU build of p+1.
        w = w_ref[...]                                   # stays VMEM resident
        if k_pad > k_real:
            # Zero the K-padding rows once per grid step: their weight columns
            # are zero, but 0 * uninitialised VMEM could still produce NaN.
            for s in range(2):
                lhs_ref[s, k_real:, :] = jnp.zeros(
                    (k_pad - k_real, LANE), lhs_ref.dtype)

        def chunk_body(c, carry):
            best = None
            for p in range(4):                           # 2x2 pool window, unrolled
                slot = p & 1
                x = patches_ref[p, c, :, :].astype(jnp.float32)
                _emit_branches(x, lhs_ref, slot, f_pad)
                # Plain (M,K)x(K,N) MXU matmul: channels x K  @  K x positions.
                r = jax.lax.dot_general(
                    w, lhs_ref[slot],
                    dimension_numbers=(((1,), (0,)), ((), ())),
                    preferred_element_type=jnp.float32)   # (CO_PAD, 128) f32
                best = r if best is None else jnp.maximum(best, r)
            out_ref[c, :, :] = best.astype(out_ref.dtype)  # 2x2 max-pool done
            return carry

        jax.lax.fori_loop(0, ncb, chunk_body, 0)

    return kernel


# -------------------------------- glue (JAX) ---------------------------------

def _extract_patches_pool_grouped(x_cf, f_pad):
    """3x3 valid patches of a channel-first activation, grouped so axis 0 is the
    2x2 max-pool window position and features sit on axis 1 (-> sublanes).

    Returns ((4, f_pad, n) bf16, n, (Hh, Wh)); feature order f = cin*9 + ky*3+kx,
    positions flattened row-major over (B, Hh, Wh)."""
    # TODO(synk): this im2col + regroup still runs as XLA glue (9x HBM expansion
    # of the input); moving it in-kernel needs a manual halo DMA via
    # memory_space=pl.ANY and is the next step if glue relayout dominates.
    c, b, h, w = x_cf.shape
    ho, wo = h - 2, w - 2
    hh, wh = ho // 2, wo // 2
    cols = [x_cf[:, :, ky:ky + ho, kx:kx + wo]
            for ky in range(3) for kx in range(3)]
    p = jnp.stack(cols, axis=1).reshape(c * 9, b, ho, wo)
    p = p[:, :, :2 * hh, :2 * wh]                         # MaxPool2d(2) floors
    p = p.reshape(c * 9, b, hh, 2, wh, 2)
    p = jnp.transpose(p, (3, 5, 0, 1, 2, 4)).reshape(4, c * 9, b * hh * wh)
    if f_pad > c * 9:
        # Padded feature rows carry x == 0 whose spline bases are NOT zero; the
        # matching zero weight columns (pack_kan_weights_t) keep them out of the
        # output -- do not repack weights without preserving that.
        p = jnp.pad(p, ((0, 0), (0, f_pad - c * 9), (0, 0)))
    return p.astype(jnp.bfloat16), b * hh * wh, (hh, wh)


def kan_conv_pool(x_cf, w_t, cout):
    """One KAN_Convolutional_Layer(kernel=3x3) + MaxPool2d(2), fused in Pallas.

    x_cf: (Cin, B, H, W) channel-first activation (f32 or bf16).
    Returns (cout, B, (H-2)//2, (W-2)//2) bf16."""
    cin, b, h, _ = x_cf.shape
    f = cin * 9
    f_pad = _round_up(f, 8)
    k_pad = _round_up((1 + NUM_BASES) * f_pad, LANE)
    assert cout <= CO_PAD
    assert w_t.shape == (CO_PAD, k_pad), (
        f"weights must be packed with pack_kan_weights_t: expected "
        f"{(CO_PAD, k_pad)}, got {w_t.shape}")

    patches, n, (hh, wh) = _extract_patches_pool_grouped(x_cf, f_pad)

    # Chunking: 128 pooled positions per chunk live on the lane axis; the chunk
    # index is a LEADING block axis so the kernel only uses full, aligned slices
    # of the minor dims.  Aim for >= 4 grid steps (megacore + DMA pipelining)
    # while capping chunks/step (~2 MiB VMEM/step -> fits the default scoped
    # VMEM limits on v5e / v6e / v7x without vmem_limit_bytes).
    nc = pl.cdiv(n, LANE)
    ncb = max(1, min(MAX_CHUNKS, pl.cdiv(nc, 4)))
    n_pad = _round_up(n, ncb * LANE)
    if n_pad > n:
        patches = jnp.pad(patches, ((0, 0), (0, 0), (0, n_pad - n)))
    nct = n_pad // LANE
    patches = jnp.transpose(patches.reshape(4, f_pad, nct, LANE), (0, 2, 1, 3))

    out = pl.pallas_call(
        _make_kan_conv_pool_kernel(f_pad, k_pad, ncb),
        out_shape=jax.ShapeDtypeStruct((nct, CO_PAD, LANE), jnp.bfloat16),
        grid=(nct // ncb,),
        in_specs=[
            pl.BlockSpec((4, ncb, f_pad, LANE), lambda i: (0, i, 0, 0)),
            pl.BlockSpec((CO_PAD, k_pad), lambda i: (0, 0)),   # weights resident
        ],
        out_specs=pl.BlockSpec((ncb, CO_PAD, LANE), lambda i: (i, 0, 0)),
        scratch_shapes=[pltpu.VMEM((2, k_pad, LANE), jnp.bfloat16)],
        compiler_params=pltpu.CompilerParams(
            dimension_semantics=("parallel",),      # independent position tiles
        ),
    )(patches, w_t)

    y = jnp.transpose(out, (1, 0, 2)).reshape(CO_PAD, n_pad)[:cout, :n]
    return y.reshape(cout, b, hh, wh)


def init_kan_layer_params(key, cin, cout):
    """Synthetic deterministic params for one KAN_Convolutional_Layer
    (efficient-kan KANLinear(cin*9 -> cout); standalone spline scaler folded)."""
    f = cin * 9
    k1, k2, k3 = jax.random.split(key, 3)
    base_w = 0.1 * jax.random.normal(k1, (f, cout), jnp.float32)
    spline_w = 0.1 * jax.random.normal(k2, (NUM_BASES, f, cout), jnp.float32)
    spline_scaler = 1.0 + 0.1 * jax.random.normal(k3, (f, cout), jnp.float32)
    return base_w, spline_w * spline_scaler[None, :, :]


def pack_kan_weights_t(base_w, spline_w_scaled):
    """Pack one layer's weights as a (CO_PAD, k_pad) bf16 channel-major matrix.

    Column block 0 = SiLU-branch weights, blocks 1..8 = spline-basis weights,
    each f_pad wide.  Columns of padded features and rows beyond cout are zero;
    these zeros are load-bearing (padded feature rows carry x == 0 whose spline
    bases are nonzero)."""
    f, c = base_w.shape
    f_pad = _round_up(f, 8)
    k_pad = _round_up((1 + NUM_BASES) * f_pad, LANE)
    w = jnp.zeros((CO_PAD, k_pad), jnp.float32)
    w = w.at[:c, 0:f].set(base_w.T)
    for j in range(NUM_BASES):
        r0 = (1 + j) * f_pad
        w = w.at[:c, r0:r0 + f].set(spline_w_scaled[j].T)
    return w.astype(jnp.bfloat16)


def kanc_mlp_medium_forward(x_nchw, params):
    b = x_nchw.shape[0]
    x_cf = jnp.transpose(x_nchw, (1, 0, 2, 3))             # (C, B, H, W)
    y1 = kan_conv_pool(x_cf, params["c1_w"], cout=5)       # (5, B, 13, 13)
    y2 = kan_conv_pool(y1, params["c2_w"], cout=10)        # (10, B, 5, 5)
    # NOTE: the torch forward prints the pre-flatten shape here; omitted so the
    # script's stdout is only the success marker.
    y2_nchw = jnp.transpose(y2, (1, 0, 2, 3))               # back to NCHW
    flat = y2_nchw.reshape(b, -1).astype(jnp.float32)       # nn.Flatten (C,H,W)
    # The 250x512 head is ~0.1 MFLOP: a standalone pallas_call would be pure
    # launch/DMA overhead, so it stays a plain XLA dot.
    # TODO(synk): the torch module declares nn.Linear(5*26*26, 512), inconsistent
    # with its own forward; the head is sized from the real flatten (10*5*5).
    return jnp.dot(flat, params["lin_w"],
                   preferred_element_type=jnp.float32) + params["lin_b"]


# ------------------- pure-JAX f32 reference (Cox-de Boor) --------------------

def _silu(x):
    return x / (1.0 + jnp.exp(-x))


def _bspline_bases_ref(x):
    g = jnp.asarray(GRID, jnp.float32)
    xg = x[..., None]
    b = ((xg >= g[:-1]) & (xg < g[1:])).astype(jnp.float32)
    for k in range(1, SPLINE_ORDER + 1):
        b = ((xg - g[:-(k + 1)]) / (g[k:-1] - g[:-(k + 1)]) * b[..., :-1]
             + (g[k + 1:] - xg) / (g[k + 1:] - g[1:-k]) * b[..., 1:])
    return b                                                  # (..., NUM_BASES)


def kan_conv_pool_ref(x_cf, base_w, spline_w):
    c, b, h, w = x_cf.shape
    ho, wo = h - 2, w - 2
    hh, wh = ho // 2, wo // 2
    cols = [x_cf[:, :, ky:ky + ho, kx:kx + wo]
            for ky in range(3) for kx in range(3)]
    p = jnp.stack(cols, axis=1).reshape(c * 9, b, ho, wo)
    y = (jnp.einsum('fbhw,fc->bhwc', _silu(p), base_w) +
         jnp.einsum('fbhwk,kfc->bhwc', _bspline_bases_ref(p), spline_w))
    cout = base_w.shape[1]
    y = y[:, :2 * hh, :2 * wh, :].reshape(b, hh, 2, wh, 2, cout).max(axis=(2, 4))
    return y                                                  # (B, Hh, Wh, cout)


def kanc_mlp_medium_reference(x_nchw, c1, c2, lin_w, lin_b):
    x_cf = jnp.transpose(x_nchw, (1, 0, 2, 3)).astype(jnp.float32)
    y1 = kan_conv_pool_ref(x_cf, c1[0], c1[1])
    y2 = kan_conv_pool_ref(jnp.transpose(y1, (3, 0, 1, 2)), c2[0], c2[1])
    flat = jnp.transpose(y2, (0, 3, 1, 2)).reshape(x_nchw.shape[0], -1)
    return flat @ lin_w + lin_b


# ----------------------------------- main -------------------------------------

if __name__ == "__main__":
    key = jax.random.PRNGKey(0)
    kx, k1, k2, kw, kb = jax.random.split(key, 5)

    # 28x28 input (module family "architectures_28x28"):
    # 28 -conv3x3-> 26 -pool2-> 13 -conv3x3-> 11 -pool2-> 5 => flatten 10*5*5 = 250
    batch = 2
    x = jax.random.normal(kx, (batch, 3, 28, 28), jnp.float32)

    c1 = init_kan_layer_params(k1, cin=3, cout=5)
    c2 = init_kan_layer_params(k2, cin=5, cout=10)
    flat_dim = 10 * 5 * 5
    lin_w = 0.05 * jax.random.normal(kw, (flat_dim, 512), jnp.float32)
    lin_b = 0.05 * jax.random.normal(kb, (512,), jnp.float32)

    params = dict(c1_w=pack_kan_weights_t(*c1), c2_w=pack_kan_weights_t(*c2),
                  lin_w=lin_w, lin_b=lin_b)

    out = jax.jit(kanc_mlp_medium_forward)(x, params)
    out = jax.block_until_ready(out)
    assert out.shape == (batch, 512) and out.dtype == jnp.float32
    assert bool(jnp.all(jnp.isfinite(out)))

    # Sanity-check the fused bf16 kernels against a pure-JAX f32 reference that
    # uses the original Cox-de Boor recursion (tolerances sized for bf16
    # patches / weights / activations and the EUP approx reciprocal in SiLU).
    ref = kanc_mlp_medium_reference(x, c1, c2, lin_w, lin_b)
    err = jnp.abs(out - ref)
    assert float(jnp.max(err)) < 0.35, float(jnp.max(err))
    assert float(jnp.mean(err)) < 0.08, float(jnp.mean(err))

    print("KERNEL_OK")
</pallas_src>

<mosaic_0001>
module attributes {stable_mosaic.version = 11 : i64} {
  func.func @kernel(%arg0: i32, %arg1: memref<4x1x32x128xbf16, #tpu.memory_space<vmem>>, %arg2: memref<16x384xbf16, #tpu.memory_space<vmem>>, %arg3: memref<1x16x128xbf16, #tpu.memory_space<vmem>>, %arg4: memref<2x384x128xbf16, #tpu.memory_space<vmem>>) attributes {dimension_semantics = [#tpu.dimension_semantics<parallel>], iteration_bounds = array<i64: 3>, scalar_prefetch = 0 : i64, scratch_operands = 1 : i64, tpu.core_type = #tpu.core_type<tc>, window_params = [{transform_indices = @transform_0, window_bounds = array<i64: 4, 1, 32, 128>}, {pipeline_mode = #tpu.pipeline_mode<synchronous>, transform_indices = @transform_1, window_bounds = array<i64: 16, 384>}, {transform_indices = @transform_2, window_bounds = array<i64: 1, 16, 128>}]} {
    %c0 = arith.constant 0 : index
    %c0_0 = arith.constant 0 : index
    %0 = vector.load %arg2[%c0, %c0_0] : memref<16x384xbf16, #tpu.memory_space<vmem>>, vector<16x384xbf16>
    %cst = arith.constant 0.000000e+00 : bf16
    %1 = vector.broadcast %cst : bf16 to vector<96x128xbf16>
    %c0_1 = arith.constant 0 : index
    %c288 = arith.constant 288 : index
    %c0_2 = arith.constant 0 : index
    %2 = vector.load %arg4[%c0_1, %c288, %c0_2] : memref<2x384x128xbf16, #tpu.memory_space<vmem>>, vector<1x96x128xbf16>
    %3 = vector.shape_cast %2 : vector<1x96x128xbf16> to vector<96x128xbf16>
    %4 = vector.shape_cast %1 : vector<96x128xbf16> to vector<1x96x128xbf16>
    tpu.vector_store %arg4[%c0_1, %c288, %c0_2], %4 {strides = array<i32>} : memref<2x384x128xbf16, #tpu.memory_space<vmem>>, vector<1x96x128xbf16>,
    %cst_3 = arith.constant 0.000000e+00 : bf16
    %5 = vector.broadcast %cst_3 : bf16 to vector<96x128xbf16>
    %c1 = arith.constant 1 : index
    %c288_4 = arith.constant 288 : index
    %c0_5 = arith.constant 0 : index
    %6 = vector.load %arg4[%c1, %c288_4, %c0_5] : memref<2x384x128xbf16, #tpu.memory_space<vmem>>, vector<1x96x128xbf16>
    %7 = vector.shape_cast %6 : vector<1x96x128xbf16> to vector<96x128xbf16>
    %8 = vector.shape_cast %5 : vector<96x128xbf16> to vector<1x96x128xbf16>
    tpu.vector_store %arg4[%c1, %c288_4, %c0_5], %8 {strides = array<i32>} : memref<2x384x128xbf16, #tpu.memory_space<vmem>>, vector<1x96x128xbf16>,
    %c0_i32 = arith.constant 0 : i32
    %c0_6 = arith.constant 0 : index
    %9 = arith.index_cast %c0_i32 : i32 to index
    %c0_7 = arith.constant 0 : index
    %c0_8 = arith.constant 0 : index
    %10 = vector.load %arg1[%c0_6, %9, %c0_7, %c0_8] : memref<4x1x32x128xbf16, #tpu.memory_space<vmem>>, vector<1x1x32x128xbf16>
    %11 = vector.shape_cast %10 : vector<1x1x32x128xbf16> to vector<32x128xbf16>
    %12 = arith.extf %11 : vector<32x128xbf16> to vector<32x128xf32>
    %cst_9 = arith.constant 0.000000e+00 : f32
    %13 = vector.broadcast %cst_9 : f32 to vector<32x128xf32>
    %14 = arith.subf %13, %12 : vector<32x128xf32>
    %15 = math.exp %14 : vector<32x128xf32>
    %cst_10 = arith.constant 1.000000e+00 : f32
    %16 = vector.broadcast %cst_10 : f32 to vector<32x128xf32>
    %17 = arith.addf %16, %15 : vector<32x128xf32>
    %18 = tpu.reciprocal %17 {approx = true} : vector<32x128xf32> -> vector<32x128xf32>
    %19 = arith.mulf %12, %18 : vector<32x128xf32>
    %20 = arith.truncf %19 : vector<32x128xf32> to vector<32x128xbf16>
    %c0_11 = arith.constant 0 : index
    %c0_12 = arith.constant 0 : index
    %c0_13 = arith.constant 0 : index
    %21 = vector.load %arg4[%c0_11, %c0_12, %c0_13] : memref<2x384x128xbf16, #tpu.memory_space<vmem>>, vector<1x32x128xbf16>
    %22 = vector.shape_cast %21 : vector<1x32x128xbf16> to vector<32x128xbf16>
    %23 = vector.shape_cast %20 : vector<32x128xbf16> to vector<1x32x128xbf16>
    tpu.vector_store %arg4[%c0_11, %c0_12, %c0_13], %23 {strides = array<i32>} : memref<2x384x128xbf16, #tpu.memory_space<vmem>>, vector<1x32x128xbf16>,
    %cst_14 = arith.constant -2.200000e+00 : f32
    %24 = vector.broadcast %cst_14 : f32 to vector<32x128xf32>
    %25 = arith.subf %12, %24 : vector<32x128xf32>
    %cst_15 = arith.constant 2.500000e+00 : f32
    %26 = vector.broadcast %cst_15 : f32 to vector<32x128xf32>
    %27 = arith.mulf %25, %26 : vector<32x128xf32>
    %28 = math.floor %27 : vector<32x128xf32>
    %29 = arith.subf %27, %28 : vector<32x128xf32>
    %30 = arith.mulf %29, %29 : vector<32x128xf32>
    %31 = arith.mulf %30, %29 : vector<32x128xf32>
    %cst_16 = arith.constant 1.000000e+00 : f32
    %32 = vector.broadcast %cst_16 : f32 to vector<32x128xf32>
    %33 = arith.subf %32, %29 : vector<32x128xf32>
    %cst_17 = arith.constant 0.166666672 : f32
    %34 = vector.broadcast %cst_17 : f32 to vector<32x128xf32>
    %35 = arith.mulf %31, %34 : vector<32x128xf32>
    %cst_18 = arith.constant 5.000000e-01 : f32
    %36 = vector.broadcast %cst_18 : f32 to vector<32x128xf32>
    %37 = arith.mulf %36, %31 : vector<32x128xf32>
    %38 = arith.subf %37, %30 : vector<32x128xf32>
    %cst_19 = arith.constant 0.666666686 : f32
    %39 = vector.broadcast %cst_19 : f32 to vector<32x128xf32>
    %40 = arith.addf %38, %39 : vector<32x128xf32>
    %41 = arith.mulf %33, %33 : vector<32x128xf32>
    %42 = arith.mulf %41, %33 : vector<32x128xf32>
    %cst_20 = arith.constant 0.166666672 : f32
    %43 = vector.broadcast %cst_20 : f32 to vector<32x128xf32>
    %44 = arith.mulf %42, %43 : vector<32x128xf32>
    %cst_21 = arith.constant 1.000000e+00 : f32
    %45 = vector.broadcast %cst_21 : f32 to vector<32x128xf32>
    %46 = arith.subf %45, %44 : vector<32x128xf32>
    %47 = arith.subf %46, %40 : vector<32x128xf32>
    %48 = arith.subf %47, %35 : vector<32x128xf32>
    %cst_22 = arith.constant 0.000000e+00 : f32
    %49 = vector.broadcast %cst_22 : f32 to vector<32x128xf32>
    %50 = arith.cmpf oeq, %28, %49 : vector<32x128xf32>
    %cst_23 = arith.constant 1.000000e+00 : f32
    %51 = vector.broadcast %cst_23 : f32 to vector<32x128xf32>
    %52 = arith.cmpf oeq, %28, %51 : vector<32x128xf32>
    %cst_24 = arith.constant 2.000000e+00 : f32
    %53 = vector.broadcast %cst_24 : f32 to vector<32x128xf32>
    %54 = arith.cmpf oeq, %28, %53 : vector<32x128xf32>
    %cst_25 = arith.constant 3.000000e+00 : f32
    %55 = vector.broadcast %cst_25 : f32 to vector<32x128xf32>
    %56 = arith.cmpf oeq, %28, %55 : vector<32x128xf32>
    %cst_26 = arith.constant 0.000000e+00 : f32
    %57 = vector.broadcast %cst_26 : f32 to vector<32x128xf32>
    %58 = arith.select %56, %44, %57 : vector<32x128xi1>, vector<32x128xf32>
    %59 = arith.select %54, %40, %58 : vector<32x128xi1>, vector<32x128xf32>
    %60 = arith.select %52, %48, %59 : vector<32x128xi1>, vector<32x128xf32>
    %61 = arith.select %50, %35, %60 : vector<32x128xi1>, vector<32x128xf32>
    %62 = arith.truncf %61 : vector<32x128xf32> to vector<32x128xbf16>
    %c0_27 = arith.constant 0 : index
    %c32 = arith.constant 32 : index
    %c0_28 = arith.constant 0 : index
    %63 = vector.load %arg4[%c0_27, %c32, %c0_28] : memref<2x384x128xbf16, #tpu.memory_space<vmem>>, vector<1x32x128xbf16>
    %64 = vector.shape_cast %63 : vector<1x32x128xbf16> to vector<32x128xbf16>
    %65 = vector.shape_cast %62 : vector<32x128xbf16> to vector<1x32x128xbf16>
    tpu.vector_store %arg4[%c0_27, %c32, %c0_28], %65 {strides = array<i32>} : memref<2x384x128xbf16, #tpu.memory_space<vmem>>, vector<1x32x128xbf16>,
    %cst_29 = arith.constant 1.000000e+00 : f32
    %66 = vector.broadcast %cst_29 : f32 to vector<32x128xf32>
    %67 = arith.cmpf oeq, %28, %66 : vector<32x128xf32>
    %cst_30 = arith.constant 2.000000e+00 : f32
    %68 = vector.broadcast %cst_30 : f32 to vector<32x128xf32>
    %69 = arith.cmpf oeq, %28, %68 : vector<32x128xf32>
    %cst_31 = arith.constant 3.000000e+00 : f32
    %70 = vector.broadcast %cst_31 : f32 to vector<32x128xf32>
    %71 = arith.cmpf oeq, %28, %70 : vector<32x128xf32>
    %cst_32 = arith.constant 4.000000e+00 : f32
    %72 = vector.broadcast %cst_32 : f32 to vector<32x128xf32>
    %73 = arith.cmpf oeq, %28, %72 : vector<32x128xf32>
    %cst_33 = arith.constant 0.000000e+00 : f32
    %74 = vector.broadcast %cst_33 : f32 to vector<32x128xf32>
    %75 = arith.select %73, %44, %74 : vector<32x128xi1>, vector<32x128xf32>
    %76 = arith.select %71, %40, %75 : vector<32x128xi1>, vector<32x128xf32>
    %77 = arith.select %69, %48, %76 : vector<32x128xi1>, vector<32x128xf32>
    %78 = arith.select %67, %35, %77 : vector<32x128xi1>, vector<32x128xf32>
    %79 = arith.truncf %78 : vector<32x128xf32> to vector<32x128xbf16>
    %c0_34 = arith.constant 0 : index
    %c64 = arith.constant 64 : index
    %c0_35 = arith.constant 0 : index
    %80 = vector.load %arg4[%c0_34, %c64, %c0_35] : memref<2x384x128xbf16, #tpu.memory_space<vmem>>, vector<1x32x128xbf16>
    %81 = vector.shape_cast %80 : vector<1x32x128xbf16> to vector<32x128xbf16>
    %82 = vector.shape_cast %79 : vector<32x128xbf16> to vector<1x32x128xbf16>
    tpu.vector_store %arg4[%c0_34, %c64, %c0_35], %82 {strides = array<i32>} : memref<2x384x128xbf16, #tpu.memory_space<vmem>>, vector<1x32x128xbf16>,
    %cst_36 = arith.constant 2.000000e+00 : f32
    %83 = vector.broadcast %cst_36 : f32 to vector<32x128xf32>
    %84 = arith.cmpf oeq, %28, %83 : vector<32x128xf32>
    %cst_37 = arith.constant 3.000000e+00 : f32
    %85 = vector.broadcast %cst_37 : f32 to vector<32x128xf32>
    %86 = arith.cmpf oeq, %28, %85 : vector<32x128xf32>
    %cst_38 = arith.constant 4.000000e+00 : f32
    %87 = vector.broadcast %cst_38 : f32 to vector<32x128xf32>
    %88 = arith.cmpf oeq, %28, %87 : vector<32x128xf32>
    %cst_39 = arith.constant 5.000000e+00 : f32
    %89 = vector.broadcast %cst_39 : f32 to vector<32x128xf32>
    %90 = arith.cmpf oeq, %28, %89 : vector<32x128xf32>
    %cst_40 = arith.constant 0.000000e+00 : f32
    %91 = vector.broadcast %cst_40 : f32 to vector<32x128xf32>
    %92 = arith.select %90, %44, %91 : vector<32x128xi1>, vector<32x128xf32>
    %93 = arith.select %88, %40, %92 : vector<32x128xi1>, vector<32x128xf32>
    %94 = arith.select %86, %48, %93 : vector<32x128xi1>, vector<32x128xf32>
    %95 = arith.select %84, %35, %94 : vector<32x128xi1>, vector<32x128xf32>
    %96 = arith.truncf %95 : vector<32x128xf32> to vector<32x128xbf16>
    %c0_41 = arith.constant 0 : index
    %c96 = arith.constant 96 : index
    %c0_42 = arith.constant 0 : index
    %97 = vector.load %arg4[%c0_41, %c96, %c0_42] : memref<2x384x128xbf16, #tpu.memory_space<vmem>>, vector<1x32x128xbf16>
    %98 = vector.shape_cast %97 : vector<1x32x128xbf16> to vector<32x128xbf16>
    %99 = vector.shape_cast %96 : vector<32x128xbf16> to vector<1x32x128xbf16>
    tpu.vector_store %arg4[%c0_41, %c96, %c0_42], %99 {strides = array<i32>} : memref<2x384x128xbf16, #tpu.memory_space<vmem>>, vector<1x32x128xbf16>,
    %cst_43 = arith.constant 3.000000e+00 : f32
    %100 = vector.broadcast %cst_43 : f32 to vector<32x128xf32>
    %101 = arith.cmpf oeq, %28, %100 : vector<32x128xf32>
    %cst_44 = arith.constant 4.000000e+00 : f32
    %102 = vector.broadcast %cst_44 : f32 to vector<32x128xf32>
    %103 = arith.cmpf oeq, %28, %102 : vector<32x128xf32>
    %cst_45 = arith.constant 5.000000e+00 : f32
    %104 = vector.broadcast %cst_45 : f32 to vector<32x128xf32>
    %105 = arith.cmpf oeq, %28, %104 : vector<32x128xf32>
    %cst_46 = arith.constant 6.000000e+00 : f32
    %106 = vector.broadcast %cst_46 : f32 to vector<32x128xf32>
    %107 = arith.cmpf oeq, %28, %106 : vector<32x128xf32>
    %cst_47 = arith.constant 0.000000e+00 : f32
    %108 = vector.broadcast %cst_47 : f32 to vector<32x128xf32>
    %109 = arith.select %107, %44, %108 : vector<32x128xi1>, vector<32x128xf32>
    %110 = arith.select %105, %40, %109 : vector<32x128xi1>, vector<32x128xf32>
    %111 = arith.select %103, %48, %110 : vector<32x128xi1>, vector<32x128xf32>
    %112 = arith.select %101, %35, %111 : vector<32x128xi1>, vector<32x128xf32>
    %113 = arith.truncf %112 : vector<32x128xf32> to vector<32x128xbf16>
    %c0_48 = arith.constant 0 : index
    %c128 = arith.constant 128 : index
    %c0_49 = arith.constant 0 : index
    %114 = vector.load %arg4[%c0_48, %c128, %c0_49] : memref<2x384x128xbf16, #tpu.memory_space<vmem>>, vector<1x32x128xbf16>
    %115 = vector.shape_cast %114 : vector<1x32x128xbf16> to vector<32x128xbf16>
    %116 = vector.shape_cast %113 : vector<32x128xbf16> to vector<1x32x128xbf16>
    tpu.vector_store %arg4[%c0_48, %c128, %c0_49], %116 {strides = array<i32>} : memref<2x384x128xbf16, #tpu.memory_space<vmem>>, vector<1x32x128xbf16>,
    %cst_50 = arith.constant 4.000000e+00 : f32
    %117 = vector.broadcast %cst_50 : f32 to vector<32x128xf32>
    %118 = arith.cmpf oeq, %28, %117 : vector<32x128xf32>
    %cst_51 = arith.constant 5.000000e+00 : f32
    %119 = vector.broadcast %cst_51 : f32 to vector<32x128xf32>
    %120 = arith.cmpf oeq, %28, %119 : vector<32x128xf32>
    %cst_52 = arith.constant 6.000000e+00 : f32
    %121 = vector.broadcast %cst_52 : f32 to vector<32x128xf32>
    %122 = arith.cmpf oeq, %28, %121 : vector<32x128xf32>
    %cst_53 = arith.constant 7.000000e+00 : f32
    %123 = vector.broadcast %cst_53 : f32 to vector<32x128xf32>
    %124 = arith.cmpf oeq, %28, %123 : vector<32x128xf32>
    %cst_54 = arith.constant 0.000000e+00 : f32
    %125 = vector.broadcast %cst_54 : f32 to vector<32x128xf32>
    %126 = arith.select %124, %44, %125 : vector<32x128xi1>, vector<32x128xf32>
    %127 = arith.select %122, %40, %126 : vector<32x128xi1>, vector<32x128xf32>
    %128 = arith.select %120, %48, %127 : vector<32x128xi1>, vector<32x128xf32>
    %129 = arith.select %118, %35, %128 : vector<32x128xi1>, vector<32x128xf32>
    %130 = arith.truncf %129 : vector<32x128xf32> to vector<32x128xbf16>
    %c0_55 = arith.constant 0 : index
    %c160 = arith.constant 160 : index
    %c0_56 = arith.constant 0 : index
    %131 = vector.load %arg4[%c0_55, %c160, %c0_56] : memref<2x384x128xbf16, #tpu.memory_space<vmem>>, vector<1x32x128xbf16>
    %132 = vector.shape_cast %131 : vector<1x32x128xbf16> to vector<32x128xbf16>
    %133 = vector.shape_cast %130 : vector<32x128xbf16> to vector<1x32x128xbf16>
    tpu.vector_store %arg4[%c0_55, %c160, %c0_56], %133 {strides = array<i32>} : memref<2x384x128xbf16, #tpu.memory_space<vmem>>, vector<1x32x128xbf16>,
    %cst_57 = arith.constant 5.000000e+00 : f32
    %134 = vector.broadcast %cst_57 : f32 to vector<32x128xf32>
    %135 = arith.cmpf oeq, %28, %134 : vector<32x128xf32>
    %cst_58 = arith.constant 6.000000e+00 : f32
    %136 = vector.broadcast %cst_58 : f32 to vector<32x128xf32>
    %137 = arith.cmpf oeq, %28, %136 : vector<32x128xf32>
    %cst_59 = arith.constant 7.000000e+00 : f32
    %138 = vector.broadcast %cst_59 : f32 to vector<32x128xf32>
    %139 = arith.cmpf oeq, %28, %138 : vector<32x128xf32>
    %cst_60 = arith.constant 8.000000e+00 : f32
    %140 = vector.broadcast %cst_60 : f32 to vector<32x128xf32>
    %141 = arith.cmpf oeq, %28, %140 : vector<32x128xf32>
    %cst_61 = arith.constant 0.000000e+00 : f32
    %142 = vector.broadcast %cst_61 : f32 to vector<32x128xf32>
    %143 = arith.select %141, %44, %142 : vector<32x128xi1>, vector<32x128xf32>
    %144 = arith.select %139, %40, %143 : vector<32x128xi1>, vector<32x128xf32>
    %145 = arith.select %137, %48, %144 : vector<32x128xi1>, vector<32x128xf32>
    %146 = arith.select %135, %35, %145 : vector<32x128xi1>, vector<32x128xf32>
    %147 = arith.truncf %146 : vector<32x128xf32> to vector<32x128xbf16>
    %c0_62 = arith.constant 0 : index
    %c192 = arith.constant 192 : index
    %c0_63 = arith.constant 0 : index
    %148 = vector.load %arg4[%c0_62, %c192, %c0_63] : memref<2x384x128xbf16, #tpu.memory_space<vmem>>, vector<1x32x128xbf16>
    %149 = vector.shape_cast %148 : vector<1x32x128xbf16> to vector<32x128xbf16>
    %150 = vector.shape_cast %147 : vector<32x128xbf16> to vector<1x32x128xbf16>
    tpu.vector_store %arg4[%c0_62, %c192, %c0_63], %150 {strides = array<i32>} : memref<2x384x128xbf16, #tpu.memory_space<vmem>>, vector<1x32x128xbf16>,
    %cst_64 = arith.constant 6.000000e+00 : f32
    %151 = vector.broadcast %cst_64 : f32 to vector<32x128xf32>
    %152 = arith.cmpf oeq, %28, %151 : vector<32x128xf32>
    %cst_65 = arith.constant 7.000000e+00 : f32
    %153 = vector.broadcast %cst_65 : f32 to vector<32x128xf32>
    %154 = arith.cmpf oeq, %28, %153 : vector<32x128xf32>
    %cst_66 = arith.constant 8.000000e+00 : f32
    %155 = vector.broadcast %cst_66 : f32 to vector<32x128xf32>
    %156 = arith.cmpf oeq, %28, %155 : vector<32x128xf32>
    %cst_67 = arith.constant 9.000000e+00 : f32
    %157 = vector.broadcast %cst_67 : f32 to vector<32x128xf32>
    %158 = arith.cmpf oeq, %28, %157 : vector<32x128xf32>
    %cst_68 = arith.constant 0.000000e+00 : f32
    %159 = vector.broadcast %cst_68 : f32 to vector<32x128xf32>
    %160 = arith.select %158, %44, %159 : vector<32x128xi1>, vector<32x128xf32>
    %161 = arith.select %156, %40, %160 : vector<32x128xi1>, vector<32x128xf32>
    %162 = arith.select %154, %48, %161 : vector<32x128xi1>, vector<32x128xf32>
    %163 = arith.select %152, %35, %162 : vector<32x128xi1>, vector<32x128xf32>
    %164 = arith.truncf %163 : vector<32x128xf32> to vector<32x128xbf16>
    %c0_69 = arith.constant 0 : index
    %c224 = arith.constant 224 : index
    %c0_70 = arith.constant 0 : index
    %165 = vector.load %arg4[%c0_69, %c224, %c0_70] : memref<2x384x128xbf16, #tpu.memory_space<vmem>>, vector<1x32x128xbf16>
    %166 = vector.shape_cast %165 : vector<1x32x128xbf16> to vector<32x128xbf16>
    %167 = vector.shape_cast %164 : vector<32x128xbf16> to vector<1x32x128xbf16>
    tpu.vector_store %arg4[%c0_69, %c224, %c0_70], %167 {strides = array<i32>} : memref<2x384x128xbf16, #tpu.memory_space<vmem>>, vector<1x32x128xbf16>,
    %cst_71 = arith.constant 7.000000e+00 : f32
    %168 = vector.broadcast %cst_71 : f32 to vector<32x128xf32>
    %169 = arith.cmpf oeq, %28, %168 : vector<32x128xf32>
    %cst_72 = arith.constant 8.000000e+00 : f32
    %170 = vector.broadcast %cst_72 : f32 to vector<32x128xf32>
    %171 = arith.cmpf oeq, %28, %170 : vector<32x128xf32>
    %cst_73 = arith.constant 9.000000e+00 : f32
    %172 = vector.broadcast %cst_73 : f32 to vector<32x128xf32>
    %173 = arith.cmpf oeq, %28, %172 : vector<32x128xf32>
    %cst_74 = arith.constant 1.000000e+01 : f32
    %174 = vector.broadcast %cst_74 : f32 to vector<32x128xf32>
    %175 = arith.cmpf oeq, %28, %174 : vector<32x128xf32>
    %cst_75 = arith.constant 0.000000e+00 : f32
    %176 = vector.broadcast %cst_75 : f32 to vector<32x128xf32>
    %177 = arith.select %175, %44, %176 : vector<32x128xi1>, vector<32x128xf32>
    %178 = arith.select %173, %40, %177 : vector<32x128xi1>, vector<32x128xf32>
    %179 = arith.select %171, %48, %178 : vector<32x128xi1>, vector<32x128xf32>
    %180 = arith.select %169, %35, %179 : vector<32x128xi1>, vector<32x128xf32>
    %181 = arith.truncf %180 : vector<32x128xf32> to vector<32x128xbf16>
    %c0_76 = arith.constant 0 : index
    %c256 = arith.constant 256 : index
    %c0_77 = arith.constant 0 : index
    %182 = vector.load %arg4[%c0_76, %c256, %c0_77] : memref<2x384x128xbf16, #tpu.memory_space<vmem>>, vector<1x32x128xbf16>
    %183 = vector.shape_cast %182 : vector<1x32x128xbf16> to vector<32x128xbf16>
    %184 = vector.shape_cast %181 : vector<32x128xbf16> to vector<1x32x128xbf16>
    tpu.vector_store %arg4[%c0_76, %c256, %c0_77], %184 {strides = array<i32>} : memref<2x384x128xbf16, #tpu.memory_space<vmem>>, vector<1x32x128xbf16>,
    %c0_78 = arith.constant 0 : index
    %c0_79 = arith.constant 0 : index
    %c0_80 = arith.constant 0 : index
    %185 = vector.load %arg4[%c0_78, %c0_79, %c0_80] : memref<2x384x128xbf16, #tpu.memory_space<vmem>>, vector<1x384x128xbf16>
    %186 = vector.shape_cast %185 : vector<1x384x128xbf16> to vector<384x128xbf16>
    %cst_81 = arith.constant dense<0.000000e+00> : vector<16x128xf32>
    %187 = tpu.matmul %0, %186, %cst_81 {dimension_numbers = #tpu.dot_dimension_numbers<[1], [0], [0], [1], [0, 0, 1, 1], [], []>} : vector<16x384xbf16>, vector<384x128xbf16>, vector<16x128xf32> -> vector<16x128xf32>
    %c1_82 = arith.constant 1 : index
    %188 = arith.index_cast %c0_i32 : i32 to index
    %c0_83 = arith.constant 0 : index
    %c0_84 = arith.constant 0 : index
    %189 = vector.load %arg1[%c1_82, %188, %c0_83, %c0_84] : memref<4x1x32x128xbf16, #tpu.memory_space<vmem>>, vector<1x1x32x128xbf16>
    %190 = vector.shape_cast %189 : vector<1x1x32x128xbf16> to vector<32x128xbf16>
    %191 = arith.extf %190 : vector<32x128xbf16> to vector<32x128xf32>
    %cst_85 = arith.constant 0.000000e+00 : f32
    %192 = vector.broadcast %cst_85 : f32 to vector<32x128xf32>
    %193 = arith.subf %192, %191 : vector<32x128xf32>
    %194 = math.exp %193 : vector<32x128xf32>
    %cst_86 = arith.constant 1.000000e+00 : f32
    %195 = vector.broadcast %cst_86 : f32 to vector<32x128xf32>
    %196 = arith.addf %195, %194 : vector<32x128xf32>
    %197 = tpu.reciprocal %196 {approx = true} : vector<32x128xf32> -> vector<32x128xf32>
    %198 = arith.mulf %191, %197 : vector<32x128xf32>
    %199 = arith.truncf %198 : vector<32x128xf32> to vector<32x128xbf16>
    %c1_87 = arith.constant 1 : index
    %c0_88 = arith.constant 0 : index
    %c0_89 = arith.constant 0 : index
    %200 = vector.load %arg4[%c1_87, %c0_88, %c0_89] : memref<2x384x128xbf16, #tpu.memory_space<vmem>>, vector<1x32x128xbf16>
    %201 = vector.shape_cast %200 : vector<1x32x128xbf16> to vector<32x128xbf16>
    %202 = vector.shape_cast %199 : vector<32x128xbf16> to vector<1x32x128xbf16>
    tpu.vector_store %arg4[%c1_87, %c0_88, %c0_89], %202 {strides = array<i32>} : memref<2x384x128xbf16, #tpu.memory_space<vmem>>, vector<1x32x128xbf16>,
    %cst_90 = arith.constant -2.200000e+00 : f32
    %203 = vector.broadcast %cst_90 : f32 to vector<32x128xf32>
    %204 = arith.subf %191, %203 : vector<32x128xf32>
    %cst_91 = arith.constant 2.500000e+00 : f32
    %205 = vector.broadcast %cst_91 : f32 to vector<32x128xf32>
    %206 = arith.mulf %204, %205 : vector<32x128xf32>
    %207 = math.floor %206 : vector<32x128xf32>
    %208 = arith.subf %206, %207 : vector<32x128xf32>
    %209 = arith.mulf %208, %208 : vector<32x128xf32>
    %210 = arith.mulf %209, %208 : vector<32x128xf32>
    %cst_92 = arith.constant 1.000000e+00 : f32
    %211 = vector.broadcast %cst_92 : f32 to vector<32x128xf32>
    %212 = arith.subf %211, %208 : vector<32x128xf32>
    %cst_93 = arith.constant 0.166666672 : f32
    %213 = vector.broadcast %cst_93 : f32 to vector<32x128xf32>
    %214 = arith.mulf %210, %213 : vector<32x128xf32>
    %cst_94 = arith.constant 5.000000e-01 : f32
    %215 = vector.broadcast %cst_94 : f32 to vector<32x128xf32>
    %216 = arith.mulf %215, %210 : vector<32x128xf32>
    %217 = arith.subf %216, %209 : vector<32x128xf32>
    %cst_95 = arith.constant 0.666666686 : f32
    %218 = vector.broadcast %cst_95 : f32 to vector<32x128xf32>
    %219 = arith.addf %217, %218 : vector<32x128xf32>
    %220 = arith.mulf %212, %212 : vector<32x128xf32>
    %221 = arith.mulf %220, %212 : vector<32x128xf32>
    %cst_96 = arith.constant 0.166666672 : f32
    %222 = vector.broadcast %cst_96 : f32 to vector<32x128xf32>
    %223 = arith.mulf %221, %222 : vector<32x128xf32>
    %cst_97 = arith.constant 1.000000e+00 : f32
    %224 = vector.broadcast %cst_97 : f32 to vector<32x128xf32>
    %225 = arith.subf %224, %223 : vector<32x128xf32>
    %226 = arith.subf %225, %219 : vector<32x128xf32>
    %227 = arith.subf %226, %214 : vector<32x128xf32>
    %cst_98 = arith.constant 0.000000e+00 : f32
    %228 = vector.broadcast %cst_98 : f32 to vector<32x128xf32>
    %229 = arith.cmpf oeq, %207, %228 : vector<32x128xf32>
    %cst_99 = arith.constant 1.000000e+00 : f32
    %230 = vector.broadcast %cst_99 : f32 to vector<32x128xf32>
    %231 = arith.cmpf oeq, %207, %230 : vector<32x128xf32>
    %cst_100 = arith.constant 2.000000e+00 : f32
    %232 = vector.broadcast %cst_100 : f32 to vector<32x128xf32>
    %233 = arith.cmpf oeq, %207, %232 : vector<32x128xf32>
    %cst_101 = arith.constant 3.000000e+00 : f32
    %234 = vector.broadcast %cst_101 : f32 to vector<32x128xf32>
    %235 = arith.cmpf oeq, %207, %234 : vector<32x128xf32>
    %cst_102 = arith.constant 0.000000e+00 : f32
    %236 = vector.broadcast %cst_102 : f32 to vector<32x128xf32>
    %237 = arith.select %235, %223, %236 : vector<32x128xi1>, vector<32x128xf32>
    %238 = arith.select %233, %219, %237 : vector<32x128xi1>, vector<32x128xf32>
    %239 = arith.select %231, %227, %238 : vector<32x128xi1>, vector<32x128xf32>
    %240 = arith.select %229, %214, %239 : vector<32x128xi1>, vector<32x128xf32>
    %241 = arith.truncf %240 : vector<32x128xf32> to vector<32x128xbf16>
    %c1_103 = arith.constant 1 : index
    %c32_104 = arith.constant 32 : index
    %c0_105 = arith.constant 0 : index
    %242 = vector.load %arg4[%c1_103, %c32_104, %c0_105] : memref<2x384x128xbf16, #tpu.memory_space<vmem>>, vector<1x32x128xbf16>
    %243 = vector.shape_cast %242 : vector<1x32x128xbf16> to vector<32x128xbf16>
    %244 = vector.shape_cast %241 : vector<32x128xbf16> to vector<1x32x128xbf16>
    tpu.vector_store %arg4[%c1_103, %c32_104, %c0_105], %244 {strides = array<i32>} : memref<2x384x128xbf16, #tpu.memory_space<vmem>>, vector<1x32x128xbf16>,
    %cst_106 = arith.constant 1.000000e+00 : f32
    %245 = vector.broadcast %cst_106 : f32 to vector<32x128xf32>
    %246 = arith.cmpf oeq, %207, %245 : vector<32x128xf32>
    %cst_107 = arith.constant 2.000000e+00 : f32
    %247 = vector.broadcast %cst_107 : f32 to vector<32x128xf32>
    %248 = arith.cmpf oeq, %207, %247 : vector<32x128xf32>
    %cst_108 = arith.constant 3.000000e+00 : f32
    %249 = vector.broadcast %cst_108 : f32 to vector<32x128xf32>
    %250 = arith.cmpf oeq, %207, %249 : vector<32x128xf32>
    %cst_109 = arith.constant 4.000000e+00 : f32
    %251 = vector.broadcast %cst_109 : f32 to vector<32x128xf32>
    %252 = arith.cmpf oeq, %207, %251 : vector<32x128xf32>
    %cst_110 = arith.constant 0.000000e+00 : f32
    %253 = vector.broadcast %cst_110 : f32 to vector<32x128xf32>
    %254 = arith.select %252, %223, %253 : vector<32x128xi1>, vector<32x128xf32>
    %255 = arith.select %250, %219, %254 : vector<32x128xi1>, vector<32x128xf32>
    %256 = arith.select %248, %227, %255 : vector<32x128xi1>, vector<32x128xf32>
    %257 = arith.select %246, %214, %256 : vector<32x128xi1>, vector<32x128xf32>
    %258 = arith.truncf %257 : vector<32x128xf32> to vector<32x128xbf16>
    %c1_111 = arith.constant 1 : index
    %c64_112 = arith.constant 64 : index
    %c0_113 = arith.constant 0 : index
    %259 = vector.load %arg4[%c1_111, %c64_112, %c0_113] : memref<2x384x128xbf16, #tpu.memory_space<vmem>>, vector<1x32x128xbf16>
    %260 = vector.shape_cast %259 : vector<1x32x128xbf16> to vector<32x128xbf16>
    %261 = vector.shape_cast %258 : vector<32x128xbf16> to vector<1x32x128xbf16>
    tpu.vector_store %arg4[%c1_111, %c64_112, %c0_113], %261 {strides = array<i32>} : memref<2x384x128xbf16, #tpu.memory_space<vmem>>, vector<1x32x128xbf16>,
    %cst_114 = arith.constant 2.000000e+00 : f32
    %262 = vector.broadcast %cst_114 : f32 to vector<32x128xf32>
    %263 = arith.cmpf oeq, %207, %262 : vector<32x128xf32>
    %cst_115 = arith.constant 3.000000e+00 : f32
    %264 = vector.broadcast %cst_115 : f32 to vector<32x128xf32>
    %265 = arith.cmpf oeq, %207, %264 : vector<32x128xf32>
    %cst_116 = arith.constant 4.000000e+00 : f32
    %266 = vector.broadcast %cst_116 : f32 to vector<32x128xf32>
    %267 = arith.cmpf oeq, %207, %266 : vector<32x128xf32>
    %cst_117 = arith.constant 5.000000e+00 : f32
    %268 = vector.broadcast %cst_117 : f32 to vector<32x128xf32>
    %269 = arith.cmpf oeq, %207, %268 : vector<32x128xf32>
    %cst_118 = arith.constant 0.000000e+00 : f32
    %270 = vector.broadcast %cst_118 : f32 to vector<32x128xf32>
    %271 = arith.select %269, %223, %270 : vector<32x128xi1>, vector<32x128xf32>
    %272 = arith.select %267, %219, %271 : vector<32x128xi1>, vector<32x128xf32>
    %273 = arith.select %265, %227, %272 : vector<32x128xi1>, vector<32x128xf32>
    %274 = arith.select %263, %214, %273 : vector<32x128xi1>, vector<32x128xf32>
    %275 = arith.truncf %274 : vector<32x128xf32> to vector<32x128xbf16>
    %c1_119 = arith.constant 1 : index
    %c96_120 = arith.constant 96 : index
    %c0_121 = arith.constant 0 : index
    %276 = vector.load %arg4[%c1_119, %c96_120, %c0_121] : memref<2x384x128xbf16, #tpu.memory_space<vmem>>, vector<1x32x128xbf16>
    %277 = vector.shape_cast %276 : vector<1x32x128xbf16> to vector<32x128xbf16>
    %278 = vector.shape_cast %275 : vector<32x128xbf16> to vector<1x32x128xbf16>
    tpu.vector_store %arg4[%c1_119, %c96_120, %c0_121], %278 {strides = array<i32>} : memref<2x384x128xbf16, #tpu.memory_space<vmem>>, vector<1x32x128xbf16>,
    %cst_122 = arith.constant 3.000000e+00 : f32
    %279 = vector.broadcast %cst_122 : f32 to vector<32x128xf32>
    %280 = arith.cmpf oeq, %207, %279 : vector<32x128xf32>
    %cst_123 = arith.constant 4.000000e+00 : f32
    %281 = vector.broadcast %cst_123 : f32 to vector<32x128xf32>
    %282 = arith.cmpf oeq, %207, %281 : vector<32x128xf32>
    %cst_124 = arith.constant 5.000000e+00 : f32
    %283 = vector.broadcast %cst_124 : f32 to vector<32x128xf32>
    %284 = arith.cmpf oeq, %207, %283 : vector<32x128xf32>
    %cst_125 = arith.constant 6.000000e+00 : f32
    %285 = vector.broadcast %cst_125 : f32 to vector<32x128xf32>
    %286 = arith.cmpf oeq, %207, %285 : vector<32x128xf32>
    %cst_126 = arith.constant 0.000000e+00 : f32
    %287 = vector.broadcast %cst_126 : f32 to vector<32x128xf32>
    %288 = arith.select %286, %223, %287 : vector<32x128xi1>, vector<32x128xf32>
    %289 = arith.select %284, %219, %288 : vector<32x128xi1>, vector<32x128xf32>
    %290 = arith.select %282, %227, %289 : vector<32x128xi1>, vector<32x128xf32>
    %291 = arith.select %280, %214, %290 : vector<32x128xi1>, vector<32x128xf32>
    %292 = arith.truncf %291 : vector<32x128xf32> to vector<32x128xbf16>
    %c1_127 = arith.constant 1 : index
    %c128_128 = arith.constant 128 : index
    %c0_129 = arith.constant 0 : index
    %293 = vector.load %arg4[%c1_127, %c128_128, %c0_129] : memref<2x384x128xbf16, #tpu.memory_space<vmem>>, vector<1x32x128xbf16>
    %294 = vector.shape_cast %293 : vector<1x32x128xbf16> to vector<32x128xbf16>
    %295 = vector.shape_cast %292 : vector<32x128xbf16> to vector<1x32x128xbf16>
    tpu.vector_store %arg4[%c1_127, %c128_128, %c0_129], %295 {strides = array<i32>} : memref<2x384x128xbf16, #tpu.memory_space<vmem>>, vector<1x32x128xbf16>,
    %cst_130 = arith.constant 4.000000e+00 : f32
    %296 = vector.broadcast %cst_130 : f32 to vector<32x128xf32>
    %297 = arith.cmpf oeq, %207, %296 : vector<32x128xf32>
    %cst_131 = arith.constant 5.000000e+00 : f32
    %298 = vector.broadcast %cst_131 : f32 to vector<32x128xf32>
    %299 = arith.cmpf oeq, %207, %298 : vector<32x128xf32>
    %cst_132 = arith.constant 6.000000e+00 : f32
    %300 = vector.broadcast %cst_132 : f32 to vector<32x128xf32>
    %301 = arith.cmpf oeq, %207, %300 : vector<32x128xf32>
    %cst_133 = arith.constant 7.000000e+00 : f32
    %302 = vector.broadcast %cst_133 : f32 to vector<32x128xf32>
    %303 = arith.cmpf oeq, %207, %302 : vector<32x128xf32>
    %cst_134 = arith.constant 0.000000e+00 : f32
    %304 = vector.broadcast %cst_134 : f32 to vector<32x128xf32>
    %305 = arith.select %303, %223, %304 : vector<32x128xi1>, vector<32x128xf32>
    %306 = arith.select %301, %219, %305 : vector<32x128xi1>, vector<32x128xf32>
    %307 = arith.select %299, %227, %306 : vector<32x128xi1>, vector<32x128xf32>
    %308 = arith.select %297, %214, %307 : vector<32x128xi1>, vector<32x128xf32>
    %309 = arith.truncf %308 : vector<32x128xf32> to vector<32x128xbf16>
    %c1_135 = arith.constant 1 : index
    %c160_136 = arith.constant 160 : index
    %c0_137 = arith.constant 0 : index
    %310 = vector.load %arg4[%c1_135, %c160_136, %c0_137] : memref<2x384x128xbf16, #tpu.memory_space<vmem>>, vector<1x32x128xbf16>
    %311 = vector.shape_cast %310 : vector<1x32x128xbf16> to vector<32x128xbf16>
    %312 = vector.shape_cast %309 : vector<32x128xbf16> to vector<1x32x128xbf16>
    tpu.vector_store %arg4[%c1_135, %c160_136, %c0_137], %312 {strides = array<i32>} : memref<2x384x128xbf16, #tpu.memory_space<vmem>>, vector<1x32x128xbf16>,
    %cst_138 = arith.constant 5.000000e+00 : f32
    %313 = vector.broadcast %cst_138 : f32 to vector<32x128xf32>
    %314 = arith.cmpf oeq, %207, %313 : vector<32x128xf32>
    %cst_139 = arith.constant 6.000000e+00 : f32
    %315 = vector.broadcast %cst_139 : f32 to vector<32x128xf32>
    %316 = arith.cmpf oeq, %207, %315 : vector<32x128xf32>
    %cst_140 = arith.constant 7.000000e+00 : f32
    %317 = vector.broadcast %cst_140 : f32 to vector<32x128xf32>
    %318 = arith.cmpf oeq, %207, %317 : vector<32x128xf32>
    %cst_141 = arith.constant 8.000000e+00 : f32
    %319 = vector.broadcast %cst_141 : f32 to vector<32x128xf32>
    %320 = arith.cmpf oeq, %207, %319 : vector<32x128xf32>
    %cst_142 = arith.constant 0.000000e+00 : f32
    %321 = vector.broadcast %cst_142 : f32 to vector<32x128xf32>
    %322 = arith.select %320, %223, %321 : vector<32x128xi1>, vector<32x128xf32>
    %323 = arith.select %318, %219, %322 : vector<32x128xi1>, vector<32x128xf32>
    %324 = arith.select %316, %227, %323 : vector<32x128xi1>, vector<32x128xf32>
    %325 = arith.select %314, %214, %324 : vector<32x128xi1>, vector<32x128xf32>
    %326 = arith.truncf %325 : vector<32x128xf32> to vector<32x128xbf16>
    %c1_143 = arith.constant 1 : index
    %c192_144 = arith.constant 192 : index
    %c0_145 = arith.constant 0 : index
    %327 = vector.load %arg4[%c1_143, %c192_144, %c0_145] : memref<2x384x128xbf16, #tpu.memory_space<vmem>>, vector<1x32x128xbf16>
    %328 = vector.shape_cast %327 : vector<1x32x128xbf16> to vector<32x128xbf16>
    %329 = vector.shape_cast %326 : vector<32x128xbf16> to vector<1x32x128xbf16>
    tpu.vector_store %arg4[%c1_143, %c192_144, %c0_145], %329 {strides = array<i32>} : memref<2x384x128xbf16, #tpu.memory_space<vmem>>, vector<1x32x128xbf16>,
    %cst_146 = arith.constant 6.000000e+00 : f32
    %330 = vector.broadcast %cst_146 : f32 to vector<32x128xf32>
    %331 = arith.cmpf oeq, %207, %330 : vector<32x128xf32>
    %cst_147 = arith.constant 7.000000e+00 : f32
    %332 = vector.broadcast %cst_147 : f32 to vector<32x128xf32>
    %333 = arith.cmpf oeq, %207, %332 : vector<32x128xf32>
    %cst_148 = arith.constant 8.000000e+00 : f32
    %334 = vector.broadcast %cst_148 : f32 to vector<32x128xf32>
    %335 = arith.cmpf oeq, %207, %334 : vector<32x128xf32>
    %cst_149 = arith.constant 9.000000e+00 : f32
    %336 = vector.broadcast %cst_149 : f32 to vector<32x128xf32>
    %337 = arith.cmpf oeq, %207, %336 : vector<32x128xf32>
    %cst_150 = arith.constant 0.000000e+00 : f32
    %338 = vector.broadcast %cst_150 : f32 to vector<32x128xf32>
    %339 = arith.select %337, %223, %338 : vector<32x128xi1>, vector<32x128xf32>
    %340 = arith.select %335, %219, %339 : vector<32x128xi1>, vector<32x128xf32>
    %341 = arith.select %333, %227, %340 : vector<32x128xi1>, vector<32x128xf32>
    %342 = arith.select %331, %214, %341 : vector<32x128xi1>, vector<32x128xf32>
    %343 = arith.truncf %342 : vector<32x128xf32> to vector<32x128xbf16>
    %c1_151 = arith.constant 1 : index
    %c224_152 = arith.constant 224 : index
    %c0_153 = arith.constant 0 : index
    %344 = vector.load %arg4[%c1_151, %c224_152, %c0_153] : memref<2x384x128xbf16, #tpu.memory_space<vmem>>, vector<1x32x128xbf16>
    %345 = vector.shape_cast %344 : vector<1x32x128xbf16> to vector<32x128xbf16>
    %346 = vector.shape_cast %343 : vector<32x128xbf16> to vector<1x32x128xbf16>
    tpu.vector_store %arg4[%c1_151, %c224_152, %c0_153], %346 {strides = array<i32>} : memref<2x384x128xbf16, #tpu.memory_space<vmem>>, vector<1x32x128xbf16>,
    %cst_154 = arith.constant 7.000000e+00 : f32
    %347 = vector.broadcast %cst_154 : f32 to vector<32x128xf32>
    %348 = arith.cmpf oeq, %207, %347 : vector<32x128xf32>
    %cst_155 = arith.constant 8.000000e+00 : f32
    %349 = vector.broadcast %cst_155 : f32 to vector<32x128xf32>
    %350 = arith.cmpf oeq, %207, %349 : vector<32x128xf32>
    %cst_156 = arith.constant 9.000000e+00 : f32
    %351 = vector.broadcast %cst_156 : f32 to vector<32x128xf32>
    %352 = arith.cmpf oeq, %207, %351 : vector<32x128xf32>
    %cst_157 = arith.constant 1.000000e+01 : f32
    %353 = vector.broadcast %cst_157 : f32 to vector<32x128xf32>
    %354 = arith.cmpf oeq, %207, %353 : vector<32x128xf32>
    %cst_158 = arith.constant 0.000000e+00 : f32
    %355 = vector.broadcast %cst_158 : f32 to vector<32x128xf32>
    %356 = arith.select %354, %223, %355 : vector<32x128xi1>, vector<32x128xf32>
    %357 = arith.select %352, %219, %356 : vector<32x128xi1>, vector<32x128xf32>
    %358 = arith.select %350, %227, %357 : vector<32x128xi1>, vector<32x128xf32>
    %359 = arith.select %348, %214, %358 : vector<32x128xi1>, vector<32x128xf32>
    %360 = arith.truncf %359 : vector<32x128xf32> to vector<32x128xbf16>
    %c1_159 = arith.constant 1 : index
    %c256_160 = arith.constant 256 : index
    %c0_161 = arith.constant 0 : index
    %361 = vector.load %arg4[%c1_159, %c256_160, %c0_161] : memref<2x384x128xbf16, #tpu.memory_space<vmem>>, vector<1x32x128xbf16>
    %362 = vector.shape_cast %361 : vector<1x32x128xbf16> to vector<32x128xbf16>
    %363 = vector.shape_cast %360 : vector<32x128xbf16> to vector<1x32x128xbf16>
    tpu.vector_store %arg4[%c1_159, %c256_160, %c0_161], %363 {strides = array<i32>} : memref<2x384x128xbf16, #tpu.memory_space<vmem>>, vector<1x32x128xbf16>,
    %c1_162 = arith.constant 1 : index
    %c0_163 = arith.constant 0 : index
    %c0_164 = arith.constant 0 : index
    %364 = vector.load %arg4[%c1_162, %c0_163, %c0_164] : memref<2x384x128xbf16, #tpu.memory_space<vmem>>, vector<1x384x128xbf16>
    %365 = vector.shape_cast %364 : vector<1x384x128xbf16> to vector<384x128xbf16>
    %cst_165 = arith.constant dense<0.000000e+00> : vector<16x128xf32>
    %366 = tpu.matmul %0, %365, %cst_165 {dimension_numbers = #tpu.dot_dimension_numbers<[1], [0], [0], [1], [0, 0, 1, 1], [], []>} : vector<16x384xbf16>, vector<384x128xbf16>, vector<16x128xf32> -> vector<16x128xf32>
    %367 = arith.maximumf %187, %366 : vector<16x128xf32>
    %c2 = arith.constant 2 : index
    %368 = arith.index_cast %c0_i32 : i32 to index
    %c0_166 = arith.constant 0 : index
    %c0_167 = arith.constant 0 : index
    %369 = vector.load %arg1[%c2, %368, %c0_166, %c0_167] : memref<4x1x32x128xbf16, #tpu.memory_space<vmem>>, vector<1x1x32x128xbf16>
    %370 = vector.shape_cast %369 : vector<1x1x32x128xbf16> to vector<32x128xbf16>
    %371 = arith.extf %370 : vector<32x128xbf16> to vector<32x128xf32>
    %cst_168 = arith.constant 0.000000e+00 : f32
    %372 = vector.broadcast %cst_168 : f32 to vector<32x128xf32>
    %373 = arith.subf %372, %371 : vector<32x128xf32>
    %374 = math.exp %373 : vector<32x128xf32>
    %cst_169 = arith.constant 1.000000e+00 : f32
    %375 = vector.broadcast %cst_169 : f32 to vector<32x128xf32>
    %376 = arith.addf %375, %374 : vector<32x128xf32>
    %377 = tpu.reciprocal %376 {approx = true} : vector<32x128xf32> -> vector<32x128xf32>
    %378 = arith.mulf %371, %377 : vector<32x128xf32>
    %379 = arith.truncf %378 : vector<32x128xf32> to vector<32x128xbf16>
    %c0_170 = arith.constant 0 : index
    %c0_171 = arith.constant 0 : index
    %c0_172 = arith.constant 0 : index
    %380 = vector.load %arg4[%c0_170, %c0_171, %c0_172] : memref<2x384x128xbf16, #tpu.memory_space<vmem>>, vector<1x32x128xbf16>
    %381 = vector.shape_cast %380 : vector<1x32x128xbf16> to vector<32x128xbf16>
    %382 = vector.shape_cast %379 : vector<32x128xbf16> to vector<1x32x128xbf16>
    tpu.vector_store %arg4[%c0_170, %c0_171, %c0_172], %382 {strides = array<i32>} : memref<2x384x128xbf16, #tpu.memory_space<vmem>>, vector<1x32x128xbf16>,
    %cst_173 = arith.constant -2.200000e+00 : f32
    %383 = vector.broadcast %cst_173 : f32 to vector<32x128xf32>
    %384 = arith.subf %371, %383 : vector<32x128xf32>
    %cst_174 = arith.constant 2.500000e+00 : f32
    %385 = vector.broadcast %cst_174 : f32 to vector<32x128xf32>
    %386 = arith.mulf %384, %385 : vector<32x128xf32>
    %387 = math.floor %386 : vector<32x128xf32>
    %388 = arith.subf %386, %387 : vector<32x128xf32>
    %389 = arith.mulf %388, %388 : vector<32x128xf32>
    %390 = arith.mulf %389, %388 : vector<32x128xf32>
    %cst_175 = arith.constant 1.000000e+00 : f32
    %391 = vector.broadcast %cst_175 : f32 to vector<32x128xf32>
    %392 = arith.subf %391, %388 : vector<32x128xf32>
    %cst_176 = arith.constant 0.166666672 : f32
    %393 = vector.broadcast %cst_176 : f32 to vector<32x128xf32>
    %394 = arith.mulf %390, %393 : vector<32x128xf32>
    %cst_177 = arith.constant 5.000000e-01 : f32
    %395 = vector.broadcast %cst_177 : f32 to vector<32x128xf32>
    %396 = arith.mulf %395, %390 : vector<32x128xf32>
    %397 = arith.subf %396, %389 : vector<32x128xf32>
    %cst_178 = arith.constant 0.666666686 : f32
    %398 = vector.broadcast %cst_178 : f32 to vector<32x128xf32>
    %399 = arith.addf %397, %398 : vector<32x128xf32>
    %400 = arith.mulf %392, %392 : vector<32x128xf32>
    %401 = arith.mulf %400, %392 : vector<32x128xf32>
    %cst_179 = arith.constant 0.166666672 : f32
    %402 = vector.broadcast %cst_179 : f32 to vector<32x128xf32>
    %403 = arith.mulf %401, %402 : vector<32x128xf32>
    %cst_180 = arith.constant 1.000000e+00 : f32
    %404 = vector.broadcast %cst_180 : f32 to vector<32x128xf32>
    %405 = arith.subf %404, %403 : vector<32x128xf32>
    %406 = arith.subf %405, %399 : vector<32x128xf32>
    %407 = arith.subf %406, %394 : vector<32x128xf32>
    %cst_181 = arith.constant 0.000000e+00 : f32
    %408 = vector.broadcast %cst_181 : f32 to vector<32x128xf32>
    %409 = arith.cmpf oeq, %387, %408 : vector<32x128xf32>
    %cst_182 = arith.constant 1.000000e+00 : f32
    %410 = vector.broadcast %cst_182 : f32 to vector<32x128xf32>
    %411 = arith.cmpf oeq, %387, %410 : vector<32x128xf32>
    %cst_183 = arith.constant 2.000000e+00 : f32
    %412 = vector.broadcast %cst_183 : f32 to vector<32x128xf32>
    %413 = arith.cmpf oeq, %387, %412 : vector<32x128xf32>
    %cst_184 = arith.constant 3.000000e+00 : f32
    %414 = vector.broadcast %cst_184 : f32 to vector<32x128xf32>
    %415 = arith.cmpf oeq, %387, %414 : vector<32x128xf32>
    %cst_185 = arith.constant 0.000000e+00 : f32
    %416 = vector.broadcast %cst_185 : f32 to vector<32x128xf32>
    %417 = arith.select %415, %403, %416 : vector<32x128xi1>, vector<32x128xf32>
    %418 = arith.select %413, %399, %417 : vector<32x128xi1>, vector<32x128xf32>
    %419 = arith.select %411, %407, %418 : vector<32x128xi1>, vector<32x128xf32>
    %420 = arith.select %409, %394, %419 : vector<32x128xi1>, vector<32x128xf32>
    %421 = arith.truncf %420 : vector<32x128xf32> to vector<32x128xbf16>
    %c0_186 = arith.constant 0 : index
    %c32_187 = arith.constant 32 : index
    %c0_188 = arith.constant 0 : index
    %422 = vector.load %arg4[%c0_186, %c32_187, %c0_188] : memref<2x384x128xbf16, #tpu.memory_space<vmem>>, vector<1x32x128xbf16>
    %423 = vector.shape_cast %422 : vector<1x32x128xbf16> to vector<32x128xbf16>
    %424 = vector.shape_cast %421 : vector<32x128xbf16> to vector<1x32x128xbf16>
    tpu.vector_store %arg4[%c0_186, %c32_187, %c0_188], %424 {strides = array<i32>} : memref<2x384x128xbf16, #tpu.memory_space<vmem>>, vector<1x32x128xbf16>,
    %cst_189 = arith.constant 1.000000e+00 : f32
    %425 = vector.broadcast %cst_189 : f32 to vector<32x128xf32>
    %426 = arith.cmpf oeq, %387, %425 : vector<32x128xf32>
    %cst_190 = arith.constant 2.000000e+00 : f32
    %427 = vector.broadcast %cst_190 : f32 to vector<32x128xf32>
    %428 = arith.cmpf oeq, %387, %427 : vector<32x128xf32>
    %cst_191 = arith.constant 3.000000e+00 : f32
    %429 = vector.broadcast %cst_191 : f32 to vector<32x128xf32>
    %430 = arith.cmpf oeq, %387, %429 : vector<32x128xf32>
    %cst_192 = arith.constant 4.000000e+00 : f32
    %431 = vector.broadcast %cst_192 : f32 to vector<32x128xf32>
    %432 = arith.cmpf oeq, %387, %431 : vector<32x128xf32>
    %cst_193 = arith.constant 0.000000e+00 : f32
    %433 = vector.broadcast %cst_193 : f32 to vector<32x128xf32>
    %434 = arith.select %432, %403, %433 : vector<32x128xi1>, vector<32x128xf32>
    %435 = arith.select %430, %399, %434 : vector<32x128xi1>, vector<32x128xf32>
    %436 = arith.select %428, %407, %435 : vector<32x128xi1>, vector<32x128xf32>
    %437 = arith.select %426, %394, %436 : vector<32x128xi1>, vector<32x128xf32>
    %438 = arith.truncf %437 : vector<32x128xf32> to vector<32x128xbf16>
    %c0_194 = arith.constant 0 : index
    %c64_195 = arith.constant 64 : index
    %c0_196 = arith.constant 0 : index
    %439 = vector.load %arg4[%c0_194, %c64_195, %c0_196] : memref<2x384x128xbf16, #tpu.memory_space<vmem>>, vector<1x32x128xbf16>
    %440 = vector.shape_cast %439 : vector<1x32x128xbf16> to vector<32x128xbf16>
    %441 = vector.shape_cast %438 : vector<32x128xbf16> to vector<1x32x128xbf16>
    tpu.vector_store %arg4[%c0_194, %c64_195, %c0_196], %441 {strides = array<i32>} : memref<2x384x128xbf16, #tpu.memory_space<vmem>>, vector<1x32x128xbf16>,
    %cst_197 = arith.constant 2.000000e+00 : f32
    %442 = vector.broadcast %cst_197 : f32 to vector<32x128xf32>
    %443 = arith.cmpf oeq, %387, %442 : vector<32x128xf32>
    %cst_198 = arith.constant 3.000000e+00 : f32
    %444 = vector.broadcast %cst_198 : f32 to vector<32x128xf32>
    %445 = arith.cmpf oeq, %387, %444 : vector<32x128xf32>
    %cst_199 = arith.constant 4.000000e+00 : f32
    %446 = vector.broadcast %cst_199 : f32 to vector<32x128xf32>
    %447 = arith.cmpf oeq, %387, %446 : vector<32x128xf32>
    %cst_200 = arith.constant 5.000000e+00 : f32
    %448 = vector.broadcast %cst_200 : f32 to vector<32x128xf32>
    %449 = arith.cmpf oeq, %387, %448 : vector<32x128xf32>
    %cst_201 = arith.constant 0.000000e+00 : f32
    %450 = vector.broadcast %cst_201 : f32 to vector<32x128xf32>
    %451 = arith.select %449, %403, %450 : vector<32x128xi1>, vector<32x128xf32>
    %452 = arith.select %447, %399, %451 : vector<32x128xi1>, vector<32x128xf32>
    %453 = arith.select %445, %407, %452 : vector<32x128xi1>, vector<32x128xf32>
    %454 = arith.select %443, %394, %453 : vector<32x128xi1>, vector<32x128xf32>
    %455 = arith.truncf %454 : vector<32x128xf32> to vector<32x128xbf16>
    %c0_202 = arith.constant 0 : index
    %c96_203 = arith.constant 96 : index
    %c0_204 = arith.constant 0 : index
    %456 = vector.load %arg4[%c0_202, %c96_203, %c0_204] : memref<2x384x128xbf16, #tpu.memory_space<vmem>>, vector<1x32x128xbf16>
    %457 = vector.shape_cast %456 : vector<1x32x128xbf16> to vector<32x128xbf16>
    %458 = vector.shape_cast %455 : vector<32x128xbf16> to vector<1x32x128xbf16>
    tpu.vector_store %arg4[%c0_202, %c96_203, %c0_204], %458 {strides = array<i32>} : memref<2x384x128xbf16, #tpu.memory_space<vmem>>, vector<1x32x128xbf16>,
    %cst_205 = arith.constant 3.000000e+00 : f32
    %459 = vector.broadcast %cst_205 : f32 to vector<32x128xf32>
    %460 = arith.cmpf oeq, %387, %459 : vector<32x128xf32>
    %cst_206 = arith.constant 4.000000e+00 : f32
    %461 = vector.broadcast %cst_206 : f32 to vector<32x128xf32>
    %462 = arith.cmpf oeq, %387, %461 : vector<32x128xf32>
    %cst_207 = arith.constant 5.000000e+00 : f32
    %463 = vector.broadcast %cst_207 : f32 to vector<32x128xf32>
    %464 = arith.cmpf oeq, %387, %463 : vector<32x128xf32>
    %cst_208 = arith.constant 6.000000e+00 : f32
    %465 = vector.broadcast %cst_208 : f32 to vector<32x128xf32>
    %466 = arith.cmpf oeq, %387, %465 : vector<32x128xf32>
    %cst_209 = arith.constant 0.000000e+00 : f32
    %467 = vector.broadcast %cst_209 : f32 to vector<32x128xf32>
    %468 = arith.select %466, %403, %467 : vector<32x128xi1>, vector<32x128xf32>
    %469 = arith.select %464, %399, %468 : vector<32x128xi1>, vector<32x128xf32>
    %470 = arith.select %462, %407, %469 : vector<32x128xi1>, vector<32x128xf32>
    %471 = arith.select %460, %394, %470 : vector<32x128xi1>, vector<32x128xf32>
    %472 = arith.truncf %471 : vector<32x128xf32> to vector<32x128xbf16>
    %c0_210 = arith.constant 0 : index
    %c128_211 = arith.constant 128 : index
    %c0_212 = arith.constant 0 : index
    %473 = vector.load %arg4[%c0_210, %c128_211, %c0_212] : memref<2x384x128xbf16, #tpu.memory_space<vmem>>, vector<1x32x128xbf16>
    %474 = vector.shape_cast %473 : vector<1x32x128xbf16> to vector<32x128xbf16>
    %475 = vector.shape_cast %472 : vector<32x128xbf16> to vector<1x32x128xbf16>
    tpu.vector_store %arg4[%c0_210, %c128_211, %c0_212], %475 {strides = array<i32>} : memref<2x384x128xbf16, #tpu.memory_space<vmem>>, vector<1x32x128xbf16>,
    %cst_213 = arith.constant 4.000000e+00 : f32
    %476 = vector.broadcast %cst_213 : f32 to vector<32x128xf32>
    %477 = arith.cmpf oeq, %387, %476 : vector<32x128xf32>
    %cst_214 = arith.constant 5.000000e+00 : f32
    %478 = vector.broadcast %cst_214 : f32 to vector<32x128xf32>
    %479 = arith.cmpf oeq, %387, %478 : vector<32x128xf32>
    %cst_215 = arith.constant 6.000000e+00 : f32
    %480 = vector.broadcast %cst_215 : f32 to vector<32x128xf32>
    %481 = arith.cmpf oeq, %387, %480 : vector<32x128xf32>
    %cst_216 = arith.constant 7.000000e+00 : f32
    %482 = vector.broadcast %cst_216 : f32 to vector<32x128xf32>
    %483 = arith.cmpf oeq, %387, %482 : vector<32x128xf32>
    %cst_217 = arith.constant 0.000000e+00 : f32
    %484 = vector.broadcast %cst_217 : f32 to vector<32x128xf32>
    %485 = arith.select %483, %403, %484 : vector<32x128xi1>, vector<32x128xf32>
    %486 = arith.select %481, %399, %485 : vector<32x128xi1>, vector<32x128xf32>
    %487 = arith.select %479, %407, %486 : vector<32x128xi1>, vector<32x128xf32>
    %488 = arith.select %477, %394, %487 : vector<32x128xi1>, vector<32x128xf32>
    %489 = arith.truncf %488 : vector<32x128xf32> to vector<32x128xbf16>
    %c0_218 = arith.constant 0 : index
    %c160_219 = arith.constant 160 : index
    %c0_220 = arith.constant 0 : index
    %490 = vector.load %arg4[%c0_218, %c160_219, %c0_220] : memref<2x384x128xbf16, #tpu.memory_space<vmem>>, vector<1x32x128xbf16>
    %491 = vector.shape_cast %490 : vector<1x32x128xbf16> to vector<32x128xbf16>
    %492 = vector.shape_cast %489 : vector<32x128xbf16> to vector<1x32x128xbf16>
    tpu.vector_store %arg4[%c0_218, %c160_219, %c0_220], %492 {strides = array<i32>} : memref<2x384x128xbf16, #tpu.memory_space<vmem>>, vector<1x32x128xbf16>,
    %cst_221 = arith.constant 5.000000e+00 : f32
    %493 = vector.broadcast %cst_221 : f32 to vector<32x128xf32>
    %494 = arith.cmpf oeq, %387, %493 : vector<32x128xf32>
    %cst_222 = arith.constant 6.000000e+00 : f32
    %495 = vector.broadcast %cst_222 : f32 to vector<32x128xf32>
    %496 = arith.cmpf oeq, %387, %495 : vector<32x128xf32>
    %cst_223 = arith.constant 7.000000e+00 : f32
    %497 = vector.broadcast %cst_223 : f32 to vector<32x128xf32>
    %498 = arith.cmpf oeq, %387, %497 : vector<32x128xf32>
    %cst_224 = arith.constant 8.000000e+00 : f32
    %499 = vector.broadcast %cst_224 : f32 to vector<32x128xf32>
    %500 = arith.cmpf oeq, %387, %499 : vector<32x128xf32>
    %cst_225 = arith.constant 0.000000e+00 : f32
    %501 = vector.broadcast %cst_225 : f32 to vector<32x128xf32>
    %502 = arith.select %500, %403, %501 : vector<32x128xi1>, vector<32x128xf32>
    %503 = arith.select %498, %399, %502 : vector<32x128xi1>, vector<32x128xf32>
    %504 = arith.select %496, %407, %503 : vector<32x128xi1>, vector<32x128xf32>
    %505 = arith.select %494, %394, %504 : vector<32x128xi1>, vector<32x128xf32>
    %506 = arith.truncf %505 : vector<32x128xf32> to vector<32x128xbf16>
    %c0_226 = arith.constant 0 : index
    %c192_227 = arith.constant 192 : index
    %c0_228 = arith.constant 0 : index
    %507 = vector.load %arg4[%c0_226, %c192_227, %c0_228] : memref<2x384x128xbf16, #tpu.memory_space<vmem>>, vector<1x32x128xbf16>
    %508 = vector.shape_cast %507 : vector<1x32x128xbf16> to vector<32x128xbf16>
    %509 = vector.shape_cast %506 : vector<32x128xbf16> to vector<1x32x128xbf16>
    tpu.vector_store %arg4[%c0_226, %c192_227, %c0_228], %509 {strides = array<i32>} : memref<2x384x128xbf16, #tpu.memory_space<vmem>>, vector<1x32x128xbf16>,
    %cst_229 = arith.constant 6.000000e+00 : f32
    %510 = vector.broadcast %cst_229 : f32 to vector<32x128xf32>
    %511 = arith.cmpf oeq, %387, %510 : vector<32x128xf32>
    %cst_230 = arith.constant 7.000000e+00 : f32
    %512 = vector.broadcast %cst_230 : f32 to vector<32x128xf32>
    %513 = arith.cmpf oeq, %387, %512 : vector<32x128xf32>
    %cst_231 = arith.constant 8.000000e+00 : f32
    %514 = vector.broadcast %cst_231 : f32 to vector<32x128xf32>
    %515 = arith.cmpf oeq, %387, %514 : vector<32x128xf32>
    %cst_232 = arith.constant 9.000000e+00 : f32
    %516 = vector.broadcast %cst_232 : f32 to vector<32x128xf32>
    %517 = arith.cmpf oeq, %387, %516 : vector<32x128xf32>
    %cst_233 = arith.constant 0.000000e+00 : f32
    %518 = vector.broadcast %cst_233 : f32 to vector<32x128xf32>
    %519 = arith.select %517, %403, %518 : vector<32x128xi1>, vector<32x128xf32>
    %520 = arith.select %515, %399, %519 : vector<32x128xi1>, vector<32x128xf32>
    %521 = arith.select %513, %407, %520 : vector<32x128xi1>, vector<32x128xf32>
    %522 = arith.select %511, %394, %521 : vector<32x128xi1>, vector<32x128xf32>
    %523 = arith.truncf %522 : vector<32x128xf32> to vector<32x128xbf16>
    %c0_234 = arith.constant 0 : index
    %c224_235 = arith.constant 224 : index
    %c0_236 = arith.constant 0 : index
    %524 = vector.load %arg4[%c0_234, %c224_235, %c0_236] : memref<2x384x128xbf16, #tpu.memory_space<vmem>>, vector<1x32x128xbf16>
    %525 = vector.shape_cast %524 : vector<1x32x128xbf16> to vector<32x128xbf16>
    %526 = vector.shape_cast %523 : vector<32x128xbf16> to vector<1x32x128xbf16>
    tpu.vector_store %arg4[%c0_234, %c224_235, %c0_236], %526 {strides = array<i32>} : memref<2x384x128xbf16, #tpu.memory_space<vmem>>, vector<1x32x128xbf16>,
    %cst_237 = arith.constant 7.000000e+00 : f32
    %527 = vector.broadcast %cst_237 : f32 to vector<32x128xf32>
    %528 = arith.cmpf oeq, %387, %527 : vector<32x128xf32>
    %cst_238 = arith.constant 8.000000e+00 : f32
    %529 = vector.broadcast %cst_238 : f32 to vector<32x128xf32>
    %530 = arith.cmpf oeq, %387, %529 : vector<32x128xf32>
    %cst_239 = arith.constant 9.000000e+00 : f32
    %531 = vector.broadcast %cst_239 : f32 to vector<32x128xf32>
    %532 = arith.cmpf oeq, %387, %531 : vector<32x128xf32>
    %cst_240 = arith.constant 1.000000e+01 : f32
    %533 = vector.broadcast %cst_240 : f32 to vector<32x128xf32>
    %534 = arith.cmpf oeq, %387, %533 : vector<32x128xf32>
    %cst_241 = arith.constant 0.000000e+00 : f32
    %535 = vector.broadcast %cst_241 : f32 to vector<32x128xf32>
    %536 = arith.select %534, %403, %535 : vector<32x128xi1>, vector<32x128xf32>
    %537 = arith.select %532, %399, %536 : vector<32x128xi1>, vector<32x128xf32>
    %538 = arith.select %530, %407, %537 : vector<32x128xi1>, vector<32x128xf32>
    %539 = arith.select %528, %394, %538 : vector<32x128xi1>, vector<32x128xf32>
    %540 = arith.truncf %539 : vector<32x128xf32> to vector<32x128xbf16>
    %c0_242 = arith.constant 0 : index
    %c256_243 = arith.constant 256 : index
    %c0_244 = arith.constant 0 : index
    %541 = vector.load %arg4[%c0_242, %c256_243, %c0_244] : memref<2x384x128xbf16, #tpu.memory_space<vmem>>, vector<1x32x128xbf16>
    %542 = vector.shape_cast %541 : vector<1x32x128xbf16> to vector<32x128xbf16>
    %543 = vector.shape_cast %540 : vector<32x128xbf16> to vector<1x32x128xbf16>
    tpu.vector_store %arg4[%c0_242, %c256_243, %c0_244], %543 {strides = array<i32>} : memref<2x384x128xbf16, #tpu.memory_space<vmem>>, vector<1x32x128xbf16>,
    %c0_245 = arith.constant 0 : index
    %c0_246 = arith.constant 0 : index
    %c0_247 = arith.constant 0 : index
    %544 = vector.load %arg4[%c0_245, %c0_246, %c0_247] : memref<2x384x128xbf16, #tpu.memory_space<vmem>>, vector<1x384x128xbf16>
    %545 = vector.shape_cast %544 : vector<1x384x128xbf16> to vector<384x128xbf16>
    %cst_248 = arith.constant dense<0.000000e+00> : vector<16x128xf32>
    %546 = tpu.matmul %0, %545, %cst_248 {dimension_numbers = #tpu.dot_dimension_numbers<[1], [0], [0], [1], [0, 0, 1, 1], [], []>} : vector<16x384xbf16>, vector<384x128xbf16>, vector<16x128xf32> -> vector<16x128xf32>
    %547 = arith.maximumf %367, %546 : vector<16x128xf32>
    %c3 = arith.constant 3 : index
    %548 = arith.index_cast %c0_i32 : i32 to index
    %c0_249 = arith.constant 0 : index
    %c0_250 = arith.constant 0 : index
    %549 = vector.load %arg1[%c3, %548, %c0_249, %c0_250] : memref<4x1x32x128xbf16, #tpu.memory_space<vmem>>, vector<1x1x32x128xbf16>
    %550 = vector.shape_cast %549 : vector<1x1x32x128xbf16> to vector<32x128xbf16>
    %551 = arith.extf %550 : vector<32x128xbf16> to vector<32x128xf32>
    %cst_251 = arith.constant 0.000000e+00 : f32
    %552 = vector.broadcast %cst_251 : f32 to vector<32x128xf32>
    %553 = arith.subf %552, %551 : vector<32x128xf32>
    %554 = math.exp %553 : vector<32x128xf32>
    %cst_252 = arith.constant 1.000000e+00 : f32
    %555 = vector.broadcast %cst_252 : f32 to vector<32x128xf32>
    %556 = arith.addf %555, %554 : vector<32x128xf32>
    %557 = tpu.reciprocal %556 {approx = true} : vector<32x128xf32> -> vector<32x128xf32>
    %558 = arith.mulf %551, %557 : vector<32x128xf32>
    %559 = arith.truncf %558 : vector<32x128xf32> to vector<32x128xbf16>
    %c1_253 = arith.constant 1 : index
    %c0_254 = arith.constant 0 : index
    %c0_255 = arith.constant 0 : index
    %560 = vector.load %arg4[%c1_253, %c0_254, %c0_255] : memref<2x384x128xbf16, #tpu.memory_space<vmem>>, vector<1x32x128xbf16>
    %561 = vector.shape_cast %560 : vector<1x32x128xbf16> to vector<32x128xbf16>
    %562 = vector.shape_cast %559 : vector<32x128xbf16> to vector<1x32x128xbf16>
    tpu.vector_store %arg4[%c1_253, %c0_254, %c0_255], %562 {strides = array<i32>} : memref<2x384x128xbf16, #tpu.memory_space<vmem>>, vector<1x32x128xbf16>,
    %cst_256 = arith.constant -2.200000e+00 : f32
    %563 = vector.broadcast %cst_256 : f32 to vector<32x128xf32>
    %564 = arith.subf %551, %563 : vector<32x128xf32>
    %cst_257 = arith.constant 2.500000e+00 : f32
    %565 = vector.broadcast %cst_257 : f32 to vector<32x128xf32>
    %566 = arith.mulf %564, %565 : vector<32x128xf32>
    %567 = math.floor %566 : vector<32x128xf32>
    %568 = arith.subf %566, %567 : vector<32x128xf32>
    %569 = arith.mulf %568, %568 : vector<32x128xf32>
    %570 = arith.mulf %569, %568 : vector<32x128xf32>
    %cst_258 = arith.constant 1.000000e+00 : f32
    %571 = vector.broadcast %cst_258 : f32 to vector<32x128xf32>
    %572 = arith.subf %571, %568 : vector<32x128xf32>
    %cst_259 = arith.constant 0.166666672 : f32
    %573 = vector.broadcast %cst_259 : f32 to vector<32x128xf32>
    %574 = arith.mulf %570, %573 : vector<32x128xf32>
    %cst_260 = arith.constant 5.000000e-01 : f32
    %575 = vector.broadcast %cst_260 : f32 to vector<32x128xf32>
    %576 = arith.mulf %575, %570 : vector<32x128xf32>
    %577 = arith.subf %576, %569 : vector<32x128xf32>
    %cst_261 = arith.constant 0.666666686 : f32
    %578 = vector.broadcast %cst_261 : f32 to vector<32x128xf32>
    %579 = arith.addf %577, %578 : vector<32x128xf32>
    %580 = arith.mulf %572, %572 : vector<32x128xf32>
    %581 = arith.mulf %580, %572 : vector<32x128xf32>
    %cst_262 = arith.constant 0.166666672 : f32
    %582 = vector.broadcast %cst_262 : f32 to vector<32x128xf32>
    %583 = arith.mulf %581, %582 : vector<32x128xf32>
    %cst_263 = arith.constant 1.000000e+00 : f32
    %584 = vector.broadcast %cst_263 : f32 to vector<32x128xf32>
    %585 = arith.subf %584, %583 : vector<32x128xf32>
    %586 = arith.subf %585, %579 : vector<32x128xf32>
    %587 = arith.subf %586, %574 : vector<32x128xf32>
    %cst_264 = arith.constant 0.000000e+00 : f32
    %588 = vector.broadcast %cst_264 : f32 to vector<32x128xf32>
    %589 = arith.cmpf oeq, %567, %588 : vector<32x128xf32>
    %cst_265 = arith.constant 1.000000e+00 : f32
    %590 = vector.broadcast %cst_265 : f32 to vector<32x128xf32>
    %591 = arith.cmpf oeq, %567, %590 : vector<32x128xf32>
    %cst_266 = arith.constant 2.000000e+00 : f32
    %592 = vector.broadcast %cst_266 : f32 to vector<32x128xf32>
    %593 = arith.cmpf oeq, %567, %592 : vector<32x128xf32>
    %cst_267 = arith.constant 3.000000e+00 : f32
    %594 = vector.broadcast %cst_267 : f32 to vector<32x128xf32>
    %595 = arith.cmpf oeq, %567, %594 : vector<32x128xf32>
    %cst_268 = arith.constant 0.000000e+00 : f32
    %596 = vector.broadcast %cst_268 : f32 to vector<32x128xf32>
    %597 = arith.select %595, %583, %596 : vector<32x128xi1>, vector<32x128xf32>
    %598 = arith.select %593, %579, %597 : vector<32x128xi1>, vector<32x128xf32>
    %599 = arith.select %591, %587, %598 : vector<32x128xi1>, vector<32x128xf32>
    %600 = arith.select %589, %574, %599 : vector<32x128xi1>, vector<32x128xf32>
    %601 = arith.truncf %600 : vector<32x128xf32> to vector<32x128xbf16>
    %c1_269 = arith.constant 1 : index
    %c32_270 = arith.constant 32 : index
    %c0_271 = arith.constant 0 : index
    %602 = vector.load %arg4[%c1_269, %c32_270, %c0_271] : memref<2x384x128xbf16, #tpu.memory_space<vmem>>, vector<1x32x128xbf16>
    %603 = vector.shape_cast %602 : vector<1x32x128xbf16> to vector<32x128xbf16>
    %604 = vector.shape_cast %601 : vector<32x128xbf16> to vector<1x32x128xbf16>
    tpu.vector_store %arg4[%c1_269, %c32_270, %c0_271], %604 {strides = array<i32>} : memref<2x384x128xbf16, #tpu.memory_space<vmem>>, vector<1x32x128xbf16>,
    %cst_272 = arith.constant 1.000000e+00 : f32
    %605 = vector.broadcast %cst_272 : f32 to vector<32x128xf32>
    %606 = arith.cmpf oeq, %567, %605 : vector<32x128xf32>
    %cst_273 = arith.constant 2.000000e+00 : f32
    %607 = vector.broadcast %cst_273 : f32 to vector<32x128xf32>
    %608 = arith.cmpf oeq, %567, %607 : vector<32x128xf32>
    %cst_274 = arith.constant 3.000000e+00 : f32
    %609 = vector.broadcast %cst_274 : f32 to vector<32x128xf32>
    %610 = arith.cmpf oeq, %567, %609 : vector<32x128xf32>
    %cst_275 = arith.constant 4.000000e+00 : f32
    %611 = vector.broadcast %cst_275 : f32 to vector<32x128xf32>
    %612 = arith.cmpf oeq, %567, %611 : vector<32x128xf32>
    %cst_276 = arith.constant 0.000000e+00 : f32
    %613 = vector.broadcast %cst_276 : f32 to vector<32x128xf32>
    %614 = arith.select %612, %583, %613 : vector<32x128xi1>, vector<32x128xf32>
    %615 = arith.select %610, %579, %614 : vector<32x128xi1>, vector<32x128xf32>
    %616 = arith.select %608, %587, %615 : vector<32x128xi1>, vector<32x128xf32>
    %617 = arith.select %606, %574, %616 : vector<32x128xi1>, vector<32x128xf32>
    %618 = arith.truncf %617 : vector<32x128xf32> to vector<32x128xbf16>
    %c1_277 = arith.constant 1 : index
    %c64_278 = arith.constant 64 : index
    %c0_279 = arith.constant 0 : index
    %619 = vector.load %arg4[%c1_277, %c64_278, %c0_279] : memref<2x384x128xbf16, #tpu.memory_space<vmem>>, vector<1x32x128xbf16>
    %620 = vector.shape_cast %619 : vector<1x32x128xbf16> to vector<32x128xbf16>
    %621 = vector.shape_cast %618 : vector<32x128xbf16> to vector<1x32x128xbf16>
    tpu.vector_store %arg4[%c1_277, %c64_278, %c0_279], %621 {strides = array<i32>} : memref<2x384x128xbf16, #tpu.memory_space<vmem>>, vector<1x32x128xbf16>,
    %cst_280 = arith.constant 2.000000e+00 : f32
    %622 = vector.broadcast %cst_280 : f32 to vector<32x128xf32>
    %623 = arith.cmpf oeq, %567, %622 : vector<32x128xf32>
    %cst_281 = arith.constant 3.000000e+00 : f32
    %624 = vector.broadcast %cst_281 : f32 to vector<32x128xf32>
    %625 = arith.cmpf oeq, %567, %624 : vector<32x128xf32>
    %cst_282 = arith.constant 4.000000e+00 : f32
    %626 = vector.broadcast %cst_282 : f32 to vector<32x128xf32>
    %627 = arith.cmpf oeq, %567, %626 : vector<32x128xf32>
    %cst_283 = arith.constant 5.000000e+00 : f32
    %628 = vector.broadcast %cst_283 : f32 to vector<32x128xf32>
    %629 = arith.cmpf oeq, %567, %628 : vector<32x128xf32>
    %cst_284 = arith.constant 0.000000e+00 : f32
    %630 = vector.broadcast %cst_284 : f32 to vector<32x128xf32>
    %631 = arith.select %629, %583, %630 : vector<32x128xi1>, vector<32x128xf32>
    %632 = arith.select %627, %579, %631 : vector<32x128xi1>, vector<32x128xf32>
    %633 = arith.select %625, %587, %632 : vector<32x128xi1>, vector<32x128xf32>
    %634 = arith.select %623, %574, %633 : vector<32x128xi1>, vector<32x128xf32>
    %635 = arith.truncf %634 : vector<32x128xf32> to vector<32x128xbf16>
    %c1_285 = arith.constant 1 : index
    %c96_286 = arith.constant 96 : index
    %c0_287 = arith.constant 0 : index
    %636 = vector.load %arg4[%c1_285, %c96_286, %c0_287] : memref<2x384x128xbf16, #tpu.memory_space<vmem>>, vector<1x32x128xbf16>
    %637 = vector.shape_cast %636 : vector<1x32x128xbf16> to vector<32x128xbf16>
    %638 = vector.shape_cast %635 : vector<32x128xbf16> to vector<1x32x128xbf16>
    tpu.vector_store %arg4[%c1_285, %c96_286, %c0_287], %638 {strides = array<i32>} : memref<2x384x128xbf16, #tpu.memory_space<vmem>>, vector<1x32x128xbf16>,
    %cst_288 = arith.constant 3.000000e+00 : f32
    %639 = vector.broadcast %cst_288 : f32 to vector<32x128xf32>
    %640 = arith.cmpf oeq, %567, %639 : vector<32x128xf32>
    %cst_289 = arith.constant 4.000000e+00 : f32
    %641 = vector.broadcast %cst_289 : f32 to vector<32x128xf32>
    %642 = arith.cmpf oeq, %567, %641 : vector<32x128xf32>
    %cst_290 = arith.constant 5.000000e+00 : f32
    %643 = vector.broadcast %cst_290 : f32 to vector<32x128xf32>
    %644 = arith.cmpf oeq, %567, %643 : vector<32x128xf32>
    %cst_291 = arith.constant 6.000000e+00 : f32
    %645 = vector.broadcast %cst_291 : f32 to vector<32x128xf32>
    %646 = arith.cmpf oeq, %567, %645 : vector<32x128xf32>
    %cst_292 = arith.constant 0.000000e+00 : f32
    %647 = vector.broadcast %cst_292 : f32 to vector<32x128xf32>
    %648 = arith.select %646, %583, %647 : vector<32x128xi1>, vector<32x128xf32>
    %649 = arith.select %644, %579, %648 : vector<32x128xi1>, vector<32x128xf32>
    %650 = arith.select %642, %587, %649 : vector<32x128xi1>, vector<32x128xf32>
    %651 = arith.select %640, %574, %650 : vector<32x128xi1>, vector<32x128xf32>
    %652 = arith.truncf %651 : vector<32x128xf32> to vector<32x128xbf16>
    %c1_293 = arith.constant 1 : index
    %c128_294 = arith.constant 128 : index
    %c0_295 = arith.constant 0 : index
    %653 = vector.load %arg4[%c1_293, %c128_294, %c0_295] : memref<2x384x128xbf16, #tpu.memory_space<vmem>>, vector<1x32x128xbf16>
    %654 = vector.shape_cast %653 : vector<1x32x128xbf16> to vector<32x128xbf16>
    %655 = vector.shape_cast %652 : vector<32x128xbf16> to vector<1x32x128xbf16>
    tpu.vector_store %arg4[%c1_293, %c128_294, %c0_295], %655 {strides = array<i32>} : memref<2x384x128xbf16, #tpu.memory_space<vmem>>, vector<1x32x128xbf16>,
    %cst_296 = arith.constant 4.000000e+00 : f32
    %656 = vector.broadcast %cst_296 : f32 to vector<32x128xf32>
    %657 = arith.cmpf oeq, %567, %656 : vector<32x128xf32>
    %cst_297 = arith.constant 5.000000e+00 : f32
    %658 = vector.broadcast %cst_297 : f32 to vector<32x128xf32>
    %659 = arith.cmpf oeq, %567, %658 : vector<32x128xf32>
    %cst_298 = arith.constant 6.000000e+00 : f32
    %660 = vector.broadcast %cst_298 : f32 to vector<32x128xf32>
    %661 = arith.cmpf oeq, %567, %660 : vector<32x128xf32>
    %cst_299 = arith.constant 7.000000e+00 : f32
    %662 = vector.broadcast %cst_299 : f32 to vector<32x128xf32>
    %663 = arith.cmpf oeq, %567, %662 : vector<32x128xf32>
    %cst_300 = arith.constant 0.000000e+00 : f32
    %664 = vector.broadcast %cst_300 : f32 to vector<32x128xf32>
    %665 = arith.select %663, %583, %664 : vector<32x128xi1>, vector<32x128xf32>
    %666 = arith.select %661, %579, %665 : vector<32x128xi1>, vector<32x128xf32>
    %667 = arith.select %659, %587, %666 : vector<32x128xi1>, vector<32x128xf32>
    %668 = arith.select %657, %574, %667 : vector<32x128xi1>, vector<32x128xf32>
    %669 = arith.truncf %668 : vector<32x128xf32> to vector<32x128xbf16>
    %c1_301 = arith.constant 1 : index
    %c160_302 = arith.constant 160 : index
    %c0_303 = arith.constant 0 : index
    %670 = vector.load %arg4[%c1_301, %c160_302, %c0_303] : memref<2x384x128xbf16, #tpu.memory_space<vmem>>, vector<1x32x128xbf16>
    %671 = vector.shape_cast %670 : vector<1x32x128xbf16> to vector<32x128xbf16>
    %672 = vector.shape_cast %669 : vector<32x128xbf16> to vector<1x32x128xbf16>
    tpu.vector_store %arg4[%c1_301, %c160_302, %c0_303], %672 {strides = array<i32>} : memref<2x384x128xbf16, #tpu.memory_space<vmem>>, vector<1x32x128xbf16>,
    %cst_304 = arith.constant 5.000000e+00 : f32
    %673 = vector.broadcast %cst_304 : f32 to vector<32x128xf32>
    %674 = arith.cmpf oeq, %567, %673 : vector<32x128xf32>
    %cst_305 = arith.constant 6.000000e+00 : f32
    %675 = vector.broadcast %cst_305 : f32 to vector<32x128xf32>
    %676 = arith.cmpf oeq, %567, %675 : vector<32x128xf32>
    %cst_306 = arith.constant 7.000000e+00 : f32
    %677 = vector.broadcast %cst_306 : f32 to vector<32x128xf32>
    %678 = arith.cmpf oeq, %567, %677 : vector<32x128xf32>
    %cst_307 = arith.constant 8.000000e+00 : f32
    %679 = vector.broadcast %cst_307 : f32 to vector<32x128xf32>
    %680 = arith.cmpf oeq, %567, %679 : vector<32x128xf32>
    %cst_308 = arith.constant 0.000000e+00 : f32
    %681 = vector.broadcast %cst_308 : f32 to vector<32x128xf32>
    %682 = arith.select %680, %583, %681 : vector<32x128xi1>, vector<32x128xf32>
    %683 = arith.select %678, %579, %682 : vector<32x128xi1>, vector<32x128xf32>
    %684 = arith.select %676, %587, %683 : vector<32x128xi1>, vector<32x128xf32>
    %685 = arith.select %674, %574, %684 : vector<32x128xi1>, vector<32x128xf32>
    %686 = arith.truncf %685 : vector<32x128xf32> to vector<32x128xbf16>
    %c1_309 = arith.constant 1 : index
    %c192_310 = arith.constant 192 : index
    %c0_311 = arith.constant 0 : index
    %687 = vector.load %arg4[%c1_309, %c192_310, %c0_311] : memref<2x384x128xbf16, #tpu.memory_space<vmem>>, vector<1x32x128xbf16>
    %688 = vector.shape_cast %687 : vector<1x32x128xbf16> to vector<32x128xbf16>
    %689 = vector.shape_cast %686 : vector<32x128xbf16> to vector<1x32x128xbf16>
    tpu.vector_store %arg4[%c1_309, %c192_310, %c0_311], %689 {strides = array<i32>} : memref<2x384x128xbf16, #tpu.memory_space<vmem>>, vector<1x32x128xbf16>,
    %cst_312 = arith.constant 6.000000e+00 : f32
    %690 = vector.broadcast %cst_312 : f32 to vector<32x128xf32>
    %691 = arith.cmpf oeq, %567, %690 : vector<32x128xf32>
    %cst_313 = arith.constant 7.000000e+00 : f32
    %692 = vector.broadcast %cst_313 : f32 to vector<32x128xf32>
    %693 = arith.cmpf oeq, %567, %692 : vector<32x128xf32>
    %cst_314 = arith.constant 8.000000e+00 : f32
    %694 = vector.broadcast %cst_314 : f32 to vector<32x128xf32>
    %695 = arith.cmpf oeq, %567, %694 : vector<32x128xf32>
    %cst_315 = arith.constant 9.000000e+00 : f32
    %696 = vector.broadcast %cst_315 : f32 to vector<32x128xf32>
    %697 = arith.cmpf oeq, %567, %696 : vector<32x128xf32>
    %cst_316 = arith.constant 0.000000e+00 : f32
    %698 = vector.broadcast %cst_316 : f32 to vector<32x128xf32>
    %699 = arith.select %697, %583, %698 : vector<32x128xi1>, vector<32x128xf32>
    %700 = arith.select %695, %579, %699 : vector<32x128xi1>, vector<32x128xf32>
    %701 = arith.select %693, %587, %700 : vector<32x128xi1>, vector<32x128xf32>
    %702 = arith.select %691, %574, %701 : vector<32x128xi1>, vector<32x128xf32>
    %703 = arith.truncf %702 : vector<32x128xf32> to vector<32x128xbf16>
    %c1_317 = arith.constant 1 : index
    %c224_318 = arith.constant 224 : index
    %c0_319 = arith.constant 0 : index
    %704 = vector.load %arg4[%c1_317, %c224_318, %c0_319] : memref<2x384x128xbf16, #tpu.memory_space<vmem>>, vector<1x32x128xbf16>
    %705 = vector.shape_cast %704 : vector<1x32x128xbf16> to vector<32x128xbf16>
    %706 = vector.shape_cast %703 : vector<32x128xbf16> to vector<1x32x128xbf16>
    tpu.vector_store %arg4[%c1_317, %c224_318, %c0_319], %706 {strides = array<i32>} : memref<2x384x128xbf16, #tpu.memory_space<vmem>>, vector<1x32x128xbf16>,
    %cst_320 = arith.constant 7.000000e+00 : f32
    %707 = vector.broadcast %cst_320 : f32 to vector<32x128xf32>
    %708 = arith.cmpf oeq, %567, %707 : vector<32x128xf32>
    %cst_321 = arith.constant 8.000000e+00 : f32
    %709 = vector.broadcast %cst_321 : f32 to vector<32x128xf32>
    %710 = arith.cmpf oeq, %567, %709 : vector<32x128xf32>
    %cst_322 = arith.constant 9.000000e+00 : f32
    %711 = vector.broadcast %cst_322 : f32 to vector<32x128xf32>
    %712 = arith.cmpf oeq, %567, %711 : vector<32x128xf32>
    %cst_323 = arith.constant 1.000000e+01 : f32
    %713 = vector.broadcast %cst_323 : f32 to vector<32x128xf32>
    %714 = arith.cmpf oeq, %567, %713 : vector<32x128xf32>
    %cst_324 = arith.constant 0.000000e+00 : f32
    %715 = vector.broadcast %cst_324 : f32 to vector<32x128xf32>
    %716 = arith.select %714, %583, %715 : vector<32x128xi1>, vector<32x128xf32>
    %717 = arith.select %712, %579, %716 : vector<32x128xi1>, vector<32x128xf32>
    %718 = arith.select %710, %587, %717 : vector<32x128xi1>, vector<32x128xf32>
    %719 = arith.select %708, %574, %718 : vector<32x128xi1>, vector<32x128xf32>
    %720 = arith.truncf %719 : vector<32x128xf32> to vector<32x128xbf16>
    %c1_325 = arith.constant 1 : index
    %c256_326 = arith.constant 256 : index
    %c0_327 = arith.constant 0 : index
    %721 = vector.load %arg4[%c1_325, %c256_326, %c0_327] : memref<2x384x128xbf16, #tpu.memory_space<vmem>>, vector<1x32x128xbf16>
    %722 = vector.shape_cast %721 : vector<1x32x128xbf16> to vector<32x128xbf16>
    %723 = vector.shape_cast %720 : vector<32x128xbf16> to vector<1x32x128xbf16>
    tpu.vector_store %arg4[%c1_325, %c256_326, %c0_327], %723 {strides = array<i32>} : memref<2x384x128xbf16, #tpu.memory_space<vmem>>, vector<1x32x128xbf16>,
    %c1_328 = arith.constant 1 : index
    %c0_329 = arith.constant 0 : index
    %c0_330 = arith.constant 0 : index
    %724 = vector.load %arg4[%c1_328, %c0_329, %c0_330] : memref<2x384x128xbf16, #tpu.memory_space<vmem>>, vector<1x384x128xbf16>
    %725 = vector.shape_cast %724 : vector<1x384x128xbf16> to vector<384x128xbf16>
    %cst_331 = arith.constant dense<0.000000e+00> : vector<16x128xf32>
    %726 = tpu.matmul %0, %725, %cst_331 {dimension_numbers = #tpu.dot_dimension_numbers<[1], [0], [0], [1], [0, 0, 1, 1], [], []>} : vector<16x384xbf16>, vector<384x128xbf16>, vector<16x128xf32> -> vector<16x128xf32>
    %727 = arith.maximumf %547, %726 : vector<16x128xf32>
    %728 = arith.truncf %727 : vector<16x128xf32> to vector<16x128xbf16>
    %729 = arith.index_cast %c0_i32 : i32 to index
    %c0_332 = arith.constant 0 : index
    %c0_333 = arith.constant 0 : index
    %730 = vector.load %arg3[%729, %c0_332, %c0_333] : memref<1x16x128xbf16, #tpu.memory_space<vmem>>, vector<1x16x128xbf16>
    %731 = vector.shape_cast %730 : vector<1x16x128xbf16> to vector<16x128xbf16>
    %732 = vector.shape_cast %728 : vector<16x128xbf16> to vector<1x16x128xbf16>
    tpu.vector_store %arg3[%729, %c0_332, %c0_333], %732 {strides = array<i32>} : memref<1x16x128xbf16, #tpu.memory_space<vmem>>, vector<1x16x128xbf16>,
    %c1_i32 = arith.constant 1 : i32
    return
  }
  func.func @transform_0(%arg0: i32) -> (i32, i32, i32, i32) {
    %c0_i32 = arith.constant 0 : i32
    %c0_i32_0 = arith.constant 0 : i32
    %c0_i32_1 = arith.constant 0 : i32
    %c0_i32_2 = arith.constant 0 : i32
    return %c0_i32, %arg0, %c0_i32_0, %c0_i32_1 : i32, i32, i32, i32
  }
  func.func @transform_1(%arg0: i32) -> (i32, i32) {
    %c0_i32 = arith.constant 0 : i32
    %c0_i32_0 = arith.constant 0 : i32
    %c0_i32_1 = arith.constant 0 : i32
    return %c0_i32, %c0_i32_0 : i32, i32
  }
  func.func @transform_2(%arg0: i32) -> (i32, i32, i32) {
    %c0_i32 = arith.constant 0 : i32
    %c0_i32_0 = arith.constant 0 : i32
    %c0_i32_1 = arith.constant 0 : i32
    return %arg0, %c0_i32, %c0_i32_0 : i32, i32, i32
  }
}

module attributes {stable_mosaic.version = 11 : i64} {
  func.func @kernel(%arg0: i32, %arg1: memref<4x1x48x128xbf16, #tpu.memory_space<vmem>>, %arg2: memref<16x512xbf16, #tpu.memory_space<vmem>>, %arg3: memref<1x16x128xbf16, #tpu.memory_space<vmem>>, %arg4: memref<2x512x128xbf16, #tpu.memory_space<vmem>>) attributes {dimension_semantics = [#tpu.dimension_semantics<parallel>], iteration_bounds = array<i64: 1>, scalar_prefetch = 0 : i64, scratch_operands = 1 : i64, tpu.core_type = #tpu.core_type<tc>, window_params = [{transform_indices = @transform_0, window_bounds = array<i64: 4, 1, 48, 128>}, {pipeline_mode = #tpu.pipeline_mode<synchronous>, transform_indices = @transform_1, window_bounds = array<i64: 16, 512>}, {transform_indices = @transform_2, window_bounds = array<i64: 1, 16, 128>}]} {
    %c0 = arith.constant 0 : index
    %c0_0 = arith.constant 0 : index
    %0 = vector.load %arg2[%c0, %c0_0] : memref<16x512xbf16, #tpu.memory_space<vmem>>, vector<16x512xbf16>
    %cst = arith.constant 0.000000e+00 : bf16
    %1 = vector.broadcast %cst : bf16 to vector<80x128xbf16>
    %c0_1 = arith.constant 0 : index
    %c432 = arith.constant 432 : index
    %c0_2 = arith.constant 0 : index
    %2 = vector.load %arg4[%c0_1, %c432, %c0_2] : memref<2x512x128xbf16, #tpu.memory_space<vmem>>, vector<1x80x128xbf16>
    %3 = vector.shape_cast %2 : vector<1x80x128xbf16> to vector<80x128xbf16>
    %4 = vector.shape_cast %1 : vector<80x128xbf16> to vector<1x80x128xbf16>
    tpu.vector_store %arg4[%c0_1, %c432, %c0_2], %4 {strides = array<i32>} : memref<2x512x128xbf16, #tpu.memory_space<vmem>>, vector<1x80x128xbf16>,
    %cst_3 = arith.constant 0.000000e+00 : bf16
    %5 = vector.broadcast %cst_3 : bf16 to vector<80x128xbf16>
    %c1 = arith.constant 1 : index
    %c432_4 = arith.constant 432 : index
    %c0_5 = arith.constant 0 : index
    %6 = vector.load %arg4[%c1, %c432_4, %c0_5] : memref<2x512x128xbf16, #tpu.memory_space<vmem>>, vector<1x80x128xbf16>
    %7 = vector.shape_cast %6 : vector<1x80x128xbf16> to vector<80x128xbf16>
    %8 = vector.shape_cast %5 : vector<80x128xbf16> to vector<1x80x128xbf16>
    tpu.vector_store %arg4[%c1, %c432_4, %c0_5], %8 {strides = array<i32>} : memref<2x512x128xbf16, #tpu.memory_space<vmem>>, vector<1x80x128xbf16>,
    %c0_i32 = arith.constant 0 : i32
    %c0_6 = arith.constant 0 : index
    %9 = arith.index_cast %c0_i32 : i32 to index
    %c0_7 = arith.constant 0 : index
    %c0_8 = arith.constant 0 : index
    %10 = vector.load %arg1[%c0_6, %9, %c0_7, %c0_8] : memref<4x1x48x128xbf16, #tpu.memory_space<vmem>>, vector<1x1x48x128xbf16>
    %11 = vector.shape_cast %10 : vector<1x1x48x128xbf16> to vector<48x128xbf16>
    %12 = arith.extf %11 : vector<48x128xbf16> to vector<48x128xf32>
    %cst_9 = arith.constant 0.000000e+00 : f32
    %13 = vector.broadcast %cst_9 : f32 to vector<48x128xf32>
    %14 = arith.subf %13, %12 : vector<48x128xf32>
    %15 = math.exp %14 : vector<48x128xf32>
    %cst_10 = arith.constant 1.000000e+00 : f32
    %16 = vector.broadcast %cst_10 : f32 to vector<48x128xf32>
    %17 = arith.addf %16, %15 : vector<48x128xf32>
    %18 = tpu.reciprocal %17 {approx = true} : vector<48x128xf32> -> vector<48x128xf32>
    %19 = arith.mulf %12, %18 : vector<48x128xf32>
    %20 = arith.truncf %19 : vector<48x128xf32> to vector<48x128xbf16>
    %c0_11 = arith.constant 0 : index
    %c0_12 = arith.constant 0 : index
    %c0_13 = arith.constant 0 : index
    %21 = vector.load %arg4[%c0_11, %c0_12, %c0_13] : memref<2x512x128xbf16, #tpu.memory_space<vmem>>, vector<1x48x128xbf16>
    %22 = vector.shape_cast %21 : vector<1x48x128xbf16> to vector<48x128xbf16>
    %23 = vector.shape_cast %20 : vector<48x128xbf16> to vector<1x48x128xbf16>
    tpu.vector_store %arg4[%c0_11, %c0_12, %c0_13], %23 {strides = array<i32>} : memref<2x512x128xbf16, #tpu.memory_space<vmem>>, vector<1x48x128xbf16>,
    %cst_14 = arith.constant -2.200000e+00 : f32
    %24 = vector.broadcast %cst_14 : f32 to vector<48x128xf32>
    %25 = arith.subf %12, %24 : vector<48x128xf32>
    %cst_15 = arith.constant 2.500000e+00 : f32
    %26 = vector.broadcast %cst_15 : f32 to vector<48x128xf32>
    %27 = arith.mulf %25, %26 : vector<48x128xf32>
    %28 = math.floor %27 : vector<48x128xf32>
    %29 = arith.subf %27, %28 : vector<48x128xf32>
    %30 = arith.mulf %29, %29 : vector<48x128xf32>
    %31 = arith.mulf %30, %29 : vector<48x128xf32>
    %cst_16 = arith.constant 1.000000e+00 : f32
    %32 = vector.broadcast %cst_16 : f32 to vector<48x128xf32>
    %33 = arith.subf %32, %29 : vector<48x128xf32>
    %cst_17 = arith.constant 0.166666672 : f32
    %34 = vector.broadcast %cst_17 : f32 to vector<48x128xf32>
    %35 = arith.mulf %31, %34 : vector<48x128xf32>
    %cst_18 = arith.constant 5.000000e-01 : f32
    %36 = vector.broadcast %cst_18 : f32 to vector<48x128xf32>
    %37 = arith.mulf %36, %31 : vector<48x128xf32>
    %38 = arith.subf %37, %30 : vector<48x128xf32>
    %cst_19 = arith.constant 0.666666686 : f32
    %39 = vector.broadcast %cst_19 : f32 to vector<48x128xf32>
    %40 = arith.addf %38, %39 : vector<48x128xf32>
    %41 = arith.mulf %33, %33 : vector<48x128xf32>
    %42 = arith.mulf %41, %33 : vector<48x128xf32>
    %cst_20 = arith.constant 0.166666672 : f32
    %43 = vector.broadcast %cst_20 : f32 to vector<48x128xf32>
    %44 = arith.mulf %42, %43 : vector<48x128xf32>
    %cst_21 = arith.constant 1.000000e+00 : f32
    %45 = vector.broadcast %cst_21 : f32 to vector<48x128xf32>
    %46 = arith.subf %45, %44 : vector<48x128xf32>
    %47 = arith.subf %46, %40 : vector<48x128xf32>
    %48 = arith.subf %47, %35 : vector<48x128xf32>
    %cst_22 = arith.constant 0.000000e+00 : f32
    %49 = vector.broadcast %cst_22 : f32 to vector<48x128xf32>
    %50 = arith.cmpf oeq, %28, %49 : vector<48x128xf32>
    %cst_23 = arith.constant 1.000000e+00 : f32
    %51 = vector.broadcast %cst_23 : f32 to vector<48x128xf32>
    %52 = arith.cmpf oeq, %28, %51 : vector<48x128xf32>
    %cst_24 = arith.constant 2.000000e+00 : f32
    %53 = vector.broadcast %cst_24 : f32 to vector<48x128xf32>
    %54 = arith.cmpf oeq, %28, %53 : vector<48x128xf32>
    %cst_25 = arith.constant 3.000000e+00 : f32
    %55 = vector.broadcast %cst_25 : f32 to vector<48x128xf32>
    %56 = arith.cmpf oeq, %28, %55 : vector<48x128xf32>
    %cst_26 = arith.constant 0.000000e+00 : f32
    %57 = vector.broadcast %cst_26 : f32 to vector<48x128xf32>
    %58 = arith.select %56, %44, %57 : vector<48x128xi1>, vector<48x128xf32>
    %59 = arith.select %54, %40, %58 : vector<48x128xi1>, vector<48x128xf32>
    %60 = arith.select %52, %48, %59 : vector<48x128xi1>, vector<48x128xf32>
    %61 = arith.select %50, %35, %60 : vector<48x128xi1>, vector<48x128xf32>
    %62 = arith.truncf %61 : vector<48x128xf32> to vector<48x128xbf16>
    %c0_27 = arith.constant 0 : index
    %c48 = arith.constant 48 : index
    %c0_28 = arith.constant 0 : index
    %63 = vector.load %arg4[%c0_27, %c48, %c0_28] : memref<2x512x128xbf16, #tpu.memory_space<vmem>>, vector<1x48x128xbf16>
    %64 = vector.shape_cast %63 : vector<1x48x128xbf16> to vector<48x128xbf16>
    %65 = vector.shape_cast %62 : vector<48x128xbf16> to vector<1x48x128xbf16>
    tpu.vector_store %arg4[%c0_27, %c48, %c0_28], %65 {strides = array<i32>} : memref<2x512x128xbf16, #tpu.memory_space<vmem>>, vector<1x48x128xbf16>,
    %cst_29 = arith.constant 1.000000e+00 : f32
    %66 = vector.broadcast %cst_29 : f32 to vector<48x128xf32>
    %67 = arith.cmpf oeq, %28, %66 : vector<48x128xf32>
    %cst_30 = arith.constant 2.000000e+00 : f32
    %68 = vector.broadcast %cst_30 : f32 to vector<48x128xf32>
    %69 = arith.cmpf oeq, %28, %68 : vector<48x128xf32>
    %cst_31 = arith.constant 3.000000e+00 : f32
    %70 = vector.broadcast %cst_31 : f32 to vector<48x128xf32>
    %71 = arith.cmpf oeq, %28, %70 : vector<48x128xf32>
    %cst_32 = arith.constant 4.000000e+00 : f32
    %72 = vector.broadcast %cst_32 : f32 to vector<48x128xf32>
    %73 = arith.cmpf oeq, %28, %72 : vector<48x128xf32>
    %cst_33 = arith.constant 0.000000e+00 : f32
    %74 = vector.broadcast %cst_33 : f32 to vector<48x128xf32>
    %75 = arith.select %73, %44, %74 : vector<48x128xi1>, vector<48x128xf32>
    %76 = arith.select %71, %40, %75 : vector<48x128xi1>, vector<48x128xf32>
    %77 = arith.select %69, %48, %76 : vector<48x128xi1>, vector<48x128xf32>
    %78 = arith.select %67, %35, %77 : vector<48x128xi1>, vector<48x128xf32>
    %79 = arith.truncf %78 : vector<48x128xf32> to vector<48x128xbf16>
    %c0_34 = arith.constant 0 : index
    %c96 = arith.constant 96 : index
    %c0_35 = arith.constant 0 : index
    %80 = vector.load %arg4[%c0_34, %c96, %c0_35] : memref<2x512x128xbf16, #tpu.memory_space<vmem>>, vector<1x48x128xbf16>
    %81 = vector.shape_cast %80 : vector<1x48x128xbf16> to vector<48x128xbf16>
    %82 = vector.shape_cast %79 : vector<48x128xbf16> to vector<1x48x128xbf16>
    tpu.vector_store %arg4[%c0_34, %c96, %c0_35], %82 {strides = array<i32>} : memref<2x512x128xbf16, #tpu.memory_space<vmem>>, vector<1x48x128xbf16>,
    %cst_36 = arith.constant 2.000000e+00 : f32
    %83 = vector.broadcast %cst_36 : f32 to vector<48x128xf32>
    %84 = arith.cmpf oeq, %28, %83 : vector<48x128xf32>
    %cst_37 = arith.constant 3.000000e+00 : f32
    %85 = vector.broadcast %cst_37 : f32 to vector<48x128xf32>
    %86 = arith.cmpf oeq, %28, %85 : vector<48x128xf32>
    %cst_38 = arith.constant 4.000000e+00 : f32
    %87 = vector.broadcast %cst_38 : f32 to vector<48x128xf32>
    %88 = arith.cmpf oeq, %28, %87 : vector<48x128xf32>
    %cst_39 = arith.constant 5.000000e+00 : f32
    %89 = vector.broadcast %cst_39 : f32 to vector<48x128xf32>
    %90 = arith.cmpf oeq, %28, %89 : vector<48x128xf32>
    %cst_40 = arith.constant 0.000000e+00 : f32
    %91 = vector.broadcast %cst_40 : f32 to vector<48x128xf32>
    %92 = arith.select %90, %44, %91 : vector<48x128xi1>, vector<48x128xf32>
    %93 = arith.select %88, %40, %92 : vector<48x128xi1>, vector<48x128xf32>
    %94 = arith.select %86, %48, %93 : vector<48x128xi1>, vector<48x128xf32>
    %95 = arith.select %84, %35, %94 : vector<48x128xi1>, vector<48x128xf32>
    %96 = arith.truncf %95 : vector<48x128xf32> to vector<48x128xbf16>
    %c0_41 = arith.constant 0 : index
    %c144 = arith.constant 144 : index
    %c0_42 = arith.constant 0 : index
    %97 = vector.load %arg4[%c0_41, %c144, %c0_42] : memref<2x512x128xbf16, #tpu.memory_space<vmem>>, vector<1x48x128xbf16>
    %98 = vector.shape_cast %97 : vector<1x48x128xbf16> to vector<48x128xbf16>
    %99 = vector.shape_cast %96 : vector<48x128xbf16> to vector<1x48x128xbf16>
    tpu.vector_store %arg4[%c0_41, %c144, %c0_42], %99 {strides = array<i32>} : memref<2x512x128xbf16, #tpu.memory_space<vmem>>, vector<1x48x128xbf16>,
    %cst_43 = arith.constant 3.000000e+00 : f32
    %100 = vector.broadcast %cst_43 : f32 to vector<48x128xf32>
    %101 = arith.cmpf oeq, %28, %100 : vector<48x128xf32>
    %cst_44 = arith.constant 4.000000e+00 : f32
    %102 = vector.broadcast %cst_44 : f32 to vector<48x128xf32>
    %103 = arith.cmpf oeq, %28, %102 : vector<48x128xf32>
    %cst_45 = arith.constant 5.000000e+00 : f32
    %104 = vector.broadcast %cst_45 : f32 to vector<48x128xf32>
    %105 = arith.cmpf oeq, %28, %104 : vector<48x128xf32>
    %cst_46 = arith.constant 6.000000e+00 : f32
    %106 = vector.broadcast %cst_46 : f32 to vector<48x128xf32>
    %107 = arith.cmpf oeq, %28, %106 : vector<48x128xf32>
    %cst_47 = arith.constant 0.000000e+00 : f32
    %108 = vector.broadcast %cst_47 : f32 to vector<48x128xf32>
    %109 = arith.select %107, %44, %108 : vector<48x128xi1>, vector<48x128xf32>
    %110 = arith.select %105, %40, %109 : vector<48x128xi1>, vector<48x128xf32>
    %111 = arith.select %103, %48, %110 : vector<48x128xi1>, vector<48x128xf32>
    %112 = arith.select %101, %35, %111 : vector<48x128xi1>, vector<48x128xf32>
    %113 = arith.truncf %112 : vector<48x128xf32> to vector<48x128xbf16>
    %c0_48 = arith.constant 0 : index
    %c192 = arith.constant 192 : index
    %c0_49 = arith.constant 0 : index
    %114 = vector.load %arg4[%c0_48, %c192, %c0_49] : memref<2x512x128xbf16, #tpu.memory_space<vmem>>, vector<1x48x128xbf16>
    %115 = vector.shape_cast %114 : vector<1x48x128xbf16> to vector<48x128xbf16>
    %116 = vector.shape_cast %113 : vector<48x128xbf16> to vector<1x48x128xbf16>
    tpu.vector_store %arg4[%c0_48, %c192, %c0_49], %116 {strides = array<i32>} : memref<2x512x128xbf16, #tpu.memory_space<vmem>>, vector<1x48x128xbf16>,
    %cst_50 = arith.constant 4.000000e+00 : f32
    %117 = vector.broadcast %cst_50 : f32 to vector<48x128xf32>
    %118 = arith.cmpf oeq, %28, %117 : vector<48x128xf32>
    %cst_51 = arith.constant 5.000000e+00 : f32
    %119 = vector.broadcast %cst_51 : f32 to vector<48x128xf32>
    %120 = arith.cmpf oeq, %28, %119 : vector<48x128xf32>
    %cst_52 = arith.constant 6.000000e+00 : f32
    %121 = vector.broadcast %cst_52 : f32 to vector<48x128xf32>
    %122 = arith.cmpf oeq, %28, %121 : vector<48x128xf32>
    %cst_53 = arith.constant 7.000000e+00 : f32
    %123 = vector.broadcast %cst_53 : f32 to vector<48x128xf32>
    %124 = arith.cmpf oeq, %28, %123 : vector<48x128xf32>
    %cst_54 = arith.constant 0.000000e+00 : f32
    %125 = vector.broadcast %cst_54 : f32 to vector<48x128xf32>
    %126 = arith.select %124, %44, %125 : vector<48x128xi1>, vector<48x128xf32>
    %127 = arith.select %122, %40, %126 : vector<48x128xi1>, vector<48x128xf32>
    %128 = arith.select %120, %48, %127 : vector<48x128xi1>, vector<48x128xf32>
    %129 = arith.select %118, %35, %128 : vector<48x128xi1>, vector<48x128xf32>
    %130 = arith.truncf %129 : vector<48x128xf32> to vector<48x128xbf16>
    %c0_55 = arith.constant 0 : index
    %c240 = arith.constant 240 : index
    %c0_56 = arith.constant 0 : index
    %131 = vector.load %arg4[%c0_55, %c240, %c0_56] : memref<2x512x128xbf16, #tpu.memory_space<vmem>>, vector<1x48x128xbf16>
    %132 = vector.shape_cast %131 : vector<1x48x128xbf16> to vector<48x128xbf16>
    %133 = vector.shape_cast %130 : vector<48x128xbf16> to vector<1x48x128xbf16>
    tpu.vector_store %arg4[%c0_55, %c240, %c0_56], %133 {strides = array<i32>} : memref<2x512x128xbf16, #tpu.memory_space<vmem>>, vector<1x48x128xbf16>,
    %cst_57 = arith.constant 5.000000e+00 : f32
    %134 = vector.broadcast %cst_57 : f32 to vector<48x128xf32>
    %135 = arith.cmpf oeq, %28, %134 : vector<48x128xf32>
    %cst_58 = arith.constant 6.000000e+00 : f32
    %136 = vector.broadcast %cst_58 : f32 to vector<48x128xf32>
    %137 = arith.cmpf oeq, %28, %136 : vector<48x128xf32>
    %cst_59 = arith.constant 7.000000e+00 : f32
    %138 = vector.broadcast %cst_59 : f32 to vector<48x128xf32>
    %139 = arith.cmpf oeq, %28, %138 : vector<48x128xf32>
    %cst_60 = arith.constant 8.000000e+00 : f32
    %140 = vector.broadcast %cst_60 : f32 to vector<48x128xf32>
    %141 = arith.cmpf oeq, %28, %140 : vector<48x128xf32>
    %cst_61 = arith.constant 0.000000e+00 : f32
    %142 = vector.broadcast %cst_61 : f32 to vector<48x128xf32>
    %143 = arith.select %141, %44, %142 : vector<48x128xi1>, vector<48x128xf32>
    %144 = arith.select %139, %40, %143 : vector<48x128xi1>, vector<48x128xf32>
    %145 = arith.select %137, %48, %144 : vector<48x128xi1>, vector<48x128xf32>
    %146 = arith.select %135, %35, %145 : vector<48x128xi1>, vector<48x128xf32>
    %147 = arith.truncf %146 : vector<48x128xf32> to vector<48x128xbf16>
    %c0_62 = arith.constant 0 : index
    %c288 = arith.constant 288 : index
    %c0_63 = arith.constant 0 : index
    %148 = vector.load %arg4[%c0_62, %c288, %c0_63] : memref<2x512x128xbf16, #tpu.memory_space<vmem>>, vector<1x48x128xbf16>
    %149 = vector.shape_cast %148 : vector<1x48x128xbf16> to vector<48x128xbf16>
    %150 = vector.shape_cast %147 : vector<48x128xbf16> to vector<1x48x128xbf16>
    tpu.vector_store %arg4[%c0_62, %c288, %c0_63], %150 {strides = array<i32>} : memref<2x512x128xbf16, #tpu.memory_space<vmem>>, vector<1x48x128xbf16>,
    %cst_64 = arith.constant 6.000000e+00 : f32
    %151 = vector.broadcast %cst_64 : f32 to vector<48x128xf32>
    %152 = arith.cmpf oeq, %28, %151 : vector<48x128xf32>
    %cst_65 = arith.constant 7.000000e+00 : f32
    %153 = vector.broadcast %cst_65 : f32 to vector<48x128xf32>
    %154 = arith.cmpf oeq, %28, %153 : vector<48x128xf32>
    %cst_66 = arith.constant 8.000000e+00 : f32
    %155 = vector.broadcast %cst_66 : f32 to vector<48x128xf32>
    %156 = arith.cmpf oeq, %28, %155 : vector<48x128xf32>
    %cst_67 = arith.constant 9.000000e+00 : f32
    %157 = vector.broadcast %cst_67 : f32 to vector<48x128xf32>
    %158 = arith.cmpf oeq, %28, %157 : vector<48x128xf32>
    %cst_68 = arith.constant 0.000000e+00 : f32
    %159 = vector.broadcast %cst_68 : f32 to vector<48x128xf32>
    %160 = arith.select %158, %44, %159 : vector<48x128xi1>, vector<48x128xf32>
    %161 = arith.select %156, %40, %160 : vector<48x128xi1>, vector<48x128xf32>
    %162 = arith.select %154, %48, %161 : vector<48x128xi1>, vector<48x128xf32>
    %163 = arith.select %152, %35, %162 : vector<48x128xi1>, vector<48x128xf32>
    %164 = arith.truncf %163 : vector<48x128xf32> to vector<48x128xbf16>
    %c0_69 = arith.constant 0 : index
    %c336 = arith.constant 336 : index
    %c0_70 = arith.constant 0 : index
    %165 = vector.load %arg4[%c0_69, %c336, %c0_70] : memref<2x512x128xbf16, #tpu.memory_space<vmem>>, vector<1x48x128xbf16>
    %166 = vector.shape_cast %165 : vector<1x48x128xbf16> to vector<48x128xbf16>
    %167 = vector.shape_cast %164 : vector<48x128xbf16> to vector<1x48x128xbf16>
    tpu.vector_store %arg4[%c0_69, %c336, %c0_70], %167 {strides = array<i32>} : memref<2x512x128xbf16, #tpu.memory_space<vmem>>, vector<1x48x128xbf16>,
    %cst_71 = arith.constant 7.000000e+00 : f32
    %168 = vector.broadcast %cst_71 : f32 to vector<48x128xf32>
    %169 = arith.cmpf oeq, %28, %168 : vector<48x128xf32>
    %cst_72 = arith.constant 8.000000e+00 : f32
    %170 = vector.broadcast %cst_72 : f32 to vector<48x128xf32>
    %171 = arith.cmpf oeq, %28, %170 : vector<48x128xf32>
    %cst_73 = arith.constant 9.000000e+00 : f32
    %172 = vector.broadcast %cst_73 : f32 to vector<48x128xf32>
    %173 = arith.cmpf oeq, %28, %172 : vector<48x128xf32>
    %cst_74 = arith.constant 1.000000e+01 : f32
    %174 = vector.broadcast %cst_74 : f32 to vector<48x128xf32>
    %175 = arith.cmpf oeq, %28, %174 : vector<48x128xf32>
    %cst_75 = arith.constant 0.000000e+00 : f32
    %176 = vector.broadcast %cst_75 : f32 to vector<48x128xf32>
    %177 = arith.select %175, %44, %176 : vector<48x128xi1>, vector<48x128xf32>
    %178 = arith.select %173, %40, %177 : vector<48x128xi1>, vector<48x128xf32>
    %179 = arith.select %171, %48, %178 : vector<48x128xi1>, vector<48x128xf32>
    %180 = arith.select %169, %35, %179 : vector<48x128xi1>, vector<48x128xf32>
    %181 = arith.truncf %180 : vector<48x128xf32> to vector<48x128xbf16>
    %c0_76 = arith.constant 0 : index
    %c384 = arith.constant 384 : index
    %c0_77 = arith.constant 0 : index
    %182 = vector.load %arg4[%c0_76, %c384, %c0_77] : memref<2x512x128xbf16, #tpu.memory_space<vmem>>, vector<1x48x128xbf16>
    %183 = vector.shape_cast %182 : vector<1x48x128xbf16> to vector<48x128xbf16>
    %184 = vector.shape_cast %181 : vector<48x128xbf16> to vector<1x48x128xbf16>
    tpu.vector_store %arg4[%c0_76, %c384, %c0_77], %184 {strides = array<i32>} : memref<2x512x128xbf16, #tpu.memory_space<vmem>>, vector<1x48x128xbf16>,
    %c0_78 = arith.constant 0 : index
    %c0_79 = arith.constant 0 : index
    %c0_80 = arith.constant 0 : index
    %185 = vector.load %arg4[%c0_78, %c0_79, %c0_80] : memref<2x512x128xbf16, #tpu.memory_space<vmem>>, vector<1x512x128xbf16>
    %186 = vector.shape_cast %185 : vector<1x512x128xbf16> to vector<512x128xbf16>
    %cst_81 = arith.constant dense<0.000000e+00> : vector<16x128xf32>
    %187 = tpu.matmul %0, %186, %cst_81 {dimension_numbers = #tpu.dot_dimension_numbers<[1], [0], [0], [1], [0, 0, 1, 1], [], []>} : vector<16x512xbf16>, vector<512x128xbf16>, vector<16x128xf32> -> vector<16x128xf32>
    %c1_82 = arith.constant 1 : index
    %188 = arith.index_cast %c0_i32 : i32 to index
    %c0_83 = arith.constant 0 : index
    %c0_84 = arith.constant 0 : index
    %189 = vector.load %arg1[%c1_82, %188, %c0_83, %c0_84] : memref<4x1x48x128xbf16, #tpu.memory_space<vmem>>, vector<1x1x48x128xbf16>
    %190 = vector.shape_cast %189 : vector<1x1x48x128xbf16> to vector<48x128xbf16>
    %191 = arith.extf %190 : vector<48x128xbf16> to vector<48x128xf32>
    %cst_85 = arith.constant 0.000000e+00 : f32
    %192 = vector.broadcast %cst_85 : f32 to vector<48x128xf32>
    %193 = arith.subf %192, %191 : vector<48x128xf32>
    %194 = math.exp %193 : vector<48x128xf32>
    %cst_86 = arith.constant 1.000000e+00 : f32
    %195 = vector.broadcast %cst_86 : f32 to vector<48x128xf32>
    %196 = arith.addf %195, %194 : vector<48x128xf32>
    %197 = tpu.reciprocal %196 {approx = true} : vector<48x128xf32> -> vector<48x128xf32>
    %198 = arith.mulf %191, %197 : vector<48x128xf32>
    %199 = arith.truncf %198 : vector<48x128xf32> to vector<48x128xbf16>
    %c1_87 = arith.constant 1 : index
    %c0_88 = arith.constant 0 : index
    %c0_89 = arith.constant 0 : index
    %200 = vector.load %arg4[%c1_87, %c0_88, %c0_89] : memref<2x512x128xbf16, #tpu.memory_space<vmem>>, vector<1x48x128xbf16>
    %201 = vector.shape_cast %200 : vector<1x48x128xbf16> to vector<48x128xbf16>
    %202 = vector.shape_cast %199 : vector<48x128xbf16> to vector<1x48x128xbf16>
    tpu.vector_store %arg4[%c1_87, %c0_88, %c0_89], %202 {strides = array<i32>} : memref<2x512x128xbf16, #tpu.memory_space<vmem>>, vector<1x48x128xbf16>,
    %cst_90 = arith.constant -2.200000e+00 : f32
    %203 = vector.broadcast %cst_90 : f32 to vector<48x128xf32>
    %204 = arith.subf %191, %203 : vector<48x128xf32>
    %cst_91 = arith.constant 2.500000e+00 : f32
    %205 = vector.broadcast %cst_91 : f32 to vector<48x128xf32>
    %206 = arith.mulf %204, %205 : vector<48x128xf32>
    %207 = math.floor %206 : vector<48x128xf32>
    %208 = arith.subf %206, %207 : vector<48x128xf32>
    %209 = arith.mulf %208, %208 : vector<48x128xf32>
    %210 = arith.mulf %209, %208 : vector<48x128xf32>
    %cst_92 = arith.constant 1.000000e+00 : f32
    %211 = vector.broadcast %cst_92 : f32 to vector<48x128xf32>
    %212 = arith.subf %211, %208 : vector<48x128xf32>
    %cst_93 = arith.constant 0.166666672 : f32
    %213 = vector.broadcast %cst_93 : f32 to vector<48x128xf32>
    %214 = arith.mulf %210, %213 : vector<48x128xf32>
    %cst_94 = arith.constant 5.000000e-01 : f32
    %215 = vector.broadcast %cst_94 : f32 to vector<48x128xf32>
    %216 = arith.mulf %215, %210 : vector<48x128xf32>
    %217 = arith.subf %216, %209 : vector<48x128xf32>
    %cst_95 = arith.constant 0.666666686 : f32
    %218 = vector.broadcast %cst_95 : f32 to vector<48x128xf32>
    %219 = arith.addf %217, %218 : vector<48x128xf32>
    %220 = arith.mulf %212, %212 : vector<48x128xf32>
    %221 = arith.mulf %220, %212 : vector<48x128xf32>
    %cst_96 = arith.constant 0.166666672 : f32
    %222 = vector.broadcast %cst_96 : f32 to vector<48x128xf32>
    %223 = arith.mulf %221, %222 : vector<48x128xf32>
    %cst_97 = arith.constant 1.000000e+00 : f32
    %224 = vector.broadcast %cst_97 : f32 to vector<48x128xf32>
    %225 = arith.subf %224, %223 : vector<48x128xf32>
    %226 = arith.subf %225, %219 : vector<48x128xf32>
    %227 = arith.subf %226, %214 : vector<48x128xf32>
    %cst_98 = arith.constant 0.000000e+00 : f32
    %228 = vector.broadcast %cst_98 : f32 to vector<48x128xf32>
    %229 = arith.cmpf oeq, %207, %228 : vector<48x128xf32>
    %cst_99 = arith.constant 1.000000e+00 : f32
    %230 = vector.broadcast %cst_99 : f32 to vector<48x128xf32>
    %231 = arith.cmpf oeq, %207, %230 : vector<48x128xf32>
    %cst_100 = arith.constant 2.000000e+00 : f32
    %232 = vector.broadcast %cst_100 : f32 to vector<48x128xf32>
    %233 = arith.cmpf oeq, %207, %232 : vector<48x128xf32>
    %cst_101 = arith.constant 3.000000e+00 : f32
    %234 = vector.broadcast %cst_101 : f32 to vector<48x128xf32>
    %235 = arith.cmpf oeq, %207, %234 : vector<48x128xf32>
    %cst_102 = arith.constant 0.000000e+00 : f32
    %236 = vector.broadcast %cst_102 : f32 to vector<48x128xf32>
    %237 = arith.select %235, %223, %236 : vector<48x128xi1>, vector<48x128xf32>
    %238 = arith.select %233, %219, %237 : vector<48x128xi1>, vector<48x128xf32>
    %239 = arith.select %231, %227, %238 : vector<48x128xi1>, vector<48x128xf32>
    %240 = arith.select %229, %214, %239 : vector<48x128xi1>, vector<48x128xf32>
    %241 = arith.truncf %240 : vector<48x128xf32> to vector<48x128xbf16>
    %c1_103 = arith.constant 1 : index
    %c48_104 = arith.constant 48 : index
    %c0_105 = arith.constant 0 : index
    %242 = vector.load %arg4[%c1_103, %c48_104, %c0_105] : memref<2x512x128xbf16, #tpu.memory_space<vmem>>, vector<1x48x128xbf16>
    %243 = vector.shape_cast %242 : vector<1x48x128xbf16> to vector<48x128xbf16>
    %244 = vector.shape_cast %241 : vector<48x128xbf16> to vector<1x48x128xbf16>
    tpu.vector_store %arg4[%c1_103, %c48_104, %c0_105], %244 {strides = array<i32>} : memref<2x512x128xbf16, #tpu.memory_space<vmem>>, vector<1x48x128xbf16>,
    %cst_106 = arith.constant 1.000000e+00 : f32
    %245 = vector.broadcast %cst_106 : f32 to vector<48x128xf32>
    %246 = arith.cmpf oeq, %207, %245 : vector<48x128xf32>
    %cst_107 = arith.constant 2.000000e+00 : f32
    %247 = vector.broadcast %cst_107 : f32 to vector<48x128xf32>
    %248 = arith.cmpf oeq, %207, %247 : vector<48x128xf32>
    %cst_108 = arith.constant 3.000000e+00 : f32
    %249 = vector.broadcast %cst_108 : f32 to vector<48x128xf32>
    %250 = arith.cmpf oeq, %207, %249 : vector<48x128xf32>
    %cst_109 = arith.constant 4.000000e+00 : f32
    %251 = vector.broadcast %cst_109 : f32 to vector<48x128xf32>
    %252 = arith.cmpf oeq, %207, %251 : vector<48x128xf32>
    %cst_110 = arith.constant 0.000000e+00 : f32
    %253 = vector.broadcast %cst_110 : f32 to vector<48x128xf32>
    %254 = arith.select %252, %223, %253 : vector<48x128xi1>, vector<48x128xf32>
    %255 = arith.select %250, %219, %254 : vector<48x128xi1>, vector<48x128xf32>
    %256 = arith.select %248, %227, %255 : vector<48x128xi1>, vector<48x128xf32>
    %257 = arith.select %246, %214, %256 : vector<48x128xi1>, vector<48x128xf32>
    %258 = arith.truncf %257 : vector<48x128xf32> to vector<48x128xbf16>
    %c1_111 = arith.constant 1 : index
    %c96_112 = arith.constant 96 : index
    %c0_113 = arith.constant 0 : index
    %259 = vector.load %arg4[%c1_111, %c96_112, %c0_113] : memref<2x512x128xbf16, #tpu.memory_space<vmem>>, vector<1x48x128xbf16>
    %260 = vector.shape_cast %259 : vector<1x48x128xbf16> to vector<48x128xbf16>
    %261 = vector.shape_cast %258 : vector<48x128xbf16> to vector<1x48x128xbf16>
    tpu.vector_store %arg4[%c1_111, %c96_112, %c0_113], %261 {strides = array<i32>} : memref<2x512x128xbf16, #tpu.memory_space<vmem>>, vector<1x48x128xbf16>,
    %cst_114 = arith.constant 2.000000e+00 : f32
    %262 = vector.broadcast %cst_114 : f32 to vector<48x128xf32>
    %263 = arith.cmpf oeq, %207, %262 : vector<48x128xf32>
    %cst_115 = arith.constant 3.000000e+00 : f32
    %264 = vector.broadcast %cst_115 : f32 to vector<48x128xf32>
    %265 = arith.cmpf oeq, %207, %264 : vector<48x128xf32>
    %cst_116 = arith.constant 4.000000e+00 : f32
    %266 = vector.broadcast %cst_116 : f32 to vector<48x128xf32>
    %267 = arith.cmpf oeq, %207, %266 : vector<48x128xf32>
    %cst_117 = arith.constant 5.000000e+00 : f32
    %268 = vector.broadcast %cst_117 : f32 to vector<48x128xf32>
    %269 = arith.cmpf oeq, %207, %268 : vector<48x128xf32>
    %cst_118 = arith.constant 0.000000e+00 : f32
    %270 = vector.broadcast %cst_118 : f32 to vector<48x128xf32>
    %271 = arith.select %269, %223, %270 : vector<48x128xi1>, vector<48x128xf32>
    %272 = arith.select %267, %219, %271 : vector<48x128xi1>, vector<48x128xf32>
    %273 = arith.select %265, %227, %272 : vector<48x128xi1>, vector<48x128xf32>
    %274 = arith.select %263, %214, %273 : vector<48x128xi1>, vector<48x128xf32>
    %275 = arith.truncf %274 : vector<48x128xf32> to vector<48x128xbf16>
    %c1_119 = arith.constant 1 : index
    %c144_120 = arith.constant 144 : index
    %c0_121 = arith.constant 0 : index
    %276 = vector.load %arg4[%c1_119, %c144_120, %c0_121] : memref<2x512x128xbf16, #tpu.memory_space<vmem>>, vector<1x48x128xbf16>
    %277 = vector.shape_cast %276 : vector<1x48x128xbf16> to vector<48x128xbf16>
    %278 = vector.shape_cast %275 : vector<48x128xbf16> to vector<1x48x128xbf16>
    tpu.vector_store %arg4[%c1_119, %c144_120, %c0_121], %278 {strides = array<i32>} : memref<2x512x128xbf16, #tpu.memory_space<vmem>>, vector<1x48x128xbf16>,
    %cst_122 = arith.constant 3.000000e+00 : f32
    %279 = vector.broadcast %cst_122 : f32 to vector<48x128xf32>
    %280 = arith.cmpf oeq, %207, %279 : vector<48x128xf32>
    %cst_123 = arith.constant 4.000000e+00 : f32
    %281 = vector.broadcast %cst_123 : f32 to vector<48x128xf32>
    %282 = arith.cmpf oeq, %207, %281 : vector<48x128xf32>
    %cst_124 = arith.constant 5.000000e+00 : f32
    %283 = vector.broadcast %cst_124 : f32 to vector<48x128xf32>
    %284 = arith.cmpf oeq, %207, %283 : vector<48x128xf32>
    %cst_125 = arith.constant 6.000000e+00 : f32
    %285 = vector.broadcast %cst_125 : f32 to vector<48x128xf32>
    %286 = arith.cmpf oeq, %207, %285 : vector<48x128xf32>
    %cst_126 = arith.constant 0.000000e+00 : f32
    %287 = vector.broadcast %cst_126 : f32 to vector<48x128xf32>
    %288 = arith.select %286, %223, %287 : vector<48x128xi1>, vector<48x128xf32>
    %289 = arith.select %284, %219, %288 : vector<48x128xi1>, vector<48x128xf32>
    %290 = arith.select %282, %227, %289 : vector<48x128xi1>, vector<48x128xf32>
    %291 = arith.select %280, %214, %290 : vector<48x128xi1>, vector<48x128xf32>
    %292 = arith.truncf %291 : vector<48x128xf32> to vector<48x128xbf16>
    %c1_127 = arith.constant 1 : index
    %c192_128 = arith.constant 192 : index
    %c0_129 = arith.constant 0 : index
    %293 = vector.load %arg4[%c1_127, %c192_128, %c0_129] : memref<2x512x128xbf16, #tpu.memory_space<vmem>>, vector<1x48x128xbf16>
    %294 = vector.shape_cast %293 : vector<1x48x128xbf16> to vector<48x128xbf16>
    %295 = vector.shape_cast %292 : vector<48x128xbf16> to vector<1x48x128xbf16>
    tpu.vector_store %arg4[%c1_127, %c192_128, %c0_129], %295 {strides = array<i32>} : memref<2x512x128xbf16, #tpu.memory_space<vmem>>, vector<1x48x128xbf16>,
    %cst_130 = arith.constant 4.000000e+00 : f32
    %296 = vector.broadcast %cst_130 : f32 to vector<48x128xf32>
    %297 = arith.cmpf oeq, %207, %296 : vector<48x128xf32>
    %cst_131 = arith.constant 5.000000e+00 : f32
    %298 = vector.broadcast %cst_131 : f32 to vector<48x128xf32>
    %299 = arith.cmpf oeq, %207, %298 : vector<48x128xf32>
    %cst_132 = arith.constant 6.000000e+00 : f32
    %300 = vector.broadcast %cst_132 : f32 to vector<48x128xf32>
    %301 = arith.cmpf oeq, %207, %300 : vector<48x128xf32>
    %cst_133 = arith.constant 7.000000e+00 : f32
    %302 = vector.broadcast %cst_133 : f32 to vector<48x128xf32>
    %303 = arith.cmpf oeq, %207, %302 : vector<48x128xf32>
    %cst_134 = arith.constant 0.000000e+00 : f32
    %304 = vector.broadcast %cst_134 : f32 to vector<48x128xf32>
    %305 = arith.select %303, %223, %304 : vector<48x128xi1>, vector<48x128xf32>
    %306 = arith.select %301, %219, %305 : vector<48x128xi1>, vector<48x128xf32>
    %307 = arith.select %299, %227, %306 : vector<48x128xi1>, vector<48x128xf32>
    %308 = arith.select %297, %214, %307 : vector<48x128xi1>, vector<48x128xf32>
    %309 = arith.truncf %308 : vector<48x128xf32> to vector<48x128xbf16>
    %c1_135 = arith.constant 1 : index
    %c240_136 = arith.constant 240 : index
    %c0_137 = arith.constant 0 : index
    %310 = vector.load %arg4[%c1_135, %c240_136, %c0_137] : memref<2x512x128xbf16, #tpu.memory_space<vmem>>, vector<1x48x128xbf16>
    %311 = vector.shape_cast %310 : vector<1x48x128xbf16> to vector<48x128xbf16>
    %312 = vector.shape_cast %309 : vector<48x128xbf16> to vector<1x48x128xbf16>
    tpu.vector_store %arg4[%c1_135, %c240_136, %c0_137], %312 {strides = array<i32>} : memref<2x512x128xbf16, #tpu.memory_space<vmem>>, vector<1x48x128xbf16>,
    %cst_138 = arith.constant 5.000000e+00 : f32
    %313 = vector.broadcast %cst_138 : f32 to vector<48x128xf32>
    %314 = arith.cmpf oeq, %207, %313 : vector<48x128xf32>
    %cst_139 = arith.constant 6.000000e+00 : f32
    %315 = vector.broadcast %cst_139 : f32 to vector<48x128xf32>
    %316 = arith.cmpf oeq, %207, %315 : vector<48x128xf32>
    %cst_140 = arith.constant 7.000000e+00 : f32
    %317 = vector.broadcast %cst_140 : f32 to vector<48x128xf32>
    %318 = arith.cmpf oeq, %207, %317 : vector<48x128xf32>
    %cst_141 = arith.constant 8.000000e+00 : f32
    %319 = vector.broadcast %cst_141 : f32 to vector<48x128xf32>
    %320 = arith.cmpf oeq, %207, %319 : vector<48x128xf32>
    %cst_142 = arith.constant 0.000000e+00 : f32
    %321 = vector.broadcast %cst_142 : f32 to vector<48x128xf32>
    %322 = arith.select %320, %223, %321 : vector<48x128xi1>, vector<48x128xf32>
    %323 = arith.select %318, %219, %322 : vector<48x128xi1>, vector<48x128xf32>
    %324 = arith.select %316, %227, %323 : vector<48x128xi1>, vector<48x128xf32>
    %325 = arith.select %314, %214, %324 : vector<48x128xi1>, vector<48x128xf32>
    %326 = arith.truncf %325 : vector<48x128xf32> to vector<48x128xbf16>
    %c1_143 = arith.constant 1 : index
    %c288_144 = arith.constant 288 : index
    %c0_145 = arith.constant 0 : index
    %327 = vector.load %arg4[%c1_143, %c288_144, %c0_145] : memref<2x512x128xbf16, #tpu.memory_space<vmem>>, vector<1x48x128xbf16>
    %328 = vector.shape_cast %327 : vector<1x48x128xbf16> to vector<48x128xbf16>
    %329 = vector.shape_cast %326 : vector<48x128xbf16> to vector<1x48x128xbf16>
    tpu.vector_store %arg4[%c1_143, %c288_144, %c0_145], %329 {strides = array<i32>} : memref<2x512x128xbf16, #tpu.memory_space<vmem>>, vector<1x48x128xbf16>,
    %cst_146 = arith.constant 6.000000e+00 : f32
    %330 = vector.broadcast %cst_146 : f32 to vector<48x128xf32>
    %331 = arith.cmpf oeq, %207, %330 : vector<48x128xf32>
    %cst_147 = arith.constant 7.000000e+00 : f32
    %332 = vector.broadcast %cst_147 : f32 to vector<48x128xf32>
    %333 = arith.cmpf oeq, %207, %332 : vector<48x128xf32>
    %cst_148 = arith.constant 8.000000e+00 : f32
    %334 = vector.broadcast %cst_148 : f32 to vector<48x128xf32>
    %335 = arith.cmpf oeq, %207, %334 : vector<48x128xf32>
    %cst_149 = arith.constant 9.000000e+00 : f32
    %336 = vector.broadcast %cst_149 : f32 to vector<48x128xf32>
    %337 = arith.cmpf oeq, %207, %336 : vector<48x128xf32>
    %cst_150 = arith.constant 0.000000e+00 : f32
    %338 = vector.broadcast %cst_150 : f32 to vector<48x128xf32>
    %339 = arith.select %337, %223, %338 : vector<48x128xi1>, vector<48x128xf32>
    %340 = arith.select %335, %219, %339 : vector<48x128xi1>, vector<48x128xf32>
    %341 = arith.select %333, %227, %340 : vector<48x128xi1>, vector<48x128xf32>
    %342 = arith.select %331, %214, %341 : vector<48x128xi1>, vector<48x128xf32>
    %343 = arith.truncf %342 : vector<48x128xf32> to vector<48x128xbf16>
    %c1_151 = arith.constant 1 : index
    %c336_152 = arith.constant 336 : index
    %c0_153 = arith.constant 0 : index
    %344 = vector.load %arg4[%c1_151, %c336_152, %c0_153] : memref<2x512x128xbf16, #tpu.memory_space<vmem>>, vector<1x48x128xbf16>
    %345 = vector.shape_cast %344 : vector<1x48x128xbf16> to vector<48x128xbf16>
    %346 = vector.shape_cast %343 : vector<48x128xbf16> to vector<1x48x128xbf16>
    tpu.vector_store %arg4[%c1_151, %c336_152, %c0_153], %346 {strides = array<i32>} : memref<2x512x128xbf16, #tpu.memory_space<vmem>>, vector<1x48x128xbf16>,
    %cst_154 = arith.constant 7.000000e+00 : f32
    %347 = vector.broadcast %cst_154 : f32 to vector<48x128xf32>
    %348 = arith.cmpf oeq, %207, %347 : vector<48x128xf32>
    %cst_155 = arith.constant 8.000000e+00 : f32
    %349 = vector.broadcast %cst_155 : f32 to vector<48x128xf32>
    %350 = arith.cmpf oeq, %207, %349 : vector<48x128xf32>
    %cst_156 = arith.constant 9.000000e+00 : f32
    %351 = vector.broadcast %cst_156 : f32 to vector<48x128xf32>
    %352 = arith.cmpf oeq, %207, %351 : vector<48x128xf32>
    %cst_157 = arith.constant 1.000000e+01 : f32
    %353 = vector.broadcast %cst_157 : f32 to vector<48x128xf32>
    %354 = arith.cmpf oeq, %207, %353 : vector<48x128xf32>
    %cst_158 = arith.constant 0.000000e+00 : f32
    %355 = vector.broadcast %cst_158 : f32 to vector<48x128xf32>
    %356 = arith.select %354, %223, %355 : vector<48x128xi1>, vector<48x128xf32>
    %357 = arith.select %352, %219, %356 : vector<48x128xi1>, vector<48x128xf32>
    %358 = arith.select %350, %227, %357 : vector<48x128xi1>, vector<48x128xf32>
    %359 = arith.select %348, %214, %358 : vector<48x128xi1>, vector<48x128xf32>
    %360 = arith.truncf %359 : vector<48x128xf32> to vector<48x128xbf16>
    %c1_159 = arith.constant 1 : index
    %c384_160 = arith.constant 384 : index
    %c0_161 = arith.constant 0 : index
    %361 = vector.load %arg4[%c1_159, %c384_160, %c0_161] : memref<2x512x128xbf16, #tpu.memory_space<vmem>>, vector<1x48x128xbf16>
    %362 = vector.shape_cast %361 : vector<1x48x128xbf16> to vector<48x128xbf16>
    %363 = vector.shape_cast %360 : vector<48x128xbf16> to vector<1x48x128xbf16>
    tpu.vector_store %arg4[%c1_159, %c384_160, %c0_161], %363 {strides = array<i32>} : memref<2x512x128xbf16, #tpu.memory_space<vmem>>, vector<1x48x128xbf16>,
    %c1_162 = arith.constant 1 : index
    %c0_163 = arith.constant 0 : index
    %c0_164 = arith.constant 0 : index
    %364 = vector.load %arg4[%c1_162, %c0_163, %c0_164] : memref<2x512x128xbf16, #tpu.memory_space<vmem>>, vector<1x512x128xbf16>
    %365 = vector.shape_cast %364 : vector<1x512x128xbf16> to vector<512x128xbf16>
    %cst_165 = arith.constant dense<0.000000e+00> : vector<16x128xf32>
    %366 = tpu.matmul %0, %365, %cst_165 {dimension_numbers = #tpu.dot_dimension_numbers<[1], [0], [0], [1], [0, 0, 1, 1], [], []>} : vector<16x512xbf16>, vector<512x128xbf16>, vector<16x128xf32> -> vector<16x128xf32>
    %367 = arith.maximumf %187, %366 : vector<16x128xf32>
    %c2 = arith.constant 2 : index
    %368 = arith.index_cast %c0_i32 : i32 to index
    %c0_166 = arith.constant 0 : index
    %c0_167 = arith.constant 0 : index
    %369 = vector.load %arg1[%c2, %368, %c0_166, %c0_167] : memref<4x1x48x128xbf16, #tpu.memory_space<vmem>>, vector<1x1x48x128xbf16>
    %370 = vector.shape_cast %369 : vector<1x1x48x128xbf16> to vector<48x128xbf16>
    %371 = arith.extf %370 : vector<48x128xbf16> to vector<48x128xf32>
    %cst_168 = arith.constant 0.000000e+00 : f32
    %372 = vector.broadcast %cst_168 : f32 to vector<48x128xf32>
    %373 = arith.subf %372, %371 : vector<48x128xf32>
    %374 = math.exp %373 : vector<48x128xf32>
    %cst_169 = arith.constant 1.000000e+00 : f32
    %375 = vector.broadcast %cst_169 : f32 to vector<48x128xf32>
    %376 = arith.addf %375, %374 : vector<48x128xf32>
    %377 = tpu.reciprocal %376 {approx = true} : vector<48x128xf32> -> vector<48x128xf32>
    %378 = arith.mulf %371, %377 : vector<48x128xf32>
    %379 = arith.truncf %378 : vector<48x128xf32> to vector<48x128xbf16>
    %c0_170 = arith.constant 0 : index
    %c0_171 = arith.constant 0 : index
    %c0_172 = arith.constant 0 : index
    %380 = vector.load %arg4[%c0_170, %c0_171, %c0_172] : memref<2x512x128xbf16, #tpu.memory_space<vmem>>, vector<1x48x128xbf16>
    %381 = vector.shape_cast %380 : vector<1x48x128xbf16> to vector<48x128xbf16>
    %382 = vector.shape_cast %379 : vector<48x128xbf16> to vector<1x48x128xbf16>
    tpu.vector_store %arg4[%c0_170, %c0_171, %c0_172], %382 {strides = array<i32>} : memref<2x512x128xbf16, #tpu.memory_space<vmem>>, vector<1x48x128xbf16>,
    %cst_173 = arith.constant -2.200000e+00 : f32
    %383 = vector.broadcast %cst_173 : f32 to vector<48x128xf32>
    %384 = arith.subf %371, %383 : vector<48x128xf32>
    %cst_174 = arith.constant 2.500000e+00 : f32
    %385 = vector.broadcast %cst_174 : f32 to vector<48x128xf32>
    %386 = arith.mulf %384, %385 : vector<48x128xf32>
    %387 = math.floor %386 : vector<48x128xf32>
    %388 = arith.subf %386, %387 : vector<48x128xf32>
    %389 = arith.mulf %388, %388 : vector<48x128xf32>
    %390 = arith.mulf %389, %388 : vector<48x128xf32>
    %cst_175 = arith.constant 1.000000e+00 : f32
    %391 = vector.broadcast %cst_175 : f32 to vector<48x128xf32>
    %392 = arith.subf %391, %388 : vector<48x128xf32>
    %cst_176 = arith.constant 0.166666672 : f32
    %393 = vector.broadcast %cst_176 : f32 to vector<48x128xf32>
    %394 = arith.mulf %390, %393 : vector<48x128xf32>
    %cst_177 = arith.constant 5.000000e-01 : f32
    %395 = vector.broadcast %cst_177 : f32 to vector<48x128xf32>
    %396 = arith.mulf %395, %390 : vector<48x128xf32>
    %397 = arith.subf %396, %389 : vector<48x128xf32>
    %cst_178 = arith.constant 0.666666686 : f32
    %398 = vector.broadcast %cst_178 : f32 to vector<48x128xf32>
    %399 = arith.addf %397, %398 : vector<48x128xf32>
    %400 = arith.mulf %392, %392 : vector<48x128xf32>
    %401 = arith.mulf %400, %392 : vector<48x128xf32>
    %cst_179 = arith.constant 0.166666672 : f32
    %402 = vector.broadcast %cst_179 : f32 to vector<48x128xf32>
    %403 = arith.mulf %401, %402 : vector<48x128xf32>
    %cst_180 = arith.constant 1.000000e+00 : f32
    %404 = vector.broadcast %cst_180 : f32 to vector<48x128xf32>
    %405 = arith.subf %404, %403 : vector<48x128xf32>
    %406 = arith.subf %405, %399 : vector<48x128xf32>
    %407 = arith.subf %406, %394 : vector<48x128xf32>
    %cst_181 = arith.constant 0.000000e+00 : f32
    %408 = vector.broadcast %cst_181 : f32 to vector<48x128xf32>
    %409 = arith.cmpf oeq, %387, %408 : vector<48x128xf32>
    %cst_182 = arith.constant 1.000000e+00 : f32
    %410 = vector.broadcast %cst_182 : f32 to vector<48x128xf32>
    %411 = arith.cmpf oeq, %387, %410 : vector<48x128xf32>
    %cst_183 = arith.constant 2.000000e+00 : f32
    %412 = vector.broadcast %cst_183 : f32 to vector<48x128xf32>
    %413 = arith.cmpf oeq, %387, %412 : vector<48x128xf32>
    %cst_184 = arith.constant 3.000000e+00 : f32
    %414 = vector.broadcast %cst_184 : f32 to vector<48x128xf32>
    %415 = arith.cmpf oeq, %387, %414 : vector<48x128xf32>
    %cst_185 = arith.constant 0.000000e+00 : f32
    %416 = vector.broadcast %cst_185 : f32 to vector<48x128xf32>
    %417 = arith.select %415, %403, %416 : vector<48x128xi1>, vector<48x128xf32>
    %418 = arith.select %413, %399, %417 : vector<48x128xi1>, vector<48x128xf32>
    %419 = arith.select %411, %407, %418 : vector<48x128xi1>, vector<48x128xf32>
    %420 = arith.select %409, %394, %419 : vector<48x128xi1>, vector<48x128xf32>
    %421 = arith.truncf %420 : vector<48x128xf32> to vector<48x128xbf16>
    %c0_186 = arith.constant 0 : index
    %c48_187 = arith.constant 48 : index
    %c0_188 = arith.constant 0 : index
    %422 = vector.load %arg4[%c0_186, %c48_187, %c0_188] : memref<2x512x128xbf16, #tpu.memory_space<vmem>>, vector<1x48x128xbf16>
    %423 = vector.shape_cast %422 : vector<1x48x128xbf16> to vector<48x128xbf16>
    %424 = vector.shape_cast %421 : vector<48x128xbf16> to vector<1x48x128xbf16>
    tpu.vector_store %arg4[%c0_186, %c48_187, %c0_188], %424 {strides = array<i32>} : memref<2x512x128xbf16, #tpu.memory_space<vmem>>, vector<1x48x128xbf16>,
    %cst_189 = arith.constant 1.000000e+00 : f32
    %425 = vector.broadcast %cst_189 : f32 to vector<48x128xf32>
    %426 = arith.cmpf oeq, %387, %425 : vector<48x128xf32>
    %cst_190 = arith.constant 2.000000e+00 : f32
    %427 = vector.broadcast %cst_190 : f32 to vector<48x128xf32>
    %428 = arith.cmpf oeq, %387, %427 : vector<48x128xf32>
    %cst_191 = arith.constant 3.000000e+00 : f32
    %429 = vector.broadcast %cst_191 : f32 to vector<48x128xf32>
    %430 = arith.cmpf oeq, %387, %429 : vector<48x128xf32>
    %cst_192 = arith.constant 4.000000e+00 : f32
    %431 = vector.broadcast %cst_192 : f32 to vector<48x128xf32>
    %432 = arith.cmpf oeq, %387, %431 : vector<48x128xf32>
    %cst_193 = arith.constant 0.000000e+00 : f32
    %433 = vector.broadcast %cst_193 : f32 to vector<48x128xf32>
    %434 = arith.select %432, %403, %433 : vector<48x128xi1>, vector<48x128xf32>
    %435 = arith.select %430, %399, %434 : vector<48x128xi1>, vector<48x128xf32>
    %436 = arith.select %428, %407, %435 : vector<48x128xi1>, vector<48x128xf32>
    %437 = arith.select %426, %394, %436 : vector<48x128xi1>, vector<48x128xf32>
    %438 = arith.truncf %437 : vector<48x128xf32> to vector<48x128xbf16>
    %c0_194 = arith.constant 0 : index
    %c96_195 = arith.constant 96 : index
    %c0_196 = arith.constant 0 : index
    %439 = vector.load %arg4[%c0_194, %c96_195, %c0_196] : memref<2x512x128xbf16, #tpu.memory_space<vmem>>, vector<1x48x128xbf16>
    %440 = vector.shape_cast %439 : vector<1x48x128xbf16> to vector<48x128xbf16>
    %441 = vector.shape_cast %438 : vector<48x128xbf16> to vector<1x48x128xbf16>
    tpu.vector_store %arg4[%c0_194, %c96_195, %c0_196], %441 {strides = array<i32>} : memref<2x512x128xbf16, #tpu.memory_space<vmem>>, vector<1x48x128xbf16>,
    %cst_197 = arith.constant 2.000000e+00 : f32
    %442 = vector.broadcast %cst_197 : f32 to vector<48x128xf32>
    %443 = arith.cmpf oeq, %387, %442 : vector<48x128xf32>
    %cst_198 = arith.constant 3.000000e+00 : f32
    %444 = vector.broadcast %cst_198 : f32 to vector<48x128xf32>
    %445 = arith.cmpf oeq, %387, %444 : vector<48x128xf32>
    %cst_199 = arith.constant 4.000000e+00 : f32
    %446 = vector.broadcast %cst_199 : f32 to vector<48x128xf32>
    %447 = arith.cmpf oeq, %387, %446 : vector<48x128xf32>
    %cst_200 = arith.constant 5.000000e+00 : f32
    %448 = vector.broadcast %cst_200 : f32 to vector<48x128xf32>
    %449 = arith.cmpf oeq, %387, %448 : vector<48x128xf32>
    %cst_201 = arith.constant 0.000000e+00 : f32
    %450 = vector.broadcast %cst_201 : f32 to vector<48x128xf32>
    %451 = arith.select %449, %403, %450 : vector<48x128xi1>, vector<48x128xf32>
    %452 = arith.select %447, %399, %451 : vector<48x128xi1>, vector<48x128xf32>
    %453 = arith.select %445, %407, %452 : vector<48x128xi1>, vector<48x128xf32>
    %454 = arith.select %443, %394, %453 : vector<48x128xi1>, vector<48x128xf32>
    %455 = arith.truncf %454 : vector<48x128xf32> to vector<48x128xbf16>
    %c0_202 = arith.constant 0 : index
    %c144_203 = arith.constant 144 : index
    %c0_204 = arith.constant 0 : index
    %456 = vector.load %arg4[%c0_202, %c144_203, %c0_204] : memref<2x512x128xbf16, #tpu.memory_space<vmem>>, vector<1x48x128xbf16>
    %457 = vector.shape_cast %456 : vector<1x48x128xbf16> to vector<48x128xbf16>
    %458 = vector.shape_cast %455 : vector<48x128xbf16> to vector<1x48x128xbf16>
    tpu.vector_store %arg4[%c0_202, %c144_203, %c0_204], %458 {strides = array<i32>} : memref<2x512x128xbf16, #tpu.memory_space<vmem>>, vector<1x48x128xbf16>,
    %cst_205 = arith.constant 3.000000e+00 : f32
    %459 = vector.broadcast %cst_205 : f32 to vector<48x128xf32>
    %460 = arith.cmpf oeq, %387, %459 : vector<48x128xf32>
    %cst_206 = arith.constant 4.000000e+00 : f32
    %461 = vector.broadcast %cst_206 : f32 to vector<48x128xf32>
    %462 = arith.cmpf oeq, %387, %461 : vector<48x128xf32>
    %cst_207 = arith.constant 5.000000e+00 : f32
    %463 = vector.broadcast %cst_207 : f32 to vector<48x128xf32>
    %464 = arith.cmpf oeq, %387, %463 : vector<48x128xf32>
    %cst_208 = arith.constant 6.000000e+00 : f32
    %465 = vector.broadcast %cst_208 : f32 to vector<48x128xf32>
    %466 = arith.cmpf oeq, %387, %465 : vector<48x128xf32>
    %cst_209 = arith.constant 0.000000e+00 : f32
    %467 = vector.broadcast %cst_209 : f32 to vector<48x128xf32>
    %468 = arith.select %466, %403, %467 : vector<48x128xi1>, vector<48x128xf32>
    %469 = arith.select %464, %399, %468 : vector<48x128xi1>, vector<48x128xf32>
    %470 = arith.select %462, %407, %469 : vector<48x128xi1>, vector<48x128xf32>
    %471 = arith.select %460, %394, %470 : vector<48x128xi1>, vector<48x128xf32>
    %472 = arith.truncf %471 : vector<48x128xf32> to vector<48x128xbf16>
    %c0_210 = arith.constant 0 : index
    %c192_211 = arith.constant 192 : index
    %c0_212 = arith.constant 0 : index
    %473 = vector.load %arg4[%c0_210, %c192_211, %c0_212] : memref<2x512x128xbf16, #tpu.memory_space<vmem>>, vector<1x48x128xbf16>
    %474 = vector.shape_cast %473 : vector<1x48x128xbf16> to vector<48x128xbf16>
    %475 = vector.shape_cast %472 : vector<48x128xbf16> to vector<1x48x128xbf16>
    tpu.vector_store %arg4[%c0_210, %c192_211, %c0_212], %475 {strides = array<i32>} : memref<2x512x128xbf16, #tpu.memory_space<vmem>>, vector<1x48x128xbf16>,
    %cst_213 = arith.constant 4.000000e+00 : f32
    %476 = vector.broadcast %cst_213 : f32 to vector<48x128xf32>
    %477 = arith.cmpf oeq, %387, %476 : vector<48x128xf32>
    %cst_214 = arith.constant 5.000000e+00 : f32
    %478 = vector.broadcast %cst_214 : f32 to vector<48x128xf32>
    %479 = arith.cmpf oeq, %387, %478 : vector<48x128xf32>
    %cst_215 = arith.constant 6.000000e+00 : f32
    %480 = vector.broadcast %cst_215 : f32 to vector<48x128xf32>
    %481 = arith.cmpf oeq, %387, %480 : vector<48x128xf32>
    %cst_216 = arith.constant 7.000000e+00 : f32
    %482 = vector.broadcast %cst_216 : f32 to vector<48x128xf32>
    %483 = arith.cmpf oeq, %387, %482 : vector<48x128xf32>
    %cst_217 = arith.constant 0.000000e+00 : f32
    %484 = vector.broadcast %cst_217 : f32 to vector<48x128xf32>
    %485 = arith.select %483, %403, %484 : vector<48x128xi1>, vector<48x128xf32>
    %486 = arith.select %481, %399, %485 : vector<48x128xi1>, vector<48x128xf32>
    %487 = arith.select %479, %407, %486 : vector<48x128xi1>, vector<48x128xf32>
    %488 = arith.select %477, %394, %487 : vector<48x128xi1>, vector<48x128xf32>
    %489 = arith.truncf %488 : vector<48x128xf32> to vector<48x128xbf16>
    %c0_218 = arith.constant 0 : index
    %c240_219 = arith.constant 240 : index
    %c0_220 = arith.constant 0 : index
    %490 = vector.load %arg4[%c0_218, %c240_219, %c0_220] : memref<2x512x128xbf16, #tpu.memory_space<vmem>>, vector<1x48x128xbf16>
    %491 = vector.shape_cast %490 : vector<1x48x128xbf16> to vector<48x128xbf16>
    %492 = vector.shape_cast %489 : vector<48x128xbf16> to vector<1x48x128xbf16>
    tpu.vector_store %arg4[%c0_218, %c240_219, %c0_220], %492 {strides = array<i32>} : memref<2x512x128xbf16, #tpu.memory_space<vmem>>, vector<1x48x128xbf16>,
    %cst_221 = arith.constant 5.000000e+00 : f32
    %493 = vector.broadcast %cst_221 : f32 to vector<48x128xf32>
    %494 = arith.cmpf oeq, %387, %493 : vector<48x128xf32>
    %cst_222 = arith.constant 6.000000e+00 : f32
    %495 = vector.broadcast %cst_222 : f32 to vector<48x128xf32>
    %496 = arith.cmpf oeq, %387, %495 : vector<48x128xf32>
    %cst_223 = arith.constant 7.000000e+00 : f32
    %497 = vector.broadcast %cst_223 : f32 to vector<48x128xf32>
    %498 = arith.cmpf oeq, %387, %497 : vector<48x128xf32>
    %cst_224 = arith.constant 8.000000e+00 : f32
    %499 = vector.broadcast %cst_224 : f32 to vector<48x128xf32>
    %500 = arith.cmpf oeq, %387, %499 : vector<48x128xf32>
    %cst_225 = arith.constant 0.000000e+00 : f32
    %501 = vector.broadcast %cst_225 : f32 to vector<48x128xf32>
    %502 = arith.select %500, %403, %501 : vector<48x128xi1>, vector<48x128xf32>
    %503 = arith.select %498, %399, %502 : vector<48x128xi1>, vector<48x128xf32>
    %504 = arith.select %496, %407, %503 : vector<48x128xi1>, vector<48x128xf32>
    %505 = arith.select %494, %394, %504 : vector<48x128xi1>, vector<48x128xf32>
    %506 = arith.truncf %505 : vector<48x128xf32> to vector<48x128xbf16>
    %c0_226 = arith.constant 0 : index
    %c288_227 = arith.constant 288 : index
    %c0_228 = arith.constant 0 : index
    %507 = vector.load %arg4[%c0_226, %c288_227, %c0_228] : memref<2x512x128xbf16, #tpu.memory_space<vmem>>, vector<1x48x128xbf16>
    %508 = vector.shape_cast %507 : vector<1x48x128xbf16> to vector<48x128xbf16>
    %509 = vector.shape_cast %506 : vector<48x128xbf16> to vector<1x48x128xbf16>
    tpu.vector_store %arg4[%c0_226, %c288_227, %c0_228], %509 {strides = array<i32>} : memref<2x512x128xbf16, #tpu.memory_space<vmem>>, vector<1x48x128xbf16>,
    %cst_229 = arith.constant 6.000000e+00 : f32
    %510 = vector.broadcast %cst_229 : f32 to vector<48x128xf32>
    %511 = arith.cmpf oeq, %387, %510 : vector<48x128xf32>
    %cst_230 = arith.constant 7.000000e+00 : f32
    %512 = vector.broadcast %cst_230 : f32 to vector<48x128xf32>
    %513 = arith.cmpf oeq, %387, %512 : vector<48x128xf32>
    %cst_231 = arith.constant 8.000000e+00 : f32
    %514 = vector.broadcast %cst_231 : f32 to vector<48x128xf32>
    %515 = arith.cmpf oeq, %387, %514 : vector<48x128xf32>
    %cst_232 = arith.constant 9.000000e+00 : f32
    %516 = vector.broadcast %cst_232 : f32 to vector<48x128xf32>
    %517 = arith.cmpf oeq, %387, %516 : vector<48x128xf32>
    %cst_233 = arith.constant 0.000000e+00 : f32
    %518 = vector.broadcast %cst_233 : f32 to vector<48x128xf32>
    %519 = arith.select %517, %403, %518 : vector<48x128xi1>, vector<48x128xf32>
    %520 = arith.select %515, %399, %519 : vector<48x128xi1>, vector<48x128xf32>
    %521 = arith.select %513, %407, %520 : vector<48x128xi1>, vector<48x128xf32>
    %522 = arith.select %511, %394, %521 : vector<48x128xi1>, vector<48x128xf32>
    %523 = arith.truncf %522 : vector<48x128xf32> to vector<48x128xbf16>
    %c0_234 = arith.constant 0 : index
    %c336_235 = arith.constant 336 : index
    %c0_236 = arith.constant 0 : index
    %524 = vector.load %arg4[%c0_234, %c336_235, %c0_236] : memref<2x512x128xbf16, #tpu.memory_space<vmem>>, vector<1x48x128xbf16>
    %525 = vector.shape_cast %524 : vector<1x48x128xbf16> to vector<48x128xbf16>
    %526 = vector.shape_cast %523 : vector<48x128xbf16> to vector<1x48x128xbf16>
    tpu.vector_store %arg4[%c0_234, %c336_235, %c0_236], %526 {strides = array<i32>} : memref<2x512x128xbf16, #tpu.memory_space<vmem>>, vector<1x48x128xbf16>,
    %cst_237 = arith.constant 7.000000e+00 : f32
    %527 = vector.broadcast %cst_237 : f32 to vector<48x128xf32>
    %528 = arith.cmpf oeq, %387, %527 : vector<48x128xf32>
    %cst_238 = arith.constant 8.000000e+00 : f32
    %529 = vector.broadcast %cst_238 : f32 to vector<48x128xf32>
    %530 = arith.cmpf oeq, %387, %529 : vector<48x128xf32>
    %cst_239 = arith.constant 9.000000e+00 : f32
    %531 = vector.broadcast %cst_239 : f32 to vector<48x128xf32>
    %532 = arith.cmpf oeq, %387, %531 : vector<48x128xf32>
    %cst_240 = arith.constant 1.000000e+01 : f32
    %533 = vector.broadcast %cst_240 : f32 to vector<48x128xf32>
    %534 = arith.cmpf oeq, %387, %533 : vector<48x128xf32>
    %cst_241 = arith.constant 0.000000e+00 : f32
    %535 = vector.broadcast %cst_241 : f32 to vector<48x128xf32>
    %536 = arith.select %534, %403, %535 : vector<48x128xi1>, vector<48x128xf32>
    %537 = arith.select %532, %399, %536 : vector<48x128xi1>, vector<48x128xf32>
    %538 = arith.select %530, %407, %537 : vector<48x128xi1>, vector<48x128xf32>
    %539 = arith.select %528, %394, %538 : vector<48x128xi1>, vector<48x128xf32>
    %540 = arith.truncf %539 : vector<48x128xf32> to vector<48x128xbf16>
    %c0_242 = arith.constant 0 : index
    %c384_243 = arith.constant 384 : index
    %c0_244 = arith.constant 0 : index
    %541 = vector.load %arg4[%c0_242, %c384_243, %c0_244] : memref<2x512x128xbf16, #tpu.memory_space<vmem>>, vector<1x48x128xbf16>
    %542 = vector.shape_cast %541 : vector<1x48x128xbf16> to vector<48x128xbf16>
    %543 = vector.shape_cast %540 : vector<48x128xbf16> to vector<1x48x128xbf16>
    tpu.vector_store %arg4[%c0_242, %c384_243, %c0_244], %543 {strides = array<i32>} : memref<2x512x128xbf16, #tpu.memory_space<vmem>>, vector<1x48x128xbf16>,
    %c0_245 = arith.constant 0 : index
    %c0_246 = arith.constant 0 : index
    %c0_247 = arith.constant 0 : index
    %544 = vector.load %arg4[%c0_245, %c0_246, %c0_247] : memref<2x512x128xbf16, #tpu.memory_space<vmem>>, vector<1x512x128xbf16>
    %545 = vector.shape_cast %544 : vector<1x512x128xbf16> to vector<512x128xbf16>
    %cst_248 = arith.constant dense<0.000000e+00> : vector<16x128xf32>
    %546 = tpu.matmul %0, %545, %cst_248 {dimension_numbers = #tpu.dot_dimension_numbers<[1], [0], [0], [1], [0, 0, 1, 1], [], []>} : vector<16x512xbf16>, vector<512x128xbf16>, vector<16x128xf32> -> vector<16x128xf32>
    %547 = arith.maximumf %367, %546 : vector<16x128xf32>
    %c3 = arith.constant 3 : index
    %548 = arith.index_cast %c0_i32 : i32 to index
    %c0_249 = arith.constant 0 : index
    %c0_250 = arith.constant 0 : index
    %549 = vector.load %arg1[%c3, %548, %c0_249, %c0_250] : memref<4x1x48x128xbf16, #tpu.memory_space<vmem>>, vector<1x1x48x128xbf16>
    %550 = vector.shape_cast %549 : vector<1x1x48x128xbf16> to vector<48x128xbf16>
    %551 = arith.extf %550 : vector<48x128xbf16> to vector<48x128xf32>
    %cst_251 = arith.constant 0.000000e+00 : f32
    %552 = vector.broadcast %cst_251 : f32 to vector<48x128xf32>
    %553 = arith.subf %552, %551 : vector<48x128xf32>
    %554 = math.exp %553 : vector<48x128xf32>
    %cst_252 = arith.constant 1.000000e+00 : f32
    %555 = vector.broadcast %cst_252 : f32 to vector<48x128xf32>
    %556 = arith.addf %555, %554 : vector<48x128xf32>
    %557 = tpu.reciprocal %556 {approx = true} : vector<48x128xf32> -> vector<48x128xf32>
    %558 = arith.mulf %551, %557 : vector<48x128xf32>
    %559 = arith.truncf %558 : vector<48x128xf32> to vector<48x128xbf16>
    %c1_253 = arith.constant 1 : index
    %c0_254 = arith.constant 0 : index
    %c0_255 = arith.constant 0 : index
    %560 = vector.load %arg4[%c1_253, %c0_254, %c0_255] : memref<2x512x128xbf16, #tpu.memory_space<vmem>>, vector<1x48x128xbf16>
    %561 = vector.shape_cast %560 : vector<1x48x128xbf16> to vector<48x128xbf16>
    %562 = vector.shape_cast %559 : vector<48x128xbf16> to vector<1x48x128xbf16>
    tpu.vector_store %arg4[%c1_253, %c0_254, %c0_255], %562 {strides = array<i32>} : memref<2x512x128xbf16, #tpu.memory_space<vmem>>, vector<1x48x128xbf16>,
    %cst_256 = arith.constant -2.200000e+00 : f32
    %563 = vector.broadcast %cst_256 : f32 to vector<48x128xf32>
    %564 = arith.subf %551, %563 : vector<48x128xf32>
    %cst_257 = arith.constant 2.500000e+00 : f32
    %565 = vector.broadcast %cst_257 : f32 to vector<48x128xf32>
    %566 = arith.mulf %564, %565 : vector<48x128xf32>
    %567 = math.floor %566 : vector<48x128xf32>
    %568 = arith.subf %566, %567 : vector<48x128xf32>
    %569 = arith.mulf %568, %568 : vector<48x128xf32>
    %570 = arith.mulf %569, %568 : vector<48x128xf32>
    %cst_258 = arith.constant 1.000000e+00 : f32
    %571 = vector.broadcast %cst_258 : f32 to vector<48x128xf32>
    %572 = arith.subf %571, %568 : vector<48x128xf32>
    %cst_259 = arith.constant 0.166666672 : f32
    %573 = vector.broadcast %cst_259 : f32 to vector<48x128xf32>
    %574 = arith.mulf %570, %573 : vector<48x128xf32>
    %cst_260 = arith.constant 5.000000e-01 : f32
    %575 = vector.broadcast %cst_260 : f32 to vector<48x128xf32>
    %576 = arith.mulf %575, %570 : vector<48x128xf32>
    %577 = arith.subf %576, %569 : vector<48x128xf32>
    %cst_261 = arith.constant 0.666666686 : f32
    %578 = vector.broadcast %cst_261 : f32 to vector<48x128xf32>
    %579 = arith.addf %577, %578 : vector<48x128xf32>
    %580 = arith.mulf %572, %572 : vector<48x128xf32>
    %581 = arith.mulf %580, %572 : vector<48x128xf32>
    %cst_262 = arith.constant 0.166666672 : f32
    %582 = vector.broadcast %cst_262 : f32 to vector<48x128xf32>
    %583 = arith.mulf %581, %582 : vector<48x128xf32>
    %cst_263 = arith.constant 1.000000e+00 : f32
    %584 = vector.broadcast %cst_263 : f32 to vector<48x128xf32>
    %585 = arith.subf %584, %583 : vector<48x128xf32>
    %586 = arith.subf %585, %579 : vector<48x128xf32>
    %587 = arith.subf %586, %574 : vector<48x128xf32>
    %cst_264 = arith.constant 0.000000e+00 : f32
    %588 = vector.broadcast %cst_264 : f32 to vector<48x128xf32>
    %589 = arith.cmpf oeq, %567, %588 : vector<48x128xf32>
    %cst_265 = arith.constant 1.000000e+00 : f32
    %590 = vector.broadcast %cst_265 : f32 to vector<48x128xf32>
    %591 = arith.cmpf oeq, %567, %590 : vector<48x128xf32>
    %cst_266 = arith.constant 2.000000e+00 : f32
    %592 = vector.broadcast %cst_266 : f32 to vector<48x128xf32>
    %593 = arith.cmpf oeq, %567, %592 : vector<48x128xf32>
    %cst_267 = arith.constant 3.000000e+00 : f32
    %594 = vector.broadcast %cst_267 : f32 to vector<48x128xf32>
    %595 = arith.cmpf oeq, %567, %594 : vector<48x128xf32>
    %cst_268 = arith.constant 0.000000e+00 : f32
    %596 = vector.broadcast %cst_268 : f32 to vector<48x128xf32>
    %597 = arith.select %595, %583, %596 : vector<48x128xi1>, vector<48x128xf32>
    %598 = arith.select %593, %579, %597 : vector<48x128xi1>, vector<48x128xf32>
    %599 = arith.select %591, %587, %598 : vector<48x128xi1>, vector<48x128xf32>
    %600 = arith.select %589, %574, %599 : vector<48x128xi1>, vector<48x128xf32>
    %601 = arith.truncf %600 : vector<48x128xf32> to vector<48x128xbf16>
    %c1_269 = arith.constant 1 : index
    %c48_270 = arith.constant 48 : index
    %c0_271 = arith.constant 0 : index
    %602 = vector.load %arg4[%c1_269, %c48_270, %c0_271] : memref<2x512x128xbf16, #tpu.memory_space<vmem>>, vector<1x48x128xbf16>
    %603 = vector.shape_cast %602 : vector<1x48x128xbf16> to vector<48x128xbf16>
    %604 = vector.shape_cast %601 : vector<48x128xbf16> to vector<1x48x128xbf16>
    tpu.vector_store %arg4[%c1_269, %c48_270, %c0_271], %604 {strides = array<i32>} : memref<2x512x128xbf16, #tpu.memory_space<vmem>>, vector<1x48x128xbf16>,
    %cst_272 = arith.constant 1.000000e+00 : f32
    %605 = vector.broadcast %cst_272 : f32 to vector<48x128xf32>
    %606 = arith.cmpf oeq, %567, %605 : vector<48x128xf32>
    %cst_273 = arith.constant 2.000000e+00 : f32
    %607 = vector.broadcast %cst_273 : f32 to vector<48x128xf32>
    %608 = arith.cmpf oeq, %567, %607 : vector<48x128xf32>
    %cst_274 = arith.constant 3.000000e+00 : f32
    %609 = vector.broadcast %cst_274 : f32 to vector<48x128xf32>
    %610 = arith.cmpf oeq, %567, %609 : vector<48x128xf32>
    %cst_275 = arith.constant 4.000000e+00 : f32
    %611 = vector.broadcast %cst_275 : f32 to vector<48x128xf32>
    %612 = arith.cmpf oeq, %567, %611 : vector<48x128xf32>
    %cst_276 = arith.constant 0.000000e+00 : f32
    %613 = vector.broadcast %cst_276 : f32 to vector<48x128xf32>
    %614 = arith.select %612, %583, %613 : vector<48x128xi1>, vector<48x128xf32>
    %615 = arith.select %610, %579, %614 : vector<48x128xi1>, vector<48x128xf32>
    %616 = arith.select %608, %587, %615 : vector<48x128xi1>, vector<48x128xf32>
    %617 = arith.select %606, %574, %616 : vector<48x128xi1>, vector<48x128xf32>
    %618 = arith.truncf %617 : vector<48x128xf32> to vector<48x128xbf16>
    %c1_277 = arith.constant 1 : index
    %c96_278 = arith.constant 96 : index
    %c0_279 = arith.constant 0 : index
    %619 = vector.load %arg4[%c1_277, %c96_278, %c0_279] : memref<2x512x128xbf16, #tpu.memory_space<vmem>>, vector<1x48x128xbf16>
    %620 = vector.shape_cast %619 : vector<1x48x128xbf16> to vector<48x128xbf16>
    %621 = vector.shape_cast %618 : vector<48x128xbf16> to vector<1x48x128xbf16>
    tpu.vector_store %arg4[%c1_277, %c96_278, %c0_279], %621 {strides = array<i32>} : memref<2x512x128xbf16, #tpu.memory_space<vmem>>, vector<1x48x128xbf16>,
    %cst_280 = arith.constant 2.000000e+00 : f32
    %622 = vector.broadcast %cst_280 : f32 to vector<48x128xf32>
    %623 = arith.cmpf oeq, %567, %622 : vector<48x128xf32>
    %cst_281 = arith.constant 3.000000e+00 : f32
    %624 = vector.broadcast %cst_281 : f32 to vector<48x128xf32>
    %625 = arith.cmpf oeq, %567, %624 : vector<48x128xf32>
    %cst_282 = arith.constant 4.000000e+00 : f32
    %626 = vector.broadcast %cst_282 : f32 to vector<48x128xf32>
    %627 = arith.cmpf oeq, %567, %626 : vector<48x128xf32>
    %cst_283 = arith.constant 5.000000e+00 : f32
    %628 = vector.broadcast %cst_283 : f32 to vector<48x128xf32>
    %629 = arith.cmpf oeq, %567, %628 : vector<48x128xf32>
    %cst_284 = arith.constant 0.000000e+00 : f32
    %630 = vector.broadcast %cst_284 : f32 to vector<48x128xf32>
    %631 = arith.select %629, %583, %630 : vector<48x128xi1>, vector<48x128xf32>
    %632 = arith.select %627, %579, %631 : vector<48x128xi1>, vector<48x128xf32>
    %633 = arith.select %625, %587, %632 : vector<48x128xi1>, vector<48x128xf32>
    %634 = arith.select %623, %574, %633 : vector<48x128xi1>, vector<48x128xf32>
    %635 = arith.truncf %634 : vector<48x128xf32> to vector<48x128xbf16>
    %c1_285 = arith.constant 1 : index
    %c144_286 = arith.constant 144 : index
    %c0_287 = arith.constant 0 : index
    %636 = vector.load %arg4[%c1_285, %c144_286, %c0_287] : memref<2x512x128xbf16, #tpu.memory_space<vmem>>, vector<1x48x128xbf16>
    %637 = vector.shape_cast %636 : vector<1x48x128xbf16> to vector<48x128xbf16>
    %638 = vector.shape_cast %635 : vector<48x128xbf16> to vector<1x48x128xbf16>
    tpu.vector_store %arg4[%c1_285, %c144_286, %c0_287], %638 {strides = array<i32>} : memref<2x512x128xbf16, #tpu.memory_space<vmem>>, vector<1x48x128xbf16>,
    %cst_288 = arith.constant 3.000000e+00 : f32
    %639 = vector.broadcast %cst_288 : f32 to vector<48x128xf32>
    %640 = arith.cmpf oeq, %567, %639 : vector<48x128xf32>
    %cst_289 = arith.constant 4.000000e+00 : f32
    %641 = vector.broadcast %cst_289 : f32 to vector<48x128xf32>
    %642 = arith.cmpf oeq, %567, %641 : vector<48x128xf32>
    %cst_290 = arith.constant 5.000000e+00 : f32
    %643 = vector.broadcast %cst_290 : f32 to vector<48x128xf32>
    %644 = arith.cmpf oeq, %567, %643 : vector<48x128xf32>
    %cst_291 = arith.constant 6.000000e+00 : f32
    %645 = vector.broadcast %cst_291 : f32 to vector<48x128xf32>
    %646 = arith.cmpf oeq, %567, %645 : vector<48x128xf32>
    %cst_292 = arith.constant 0.000000e+00 : f32
    %647 = vector.broadcast %cst_292 : f32 to vector<48x128xf32>
    %648 = arith.select %646, %583, %647 : vector<48x128xi1>, vector<48x128xf32>
    %649 = arith.select %644, %579, %648 : vector<48x128xi1>, vector<48x128xf32>
    %650 = arith.select %642, %587, %649 : vector<48x128xi1>, vector<48x128xf32>
    %651 = arith.select %640, %574, %650 : vector<48x128xi1>, vector<48x128xf32>
    %652 = arith.truncf %651 : vector<48x128xf32> to vector<48x128xbf16>
    %c1_293 = arith.constant 1 : index
    %c192_294 = arith.constant 192 : index
    %c0_295 = arith.constant 0 : index
    %653 = vector.load %arg4[%c1_293, %c192_294, %c0_295] : memref<2x512x128xbf16, #tpu.memory_space<vmem>>, vector<1x48x128xbf16>
    %654 = vector.shape_cast %653 : vector<1x48x128xbf16> to vector<48x128xbf16>
    %655 = vector.shape_cast %652 : vector<48x128xbf16> to vector<1x48x128xbf16>
    tpu.vector_store %arg4[%c1_293, %c192_294, %c0_295], %655 {strides = array<i32>} : memref<2x512x128xbf16, #tpu.memory_space<vmem>>, vector<1x48x128xbf16>,
    %cst_296 = arith.constant 4.000000e+00 : f32
    %656 = vector.broadcast %cst_296 : f32 to vector<48x128xf32>
    %657 = arith.cmpf oeq, %567, %656 : vector<48x128xf32>
    %cst_297 = arith.constant 5.000000e+00 : f32
    %658 = vector.broadcast %cst_297 : f32 to vector<48x128xf32>
    %659 = arith.cmpf oeq, %567, %658 : vector<48x128xf32>
    %cst_298 = arith.constant 6.000000e+00 : f32
    %660 = vector.broadcast %cst_298 : f32 to vector<48x128xf32>
    %661 = arith.cmpf oeq, %567, %660 : vector<48x128xf32>
    %cst_299 = arith.constant 7.000000e+00 : f32
    %662 = vector.broadcast %cst_299 : f32 to vector<48x128xf32>
    %663 = arith.cmpf oeq, %567, %662 : vector<48x128xf32>
    %cst_300 = arith.constant 0.000000e+00 : f32
    %664 = vector.broadcast %cst_300 : f32 to vector<48x128xf32>
    %665 = arith.select %663, %583, %664 : vector<48x128xi1>, vector<48x128xf32>
    %666 = arith.select %661, %579, %665 : vector<48x128xi1>, vector<48x128xf32>
    %667 = arith.select %659, %587, %666 : vector<48x128xi1>, vector<48x128xf32>
    %668 = arith.select %657, %574, %667 : vector<48x128xi1>, vector<48x128xf32>
    %669 = arith.truncf %668 : vector<48x128xf32> to vector<48x128xbf16>
    %c1_301 = arith.constant 1 : index
    %c240_302 = arith.constant 240 : index
    %c0_303 = arith.constant 0 : index
    %670 = vector.load %arg4[%c1_301, %c240_302, %c0_303] : memref<2x512x128xbf16, #tpu.memory_space<vmem>>, vector<1x48x128xbf16>
    %671 = vector.shape_cast %670 : vector<1x48x128xbf16> to vector<48x128xbf16>
    %672 = vector.shape_cast %669 : vector<48x128xbf16> to vector<1x48x128xbf16>
    tpu.vector_store %arg4[%c1_301, %c240_302, %c0_303], %672 {strides = array<i32>} : memref<2x512x128xbf16, #tpu.memory_space<vmem>>, vector<1x48x128xbf16>,
    %cst_304 = arith.constant 5.000000e+00 : f32
    %673 = vector.broadcast %cst_304 : f32 to vector<48x128xf32>
    %674 = arith.cmpf oeq, %567, %673 : vector<48x128xf32>
    %cst_305 = arith.constant 6.000000e+00 : f32
    %675 = vector.broadcast %cst_305 : f32 to vector<48x128xf32>
    %676 = arith.cmpf oeq, %567, %675 : vector<48x128xf32>
    %cst_306 = arith.constant 7.000000e+00 : f32
    %677 = vector.broadcast %cst_306 : f32 to vector<48x128xf32>
    %678 = arith.cmpf oeq, %567, %677 : vector<48x128xf32>
    %cst_307 = arith.constant 8.000000e+00 : f32
    %679 = vector.broadcast %cst_307 : f32 to vector<48x128xf32>
    %680 = arith.cmpf oeq, %567, %679 : vector<48x128xf32>
    %cst_308 = arith.constant 0.000000e+00 : f32
    %681 = vector.broadcast %cst_308 : f32 to vector<48x128xf32>
    %682 = arith.select %680, %583, %681 : vector<48x128xi1>, vector<48x128xf32>
    %683 = arith.select %678, %579, %682 : vector<48x128xi1>, vector<48x128xf32>
    %684 = arith.select %676, %587, %683 : vector<48x128xi1>, vector<48x128xf32>
    %685 = arith.select %674, %574, %684 : vector<48x128xi1>, vector<48x128xf32>
    %686 = arith.truncf %685 : vector<48x128xf32> to vector<48x128xbf16>
    %c1_309 = arith.constant 1 : index
    %c288_310 = arith.constant 288 : index
    %c0_311 = arith.constant 0 : index
    %687 = vector.load %arg4[%c1_309, %c288_310, %c0_311] : memref<2x512x128xbf16, #tpu.memory_space<vmem>>, vector<1x48x128xbf16>
    %688 = vector.shape_cast %687 : vector<1x48x128xbf16> to vector<48x128xbf16>
    %689 = vector.shape_cast %686 : vector<48x128xbf16> to vector<1x48x128xbf16>
    tpu.vector_store %arg4[%c1_309, %c288_310, %c0_311], %689 {strides = array<i32>} : memref<2x512x128xbf16, #tpu.memory_space<vmem>>, vector<1x48x128xbf16>,
    %cst_312 = arith.constant 6.000000e+00 : f32
    %690 = vector.broadcast %cst_312 : f32 to vector<48x128xf32>
    %691 = arith.cmpf oeq, %567, %690 : vector<48x128xf32>
    %cst_313 = arith.constant 7.000000e+00 : f32
    %692 = vector.broadcast %cst_313 : f32 to vector<48x128xf32>
    %693 = arith.cmpf oeq, %567, %692 : vector<48x128xf32>
    %cst_314 = arith.constant 8.000000e+00 : f32
    %694 = vector.broadcast %cst_314 : f32 to vector<48x128xf32>
    %695 = arith.cmpf oeq, %567, %694 : vector<48x128xf32>
    %cst_315 = arith.constant 9.000000e+00 : f32
    %696 = vector.broadcast %cst_315 : f32 to vector<48x128xf32>
    %697 = arith.cmpf oeq, %567, %696 : vector<48x128xf32>
    %cst_316 = arith.constant 0.000000e+00 : f32
    %698 = vector.broadcast %cst_316 : f32 to vector<48x128xf32>
    %699 = arith.select %697, %583, %698 : vector<48x128xi1>, vector<48x128xf32>
    %700 = arith.select %695, %579, %699 : vector<48x128xi1>, vector<48x128xf32>
    %701 = arith.select %693, %587, %700 : vector<48x128xi1>, vector<48x128xf32>
    %702 = arith.select %691, %574, %701 : vector<48x128xi1>, vector<48x128xf32>
    %703 = arith.truncf %702 : vector<48x128xf32> to vector<48x128xbf16>
    %c1_317 = arith.constant 1 : index
    %c336_318 = arith.constant 336 : index
    %c0_319 = arith.constant 0 : index
    %704 = vector.load %arg4[%c1_317, %c336_318, %c0_319] : memref<2x512x128xbf16, #tpu.memory_space<vmem>>, vector<1x48x128xbf16>
    %705 = vector.shape_cast %704 : vector<1x48x128xbf16> to vector<48x128xbf16>
    %706 = vector.shape_cast %703 : vector<48x128xbf16> to vector<1x48x128xbf16>
    tpu.vector_store %arg4[%c1_317, %c336_318, %c0_319], %706 {strides = array<i32>} : memref<2x512x128xbf16, #tpu.memory_space<vmem>>, vector<1x48x128xbf16>,
    %cst_320 = arith.constant 7.000000e+00 : f32
    %707 = vector.broadcast %cst_320 : f32 to vector<48x128xf32>
    %708 = arith.cmpf oeq, %567, %707 : vector<48x128xf32>
    %cst_321 = arith.constant 8.000000e+00 : f32
    %709 = vector.broadcast %cst_321 : f32 to vector<48x128xf32>
    %710 = arith.cmpf oeq, %567, %709 : vector<48x128xf32>
    %cst_322 = arith.constant 9.000000e+00 : f32
    %711 = vector.broadcast %cst_322 : f32 to vector<48x128xf32>
    %712 = arith.cmpf oeq, %567, %711 : vector<48x128xf32>
    %cst_323 = arith.constant 1.000000e+01 : f32
    %713 = vector.broadcast %cst_323 : f32 to vector<48x128xf32>
    %714 = arith.cmpf oeq, %567, %713 : vector<48x128xf32>
    %cst_324 = arith.constant 0.000000e+00 : f32
    %715 = vector.broadcast %cst_324 : f32 to vector<48x128xf32>
    %716 = arith.select %714, %583, %715 : vector<48x128xi1>, vector<48x128xf32>
    %717 = arith.select %712, %579, %716 : vector<48x128xi1>, vector<48x128xf32>
    %718 = arith.select %710, %587, %717 : vector<48x128xi1>, vector<48x128xf32>
    %719 = arith.select %708, %574, %718 : vector<48x128xi1>, vector<48x128xf32>
    %720 = arith.truncf %719 : vector<48x128xf32> to vector<48x128xbf16>
    %c1_325 = arith.constant 1 : index
    %c384_326 = arith.constant 384 : index
    %c0_327 = arith.constant 0 : index
    %721 = vector.load %arg4[%c1_325, %c384_326, %c0_327] : memref<2x512x128xbf16, #tpu.memory_space<vmem>>, vector<1x48x128xbf16>
    %722 = vector.shape_cast %721 : vector<1x48x128xbf16> to vector<48x128xbf16>
    %723 = vector.shape_cast %720 : vector<48x128xbf16> to vector<1x48x128xbf16>
    tpu.vector_store %arg4[%c1_325, %c384_326, %c0_327], %723 {strides = array<i32>} : memref<2x512x128xbf16, #tpu.memory_space<vmem>>, vector<1x48x128xbf16>,
    %c1_328 = arith.constant 1 : index
    %c0_329 = arith.constant 0 : index
    %c0_330 = arith.constant 0 : index
    %724 = vector.load %arg4[%c1_328, %c0_329, %c0_330] : memref<2x512x128xbf16, #tpu.memory_space<vmem>>, vector<1x512x128xbf16>
    %725 = vector.shape_cast %724 : vector<1x512x128xbf16> to vector<512x128xbf16>
    %cst_331 = arith.constant dense<0.000000e+00> : vector<16x128xf32>
    %726 = tpu.matmul %0, %725, %cst_331 {dimension_numbers = #tpu.dot_dimension_numbers<[1], [0], [0], [1], [0, 0, 1, 1], [], []>} : vector<16x512xbf16>, vector<512x128xbf16>, vector<16x128xf32> -> vector<16x128xf32>
    %727 = arith.maximumf %547, %726 : vector<16x128xf32>
    %728 = arith.truncf %727 : vector<16x128xf32> to vector<16x128xbf16>
    %729 = arith.index_cast %c0_i32 : i32 to index
    %c0_332 = arith.constant 0 : index
    %c0_333 = arith.constant 0 : index
    %730 = vector.load %arg3[%729, %c0_332, %c0_333] : memref<1x16x128xbf16, #tpu.memory_space<vmem>>, vector<1x16x128xbf16>
    %731 = vector.shape_cast %730 : vector<1x16x128xbf16> to vector<16x128xbf16>
    %732 = vector.shape_cast %728 : vector<16x128xbf16> to vector<1x16x128xbf16>
    tpu.vector_store %arg3[%729, %c0_332, %c0_333], %732 {strides = array<i32>} : memref<1x16x128xbf16, #tpu.memory_space<vmem>>, vector<1x16x128xbf16>,
    %c1_i32 = arith.constant 1 : i32
    return
  }
  func.func @transform_0(%arg0: i32) -> (i32, i32, i32, i32) {
    %c0_i32 = arith.constant 0 : i32
    %c0_i32_0 = arith.constant 0 : i32
    %c0_i32_1 = arith.constant 0 : i32
    %c0_i32_2 = arith.constant 0 : i32
    return %c0_i32, %arg0, %c0_i32_0, %c0_i32_1 : i32, i32, i32, i32
  }
  func.func @transform_1(%arg0: i32) -> (i32, i32) {
    %c0_i32 = arith.constant 0 : i32
    %c0_i32_0 = arith.constant 0 : i32
    %c0_i32_1 = arith.constant 0 : i32
    return %c0_i32, %c0_i32_0 : i32, i32
  }
  func.func @transform_2(%arg0: i32) -> (i32, i32, i32) {
    %c0_i32 = arith.constant 0 : i32
    %c0_i32_0 = arith.constant 0 : i32
    %c0_i32_1 = arith.constant 0 : i32
    return %arg0, %c0_i32, %c0_i32_0 : i32, i32, i32
  }
}

</mosaic_0001>

<bundles_post_ra>
// kernel: kanc_mlp_medium_forward.2
= control target key start
LH: loop header
LB: loop body
LE: loop exit
PB: predicated region body
PF: predicated region fallthrough
CT: control target
= control target key end

     0   :  { %s2381_s9 = smov 0   ;;  %s2383_s10 = smov 0   ;;  %s4607_s0 = inlined_call_operand.vmem [shape: bf16[4,3,32,128], index: 0, kind: input, shape index: {}]   ;;  %s4608_s1 = inlined_call_operand.vmem [shape: bf16[16,384], index: 1, kind: input, shape index: {}]   ;;  %s4609_s2 = inlined_call_operand.vmem [shape: bf16[3,16,128], index: 2, kind: output, shape index: {}]  }
   0x1   :  { %s2385_s11 = smov 0  }
   0x2 LB: > { %s2016_s12 = sadd.s32 4294967295, %s2362_s11   ;;  %s2398_s13 = sadd.s32 1, %s2362_s11   ;;  %s2362_s11 = sphi %s2385_s11, %s5033_s11   ;;  %s2358_s10 = sphi %s2383_s10, %s5032_s10   ;;  %s2354_s9 = sphi %s2381_s9, %s5031_s9  }
   0x3   : > { %s16_s14 = ssub.s32 %s2362_s11, %s2398_s13  ;;  %s19_s15 = sadd.s32 1, %s2358_s10 }
   0x4   : > { %p17_p0 = scmp.eq.s32.totalorder %s16_s14, 0  ;;  %p26_p1 = scmp.ne.s32.totalorder %s2358_s10, %s2354_s9 }
   0x5   : > { %p27_p2 = scmp.eq.s32.totalorder %s2362_s11, 0  ;;  %p2019_p4 = scmp.ge.s32.totalorder %s2362_s11, 3 }
   0x6   : > { %s2407_s16 = scalar_select %p17_p0, %s2358_s10, %s19_s15  }
   0x7   : > { %p28_p3 = por %p27_p2, %p26_p1  ;;  %102 = sbr.rel (%p2019_p4) target bundleno = 22 (0x16), region = 20 }
   0xe   : > { %105 = sbr.rel (!%p28_p3) target bundleno = 22 (0x16), region = 24  ;;  %s107_s17 = sand.u32 (%p28_p3), 1, %s2358_s10  }
   0xf   : > { %s2062_s18 = sshll.u32 (%p28_p3), %s2362_s11, 4  ;;  %s2020_s19 = sshll.u32 (%p28_p3), %s107_s17, 6 }
  0x10   : > { %s112_s22 = scalar_lea.vmem (%p28_p3), %s4607_s0, %s2062_s18  ;;  %s109_s23 = scalar_lea.vmem (%p28_p3), [#allocation3], %s2020_s19 }
  0x11   : > { %v128_v0 = vld [vmem:[%s112_s22] sm:$0xff] (%p28_p3)   ;;  %v132_v1 = vld [vmem:[%s112_s22 + $0x8] sm:$0xff] (%p28_p3)   ;;  %v136_v2 = vld [vmem:[%s112_s22 + $0x30] sm:$0xff] (%p28_p3)  }
  0x12   : > { %129 = vst [vmem:[%s109_s23] sm:$0xff] (%p28_p3), %v128_v0   ;;  %133 = vst [vmem:[%s109_s23 + $0x8] sm:$0xff] (%p28_p3), %v132_v1   ;;  %v140_v3 = vld [vmem:[%s112_s22 + $0x38] sm:$0xff] (%p28_p3)   ;;  %v144_v4 = vld [vmem:[%s112_s22 + $0x60] sm:$0xff] (%p28_p3)  }
  0x13   : > { %137 = vst [vmem:[%s109_s23 + $0x10] sm:$0xff] (%p28_p3), %v136_v2   ;;  %v148_v5 = vld [vmem:[%s112_s22 + $0x68] sm:$0xff] (%p28_p3)   ;;  %141 = vst [vmem:[%s109_s23 + $0x18] sm:$0xff] (%p28_p3), %v140_v3   ;;  %v152_v6 = vld [vmem:[%s112_s22 + $0x90] sm:$0xff] (%p28_p3)  }
  0x14   : > { %145 = vst [vmem:[%s109_s23 + $0x20] sm:$0xff] (%p28_p3), %v144_v4   ;;  %149 = vst [vmem:[%s109_s23 + $0x28] sm:$0xff] (%p28_p3), %v148_v5   ;;  %v156_v7 = vld [vmem:[%s112_s22 + $0x98] sm:$0xff] (%p28_p3)  }
  0x15   : > { %153 = vst [vmem:[%s109_s23 + $0x30] sm:$0xff] %v152_v6   ;;  %157 = vst [vmem:[%s109_s23 + $0x38] sm:$0xff] %v156_v7  }
  0x16 PF: > { %p2023_p5 = scmp.ge.s32.totalorder %s2362_s11, 1  ;;  %p213_p6 = scmp.lt.s32.totalorder %s2362_s11, 4 }
  0x18   : > { %p214_p7 = pnand %p2023_p5, %p213_p6 }
  0x1a   : > { %217 = sbr.rel (%p214_p7) target bundleno = 615 (0x267), region = 65 }
  0x21   : > { %s220_s24 = sand.u32 1, %s2354_s9   ;;  %v4634_v8 = vmov 0.0   ;;  %vm4610_vm0 = vmmov 0   ;;  %v2457_v34 = vld [vmem:[%s4608_s1 + $0x4] ss:$12 sps:$4 sm:$0xff]   ;;  %p241_p8 = scmp.lt.s32.totalorder %s2016_s12, 2 }
  0x22   : > { %2210 = vmatprep.subr.bf16.mxu1 %v4634_v8  ;;  %s2024_s25 = sshll.u32 %s220_s24, 6  ;;  %2214 = vmatprep.mubr.msk.bf16.mxu1 %vm4610_vm0, %v4634_v8 }
  0x23   : > { %s2421_s26 = scalar_lea.vmem [#allocation3], %s2024_s25  ;;  %644 = vmatprep.mubr.bf16.mxu0 %v2457_v34  ;;  %s5035_s12 = smov (!%p241_p8, %s2016_s12), 2 }
  0x24   : > { %v2067_v9 = vld [vmem:[%s2421_s26] sm:$0xff]   ;;  %v2103_v10 = vld [vmem:[%s2421_s26 + $0x8] sm:$0xff]   ;;  %v2104_v14 = vld [vmem:[%s2421_s26 + $0x10] sm:$0xff]   ;;  %s2063_s15 = sshll.u32 %s5035_s12, 3 }
  0x25   : > { %v2425_v11 = vunpack.c.l.bf16 %v2067_v9  ;;  %v2427_v12 = vunpack.c.h.bf16 %v2067_v9  ;;  %v2429_v13 = vunpack.c.l.bf16 %v2103_v10  ;;  %v2432_v15 = vunpack.c.h.bf16 %v2103_v10  ;;  %v2105_v25 = vld [vmem:[%s2421_s26 + $0x18] sm:$0xff]   ;;  %v2106_v35 = vld [vmem:[%s2421_s26 + $0x20] sm:$0xff]   ;;  %s245_s19 = scalar_lea.vmem %s4609_s2, %s2063_s15 }
  0x26   : > { %v2437_v19 = vunpack.c.l.bf16 %v2104_v14  ;;  %v2448_v30 = vunpack.c.h.bf16 %v2104_v14  ;;  %v2452_v33 = vunpack.c.l.bf16 %v2105_v25  ;;  %v2468_v46 = vunpack.c.h.bf16 %v2105_v25 }
  0x27   : > { %v2027_v16 = vadd.f32 2.2, %v2425_v11  ;;  %v2028_v17 = vadd.f32 2.2, %v2427_v12  ;;  %v2029_v18 = vadd.f32 2.2, %v2429_v13  ;;  %v2470_v47 = vunpack.c.l.bf16 %v2106_v35 }
  0x28   : > { %v2030_v22 = vadd.f32 2.2, %v2432_v15  ;;  %v272_v23 = vsub.f32 0.0, %v2425_v11  ;;  %v2038_v24 = vadd.f32 2.2, %v2437_v19  ;;  %v273_v29 = vsub.f32 0.0, %v2427_v12 }
  0x29   : > { %v304_v20 = vmul.f32 2.5, %v2027_v16  ;;  %v305_v21 = vmul.f32 2.5, %v2028_v17  ;;  %v306_v28 = vmul.f32 2.5, %v2029_v18  ;;  %v2039_v38 = vadd.f32 2.2, %v2448_v30  ;;  %4740 = vst [vmem:[#allocation4_spill] sm:$0xff] %v2468_v46 }
  0x2a   : > { %v307_v36 = vmul.f32 2.5, %v2030_v22  ;;  %v276_v37 = vmul.f32 1.442695, %v272_v23  ;;  %v2461_v39 = vmul.f32 2.5, %v2038_v24  ;;  %v2466_v45 = vmul.f32 1.442695, %v273_v29 }
  0x2b   : > { %v2443_v26 = vfloor.f32 %v304_v20  ;;  %v2445_v27 = vfloor.f32 %v305_v21  ;;  %v2464_v44 = vfloor.f32 %v306_v28  ;;  %4741 = vst [vmem:[#allocation5_spill] sm:$0xff] %v2470_v47  ;;  %v2474_v53 = vmul.f32 2.5, %v2039_v38 }
  0x2c   : > { %v2472_v52 = vfloor.f32 %v307_v36  ;;  %2272 = vpow2.f32 %v276_v37  ;;  %v2477_v54 = vfloor.f32 %v2461_v39 }
  0x2d   : > { %v312_v31 = vsub.f32 %v304_v20, %v2443_v26  ;;  %v313_v32 = vsub.f32 %v305_v21, %v2445_v27  ;;  %vm500_vm1 = vcmp.eq.f32.partialorder %v2443_v26, 8.0  ;;  %vm4622_vm2 = vcmp.eq.f32.partialorder %v2445_v27, 8.0 }
  0x2e   : > { %vm4613_vm3 = vcmp.eq.f32.partialorder %v2443_v26, 7.0  ;;  %vm4612_vm4 = vcmp.eq.f32.partialorder %v2445_v27, 7.0  ;;  %vm524_vm5 = vcmp.eq.f32.partialorder %v2443_v26, 9.0  ;;  %vm525_vm6 = vcmp.eq.f32.partialorder %v2445_v27, 9.0 }
  0x2f   : > { %v316_v40 = vmul.f32 %v312_v31, %v312_v31  ;;  %v317_v41 = vmul.f32 %v313_v32, %v313_v32  ;;  %v324_v42 = vsub.f32 1.0, %v312_v31  ;;  %v325_v43 = vsub.f32 1.0, %v313_v32 }
  0x30   : > { %vm548_vm7 = vcmp.eq.f32.partialorder %v2443_v26, 10.0  ;;  %vm549_vm8 = vcmp.eq.f32.partialorder %v2445_v27, 10.0  ;;  %vm4626_vm9 = vcmp.eq.f32.partialorder %v2443_v26, 4.0  ;;  %vm4632_vm10 = vcmp.eq.f32.partialorder %v2443_v26, 5.0 }
  0x31   : > { %v320_v48 = vmul.f32 %v316_v40, %v312_v31  ;;  %v321_v49 = vmul.f32 %v317_v41, %v313_v32  ;;  %v344_v50 = vmul.f32 %v324_v42, %v324_v42  ;;  %v345_v51 = vmul.f32 %v325_v43, %v325_v43 }
  0x32   : > { %v314_v2 = vsub.f32 %v306_v28, %v2464_v44  ;;  %vm4629_vm11 = vcmp.eq.f32.partialorder %v2443_v26, 6.0  ;;  %vm4633_vm12 = vcmp.eq.f32.partialorder %v2445_v27, 6.0  ;;  %v315_v9 = vsub.f32 %v307_v36, %v2472_v52 }
  0x33   : > { %v332_v55 = vmul.f32 0.5, %v320_v48  ;;  %v333_v56 = vmul.f32 0.5, %v321_v49  ;;  %v348_v57 = vmul.f32 %v344_v50, %v324_v42  ;;  %v349_v58 = vmul.f32 %v345_v51, %v325_v43 }
  0x34   : > { %v2493_v63 = vmul.f32 0.16666667, %v320_v48  ;;  %v2500_v3 = vmul.f32 0.16666667, %v321_v49  ;;  %vm4631_vm13 = vcmp.eq.f32.partialorder %v2445_v27, 5.0  ;;  %v318_v21 = vmul.f32 %v314_v2, %v314_v2 }
  0x35   : > { %v336_v59 = vsub.f32 %v332_v55, %v316_v40  ;;  %v337_v60 = vsub.f32 %v333_v56, %v317_v41  ;;  %v2487_v61 = vmul.f32 0.16666667, %v348_v57  ;;  %v2489_v62 = vmul.f32 0.16666667, %v349_v58 }
  0x36   : > { %v2273_v22 = vpop.eup %2272  ;;  %vm4623_vm14 = vcmp.eq.f32.partialorder %v2445_v27, 4.0  ;;  %v319_v32 = vmul.f32 %v315_v9, %v315_v9  ;;  %vm4621_vm15 = vcmp.eq.f32.partialorder %v2443_v26, 3.0  ;;  %v322_v49 = vmul.f32 %v318_v21, %v314_v2 }
  0x37   : > { %4742 = vst [vmem:[#allocation6_spill] sm:$0xff] %v2487_v61  ;;  %4743 = vst [vmem:[#allocation7_spill] sm:$0xff] %v2489_v62  ;;  %v2495_v0 = vadd.f32 0.6666667, %v336_v59  ;;  %v2497_v1 = vadd.f32 0.6666667, %v337_v60  ;;  %2274 = vpow2.f32 %v2466_v45 }
  0x38   : > { %v356_v4 = vsub.f32 1.0, %v2487_v61  ;;  %v357_v5 = vsub.f32 1.0, %v2489_v62  ;;  %v528_v6 = vsel %vm524_vm5, %v2487_v61, 0.0  ;;  %v529_v7 = vsel %vm525_vm6, %v2489_v62, 0.0 }
  0x39   : > { %v2518_v16 = vsel %vm500_vm1, %v2495_v0, %v528_v6  ;;  %v2523_v17 = vsel %vm4622_vm2, %v2497_v1, %v529_v7  ;;  %v552_v18 = vsel %vm548_vm7, %v2487_v61, 0.0  ;;  %v553_v20 = vsel %vm549_vm8, %v2489_v62, 0.0 }
  0x3a   : > { %v360_v10 = vsub.f32 %v356_v4, %v2495_v0  ;;  %v361_v14 = vsub.f32 %v357_v5, %v2497_v1  ;;  %4744 = vst [vmem:[#allocation8_spill] sm:$0xff] %v2518_v16  ;;  %4745 = vst [vmem:[#allocation9_spill] sm:$0xff] %v2523_v17  ;;  %v556_v25 = vsel %vm524_vm5, %v2495_v0, %v552_v18  ;;  %v456_v29 = vsel %vm4629_vm11, %v2487_v61, 0.0 }
  0x3b   : > { %v557_v28 = vsel %vm525_vm6, %v2497_v1, %v553_v20  ;;  %v457_v31 = vsel %vm4633_vm12, %v2489_v62, 0.0  ;;  %vm4614_vm5 = vcmp.eq.f32.partialorder %v2445_v27, 3.0  ;;  %v460_v40 = vsel %vm4632_vm10, %v2495_v0, %v456_v29 }
  0x3c   : > { %v2533_v23 = vsub.f32 %v360_v10, %v2493_v63  ;;  %v2536_v24 = vsub.f32 %v361_v14, %v2500_v3  ;;  %v461_v41 = vsel %vm4631_vm13, %v2497_v1, %v457_v31  ;;  %v323_v55 = vmul.f32 %v319_v32, %v315_v9 }
  0x3d   : > { %v326_v56 = vsub.f32 1.0, %v314_v2  ;;  %v327_v58 = vsub.f32 1.0, %v315_v9  ;;  %v334_v59 = vmul.f32 0.5, %v322_v49  ;;  %v703_v60 = vsub.f32 0.0, %v2437_v19 }
  0x3e   : > { %v560_v35 = vsel %vm500_vm1, %v2533_v23, %v556_v25  ;;  %v561_v36 = vsel %vm4622_vm2, %v2536_v24, %v557_v28  ;;  %v464_v43 = vsel %vm4626_vm9, %v2533_v23, %v460_v40  ;;  %v465_v48 = vsel %vm4623_vm14, %v2536_v24, %v461_v41 }
  0x3f   : > { %v564_v37 = vsel %vm4613_vm3, %v2493_v63, %v560_v35  ;;  %v565_v38 = vsel %vm4612_vm4, %v2500_v3, %v561_v36  ;;  %v468_v50 = vsel %vm4621_vm15, %v2493_v63, %v464_v43  ;;  %v469_v51 = vsel %vm4614_vm5, %v2500_v3, %v465_v48 }
  0x40   : > { %v568_v42 = vpack.c.bf16 %v565_v38, %v564_v37  ;;  %v472_v57 = vpack.c.bf16 %v469_v51, %v468_v50  ;;  %v2587_v4 = vsel %vm4613_vm3, %v2487_v61, 0.0  ;;  %v2592_v5 = vsel %vm4612_vm4, %v2489_v62, 0.0 }
  0x41   : > { %v335_v6 = vmul.f32 0.5, %v323_v55  ;;  %v346_v2 = vmul.f32 %v326_v56, %v326_v56  ;;  %v2598_v7 = vsel %vm500_vm1, %v2487_v61, 0.0  ;;  %v2600_v9 = vmul.f32 0.16666667, %v322_v49 }
  0x42   : > { %2211 = vmatpush3.bf16.msra.mxu1 %v568_v42  ;;  %4746 = vst [vmem:[#allocation10_spill] sm:$0xff] %v2598_v7  ;;  %2110 = vmatprep.subr.bf16.mxu0 %v472_v57  ;;  %v338_v10 = vsub.f32 %v334_v59, %v318_v21  ;;  %v347_v14 = vmul.f32 %v327_v58, %v327_v58  ;;  %v2602_v18 = vmul.f32 0.16666667, %v323_v55  ;;  %vm4620_vm6 = vcmp.eq.f32.partialorder %v2464_v44, 7.0 }
  0x43   : > { %2212 = vmatprep.subr.bf16.mxu1 %v4634_v8  ;;  %v339_v20 = vsub.f32 %v335_v6, %v319_v32  ;;  %v350_v25 = vmul.f32 %v346_v2, %v326_v56  ;;  %vm4618_vm7 = vcmp.eq.f32.partialorder %v2464_v44, 8.0  ;;  %vm4619_vm8 = vcmp.eq.f32.partialorder %v2472_v52, 7.0 }
  0x44   : > { %v2606_v28 = vadd.f32 0.6666667, %v338_v10  ;;  %v351_v29 = vmul.f32 %v347_v14, %v327_v58  ;;  %vm550_vm1 = vcmp.eq.f32.partialorder %v2464_v44, 10.0  ;;  %vm551_vm0 = vcmp.eq.f32.partialorder %v2472_v52, 10.0 }
  0x45   : > { %v2611_v31 = vmul.f32 0.16666667, %v350_v25  ;;  %v284_v21 = vadd.f32 1.0, %v2273_v22  ;;  %v2615_v32 = vfloor.f32 %v2474_v53  ;;  %v2617_v35 = vadd.f32 0.6666667, %v339_v20  ;;  %v2275_v25 = vpop.eup %2274 }
  0x46   : > { %v2619_v36 = vmul.f32 0.16666667, %v351_v29  ;;  %vm4615_vm4 = vcmp.eq.f32.partialorder %v2464_v44, 9.0  ;;  %v743_v37 = vsub.f32 %v2461_v39, %v2477_v54  ;;  %vm4616_vm3 = vcmp.eq.f32.partialorder %v2472_v52, 9.0 }
  0x47   : > { %v358_v38 = vsub.f32 1.0, %v2611_v31  ;;  %v554_v45 = vsel %vm550_vm1, %v2611_v31, 0.0  ;;  %2276 = vrcp.f32 %v284_v21  ;;  %v744_v22 = vsub.f32 %v2474_v53, %v2615_v32 }
  0x48   : > { %v359_v40 = vsub.f32 1.0, %v2619_v36  ;;  %v555_v41 = vsel %vm551_vm0, %v2619_v36, 0.0  ;;  %v747_v42 = vmul.f32 %v743_v37, %v743_v37  ;;  %vm4617_vm5 = vcmp.eq.f32.partialorder %v2472_v52, 8.0 }
  0x49   : > { %v362_v43 = vsub.f32 %v358_v38, %v2606_v28  ;;  %v748_v39 = vmul.f32 %v744_v22, %v744_v22  ;;  %v755_v48 = vsub.f32 1.0, %v743_v37  ;;  %v558_v50 = vsel %vm4615_vm4, %v2606_v28, %v554_v45 }
  0x4a   : > { %v363_v49 = vsub.f32 %v359_v40, %v2617_v35  ;;  %v751_v53 = vmul.f32 %v747_v42, %v743_v37  ;;  %v756_v51 = vsub.f32 1.0, %v744_v22  ;;  %v559_v56 = vsel %vm4616_vm3, %v2617_v35, %v555_v41 }
  0x4b   : > { %v2638_v55 = vsub.f32 %v362_v43, %v2600_v9  ;;  %v752_v57 = vmul.f32 %v748_v39, %v744_v22  ;;  %v775_v58 = vmul.f32 %v755_v48, %v755_v48  ;;  %vm4657_vm0 = vcmp.eq.f32.partialorder %v2477_v54, 4.0  ;;  %v2667_v43 = vld [vmem:[%s4608_s1 + $0x8] ss:$12 sps:$4 sm:$0xff]  }
  0x4c   : > { %v2644_v59 = vsub.f32 %v363_v49, %v2602_v18  ;;  %v763_v6 = vmul.f32 0.5, %v751_v53  ;;  %v776_v2 = vmul.f32 %v756_v51, %v756_v51  ;;  %vm4637_vm1 = vcmp.eq.f32.partialorder %v2477_v54, 3.0  ;;  %4747 = vst [vmem:[#allocation11_spill] sm:$0xff] %v2667_v43 }
  0x4d   : > { %v562_v10 = vsel %vm4618_vm7, %v2638_v55, %v558_v50  ;;  %v764_v14 = vmul.f32 0.5, %v752_v57  ;;  %v779_v20 = vmul.f32 %v775_v58, %v755_v48  ;;  %vm4656_vm4 = vcmp.eq.f32.partialorder %v2615_v32, 4.0 }
  0x4e   : > { %v563_v29 = vsel %vm4617_vm5, %v2644_v59, %v559_v56  ;;  %v566_v21 = vsel %vm4620_vm6, %v2600_v9, %v562_v10  ;;  %v767_v37 = vsub.f32 %v763_v6, %v747_v42  ;;  %v780_v38 = vmul.f32 %v776_v2, %v756_v51 }
  0x4f   : > { %vm4636_vm3 = vcmp.eq.f32.partialorder %v2615_v32, 3.0  ;;  %v567_v45 = vsel %vm4619_vm8, %v2602_v18, %v563_v29  ;;  %v285_v22 = vadd.f32 1.0, %v2275_v25  ;;  %v768_v40 = vsub.f32 %v764_v14, %v748_v39 }
  0x50   : > { %v2662_v41 = vmul.f32 0.16666667, %v779_v20  ;;  %v569_v48 = vpack.c.bf16 %v567_v45, %v566_v21  ;;  %v2669_v49 = vmul.f32 0.16666667, %v751_v53  ;;  %v2671_v42 = vadd.f32 0.6666667, %v767_v37 }
  0x51   : > { %v2673_v50 = vmul.f32 0.16666667, %v780_v38  ;;  %v2277_v51 = vpop.eup %2276  ;;  %2278 = vrcp.f32 %v285_v22  ;;  %v2675_v56 = vmul.f32 0.16666667, %v752_v57  ;;  %v2677_v58 = vadd.f32 0.6666667, %v768_v40 }
  0x52   : > { %v787_v39 = vsub.f32 1.0, %v2662_v41  ;;  %2213 = vmatpush3.bf16.msra.mxu1 %v569_v48  ;;  %v292_v6 = vmul.f32 %v2277_v51, %v2425_v11  ;;  %vm4628_vm5 = vcmp.eq.f32.partialorder %v2477_v54, 5.0  ;;  %vm4627_vm7 = vcmp.eq.f32.partialorder %v2615_v32, 5.0 }
  0x53   : > { %4748 = vst [vmem:[#allocation12_spill] sm:$0xff] %v2673_v50  ;;  %v788_v2 = vsub.f32 1.0, %v2673_v50  ;;  %vm4625_vm8 = vcmp.eq.f32.partialorder %v2477_v54, 6.0  ;;  %vm4624_vm6 = vcmp.eq.f32.partialorder %v2615_v32, 6.0  ;;  %vm4641_vm15 = vcmp.eq.f32.partialorder %v2464_v44, 3.0 }
  0x54   : > { %v791_v53 = vsub.f32 %v787_v39, %v2671_v42  ;;  %v887_v11 = vsel %vm4625_vm8, %v2662_v41, 0.0  ;;  %v888_v10 = vsel %vm4624_vm6, %v2673_v50, 0.0  ;;  %vm4630_vm2 = vcmp.eq.f32.partialorder %v2472_v52, 3.0 }
  0x55   : > { %v792_v57 = vsub.f32 %v788_v2, %v2677_v58  ;;  %v891_v20 = vsel %vm4628_vm5, %v2671_v42, %v887_v11  ;;  %v892_v25 = vsel %vm4627_vm7, %v2677_v58, %v888_v10  ;;  %vm4644_vm14 = vcmp.eq.f32.partialorder %v2464_v44, 4.0  ;;  %2215 = vmatmul.mubr.bf16.vlgmr.msra.gmra.mrb[0].mxu1 %v2667_v43 }
  0x56   : > { %v2697_v14 = vsub.f32 %v791_v53, %v2669_v49  ;;  %vm4642_vm6 = vcmp.eq.f32.partialorder %v2472_v52, 4.0  ;;  %vm4646_vm8 = vcmp.eq.f32.partialorder %v2464_v44, 5.0  ;;  %vm4645_vm9 = vcmp.eq.f32.partialorder %v2472_v52, 5.0  ;;  %1059 = vmatprep.mubr.bf16.mxu1 %v2457_v34 }
  0x57   : > { %v2708_v29 = vsub.f32 %v792_v57, %v2675_v56  ;;  %vm4649_vm7 = vcmp.eq.f32.partialorder %v2464_v44, 6.0  ;;  %vm4647_vm5 = vcmp.eq.f32.partialorder %v2472_v52, 6.0  ;;  %v704_v37 = vsub.f32 0.0, %v2448_v30 }
  0x58   : > { %v895_v21 = vsel %vm4657_vm0, %v2697_v14, %v891_v20  ;;  %v458_v34 = vsel %vm4649_vm7, %v2611_v31, 0.0  ;;  %v459_v22 = vsel %vm4647_vm5, %v2619_v36, 0.0  ;;  %v707_v39 = vmul.f32 1.442695, %v703_v60 }
  0x59   : > { %v896_v38 = vsel %vm4656_vm4, %v2708_v29, %v892_v25  ;;  %v899_v45 = vsel %vm4637_vm1, %v2669_v49, %v895_v21  ;;  %v462_v48 = vsel %vm4646_vm8, %v2606_v28, %v458_v34  ;;  %v463_v51 = vsel %vm4645_vm9, %v2617_v35, %v459_v22 }
  0x5a   : > { %v900_v40 = vsel %vm4636_vm3, %v2675_v56, %v896_v38  ;;  %v466_v53 = vsel %vm4644_vm14, %v2638_v55, %v462_v48  ;;  %v467_v57 = vsel %vm4642_vm6, %v2644_v59, %v463_v51  ;;  %v709_v11 = vmul.f32 1.442695, %v704_v37 }
  0x5b   : > { %v903_v2 = vpack.c.bf16 %v900_v40, %v899_v45  ;;  %v2279_v10 = vpop.eup %2278  ;;  %v470_v20 = vsel %vm4641_vm15, %v2600_v9, %v466_v53  ;;  %v471_v25 = vsel %vm4630_vm2, %v2602_v18, %v467_v57  ;;  %2280 = vpow2.f32 %v707_v39 }
  0x5c   : > { %v274_v60 = vsub.f32 0.0, %v2429_v13  ;;  %v293_v21 = vmul.f32 %v2279_v10, %v2427_v12  ;;  %v473_v38 = vpack.c.bf16 %v471_v25, %v470_v20  ;;  %2282 = vpow2.f32 %v709_v11 }
  0x5d   : > { %2135 = vmatprep.subr.bf16.mxu1 %v903_v2  ;;  %v275_v45 = vsub.f32 0.0, %v2432_v15  ;;  %v2040_v34 = vadd.f32 2.2, %v2452_v33  ;;  %v2041_v22 = vadd.f32 2.2, %v2468_v46  ;;  %v484_v40 = vsel %vm4629_vm11, %v2495_v0, %v2587_v4 }
  0x5e   : > { %v280_v37 = vmul.f32 1.442695, %v274_v60  ;;  %v296_v48 = vpack.c.bf16 %v293_v21, %v292_v6  ;;  %v485_v12 = vsel %vm4633_vm12, %v2497_v1, %v2592_v5  ;;  %v488_v39 = vsel %vm4632_vm10, %v2533_v23, %v484_v40 }
  0x5f   : > { %v282_v51 = vmul.f32 1.442695, %v275_v45  ;;  %v737_v2 = vmul.f32 2.5, %v2040_v34  ;;  %v738_v53 = vmul.f32 2.5, %v2041_v22  ;;  %v489_v57 = vsel %vm4631_vm13, %v2536_v24, %v485_v12 }
  0x60   : > { %2284 = vpow2.f32 %v280_v37  ;;  %vm4749_vm11 = vcmp.eq.f32.partialorder %v2443_v26, 4.0  ;;  %vm4750_vm2 = vcmp.eq.f32.partialorder %v2445_v27, 4.0  ;;  %2111 = vmatpush3.bf16.msra.mxu0 %v296_v48  ;;  %v705_v5 = vsub.f32 0.0, %v2452_v33 }
  0x61   : > { %v408_v4 = vsel %vm4749_vm11, %v2487_v61, 0.0  ;;  %v409_v6 = vsel %vm4750_vm2, %v2489_v62, 0.0  ;;  %2286 = vpow2.f32 %v282_v51  ;;  %2112 = vmatprep.subr.bf16.mxu0 %v473_v38  ;;  %v2781_v11 = vfloor.f32 %v737_v2  ;;  %vm4751_vm13 = vmmov %vm4749_vm11 }
  0x62   : > { %v2783_v10 = vfloor.f32 %v738_v53  ;;  %v2788_v20 = vsel %vm4751_vm13, %v2493_v63, %v488_v39  ;;  %vm4752_vm11 = vmmov %vm4750_vm2  ;;  %vm4753_vm2 = vcmp.eq.f32.partialorder %v2445_v27, 8.0  ;;  %vm4755_vm10 = vcmp.eq.f32.partialorder %v2443_v26, 3.0 }
  0x63   : > { %v2793_v25 = vsel %vm4752_vm11, %v2500_v3, %v489_v57  ;;  %v2798_v60 = vsel %vm4753_vm2, %v2489_v62, 0.0  ;;  %v384_v21 = vsel %vm4755_vm10, %v2487_v61, 0.0  ;;  %vm4756_vm12 = vcmp.eq.f32.partialorder %v2445_v27, 3.0  ;;  %vm4757_vm13 = vmmov %vm4755_vm10 }
  0x64   : > { %4754 = vst [vmem:[#allocation13_spill] sm:$0xff] %v2798_v60  ;;  %v2806_v38 = vsel %vm4756_vm12, %v2489_v62, 0.0  ;;  %v711_v45 = vmul.f32 1.442695, %v705_v5  ;;  %v2811_v37 = vsel %vm4757_vm13, %v2495_v0, %v408_v4  ;;  %vm4759_vm11 = vmmov %vm4756_vm12  ;;  %v745_v22 = vsub.f32 %v737_v2, %v2781_v11 }
  0x65   : > { %4758 = vst [vmem:[#allocation14_spill] sm:$0xff] %v2811_v37  ;;  %v2816_v34 = vsel %vm4759_vm11, %v2497_v1, %v409_v6  ;;  %v746_v40 = vsub.f32 %v738_v53, %v2783_v10  ;;  %v2823_v48 = vsel %vm4637_vm1, %v2662_v41, 0.0  ;;  %v2828_v51 = vsel %vm4636_vm3, %v2673_v50, 0.0  ;;  %v2281_v57 = vpop.eup %2280 }
  0x66   : > { %4760 = vst [vmem:[#allocation15_spill] sm:$0xff] %v2816_v34  ;;  %v706_v39 = vsub.f32 0.0, %v2468_v46  ;;  %v749_v4 = vmul.f32 %v745_v22, %v745_v22  ;;  %v757_v6 = vsub.f32 1.0, %v745_v22  ;;  %vm4653_vm10 = vcmp.eq.f32.partialorder %v2781_v11, 3.0  ;;  %v2283_v5 = vpop.eup %2282 }
  0x67   : > { %v750_v2 = vmul.f32 %v746_v40, %v746_v40  ;;  %v758_v53 = vsub.f32 1.0, %v746_v40  ;;  %vm4669_vm12 = vcmp.eq.f32.partialorder %v2781_v11, 5.0  ;;  %vm4668_vm2 = vcmp.eq.f32.partialorder %v2783_v10, 5.0 }
  0x68   : > { %v715_v8 = vadd.f32 1.0, %v2281_v57  ;;  %vm4652_vm13 = vcmp.eq.f32.partialorder %v2783_v10, 3.0  ;;  %vm885_vm11 = vcmp.eq.f32.partialorder %v2781_v11, 6.0  ;;  %vm886_vm3 = vcmp.eq.f32.partialorder %v2783_v10, 6.0 }
  0x69   : > { %2288 = vpow2.f32 %v711_v45  ;;  %vm4660_vm1 = vcmp.eq.f32.partialorder %v2443_v26, 1.0  ;;  %v716_v12 = vadd.f32 1.0, %v2283_v5  ;;  %v753_v43 = vmul.f32 %v749_v4, %v745_v22 }
  0x6a   : > { %v754_v47 = vmul.f32 %v750_v2, %v746_v40  ;;  %v777_v62 = vmul.f32 %v757_v6, %v757_v6  ;;  %vm368_vm15 = vcmp.eq.f32.partialorder %v2443_v26, 0.0  ;;  %vm369_vm6 = vcmp.eq.f32.partialorder %v2445_v27, 0.0  ;;  %v2285_v17 = vpop.eup %2284 }
  0x6b   : > { %2290 = vrcp.f32 %v715_v8  ;;  %v778_v61 = vmul.f32 %v758_v53, %v758_v53  ;;  %v713_v57 = vmul.f32 1.442695, %v706_v39  ;;  %vm4651_vm14 = vcmp.eq.f32.partialorder %v2445_v27, 1.0  ;;  %v2287_v22 = vpop.eup %2286 }
  0x6c   : > { %2292 = vrcp.f32 %v716_v12  ;;  %v2843_v16 = vmul.f32 0.16666667, %v753_v43  ;;  %v2845_v45 = vmul.f32 0.16666667, %v754_v47  ;;  %v765_v34 = vmul.f32 0.5, %v753_v43 }
  0x6d   : > { %vm4666_vm9 = vcmp.eq.f32.partialorder %v2781_v11, 4.0  ;;  %vm4667_vm8 = vcmp.eq.f32.partialorder %v2783_v10, 4.0  ;;  %v286_v40 = vadd.f32 1.0, %v2285_v17  ;;  %v766_v5 = vmul.f32 0.5, %v754_v47 }
  0x6e   : > { %v781_v37 = vmul.f32 %v777_v62, %v757_v6  ;;  %v782_v8 = vmul.f32 %v778_v61, %v758_v53  ;;  %v287_v60 = vadd.f32 1.0, %v2287_v22  ;;  %v769_v39 = vsub.f32 %v765_v34, %v749_v4 }
  0x6f   : > { %2294 = vpow2.f32 %v713_v57  ;;  %vm4661_vm5 = vcmp.eq.f32.partialorder %v2443_v26, 2.0  ;;  %v770_v12 = vsub.f32 %v766_v5, %v750_v2  ;;  %vm4650_vm7 = vcmp.eq.f32.partialorder %v2445_v27, 2.0 }
  0x70   : > { %2296 = vrcp.f32 %v286_v40  ;;  %v2850_v7 = vmul.f32 0.16666667, %v781_v37  ;;  %v2852_v46 = vmul.f32 0.16666667, %v782_v8  ;;  %v2854_v43 = vadd.f32 0.6666667, %v769_v39 }
  0x71   : > { %2298 = vrcp.f32 %v287_v60  ;;  %v388_v47 = vsel %vm4661_vm5, %v2495_v0, %v384_v21  ;;  %v2860_v61 = vadd.f32 0.6666667, %v770_v12  ;;  %v389_v4 = vsel %vm4650_vm7, %v2497_v1, %v2806_v38 }
  0x72   : > { %v789_v62 = vsub.f32 1.0, %v2850_v7  ;;  %v790_v17 = vsub.f32 1.0, %v2852_v46  ;;  %v2867_v37 = vsel %vm4653_vm10, %v2850_v7, 0.0  ;;  %v2872_v60 = vsel %vm4652_vm13, %v2852_v46, 0.0 }
  0x73   : > { %v889_v21 = vsel %vm885_vm11, %v2850_v7, 0.0  ;;  %v890_v34 = vsel %vm886_vm3, %v2852_v46, 0.0  ;;  %v2289_v2 = vpop.eup %2288  ;;  %v392_v5 = vsel %vm4660_vm1, %v2533_v23, %v388_v47  ;;  %v393_v38 = vsel %vm4651_vm14, %v2536_v24, %v389_v4 }
  0x74   : > { %v793_v6 = vsub.f32 %v789_v62, %v2854_v43  ;;  %v794_v53 = vsub.f32 %v790_v17, %v2860_v61  ;;  %v893_v57 = vsel %vm4669_vm12, %v2854_v43, %v889_v21  ;;  %v894_v22 = vsel %vm4668_vm2, %v2860_v61, %v890_v34 }
  0x75   : > { %v717_v40 = vadd.f32 1.0, %v2289_v2  ;;  %vm4659_vm7 = vcmp.eq.f32.partialorder %v2477_v54, 7.0  ;;  %v2291_v8 = vpop.eup %2290  ;;  %v2908_v62 = vsel %vm368_vm15, %v2493_v63, %v392_v5  ;;  %v397_v47 = vsel %vm369_vm6, %v2500_v3, %v393_v38 }
  0x76   : > { %v2900_v39 = vsub.f32 %v793_v6, %v2843_v16  ;;  %v2903_v12 = vsub.f32 %v794_v53, %v2845_v45  ;;  %v2293_v17 = vpop.eup %2292  ;;  %v723_v21 = vmul.f32 %v2291_v8, %v2437_v19  ;;  %v400_v34 = vpack.c.bf16 %v397_v47, %v2908_v62 }
  0x77   : > { %2300 = vrcp.f32 %v717_v40  ;;  %vm4658_vm14 = vcmp.eq.f32.partialorder %v2615_v32, 7.0  ;;  %v724_v4 = vmul.f32 %v2293_v17, %v2448_v30  ;;  %v911_v53 = vsel %vm4659_vm7, %v2662_v41, 0.0 }
  0x78   : > { %v897_v2 = vsel %vm4666_vm9, %v2900_v39, %v893_v57  ;;  %v898_v6 = vsel %vm4667_vm8, %v2903_v12, %v894_v22  ;;  %v912_v57 = vsel %vm4658_vm14, %v2673_v50, 0.0  ;;  %vm4761_vm15 = vcmp.eq.f32.partialorder %v2477_v54, 6.0 }
  0x79   : > { %v2295_v19 = vpop.eup %2294  ;;  %v901_v40 = vsel %vm4653_vm10, %v2843_v16, %v897_v2  ;;  %v902_v30 = vsel %vm4652_vm13, %v2845_v45, %v898_v6  ;;  %v915_v22 = vsel %vm4761_vm15, %v2671_v42, %v911_v53  ;;  %v727_v38 = vpack.c.bf16 %v724_v4, %v723_v21 }
  0x7a   : > { %v2297_v5 = vpop.eup %2296  ;;  %v904_v8 = vpack.c.bf16 %v902_v30, %v901_v40  ;;  %v718_v62 = vadd.f32 1.0, %v2295_v19  ;;  %vm4762_vm6 = vcmp.eq.f32.partialorder %v2615_v32, 6.0  ;;  %vm4763_vm13 = vcmp.eq.f32.partialorder %v2477_v54, 5.0 }
  0x7b   : > { %v916_v47 = vsel %vm4762_vm6, %v2677_v58, %v912_v57  ;;  %v2299_v17 = vpop.eup %2298  ;;  %v294_v2 = vmul.f32 %v2297_v5, %v2429_v13  ;;  %v919_v6 = vsel %vm4763_vm13, %v2697_v14, %v915_v22  ;;  %vm4764_vm10 = vcmp.eq.f32.partialorder %v2615_v32, 5.0  ;;  %2136 = vmatpush3.bf16.msra.mxu1 %v727_v38 }
  0x7c   : > { %v920_v50 = vsel %vm4764_vm10, %v2708_v29, %v916_v47  ;;  %vm4765_vm15 = vcmp.eq.f32.partialorder %v2464_v44, 7.0  ;;  %v295_v4 = vmul.f32 %v2299_v17, %v2432_v15  ;;  %2302 = vrcp.f32 %v718_v62  ;;  %2137 = vmatprep.subr.bf16.mxu1 %v904_v8 }
  0x7d   : > { %v482_v21 = vsel %vm4765_vm15, %v2611_v31, 0.0  ;;  %v2955_v13 = vsel %vm4657_vm0, %v2669_v49, %v919_v6  ;;  %v2960_v53 = vsel %vm4656_vm4, %v2675_v56, %v920_v50  ;;  %vm4766_vm10 = vcmp.eq.f32.partialorder %v2472_v52, 7.0 }
  0x7e   : > { %v927_v19 = vpack.c.bf16 %v2960_v53, %v2955_v13  ;;  %v483_v40 = vsel %vm4766_vm10, %v2619_v36, 0.0  ;;  %vm4767_vm13 = vcmp.eq.f32.partialorder %v2464_v44, 6.0  ;;  %vm799_vm6 = vcmp.eq.f32.partialorder %v2477_v54, 0.0  ;;  %v4787_v53 = vld [vmem:[#allocation15_spill] sm:$0xff] }
  0x7f   : > { %v486_v15 = vsel %vm4767_vm13, %v2606_v28, %v482_v21  ;;  %v297_v30 = vpack.c.bf16 %v295_v4, %v294_v2  ;;  %vm4768_vm15 = vcmp.eq.f32.partialorder %v2472_v52, 6.0  ;;  %vm4769_vm4 = vcmp.eq.f32.partialorder %v2464_v44, 5.0 }
  0x80   : > { %v487_v50 = vsel %vm4768_vm15, %v2617_v35, %v483_v40  ;;  %v490_v57 = vsel %vm4769_vm4, %v2638_v55, %v486_v15  ;;  %vm800_vm0 = vcmp.eq.f32.partialorder %v2615_v32, 0.0  ;;  %vm4770_vm10 = vcmp.eq.f32.partialorder %v2472_v52, 5.0 }
  0x81   : > { %v491_v22 = vsel %vm4770_vm10, %v2644_v59, %v487_v50  ;;  %vm4771_vm13 = vcmp.eq.f32.partialorder %v2464_v44, 4.0  ;;  %vm4663_vm14 = vcmp.eq.f32.partialorder %v2477_v54, 1.0  ;;  %vm4664_vm7 = vcmp.eq.f32.partialorder %v2615_v32, 1.0  ;;  %2113 = vmatpush3.bf16.msra.mxu0 %v297_v30  ;;  %v2301_v8 = vpop.eup %2300 }
  0x82   : > { %v494_v5 = vsel %vm4771_vm13, %v2600_v9, %v490_v57  ;;  %vm4772_vm15 = vcmp.eq.f32.partialorder %v2472_v52, 4.0  ;;  %vm4665_vm4 = vcmp.eq.f32.partialorder %v2477_v54, 2.0  ;;  %vm4662_vm1 = vcmp.eq.f32.partialorder %v2615_v32, 2.0 }
  0x83   : > { %v495_v38 = vsel %vm4772_vm15, %v2602_v18, %v491_v22  ;;  %vm370_vm5 = vcmp.eq.f32.partialorder %v2464_v44, 0.0  ;;  %v4773_v62 = vpack.c.bf16 %v2793_v25, %v2788_v20  ;;  %v819_v17 = vsel %vm4665_vm4, %v2671_v42, %v2823_v48 }
  0x84   : > { %v497_v47 = vpack.c.bf16 %v495_v38, %v494_v5  ;;  %v820_v2 = vsel %vm4662_vm1, %v2677_v58, %v2828_v51  ;;  %vm371_vm10 = vcmp.eq.f32.partialorder %v2472_v52, 0.0  ;;  %v725_v6 = vmul.f32 %v2301_v8, %v2452_v33  ;;  %v4776_v5 = vld [vmem:[#allocation4_spill] sm:$0xff] }
  0x85   : > { %2114 = vmatprep.subr.bf16.mxu0 %v4773_v62  ;;  %v823_v20 = vsel %vm4663_vm14, %v2697_v14, %v819_v17  ;;  %v824_v25 = vsel %vm4664_vm7, %v2708_v29, %v820_v2  ;;  %vm374_vm13 = vcmp.eq.f32.partialorder %v2464_v44, 1.0  ;;  %vm375_vm15 = vcmp.eq.f32.partialorder %v2472_v52, 1.0 }
  0x86   : > { %v827_v48 = vsel %vm799_vm6, %v2669_v49, %v823_v20  ;;  %v828_v51 = vsel %vm800_vm0, %v2675_v56, %v824_v25  ;;  %vm378_vm1 = vcmp.eq.f32.partialorder %v2464_v44, 2.0  ;;  %2115 = vmatpush3.bf16.msra.mxu0 %v400_v34  ;;  %vm379_vm14 = vcmp.eq.f32.partialorder %v2472_v52, 2.0  ;;  %v2303_v15 = vpop.eup %2302  ;;  %v4777_v25 = vld [vmem:[#allocation10_spill] sm:$0xff] }
  0x87   : > { %v831_v33 = vpack.c.bf16 %v828_v51, %v827_v48  ;;  %vm4774_vm7 = vcmp.eq.f32.partialorder %v2464_v44, 3.0  ;;  %vm4775_vm4 = vcmp.eq.f32.partialorder %v2472_v52, 3.0  ;;  %2116 = vmatprep.subr.bf16.mxu0 %v497_v47  ;;  %vm909_vm0 = vcmp.eq.f32.partialorder %v2781_v11, 7.0 }
  0x88   : > { %v386_v21 = vsel %vm4774_vm7, %v2611_v31, 0.0  ;;  %v387_v4 = vsel %vm4775_vm4, %v2619_v36, 0.0  ;;  %vm910_vm6 = vcmp.eq.f32.partialorder %v2783_v10, 7.0  ;;  %v913_v57 = vsel %vm909_vm0, %v2850_v7, 0.0 }
  0x89   : > { %v390_v40 = vsel %vm378_vm1, %v2606_v28, %v386_v21  ;;  %v391_v34 = vsel %vm379_vm14, %v2617_v35, %v387_v4  ;;  %v914_v22 = vsel %vm910_vm6, %v2852_v46, 0.0  ;;  %v726_v38 = vmul.f32 %v2303_v15, %v4776_v5 }
  0x8a   : > { %v394_v30 = vsel %vm374_vm13, %v2638_v55, %v390_v40  ;;  %v395_v50 = vsel %vm375_vm15, %v2644_v59, %v391_v34  ;;  %v917_v47 = vsel %vm885_vm11, %v2854_v43, %v913_v57  ;;  %v918_v2 = vsel %vm886_vm3, %v2860_v61, %v914_v22  ;;  %v4779_v40 = vld [vmem:[#allocation13_spill] sm:$0xff] }
  0x8b   : > { %v398_v8 = vsel %vm370_vm5, %v2600_v9, %v394_v30  ;;  %v399_v62 = vsel %vm371_vm10, %v2602_v18, %v395_v50  ;;  %v921_v20 = vsel %vm4669_vm12, %v2900_v39, %v917_v47  ;;  %vm4778_vm5 = vcmp.eq.f32.partialorder %v2443_v26, 7.0 }
  0x8c   : > { %v401_v17 = vpack.c.bf16 %v399_v62, %v398_v8  ;;  %v508_v48 = vsel %vm4778_vm5, %v2495_v0, %v4777_v25  ;;  %v728_v51 = vpack.c.bf16 %v726_v38, %v725_v6  ;;  %v922_v21 = vsel %vm4668_vm2, %v2903_v12, %v918_v2  ;;  %v4785_v8 = vld [vmem:[#allocation14_spill] sm:$0xff] }
  0x8d   : > { %v925_v4 = vsel %vm4666_vm9, %v2843_v16, %v921_v20  ;;  %vm4780_vm7 = vcmp.eq.f32.partialorder %v2445_v27, 7.0  ;;  %v926_v15 = vsel %vm4667_vm8, %v2845_v45, %v922_v21  ;;  %vm4781_vm4 = vcmp.eq.f32.partialorder %v2443_v26, 6.0  ;;  %v4792_v21 = vld [vmem:[#allocation12_spill] sm:$0xff] }
  0x8e   : > { %v509_v34 = vsel %vm4780_vm7, %v2497_v1, %v4779_v40  ;;  %2117 = vmatpush3.bf16.msra.mxu0 %v401_v17  ;;  %v512_v6 = vsel %vm4781_vm4, %v2533_v23, %v508_v48  ;;  %vm4782_vm10 = vcmp.eq.f32.partialorder %v2445_v27, 6.0  ;;  %vm801_vm5 = vcmp.eq.f32.partialorder %v2781_v11, 0.0  ;;  %2138 = vmatpush3.bf16.msra.mxu1 %v728_v51 }
  0x8f   : > { %v513_v30 = vsel %vm4782_vm10, %v2536_v24, %v509_v34  ;;  %v928_v50 = vpack.c.bf16 %v926_v15, %v925_v4  ;;  %vm4783_vm7 = vcmp.eq.f32.partialorder %v2443_v26, 5.0  ;;  %vm4784_vm9 = vcmp.eq.f32.partialorder %v2445_v27, 5.0  ;;  %2139 = vmatprep.subr.bf16.mxu1 %v927_v19 }
  0x90   : > { %v516_v57 = vsel %vm4783_vm7, %v2493_v63, %v512_v6  ;;  %v517_v22 = vsel %vm4784_vm9, %v2500_v3, %v513_v30  ;;  %vm802_vm8 = vcmp.eq.f32.partialorder %v2783_v10, 0.0  ;;  %vm805_vm4 = vcmp.eq.f32.partialorder %v2781_v11, 1.0 }
  0x91   : > { %v520_v5 = vpack.c.bf16 %v517_v22, %v516_v57  ;;  %vm4672_vm10 = vcmp.eq.f32.partialorder %v2783_v10, 1.0  ;;  %vm4670_vm2 = vcmp.eq.f32.partialorder %v2781_v11, 2.0  ;;  %vm810_vm12 = vcmp.eq.f32.partialorder %v2783_v10, 2.0 }
  0x92   : > { %v821_v38 = vsel %vm4670_vm2, %v2854_v43, %v2867_v37  ;;  %vm4786_vm9 = vcmp.eq.f32.partialorder %v2443_v26, 2.0  ;;  %vm4788_vm7 = vcmp.eq.f32.partialorder %v2445_v27, 2.0  ;;  %v822_v62 = vsel %vm810_vm12, %v2860_v61, %v2872_v60  ;;  %2140 = vmatpush3.bf16.msra.mxu1 %v831_v33 }
  0x93   : > { %v416_v13 = vsel %vm4786_vm9, %v2533_v23, %v4785_v8  ;;  %v417_v19 = vsel %vm4788_vm7, %v2536_v24, %v4787_v53  ;;  %2118 = vmatprep.subr.bf16.mxu0 %v520_v5  ;;  %v825_v37 = vsel %vm805_vm4, %v2900_v39, %v821_v38  ;;  %vm4789_vm2 = vcmp.eq.f32.partialorder %v2443_v26, 1.0  ;;  %2141 = vmatprep.subr.bf16.mxu1 %v928_v50 }
  0x94   : > { %v420_v47 = vsel %vm4789_vm2, %v2493_v63, %v416_v13  ;;  %vm4790_vm9 = vcmp.eq.f32.partialorder %v2445_v27, 1.0  ;;  %v826_v2 = vsel %vm4672_vm10, %v2903_v12, %v822_v62  ;;  %v829_v60 = vsel %vm801_vm5, %v2843_v16, %v825_v37 }
  0x95   : > { %v421_v17 = vsel %vm4790_vm9, %v2500_v3, %v417_v19  ;;  %vm4671_vm7 = vcmp.eq.f32.partialorder %v2477_v54, 8.0  ;;  %v830_v25 = vsel %vm802_vm8, %v2845_v45, %v826_v2  ;;  %vm4673_vm2 = vcmp.eq.f32.partialorder %v2615_v32, 8.0 }
  0x96   : > { %v424_v20 = vpack.c.bf16 %v421_v17, %v420_v47  ;;  %v935_v33 = vsel %vm4671_vm7, %v2662_v41, 0.0  ;;  %vm4791_vm9 = vcmp.eq.f32.partialorder %v2464_v44, 8.0  ;;  %v832_v51 = vpack.c.bf16 %v830_v25, %v829_v60 }
  0x97   : > { %v506_v48 = vsel %vm4791_vm9, %v2611_v31, 0.0  ;;  %v936_v4 = vsel %vm4673_vm2, %v4792_v21, 0.0  ;;  %vm4793_vm5 = vcmp.eq.f32.partialorder %v2477_v54, 7.0  ;;  %vm4794_vm8 = vcmp.eq.f32.partialorder %v2472_v52, 8.0 }
  0x98   : > { %2119 = vmatpush3.bf16.msra.mxu0 %v424_v20  ;;  %v939_v40 = vsel %vm4793_vm5, %v2671_v42, %v935_v33  ;;  %v507_v34 = vsel %vm4794_vm8, %v2619_v36, 0.0  ;;  %vm4795_vm7 = vcmp.eq.f32.partialorder %v2615_v32, 7.0  ;;  %vm4796_vm9 = vcmp.eq.f32.partialorder %v2477_v54, 6.0  ;;  %2142 = vmatpush3.bf16.msra.mxu1 %v832_v51 }
  0x99   : > { %v940_v15 = vsel %vm4795_vm7, %v2677_v58, %v936_v4  ;;  %v943_v6 = vsel %vm4796_vm9, %v2697_v14, %v939_v40  ;;  %vm4797_vm10 = vcmp.eq.f32.partialorder %v2464_v44, 7.0  ;;  %vm4798_vm2 = vcmp.eq.f32.partialorder %v2472_v52, 7.0 }
  0x9a   : > { %v510_v30 = vsel %vm4797_vm10, %v2606_v28, %v506_v48  ;;  %v511_v50 = vsel %vm4798_vm2, %v2617_v35, %v507_v34  ;;  %vm4799_vm5 = vcmp.eq.f32.partialorder %v2615_v32, 6.0  ;;  %vm4800_vm7 = vcmp.eq.f32.partialorder %v2477_v54, 5.0 }
  0x9b   : > { %v944_v57 = vsel %vm4799_vm5, %v2708_v29, %v940_v15  ;;  %v947_v22 = vsel %vm4800_vm7, %v2669_v49, %v943_v6  ;;  %vm4801_vm8 = vcmp.eq.f32.partialorder %v2464_v44, 6.0  ;;  %vm4802_vm10 = vcmp.eq.f32.partialorder %v2472_v52, 6.0 }
  0x9c   : > { %v514_v5 = vsel %vm4801_vm8, %v2638_v55, %v510_v30  ;;  %v515_v38 = vsel %vm4802_vm10, %v2644_v59, %v511_v50  ;;  %vm4803_vm2 = vcmp.eq.f32.partialorder %v2615_v32, 5.0  ;;  %vm4804_vm9 = vcmp.eq.f32.partialorder %v2464_v44, 5.0 }
  0x9d   : > { %v948_v8 = vsel %vm4803_vm2, %v2675_v56, %v944_v57  ;;  %v518_v13 = vsel %vm4804_vm9, %v2600_v9, %v514_v5  ;;  %vm4805_vm5 = vcmp.eq.f32.partialorder %v2472_v52, 5.0  ;;  %vm4806_vm7 = vcmp.eq.f32.partialorder %v2477_v54, 4.0 }
  0x9e   : > { %v519_v53 = vsel %vm4805_vm5, %v2602_v18, %v515_v38  ;;  %v839_v19 = vsel %vm4806_vm7, %v2662_v41, 0.0  ;;  %v951_v62 = vpack.c.bf16 %v948_v8, %v947_v22  ;;  %vm4807_vm8 = vcmp.eq.f32.partialorder %v2615_v32, 4.0  ;;  %v4818_v38 = vld [vmem:[#allocation8_spill] sm:$0xff] }
  0x9f   : > { %v521_v37 = vpack.c.bf16 %v519_v53, %v518_v13  ;;  %v840_v47 = vsel %vm4807_vm8, %v4792_v21, 0.0  ;;  %vm4808_vm10 = vcmp.eq.f32.partialorder %v2477_v54, 3.0  ;;  %vm4809_vm2 = vcmp.eq.f32.partialorder %v2615_v32, 3.0 }
  0xa0   : > { %v843_v17 = vsel %vm4808_vm10, %v2671_v42, %v839_v19  ;;  %v844_v2 = vsel %vm4809_vm2, %v2677_v58, %v840_v47  ;;  %vm4810_vm9 = vcmp.eq.f32.partialorder %v2477_v54, 2.0  ;;  %vm4811_vm5 = vcmp.eq.f32.partialorder %v2464_v44, 4.0  ;;  %2143 = vmatprep.subr.bf16.mxu1 %v951_v62  ;;  %v4820_v62 = vld [vmem:[#allocation9_spill] sm:$0xff] }
  0xa1   : > { %v847_v60 = vsel %vm4810_vm9, %v2697_v14, %v843_v17  ;;  %v410_v20 = vsel %vm4811_vm5, %v2611_v31, 0.0  ;;  %vm4812_vm7 = vcmp.eq.f32.partialorder %v2472_v52, 4.0  ;;  %2120 = vmatprep.subr.bf16.mxu0 %v521_v37  ;;  %vm4813_vm8 = vcmp.eq.f32.partialorder %v2615_v32, 2.0 }
  0xa2   : > { %v411_v25 = vsel %vm4812_vm7, %v2619_v36, 0.0  ;;  %v848_v33 = vsel %vm4813_vm8, %v2708_v29, %v844_v2  ;;  %vm4814_vm10 = vcmp.eq.f32.partialorder %v2477_v54, 1.0  ;;  %vm4815_vm2 = vcmp.eq.f32.partialorder %v2464_v44, 3.0 }
  0xa3   : > { %v851_v48 = vsel %vm4814_vm10, %v2669_v49, %v847_v60  ;;  %v414_v51 = vsel %vm4815_vm2, %v2606_v28, %v410_v20  ;;  %vm933_vm9 = vcmp.eq.f32.partialorder %v2781_v11, 8.0  ;;  %vm4816_vm5 = vcmp.eq.f32.partialorder %v2615_v32, 1.0 }
  0xa4   : > { %v852_v4 = vsel %vm4816_vm5, %v2675_v56, %v848_v33  ;;  %vm4817_vm7 = vcmp.eq.f32.partialorder %v2472_v52, 3.0  ;;  %v418_v34 = vsel %vm378_vm1, %v2638_v55, %v414_v51  ;;  %vm934_vm8 = vcmp.eq.f32.partialorder %v2783_v10, 8.0 }
  0xa5   : > { %v415_v40 = vsel %vm4817_vm7, %v2617_v35, %v411_v25  ;;  %v855_v15 = vpack.c.bf16 %v852_v4, %v851_v48  ;;  %v422_v30 = vsel %vm374_vm13, %v2600_v9, %v418_v34  ;;  %v937_v50 = vsel %vm933_vm9, %v2850_v7, 0.0  ;;  %v4830_v34 = vld [vmem:[#allocation6_spill] sm:$0xff] }
  0xa6   : > { %v419_v6 = vsel %vm379_vm14, %v2644_v59, %v415_v40  ;;  %v938_v22 = vsel %vm934_vm8, %v2852_v46, 0.0  ;;  %v941_v5 = vsel %vm909_vm0, %v2854_v43, %v937_v50  ;;  %vm4819_vm13 = vcmp.eq.f32.partialorder %v2443_v26, 7.0  ;;  %v4833_v50 = vld [vmem:[#allocation7_spill] sm:$0xff] }
  0xa7   : > { %v423_v57 = vsel %vm375_vm15, %v2602_v18, %v419_v6  ;;  %v536_v8 = vsel %vm4819_vm13, %v2533_v23, %v4818_v38  ;;  %2144 = vmatpush3.bf16.msra.mxu1 %v855_v15  ;;  %v942_v53 = vsel %vm910_vm6, %v2860_v61, %v938_v22  ;;  %v945_v19 = vsel %vm885_vm11, %v2900_v39, %v941_v5 }
  0xa8   : > { %v425_v13 = vpack.c.bf16 %v423_v57, %v422_v30  ;;  %vm4821_vm15 = vcmp.eq.f32.partialorder %v2445_v27, 7.0  ;;  %v946_v47 = vsel %vm886_vm3, %v2903_v12, %v942_v53  ;;  %vm4822_vm10 = vcmp.eq.f32.partialorder %v2781_v11, 5.0 }
  0xa9   : > { %v537_v37 = vsel %vm4821_vm15, %v2536_v24, %v4820_v62  ;;  %v949_v17 = vsel %vm4822_vm10, %v2843_v16, %v945_v19  ;;  %vm4823_vm2 = vcmp.eq.f32.partialorder %v2443_v26, 6.0  ;;  %vm4824_vm5 = vcmp.eq.f32.partialorder %v2445_v27, 6.0 }
  0xaa   : > { %v540_v2 = vsel %vm4823_vm2, %v2493_v63, %v536_v8  ;;  %v541_v60 = vsel %vm4824_vm5, %v2500_v3, %v537_v37  ;;  %2121 = vmatpush3.bf16.msra.mxu0 %v425_v13  ;;  %vm4825_vm7 = vcmp.eq.f32.partialorder %v2783_v10, 5.0  ;;  %vm4826_vm13 = vcmp.eq.f32.partialorder %v2781_v11, 4.0 }
  0xab   : > { %v950_v20 = vsel %vm4825_vm7, %v2845_v45, %v946_v47  ;;  %v544_v25 = vpack.c.bf16 %v541_v60, %v540_v2  ;;  %v841_v33 = vsel %vm4826_vm13, %v2850_v7, 0.0  ;;  %vm4827_vm15 = vcmp.eq.f32.partialorder %v2783_v10, 4.0 }
  0xac   : > { %v842_v48 = vsel %vm4827_vm15, %v2852_v46, 0.0  ;;  %v952_v51 = vpack.c.bf16 %v950_v20, %v949_v17  ;;  %vm4828_vm10 = vcmp.eq.f32.partialorder %v2781_v11, 3.0  ;;  %vm4829_vm2 = vcmp.eq.f32.partialorder %v2783_v10, 3.0 }
  0xad   : > { %v845_v4 = vsel %vm4828_vm10, %v2854_v43, %v841_v33  ;;  %v846_v40 = vsel %vm4829_vm2, %v2860_v61, %v842_v48  ;;  %vm4831_vm5 = vcmp.eq.f32.partialorder %v2443_v26, 5.0  ;;  %2122 = vmatprep.subr.bf16.mxu0 %v544_v25  ;;  %vm4832_vm7 = vcmp.eq.f32.partialorder %v2781_v11, 2.0 }
  0xae   : > { %v432_v15 = vsel %vm4831_vm5, %v4830_v34, 0.0  ;;  %v849_v6 = vsel %vm4832_vm7, %v2900_v39, %v845_v4  ;;  %v850_v30 = vsel %vm810_vm12, %v2903_v12, %v846_v40  ;;  %vm4834_vm13 = vcmp.eq.f32.partialorder %v2445_v27, 5.0  ;;  %2145 = vmatprep.subr.bf16.mxu1 %v952_v51 }
  0xaf   : > { %v433_v57 = vsel %vm4834_vm13, %v4833_v50, 0.0  ;;  %vm4835_vm15 = vcmp.eq.f32.partialorder %v2443_v26, 4.0  ;;  %v853_v5 = vsel %vm805_vm4, %v2843_v16, %v849_v6  ;;  %vm4836_vm10 = vcmp.eq.f32.partialorder %v2783_v10, 1.0 }
  0xb0   : > { %v436_v22 = vsel %vm4835_vm15, %v2495_v0, %v432_v15  ;;  %v854_v38 = vsel %vm4836_vm10, %v2845_v45, %v850_v30  ;;  %vm4837_vm2 = vcmp.eq.f32.partialorder %v2445_v27, 4.0  ;;  %vm4838_vm5 = vcmp.eq.f32.partialorder %v2443_v26, 3.0 }
  0xb1   : > { %v437_v8 = vsel %vm4837_vm2, %v2497_v1, %v433_v57  ;;  %v440_v13 = vsel %vm4838_vm5, %v2533_v23, %v436_v22  ;;  %v856_v53 = vpack.c.bf16 %v854_v38, %v853_v5  ;;  %vm4839_vm7 = vcmp.eq.f32.partialorder %v2445_v27, 3.0 }
  0xb2   : > { %v441_v0 = vsel %vm4839_vm7, %v2536_v24, %v437_v8  ;;  %vm4840_vm4 = vcmp.eq.f32.partialorder %v2443_v26, 2.0  ;;  %vm955_vm13 = vcmp.eq.f32.partialorder %v2477_v54, 9.0  ;;  %vm4841_vm15 = vcmp.eq.f32.partialorder %v2445_v27, 2.0 }
  0xb3   : > { %v444_v19 = vsel %vm4840_vm4, %v2493_v63, %v440_v13  ;;  %v445_v62 = vsel %vm4841_vm15, %v2500_v3, %v441_v0  ;;  %vm4674_vm10 = vcmp.eq.f32.partialorder %v2615_v32, 9.0  ;;  %v959_v1 = vsel %vm955_vm13, %v2662_v41, 0.0  ;;  %2146 = vmatpush3.bf16.msra.mxu1 %v856_v53 }
  0xb4   : > { %vm4842_vm2 = vcmp.eq.f32.partialorder %v2464_v44, 9.0  ;;  %v448_v24 = vpack.c.bf16 %v445_v62, %v444_v19  ;;  %v960_v26 = vsel %vm4674_vm10, %v4792_v21, 0.0  ;;  %vm4843_vm5 = vcmp.eq.f32.partialorder %v2477_v54, 8.0 }
  0xb5   : > { %v530_v23 = vsel %vm4842_vm2, %v2611_v31, 0.0  ;;  %v963_v27 = vsel %vm4843_vm5, %v2671_v42, %v959_v1  ;;  %vm4844_vm7 = vcmp.eq.f32.partialorder %v2472_v52, 9.0  ;;  %vm4845_vm4 = vcmp.eq.f32.partialorder %v2615_v32, 8.0 }
  0xb6   : > { %v531_v63 = vsel %vm4844_vm7, %v2619_v36, 0.0  ;;  %v964_v3 = vsel %vm4845_vm4, %v2677_v58, %v960_v26  ;;  %vm4846_vm15 = vcmp.eq.f32.partialorder %v2477_v54, 7.0  ;;  %vm4847_vm2 = vcmp.eq.f32.partialorder %v2464_v44, 8.0  ;;  %2123 = vmatpush3.bf16.msra.mxu0 %v448_v24  ;;  %v2271_v24 = vld [vmem:[%s4608_s1] ss:$12 sps:$4 sm:$0xff]  }
  0xb7   : > { %v967_v37 = vsel %vm4846_vm15, %v2697_v14, %v963_v27  ;;  %v534_v47 = vsel %vm4847_vm2, %v2606_v28, %v530_v23  ;;  %vm4848_vm10 = vcmp.eq.f32.partialorder %v2472_v52, 8.0  ;;  %vm4849_vm5 = vcmp.eq.f32.partialorder %v2615_v32, 7.0 }
  0xb8   : > { %v535_v17 = vsel %vm4848_vm10, %v2617_v35, %v531_v63  ;;  %v968_v2 = vsel %vm4849_vm5, %v2708_v29, %v964_v3  ;;  %vm4850_vm7 = vcmp.eq.f32.partialorder %v2477_v54, 6.0  ;;  %vm4851_vm4 = vcmp.eq.f32.partialorder %v2464_v44, 7.0 }
  0xb9   : > { %v971_v60 = vsel %vm4850_vm7, %v2669_v49, %v967_v37  ;;  %v538_v20 = vsel %vm4851_vm4, %v2638_v55, %v534_v47  ;;  %vm4852_vm15 = vcmp.eq.f32.partialorder %v2472_v52, 7.0  ;;  %vm4853_vm10 = vcmp.eq.f32.partialorder %v2615_v32, 6.0 }
  0xba   : > { %v539_v25 = vsel %vm4852_vm15, %v2644_v59, %v535_v17  ;;  %v972_v33 = vsel %vm4853_vm10, %v2675_v56, %v968_v2  ;;  %vm4854_vm2 = vcmp.eq.f32.partialorder %v2464_v44, 6.0  ;;  %vm4855_vm5 = vcmp.eq.f32.partialorder %v2472_v52, 6.0 }
  0xbb   : > { %v542_v48 = vsel %vm4854_vm2, %v2600_v9, %v538_v20  ;;  %v543_v51 = vsel %vm4855_vm5, %v2602_v18, %v539_v25  ;;  %vm4856_vm7 = vcmp.eq.f32.partialorder %v2477_v54, 5.0  ;;  %v975_v40 = vpack.c.bf16 %v972_v33, %v971_v60 }
  0xbc   : > { %v863_v4 = vsel %vm4856_vm7, %v2662_v41, 0.0  ;;  %v545_v34 = vpack.c.bf16 %v543_v51, %v542_v48  ;;  %vm4857_vm4 = vcmp.eq.f32.partialorder %v2615_v32, 5.0  ;;  %vm4858_vm15 = vcmp.eq.f32.partialorder %v2477_v54, 4.0  ;;  %v2336_v48 = vld [vmem:[%s2421_s26 + $0x20] sm:$0xff]  }
  0xbd   : > { %v864_v15 = vsel %vm4857_vm4, %v4792_v21, 0.0  ;;  %v867_v6 = vsel %vm4858_vm15, %v2671_v42, %v863_v4  ;;  %vm4859_vm10 = vcmp.eq.f32.partialorder %v2615_v32, 4.0  ;;  %vm4860_vm2 = vcmp.eq.f32.partialorder %v2477_v54, 3.0  ;;  %2147 = vmatprep.subr.bf16.mxu1 %v975_v40 }
  0xbe   : > { %v868_v30 = vsel %vm4859_vm10, %v2677_v58, %v864_v15  ;;  %v871_v50 = vsel %vm4860_vm2, %v2697_v14, %v867_v6  ;;  %vm4861_vm5 = vcmp.eq.f32.partialorder %v2464_v44, 5.0  ;;  %vm4862_vm7 = vcmp.eq.f32.partialorder %v2472_v52, 5.0  ;;  %2124 = vmatprep.subr.bf16.mxu0 %v545_v34  ;;  %v4879_v34 = vld [vmem:[#allocation5_spill] sm:$0xff] }
  0xbf   : > { %v434_v57 = vsel %vm4861_vm5, %v2611_v31, 0.0  ;;  %v435_v22 = vsel %vm4862_vm7, %v2619_v36, 0.0  ;;  %vm4863_vm4 = vcmp.eq.f32.partialorder %v2615_v32, 3.0  ;;  %vm4864_vm15 = vcmp.eq.f32.partialorder %v2477_v54, 2.0 }
  0xc0   : > { %v872_v5 = vsel %vm4863_vm4, %v2708_v29, %v868_v30  ;;  %v875_v38 = vsel %vm4864_vm15, %v2669_v49, %v871_v50  ;;  %vm4865_vm10 = vcmp.eq.f32.partialorder %v2464_v44, 4.0  ;;  %vm957_vm2 = vcmp.eq.f32.partialorder %v2781_v11, 9.0 }
  0xc1   : > { %v438_v8 = vsel %vm4865_vm10, %v2606_v28, %v434_v57  ;;  %vm4866_vm5 = vcmp.eq.f32.partialorder %v2615_v32, 2.0  ;;  %vm4867_vm7 = vcmp.eq.f32.partialorder %v2472_v52, 4.0  ;;  %vm4868_vm4 = vcmp.eq.f32.partialorder %v2464_v44, 3.0 }
  0xc2   : > { %v876_v31 = vsel %vm4866_vm5, %v2675_v56, %v872_v5  ;;  %v439_v36 = vsel %vm4867_vm7, %v2617_v35, %v435_v22  ;;  %v442_v13 = vsel %vm4868_vm4, %v2638_v55, %v438_v8  ;;  %vm958_vm15 = vcmp.eq.f32.partialorder %v2783_v10, 9.0 }
  0xc3   : > { %v879_v53 = vpack.c.bf16 %v876_v31, %v875_v38  ;;  %vm4869_vm10 = vcmp.eq.f32.partialorder %v2472_v52, 3.0  ;;  %v446_v0 = vsel %vm378_vm1, %v2600_v9, %v442_v13  ;;  %v961_v19 = vsel %vm957_vm2, %v2850_v7, 0.0 }
  0xc4   : > { %v443_v28 = vsel %vm4869_vm10, %v2644_v59, %v439_v36  ;;  %v962_v55 = vsel %vm958_vm15, %v2852_v46, 0.0  ;;  %v965_v59 = vsel %vm933_vm9, %v2854_v43, %v961_v19  ;;  %vm4870_vm5 = vcmp.eq.f32.partialorder %v2781_v11, 5.0 }
  0xc5   : > { %v447_v35 = vsel %vm379_vm14, %v2602_v18, %v443_v28  ;;  %v865_v44 = vsel %vm4870_vm5, %v2850_v7, 0.0  ;;  %2148 = vmatpush3.bf16.msra.mxu1 %v879_v53  ;;  %v966_v62 = vsel %vm934_vm8, %v2860_v61, %v962_v55  ;;  %v969_v52 = vsel %vm909_vm0, %v2900_v39, %v965_v59 }
  0xc6   : > { %v449_v9 = vpack.c.bf16 %v447_v35, %v446_v0  ;;  %vm4871_vm14 = vcmp.eq.f32.partialorder %v2783_v10, 5.0  ;;  %v970_v1 = vsel %vm910_vm6, %v2903_v12, %v966_v62  ;;  %v973_v23 = vsel %vm885_vm11, %v2843_v16, %v969_v52 }
  0xc7   : > { %v866_v18 = vsel %vm4871_vm14, %v2852_v46, 0.0  ;;  %vm4872_vm1 = vcmp.eq.f32.partialorder %v2781_v11, 4.0  ;;  %vm4873_vm7 = vcmp.eq.f32.partialorder %v2783_v10, 4.0  ;;  %v974_v63 = vsel %vm886_vm3, %v2845_v45, %v970_v1 }
  0xc8   : > { %v869_v26 = vsel %vm4872_vm1, %v2854_v43, %v865_v44  ;;  %v870_v27 = vsel %vm4873_vm7, %v2860_v61, %v866_v18  ;;  %2125 = vmatpush3.bf16.msra.mxu0 %v449_v9  ;;  %vm4874_vm11 = vcmp.eq.f32.partialorder %v2781_v11, 3.0  ;;  %vm4875_vm4 = vcmp.eq.f32.partialorder %v2783_v10, 3.0  ;;  %v4887_v18 = vld [vmem:[#allocation11_spill] sm:$0xff] }
  0xc9   : > { %v873_v3 = vsel %vm4874_vm11, %v2900_v39, %v869_v26  ;;  %v874_v37 = vsel %vm4875_vm4, %v2903_v12, %v870_v27  ;;  %vm979_vm10 = vcmp.eq.f32.partialorder %v2477_v54, 10.0  ;;  %v976_v47 = vpack.c.bf16 %v974_v63, %v973_v23  ;;  %v3571_v63 = vld [vmem:[%s4608_s1 + $0x4] ss:$12 sps:$4 sm:$0xff]  }
  0xca   : > { %vm4876_vm5 = vcmp.eq.f32.partialorder %v2781_v11, 2.0  ;;  %v878_v2 = vsel %vm810_vm12, %v2845_v45, %v874_v37  ;;  %v4877_v60 = vmov 0.0   ;;  %vm980_vm3 = vcmp.eq.f32.partialorder %v2615_v32, 10.0 }
  0xcb   : > { %v877_v17 = vsel %vm4876_vm5, %v2843_v16, %v873_v3  ;;  %2218 = vmatprep.subr.bf16.mxu0 %v4877_v60  ;;  %v983_v25 = vsel %vm979_vm10, %v2662_v41, 0.0  ;;  %v984_v33 = vsel %vm980_vm3, %v4792_v21, 0.0  ;;  %v3478_v51 = vunpack.c.h.bf16 %v2336_v48  ;;  %2149 = vmatprep.subr.bf16.mxu1 %v976_v47 }
  0xcc   : > { %v880_v20 = vpack.c.bf16 %v878_v2, %v877_v17  ;;  %645 = vmatmul.mubr.bf16.vlgmr.msra.gmra.mrb[0].mxu0 %v2271_v24  ;;  %v987_v4 = vsel %vm955_vm13, %v2671_v42, %v983_v25  ;;  %vm4878_vm12 = vcmp.eq.f32.partialorder %v2615_v32, 9.0  ;;  %v2046_v15 = vadd.f32 2.2, %v4879_v34 }
  0xcd   : > { %v988_v40 = vsel %vm4878_vm12, %v2677_v58, %v984_v33  ;;  %vm981_vm14 = vcmp.eq.f32.partialorder %v2781_v11, 10.0  ;;  %vm4880_vm1 = vcmp.eq.f32.partialorder %v2477_v54, 8.0  ;;  %vm4881_vm7 = vcmp.eq.f32.partialorder %v2615_v32, 8.0 }
  0xce   : > { %2150 = vmatpush3.bf16.msra.mxu1 %v880_v20  ;;  %v991_v41 = vsel %vm4880_vm1, %v2697_v14, %v987_v4  ;;  %v992_v21 = vsel %vm4881_vm7, %v2708_v29, %v988_v40  ;;  %v2047_v6 = vadd.f32 2.2, %v3478_v51  ;;  %vm982_vm13 = vcmp.eq.f32.partialorder %v2783_v10, 10.0 }
  0xcf   : > { %vm4882_vm11 = vmmov 0   ;;  %vm4883_vm4 = vcmp.eq.f32.partialorder %v2477_v54, 7.0  ;;  %vm4884_vm10 = vcmp.eq.f32.partialorder %v2615_v32, 7.0  ;;  %2226 = vmatprep.subr.bf16.mxu1 %v4877_v60  ;;  %v1152_v14 = vmul.f32 2.5, %v2046_v15 }
  0xd0   : > { %2222 = vmatprep.mubr.msk.bf16.mxu0 %vm4882_vm11, %v4877_v60  ;;  %v995_v42 = vsel %vm4883_vm4, %v2669_v49, %v991_v41  ;;  %v996_v58 = vsel %vm4884_vm10, %v2675_v56, %v992_v21  ;;  %v985_v29 = vsel %vm981_vm14, %v2850_v7, 0.0  ;;  %v1153_v50 = vmul.f32 2.5, %v2047_v6  ;;  %v2107_v56 = vld [vmem:[%s2421_s26 + $0x28] sm:$0xff]  }
  0xd1   : > { %v999_v30 = vpack.c.bf16 %v996_v58, %v995_v42  ;;  %v986_v57 = vsel %vm982_vm13, %v2852_v46, 0.0  ;;  %v989_v22 = vsel %vm957_vm2, %v2854_v43, %v985_v29  ;;  %1060 = vmatmul.mubr.bf16.vlgmr.msra.gmra.mrb[4].mxu1 %v2271_v24  ;;  %v3510_v54 = vfloor.f32 %v1152_v14 }
  0xd2   : > { %v990_v32 = vsel %vm958_vm15, %v2860_v61, %v986_v57  ;;  %v993_v49 = vsel %vm933_vm9, %v2900_v39, %v989_v22  ;;  %v3518_v7 = vfloor.f32 %v1153_v50  ;;  %2230 = vmatprep.mubr.msk.bf16.mxu1 %vm4882_vm11, %v4877_v60  ;;  %v3532_v8 = vunpack.c.l.bf16 %v2107_v56 }
  0xd3   : > { %2219 = vmatpush3.bf16.msra.mxu0 %v999_v30  ;;  %v1160_v46 = vsub.f32 %v1152_v14, %v3510_v54  ;;  %v994_v43 = vsel %vm934_vm8, %v2903_v12, %v990_v32  ;;  %v997_v39 = vsel %vm909_vm0, %v2843_v16, %v993_v49  ;;  %v3534_v31 = vunpack.c.h.bf16 %v2107_v56 }
  0xd4   : > { %2220 = vmatprep.subr.bf16.mxu0 %v4877_v60  ;;  %v1161_v61 = vsub.f32 %v1153_v50, %v3518_v7  ;;  %vm4676_vm9 = vcmp.eq.f32.partialorder %v3510_v54, 9.0  ;;  %v998_v12 = vsel %vm910_vm6, %v2845_v45, %v994_v43  ;;  %vm4675_vm8 = vcmp.eq.f32.partialorder %v3518_v7, 9.0  ;;  %v2108_v43 = vld [vmem:[%s2421_s26 + $0x30] sm:$0xff]  }
  0xd5   : > { %v1164_v5 = vmul.f32 %v1160_v46, %v1160_v46  ;;  %v1172_v38 = vsub.f32 1.0, %v1160_v46  ;;  %v1000_v11 = vpack.c.bf16 %v998_v12, %v997_v39  ;;  %vm4678_vm0 = vcmp.eq.f32.partialorder %v3510_v54, 8.0 }
  0xd6   : > { %v1165_v36 = vmul.f32 %v1161_v61, %v1161_v61  ;;  %v1173_v13 = vsub.f32 1.0, %v1161_v61  ;;  %vm1396_vm2 = vcmp.eq.f32.partialorder %v3510_v54, 10.0  ;;  %vm1397_vm15 = vcmp.eq.f32.partialorder %v3518_v7, 10.0 }
  0xd7   : > { %v1168_v53 = vmul.f32 %v1164_v5, %v1160_v46  ;;  %v1192_v28 = vmul.f32 %v1172_v38, %v1172_v38  ;;  %vm4695_vm5 = vcmp.eq.f32.partialorder %v3510_v54, 7.0  ;;  %vm4677_vm3 = vcmp.eq.f32.partialorder %v3518_v7, 8.0  ;;  %2221 = vmatpush3.bf16.msra.mxu0 %v1000_v11 }
  0xd8   : > { %v1169_v16 = vmul.f32 %v1165_v36, %v1161_v61  ;;  %v1193_v0 = vmul.f32 %v1173_v13, %v1173_v13  ;;  %vm4688_vm6 = vcmp.eq.f32.partialorder %v3510_v54, 3.0  ;;  %vm4687_vm12 = vcmp.eq.f32.partialorder %v3510_v54, 4.0 }
  0xd9   : > { %v1180_v19 = vmul.f32 0.5, %v1168_v53  ;;  %v1196_v35 = vmul.f32 %v1192_v28, %v1172_v38  ;;  %v3548_v10 = vmul.f32 0.16666667, %v1168_v53  ;;  %vm4690_vm14 = vcmp.eq.f32.partialorder %v3510_v54, 5.0 }
  0xda   : > { %v1181_v45 = vmul.f32 0.5, %v1169_v16  ;;  %v1197_v55 = vmul.f32 %v1193_v0, %v1173_v13  ;;  %v3551_v59 = vmul.f32 0.16666667, %v1169_v16  ;;  %vm4692_vm1 = vcmp.eq.f32.partialorder %v3510_v54, 6.0  ;;  %2223 = vmatmul.mubr.bf16.vlgmr.msra.gmra.mrb[4].mxu0 %v4887_v18 }
  0xdb   : > { %v1184_v44 = vsub.f32 %v1180_v19, %v1164_v5  ;;  %v3553_v9 = vmul.f32 0.16666667, %v1196_v35  ;;  %vm4691_vm7 = vcmp.eq.f32.partialorder %v3518_v7, 6.0  ;;  %v2048_v1 = vadd.f32 2.2, %v3532_v8  ;;  %1476 = vmatprep.mubr.bf16.mxu0 %v3571_v63 }
  0xdc   : > { %v1185_v62 = vsub.f32 %v1181_v45, %v1165_v36  ;;  %v3556_v52 = vmul.f32 0.16666667, %v1197_v55  ;;  %v2049_v27 = vadd.f32 2.2, %v3534_v31  ;;  %vm4689_vm13 = vcmp.eq.f32.partialorder %v3518_v7, 5.0 }
  0xdd   : > { %4885 = vst [vmem:[#allocation4_spill] sm:$0xff] %v3553_v9  ;;  %v3561_v23 = vadd.f32 0.6666667, %v1184_v44  ;;  %v1204_v24 = vsub.f32 1.0, %v3553_v9  ;;  %v1400_v26 = vsel %vm1396_vm2, %v3553_v9, 0.0  ;;  %vm4686_vm4 = vcmp.eq.f32.partialorder %v3518_v7, 4.0 }
  0xde   : > { %4886 = vst [vmem:[#allocation10_spill] sm:$0xff] %v3556_v52  ;;  %v3574_v3 = vadd.f32 0.6666667, %v1185_v62  ;;  %v1205_v37 = vsub.f32 1.0, %v3556_v52  ;;  %v1401_v47 = vsel %vm1397_vm15, %v3556_v52, 0.0  ;;  %v1304_v2 = vsel %vm4692_vm1, %v3553_v9, 0.0 }
  0xdf   : > { %v1208_v17 = vsub.f32 %v1204_v24, %v3561_v23  ;;  %v1305_v20 = vsel %vm4691_vm7, %v3556_v52, 0.0  ;;  %v1404_v33 = vsel %vm4676_vm9, %v3561_v23, %v1400_v26  ;;  %v1308_v4 = vsel %vm4690_vm14, %v3561_v23, %v1304_v2 }
  0xe0   : > { %v1209_v25 = vsub.f32 %v1205_v37, %v3574_v3  ;;  %v1405_v48 = vsel %vm4675_vm8, %v3574_v3, %v1401_v47  ;;  %v1309_v15 = vsel %vm4689_vm13, %v3574_v3, %v1305_v20  ;;  %v1154_v41 = vmul.f32 2.5, %v2048_v1 }
  0xe1   : > { %v3600_v40 = vsub.f32 %v1208_v17, %v3548_v10  ;;  %v1155_v21 = vmul.f32 2.5, %v2049_v27  ;;  %vm4693_vm10 = vcmp.eq.f32.partialorder %v3518_v7, 7.0  ;;  %vm4679_vm2 = vcmp.eq.f32.partialorder %v3518_v7, 3.0 }
  0xe2   : > { %v3606_v6 = vsub.f32 %v1209_v25, %v3551_v59  ;;  %v3616_v14 = vfloor.f32 %v1154_v41  ;;  %v1120_v5 = vsub.f32 0.0, %v4879_v34  ;;  %v1121_v38 = vsub.f32 0.0, %v3478_v51 }
  0xe3   : > { %v1408_v42 = vsel %vm4678_vm0, %v3600_v40, %v1404_v33  ;;  %v1312_v58 = vsel %vm4687_vm12, %v3600_v40, %v1308_v4  ;;  %v3618_v29 = vfloor.f32 %v1155_v21  ;;  %v3643_v28 = vunpack.c.l.bf16 %v2108_v43 }
  0xe4   : > { %v1409_v30 = vsel %vm4677_vm3, %v3606_v6, %v1405_v48  ;;  %v1412_v50 = vsel %vm4695_vm5, %v3548_v10, %v1408_v42  ;;  %v1313_v57 = vsel %vm4686_vm4, %v3606_v6, %v1309_v15  ;;  %v1316_v22 = vsel %vm4688_vm6, %v3548_v10, %v1312_v58 }
  0xe5   : > { %v1413_v32 = vsel %vm4693_vm10, %v3551_v59, %v1409_v30  ;;  %v1317_v49 = vsel %vm4679_vm2, %v3551_v59, %v1313_v57  ;;  %v1162_v56 = vsub.f32 %v1154_v41, %v3616_v14  ;;  %v1163_v46 = vsub.f32 %v1155_v21, %v3618_v29 }
  0xe6   : > { %v1416_v61 = vpack.c.bf16 %v1413_v32, %v1412_v50  ;;  %v1320_v39 = vpack.c.bf16 %v1317_v49, %v1316_v22  ;;  %v3645_v11 = vunpack.c.h.bf16 %v2108_v43  ;;  %vm1398_vm15 = vcmp.eq.f32.partialorder %v3616_v14, 10.0 }
  0xe7   : > { %v1166_v36 = vmul.f32 %v1162_v56, %v1162_v56  ;;  %v1167_v13 = vmul.f32 %v1163_v46, %v1163_v46  ;;  %v1174_v12 = vsub.f32 1.0, %v1162_v56  ;;  %v1175_v53 = vsub.f32 1.0, %v1163_v46 }
  0xe8   : > { %2227 = vmatpush3.bf16.msra.mxu1 %v1416_v61  ;;  %2160 = vmatprep.subr.bf16.mxu0 %v1320_v39  ;;  %vm1399_vm8 = vcmp.eq.f32.partialorder %v3618_v29, 10.0  ;;  %v1124_v45 = vmul.f32 1.442695, %v1120_v5  ;;  %v1126_v55 = vmul.f32 1.442695, %v1121_v38  ;;  %vm4681_vm9 = vcmp.eq.f32.partialorder %v3616_v14, 9.0 }
  0xe9   : > { %2228 = vmatprep.subr.bf16.mxu1 %v4877_v60  ;;  %v1170_v16 = vmul.f32 %v1166_v36, %v1162_v56  ;;  %v1171_v0 = vmul.f32 %v1167_v13, %v1163_v46  ;;  %v1194_v19 = vmul.f32 %v1174_v12, %v1174_v12  ;;  %v1195_v35 = vmul.f32 %v1175_v53, %v1175_v53 }
  0xea   : > { %2304 = vpow2.f32 %v1124_v45  ;;  %v2054_v27 = vadd.f32 2.2, %v3643_v28  ;;  %v2055_v17 = vadd.f32 2.2, %v3645_v11  ;;  %vm4680_vm3 = vcmp.eq.f32.partialorder %v3618_v29, 9.0 }
  0xeb   : > { %v3650_v44 = vmul.f32 0.16666667, %v1170_v16  ;;  %v3652_v62 = vmul.f32 0.16666667, %v1171_v0  ;;  %v1182_v18 = vmul.f32 0.5, %v1170_v16  ;;  %v1183_v1 = vmul.f32 0.5, %v1171_v0 }
  0xec   : > { %v1198_v24 = vmul.f32 %v1194_v19, %v1174_v12  ;;  %v1199_v26 = vmul.f32 %v1195_v35, %v1175_v53  ;;  %2306 = vpow2.f32 %v1126_v55  ;;  %v1569_v25 = vmul.f32 2.5, %v2054_v27 }
  0xed   : > { %v1186_v37 = vsub.f32 %v1182_v18, %v1166_v36  ;;  %v1187_v47 = vsub.f32 %v1183_v1, %v1167_v13  ;;  %v1570_v4 = vmul.f32 2.5, %v2055_v17  ;;  %vm4683_vm0 = vcmp.eq.f32.partialorder %v3616_v14, 8.0 }
  0xee   : > { %v3656_v2 = vmul.f32 0.16666667, %v1198_v24  ;;  %v3658_v20 = vmul.f32 0.16666667, %v1199_v26  ;;  %v3674_v58 = vfloor.f32 %v1569_v25  ;;  %vm4682_vm2 = vcmp.eq.f32.partialorder %v3618_v29, 8.0 }
  0xef   : > { %v3661_v33 = vadd.f32 0.6666667, %v1186_v37  ;;  %v3663_v48 = vadd.f32 0.6666667, %v1187_v47  ;;  %v3676_v30 = vfloor.f32 %v1570_v4  ;;  %vm4697_vm14 = vcmp.eq.f32.partialorder %v3616_v14, 4.0 }
  0xf0   : > { %v1206_v15 = vsub.f32 1.0, %v3656_v2  ;;  %v1207_v41 = vsub.f32 1.0, %v3658_v20  ;;  %v1402_v21 = vsel %vm1398_vm15, %v3656_v2, 0.0  ;;  %v1403_v42 = vsel %vm1399_vm8, %v3658_v20, 0.0 }
  0xf1   : > { %v1406_v22 = vsel %vm4681_vm9, %v3661_v33, %v1402_v21  ;;  %v1407_v32 = vsel %vm4680_vm3, %v3663_v48, %v1403_v42  ;;  %v1577_v49 = vsub.f32 %v1569_v25, %v3674_v58  ;;  %v1578_v56 = vsub.f32 %v1570_v4, %v3676_v30 }
  0xf2   : > { %v1210_v50 = vsub.f32 %v1206_v15, %v3661_v33  ;;  %v1211_v57 = vsub.f32 %v1207_v41, %v3663_v48  ;;  %vm4685_vm8 = vcmp.eq.f32.partialorder %v3616_v14, 7.0  ;;  %vm4684_vm15 = vcmp.eq.f32.partialorder %v3618_v29, 7.0 }
  0xf3   : > { %v1581_v61 = vmul.f32 %v1577_v49, %v1577_v49  ;;  %v1582_v39 = vmul.f32 %v1578_v56, %v1578_v56  ;;  %v1589_v5 = vsub.f32 1.0, %v1577_v49  ;;  %v1590_v38 = vsub.f32 1.0, %v1578_v56 }
  0xf4   : > { %v3691_v46 = vsub.f32 %v1210_v50, %v3650_v44  ;;  %v3694_v43 = vsub.f32 %v1211_v57, %v3652_v62  ;;  %v2305_v36 = vpop.eup %2304  ;;  %vm4713_vm3 = vcmp.eq.f32.partialorder %v3674_v58, 4.0  ;;  %vm4715_vm9 = vcmp.eq.f32.partialorder %v3674_v58, 5.0  ;;  %v3735_v50 = vld [vmem:[%s4608_s1 + $0x8] ss:$12 sps:$4 sm:$0xff]  }
  0xf5   : > { %v1132_v19 = vadd.f32 1.0, %v2305_v36  ;;  %v1585_v35 = vmul.f32 %v1581_v61, %v1577_v49  ;;  %v1586_v18 = vmul.f32 %v1582_v39, %v1578_v56  ;;  %v1609_v1 = vmul.f32 %v1589_v5, %v1589_v5  ;;  %4889 = vst [vmem:[#allocation14_spill] sm:$0xff] %v3735_v50 }
  0xf6   : > { %v1410_v13 = vsel %vm4683_vm0, %v3691_v46, %v1406_v22  ;;  %v1411_v12 = vsel %vm4682_vm2, %v3694_v43, %v1407_v32  ;;  %v2307_v53 = vpop.eup %2306  ;;  %v1610_v26 = vmul.f32 %v1590_v38, %v1590_v38  ;;  %vm4701_vm2 = vcmp.eq.f32.partialorder %v3616_v14, 3.0 }
  0xf7   : > { %v1414_v16 = vsel %vm4685_vm8, %v3650_v44, %v1410_v13  ;;  %v1415_v0 = vsel %vm4684_vm15, %v3652_v62, %v1411_v12  ;;  %v1133_v55 = vadd.f32 1.0, %v2307_v53  ;;  %2308 = vrcp.f32 %v1132_v19 }
  0xf8   : > { %v1417_v45 = vpack.c.bf16 %v1415_v0, %v1414_v16  ;;  %v1597_v24 = vmul.f32 0.5, %v1585_v35  ;;  %vm4700_vm0 = vcmp.eq.f32.partialorder %v3618_v29, 3.0  ;;  %v1598_v27 = vmul.f32 0.5, %v1586_v18 }
  0xf9   : > { %2310 = vrcp.f32 %v1133_v55  ;;  %v1613_v37 = vmul.f32 %v1609_v1, %v1589_v5  ;;  %vm4703_vm15 = vcmp.eq.f32.partialorder %v3674_v58, 3.0  ;;  %vm4710_vm8 = vcmp.eq.f32.partialorder %v3676_v30, 4.0 }
  0xfa   : > { %2229 = vmatpush3.bf16.msra.mxu1 %v1417_v45  ;;  %vm4714_vm4 = vcmp.eq.f32.partialorder %v3676_v30, 5.0  ;;  %v3717_v47 = vmul.f32 0.16666667, %v1585_v35  ;;  %v1601_v17 = vsub.f32 %v1597_v24, %v1581_v61  ;;  %v1614_v25 = vmul.f32 %v1610_v26, %v1590_v38 }
  0xfb   : > { %vm4702_vm12 = vcmp.eq.f32.partialorder %v3676_v30, 3.0  ;;  %vm4694_vm6 = vcmp.eq.f32.partialorder %v3674_v58, 6.0  ;;  %v3721_v4 = vmul.f32 0.16666667, %v1586_v18  ;;  %v1602_v15 = vsub.f32 %v1598_v27, %v1582_v39 }
  0xfc   : > { %v3723_v41 = vmul.f32 0.16666667, %v1613_v37  ;;  %vm4722_vm13 = vcmp.eq.f32.partialorder %v3676_v30, 6.0  ;;  %v3726_v21 = vadd.f32 0.6666667, %v1601_v17  ;;  %vm4696_vm7 = vcmp.eq.f32.partialorder %v3618_v29, 4.0 }
  0xfd   : > { %v3728_v42 = vmul.f32 0.16666667, %v1614_v25  ;;  %2231 = vmatmul.mubr.bf16.vlgmr.msra.gmra.mrb[8].mxu1 %v3735_v50  ;;  %v3738_v57 = vadd.f32 0.6666667, %v1602_v15  ;;  %vm4699_vm1 = vcmp.eq.f32.partialorder %v3616_v14, 5.0  ;;  %vm4698_vm10 = vcmp.eq.f32.partialorder %v3618_v29, 5.0 }
  0xfe   : > { %v1621_v22 = vsub.f32 1.0, %v3723_v41  ;;  %v1721_v32 = vsel %vm4694_vm6, %v3723_v41, 0.0  ;;  %1893 = vmatprep.mubr.bf16.mxu1 %v3571_v63  ;;  %vm4705_vm6 = vcmp.eq.f32.partialorder %v3616_v14, 6.0  ;;  %vm4704_vm5 = vcmp.eq.f32.partialorder %v3618_v29, 6.0  ;;  %v2109_v17 = vld [vmem:[%s2421_s26 + $0x38] sm:$0xff]  }
  0xff   : > { %4888 = vst [vmem:[#allocation13_spill] sm:$0xff] %v3728_v42  ;;  %v1622_v49 = vsub.f32 1.0, %v3728_v42  ;;  %v1722_v56 = vsel %vm4722_vm13, %v3728_v42, 0.0  ;;  %v1725_v61 = vsel %vm4715_vm9, %v3726_v21, %v1721_v32  ;;  %v1306_v38 = vsel %vm4705_vm6, %v3656_v2, 0.0 }
 0x100   : > { %v1625_v39 = vsub.f32 %v1621_v22, %v3726_v21  ;;  %v1726_v5 = vsel %vm4714_vm4, %v3738_v57, %v1722_v56  ;;  %v1307_v36 = vsel %vm4704_vm5, %v3658_v20, 0.0  ;;  %v1537_v13 = vsub.f32 0.0, %v3643_v28 }
 0x101   : > { %v1626_v63 = vsub.f32 %v1622_v49, %v3738_v57  ;;  %v1310_v53 = vsel %vm4699_vm1, %v3661_v33, %v1306_v38  ;;  %v1311_v16 = vsel %vm4698_vm10, %v3663_v48, %v1307_v36  ;;  %v1538_v0 = vsub.f32 0.0, %v3645_v11  ;;  %v2309_v19 = vpop.eup %2308 }
 0x102   : > { %v3769_v12 = vsub.f32 %v1625_v39, %v3717_v47  ;;  %v1314_v45 = vsel %vm4697_vm14, %v3691_v46, %v1310_v53  ;;  %v1315_v55 = vsel %vm4696_vm7, %v3694_v43, %v1311_v16  ;;  %v1541_v18 = vmul.f32 1.442695, %v1537_v13 }
 0x103   : > { %v3779_v35 = vsub.f32 %v1626_v63, %v3721_v4  ;;  %v2311_v1 = vpop.eup %2310  ;;  %v1140_v24 = vmul.f32 %v2309_v19, %v4879_v34  ;;  %v1318_v27 = vsel %vm4701_vm2, %v3650_v44, %v1314_v45  ;;  %v1319_v37 = vsel %vm4700_vm0, %v3652_v62, %v1315_v55 }
 0x104   : > { %v1729_v26 = vsel %vm4713_vm3, %v3769_v12, %v1725_v61  ;;  %v1141_v25 = vmul.f32 %v2311_v1, %v3478_v51  ;;  %v1321_v22 = vpack.c.bf16 %v1319_v37, %v1318_v27  ;;  %2312 = vpow2.f32 %v1541_v18 }
 0x105   : > { %v1730_v15 = vsel %vm4710_vm8, %v3779_v35, %v1726_v5  ;;  %v1733_v34 = vsel %vm4703_vm15, %v3717_v47, %v1729_v26  ;;  %v1543_v49 = vmul.f32 1.442695, %v1538_v0  ;;  %v1122_v56 = vsub.f32 0.0, %v3532_v8 }
 0x106   : > { %v1734_v32 = vsel %vm4702_vm12, %v3721_v4, %v1730_v15  ;;  %v1144_v61 = vpack.c.bf16 %v1141_v25, %v1140_v24  ;;  %v1123_v51 = vsub.f32 0.0, %v3534_v31  ;;  %v3810_v63 = vunpack.c.l.bf16 %v2109_v17 }
 0x107   : > { %v1737_v39 = vpack.c.bf16 %v1734_v32, %v1733_v34  ;;  %2314 = vpow2.f32 %v1543_v49  ;;  %v1128_v5 = vmul.f32 1.442695, %v1122_v56  ;;  %v3812_v38 = vunpack.c.h.bf16 %v2109_v17 }
 0x108   : > { %vm4890_vm7 = vcmp.eq.f32.partialorder %v3510_v54, 7.0  ;;  %2161 = vmatpush3.bf16.msra.mxu0 %v1144_v61  ;;  %v1130_v13 = vmul.f32 1.442695, %v1123_v51  ;;  %v2056_v53 = vadd.f32 2.2, %v3810_v63  ;;  %vm4891_vm14 = vcmp.eq.f32.partialorder %v3518_v7, 7.0 }
 0x109   : > { %v1328_v36 = vsel %vm4890_vm7, %v3553_v9, 0.0  ;;  %2185 = vmatprep.subr.bf16.mxu1 %v1737_v39  ;;  %v1329_v16 = vsel %vm4891_vm14, %v3556_v52, 0.0  ;;  %vm4892_vm10 = vcmp.eq.f32.partialorder %v3510_v54, 6.0  ;;  %2162 = vmatprep.subr.bf16.mxu0 %v1321_v22  ;;  %2316 = vpow2.f32 %v1128_v5 }
 0x10a   : > { %v1332_v0 = vsel %vm4892_vm10, %v3561_v23, %v1328_v36  ;;  %v2057_v19 = vadd.f32 2.2, %v3812_v38  ;;  %vm4893_vm7 = vcmp.eq.f32.partialorder %v3518_v7, 6.0  ;;  %vm4894_vm1 = vcmp.eq.f32.partialorder %v3510_v54, 5.0 }
 0x10b   : > { %v1333_v45 = vsel %vm4893_vm7, %v3574_v3, %v1329_v16  ;;  %v1336_v55 = vsel %vm4894_vm1, %v3600_v40, %v1332_v0  ;;  %2318 = vpow2.f32 %v1130_v13  ;;  %v1571_v18 = vmul.f32 2.5, %v2056_v53 }
 0x10c   : > { %vm4895_vm14 = vcmp.eq.f32.partialorder %v3518_v7, 5.0  ;;  %v1572_v24 = vmul.f32 2.5, %v2057_v19  ;;  %v1539_v26 = vsub.f32 0.0, %v3810_v63  ;;  %v1540_v27 = vsub.f32 0.0, %v3812_v38 }
 0x10d   : > { %v1337_v1 = vsel %vm4895_vm14, %v3606_v6, %v1333_v45  ;;  %vm4896_vm10 = vcmp.eq.f32.partialorder %v3510_v54, 3.0  ;;  %v3841_v17 = vfloor.f32 %v1571_v18  ;;  %vm4897_vm1 = vcmp.eq.f32.partialorder %v3510_v54, 4.0 }
 0x10e   : > { %v3839_v37 = vsel %vm4896_vm10, %v3553_v9, 0.0  ;;  %v3846_v25 = vsel %vm4897_vm1, %v3548_v10, %v1336_v55  ;;  %vm4898_vm7 = vcmp.eq.f32.partialorder %v3518_v7, 4.0  ;;  %vm4899_vm14 = vcmp.eq.f32.partialorder %v3518_v7, 3.0  ;;  %v2313_v5 = vpop.eup %2312 }
 0x10f   : > { %v3851_v15 = vsel %vm4898_vm7, %v3551_v59, %v1337_v1  ;;  %v1233_v34 = vsel %vm4899_vm14, %v3556_v52, 0.0  ;;  %v3859_v22 = vsel %vm4701_vm2, %v3656_v2, 0.0  ;;  %v3861_v32 = vfloor.f32 %v1572_v24 }
 0x110   : > { %v1545_v49 = vmul.f32 1.442695, %v1539_v26  ;;  %v3866_v56 = vsel %vm4703_vm15, %v3723_v41, 0.0  ;;  %v3871_v61 = vsel %vm4702_vm12, %v3728_v42, 0.0  ;;  %v3876_v39 = vsel %vm4700_vm0, %v3658_v20, 0.0 }
 0x111   : > { %4900 = vst [vmem:[#allocation15_spill] sm:$0xff] %v3876_v39  ;;  %v1579_v51 = vsub.f32 %v1571_v18, %v3841_v17  ;;  %v1580_v36 = vsub.f32 %v1572_v24, %v3861_v32  ;;  %vm4733_vm10 = vcmp.eq.f32.partialorder %v3841_v17, 5.0  ;;  %v1547_v53 = vmul.f32 1.442695, %v1540_v27  ;;  %v2315_v45 = vpop.eup %2314 }
 0x112   : > { %v1549_v16 = vadd.f32 1.0, %v2313_v5  ;;  %vm4719_vm1 = vcmp.eq.f32.partialorder %v3841_v17, 3.0  ;;  %vm4731_vm7 = vcmp.eq.f32.partialorder %v3861_v32, 5.0  ;;  %vm4730_vm14 = vcmp.eq.f32.partialorder %v3841_v17, 6.0 }
 0x113   : > { %v1583_v0 = vmul.f32 %v1579_v51, %v1579_v51  ;;  %v1591_v19 = vsub.f32 1.0, %v1579_v51  ;;  %vm4724_vm0 = vcmp.eq.f32.partialorder %v3510_v54, 1.0  ;;  %v1584_v55 = vmul.f32 %v1580_v36, %v1580_v36  ;;  %v2317_v27 = vpop.eup %2316 }
 0x114   : > { %v1592_v18 = vsub.f32 1.0, %v1580_v36  ;;  %vm4721_vm2 = vcmp.eq.f32.partialorder %v3861_v32, 3.0  ;;  %vm4735_vm12 = vcmp.eq.f32.partialorder %v3861_v32, 6.0  ;;  %2320 = vpow2.f32 %v1545_v49 }
 0x115   : > { %vm1216_vm15 = vcmp.eq.f32.partialorder %v3510_v54, 0.0  ;;  %vm1217_vm5 = vcmp.eq.f32.partialorder %v3518_v7, 0.0  ;;  %v1550_v1 = vadd.f32 1.0, %v2315_v45  ;;  %2322 = vrcp.f32 %v1549_v16  ;;  %v2319_v50 = vpop.eup %2318 }
 0x116   : > { %v1587_v24 = vmul.f32 %v1583_v0, %v1579_v51  ;;  %v1611_v26 = vmul.f32 %v1591_v19, %v1591_v19  ;;  %v1588_v5 = vmul.f32 %v1584_v55, %v1580_v36  ;;  %v1612_v13 = vmul.f32 %v1592_v18, %v1592_v18 }
 0x117   : > { %2324 = vpow2.f32 %v1547_v53  ;;  %vm4716_vm6 = vcmp.eq.f32.partialorder %v3518_v7, 1.0  ;;  %v1134_v60 = vadd.f32 1.0, %v2317_v27  ;;  %vm4732_vm8 = vcmp.eq.f32.partialorder %v3841_v17, 4.0 }
 0x118   : > { %2326 = vrcp.f32 %v1550_v1  ;;  %v3892_v52 = vmul.f32 0.16666667, %v1587_v24  ;;  %v1599_v49 = vmul.f32 0.5, %v1587_v24  ;;  %v1135_v9 = vadd.f32 1.0, %v2319_v50 }
 0x119   : > { %v3895_v39 = vmul.f32 0.16666667, %v1588_v5  ;;  %v1600_v16 = vmul.f32 0.5, %v1588_v5  ;;  %v1615_v51 = vmul.f32 %v1611_v26, %v1591_v19  ;;  %vm4734_vm3 = vcmp.eq.f32.partialorder %v3861_v32, 4.0 }
 0x11a   : > { %2328 = vrcp.f32 %v1134_v60  ;;  %v1603_v36 = vsub.f32 %v1599_v49, %v1583_v0  ;;  %v1616_v53 = vmul.f32 %v1612_v13, %v1592_v18  ;;  %vm4726_vm4 = vcmp.eq.f32.partialorder %v3510_v54, 2.0 }
 0x11b   : > { %2330 = vrcp.f32 %v1135_v9  ;;  %v1604_v45 = vsub.f32 %v1600_v16, %v1584_v55  ;;  %v3899_v1 = vmul.f32 0.16666667, %v1615_v51  ;;  %vm4725_vm9 = vcmp.eq.f32.partialorder %v3518_v7, 2.0 }
 0x11c   : > { %v3902_v24 = vadd.f32 0.6666667, %v1603_v36  ;;  %v3904_v50 = vmul.f32 0.16666667, %v1616_v53  ;;  %v1236_v19 = vsel %vm4726_vm4, %v3561_v23, %v3839_v37  ;;  %v1237_v60 = vsel %vm4725_vm9, %v3574_v3, %v1233_v34 }
 0x11d   : > { %v3913_v13 = vadd.f32 0.6666667, %v1604_v45  ;;  %v1623_v9 = vsub.f32 1.0, %v3899_v1  ;;  %v3919_v0 = vsel %vm4719_vm1, %v3899_v1, 0.0  ;;  %v1723_v55 = vsel %vm4730_vm14, %v3899_v1, 0.0 }
 0x11e   : > { %v1624_v18 = vsub.f32 1.0, %v3904_v50  ;;  %v3928_v37 = vsel %vm4721_vm2, %v3904_v50, 0.0  ;;  %v1724_v34 = vsel %vm4735_vm12, %v3904_v50, 0.0  ;;  %v1727_v26 = vsel %vm4733_vm10, %v3902_v24, %v1723_v55  ;;  %v2321_v27 = vpop.eup %2320 }
 0x11f   : > { %4901 = vst [vmem:[#allocation12_spill] sm:$0xff] %v3928_v37  ;;  %v1627_v5 = vsub.f32 %v1623_v9, %v3902_v24  ;;  %v1728_v49 = vsel %vm4731_vm7, %v3913_v13, %v1724_v34  ;;  %v1240_v16 = vsel %vm4724_vm0, %v3600_v40, %v1236_v19  ;;  %v1241_v51 = vsel %vm4716_vm6, %v3606_v6, %v1237_v60  ;;  %v2323_v36 = vpop.eup %2322 }
 0x120   : > { %v1628_v53 = vsub.f32 %v1624_v18, %v3913_v13  ;;  %v1551_v45 = vadd.f32 1.0, %v2321_v27  ;;  %v3950_v9 = vsel %vm1216_vm15, %v3548_v10, %v1240_v16  ;;  %v3955_v55 = vsel %vm1217_vm5, %v3551_v59, %v1241_v51 }
 0x121   : > { %v2325_v34 = vpop.eup %2324  ;;  %v1557_v19 = vmul.f32 %v2323_v36, %v3643_v28  ;;  %v3959_v37 = vsub.f32 %v1627_v5, %v3892_v52  ;;  %v1248_v60 = vpack.c.bf16 %v3955_v55, %v3950_v9  ;;  %vm4723_vm6 = vcmp.eq.f32.partialorder %v3674_v58, 7.0 }
 0x122   : > { %v2327_v18 = vpop.eup %2326  ;;  %v3965_v27 = vsub.f32 %v1628_v53, %v3895_v39  ;;  %v1552_v16 = vadd.f32 1.0, %v2325_v34  ;;  %2332 = vrcp.f32 %v1551_v45  ;;  %vm4720_vm5 = vcmp.eq.f32.partialorder %v3676_v30, 7.0 }
 0x123   : > { %v1558_v51 = vmul.f32 %v2327_v18, %v3645_v11  ;;  %v1731_v28 = vsel %vm4732_vm8, %v3959_v37, %v1727_v26  ;;  %v1745_v5 = vsel %vm4723_vm6, %v3723_v41, 0.0  ;;  %v1746_v36 = vsel %vm4720_vm5, %v3728_v42, 0.0 }
 0x124   : > { %v2329_v53 = vpop.eup %2328  ;;  %v1732_v45 = vsel %vm4734_vm3, %v3965_v27, %v1728_v49  ;;  %v1735_v11 = vsel %vm4719_vm1, %v3892_v52, %v1731_v28  ;;  %2334 = vrcp.f32 %v1552_v16  ;;  %vm4902_vm15 = vcmp.eq.f32.partialorder %v3674_v58, 6.0 }
 0x125   : > { %v1749_v26 = vsel %vm4902_vm15, %v3726_v21, %v1745_v5  ;;  %v2331_v9 = vpop.eup %2330  ;;  %v1561_v55 = vpack.c.bf16 %v1558_v51, %v1557_v19  ;;  %v1142_v34 = vmul.f32 %v2329_v53, %v3532_v8  ;;  %v1736_v18 = vsel %vm4721_vm2, %v3895_v39, %v1732_v45 }
 0x126   : > { %v1750_v49 = vsel %vm4722_vm13, %v3738_v57, %v1746_v36  ;;  %v1143_v42 = vmul.f32 %v2331_v9, %v3534_v31  ;;  %v1738_v28 = vpack.c.bf16 %v1736_v18, %v1735_v11  ;;  %vm4903_vm1 = vcmp.eq.f32.partialorder %v3674_v58, 5.0 }
 0x127   : > { %v1753_v16 = vsel %vm4903_vm1, %v3769_v12, %v1749_v26  ;;  %vm4904_vm15 = vcmp.eq.f32.partialorder %v3676_v30, 5.0  ;;  %2186 = vmatpush3.bf16.msra.mxu1 %v1561_v55  ;;  %vm4905_vm5 = vcmp.eq.f32.partialorder %v3674_v58, 4.0  ;;  %vm4906_vm2 = vcmp.eq.f32.partialorder %v3676_v30, 4.0 }
 0x128   : > { %v1754_v19 = vsel %vm4904_vm15, %v3779_v35, %v1750_v49  ;;  %v1757_v8 = vsel %vm4905_vm5, %v3717_v47, %v1753_v16  ;;  %vm4907_vm13 = vcmp.eq.f32.partialorder %v3616_v14, 7.0  ;;  %vm4908_vm1 = vcmp.eq.f32.partialorder %v3618_v29, 7.0  ;;  %2187 = vmatprep.subr.bf16.mxu1 %v1738_v28 }
 0x129   : > { %v1758_v51 = vsel %vm4906_vm2, %v3721_v4, %v1754_v19  ;;  %v1330_v31 = vsel %vm4907_vm13, %v3656_v2, 0.0  ;;  %v1331_v5 = vsel %vm4908_vm1, %v3658_v20, 0.0  ;;  %v1145_v36 = vpack.c.bf16 %v1143_v42, %v1142_v34 }
 0x12a   : > { %v1761_v53 = vpack.c.bf16 %v1758_v51, %v1757_v8  ;;  %vm4909_vm15 = vcmp.eq.f32.partialorder %v3616_v14, 6.0  ;;  %vm4910_vm5 = vcmp.eq.f32.partialorder %v3618_v29, 6.0  ;;  %vm4911_vm2 = vcmp.eq.f32.partialorder %v3616_v14, 5.0 }
 0x12b   : > { %v1334_v45 = vsel %vm4909_vm15, %v3661_v33, %v1330_v31  ;;  %v1335_v11 = vsel %vm4910_vm5, %v3663_v48, %v1331_v5  ;;  %vm4912_vm13 = vcmp.eq.f32.partialorder %v3618_v29, 5.0  ;;  %vm1633_vm1 = vcmp.eq.f32.partialorder %v3674_v58, 0.0  ;;  %2163 = vmatpush3.bf16.msra.mxu0 %v1145_v36  ;;  %v4916_v31 = vld [vmem:[#allocation15_spill] sm:$0xff] }
 0x12c   : > { %v1338_v26 = vsel %vm4911_vm2, %v3691_v46, %v1334_v45  ;;  %v1339_v9 = vsel %vm4912_vm13, %v3694_v43, %v1335_v11  ;;  %vm1634_vm6 = vcmp.eq.f32.partialorder %v3676_v30, 0.0  ;;  %vm4913_vm15 = vcmp.eq.f32.partialorder %v3616_v14, 4.0  ;;  %v2333_v49 = vpop.eup %2332 }
 0x12d   : > { %v1342_v42 = vsel %vm4913_vm15, %v3650_v44, %v1338_v26  ;;  %vm4914_vm5 = vcmp.eq.f32.partialorder %v3618_v29, 4.0  ;;  %vm4729_vm0 = vcmp.eq.f32.partialorder %v3674_v58, 1.0  ;;  %vm1638_vm2 = vcmp.eq.f32.partialorder %v3676_v30, 1.0 }
 0x12e   : > { %v1343_v55 = vsel %vm4914_vm5, %v3652_v62, %v1339_v9  ;;  %v4915_v34 = vpack.c.bf16 %v3851_v15, %v3846_v25  ;;  %vm4727_vm13 = vcmp.eq.f32.partialorder %v3674_v58, 2.0  ;;  %vm4728_vm9 = vcmp.eq.f32.partialorder %v3676_v30, 2.0 }
 0x12f   : > { %v1345_v18 = vpack.c.bf16 %v1343_v55, %v1342_v42  ;;  %vm1218_vm4 = vcmp.eq.f32.partialorder %v3616_v14, 0.0  ;;  %v1653_v28 = vsel %vm4727_vm13, %v3726_v21, %v3866_v56  ;;  %v1654_v16 = vsel %vm4728_vm9, %v3738_v57, %v3871_v61  ;;  %v2335_v56 = vpop.eup %2334 }
 0x130   : > { %2164 = vmatprep.subr.bf16.mxu0 %v4915_v34  ;;  %vm1219_vm15 = vcmp.eq.f32.partialorder %v3618_v29, 0.0  ;;  %vm1222_vm5 = vcmp.eq.f32.partialorder %v3616_v14, 1.0  ;;  %v1559_v25 = vmul.f32 %v2333_v49, %v3810_v63  ;;  %v1657_v15 = vsel %vm4729_vm0, %v3769_v12, %v1653_v28  ;;  %v4917_v34 = vld [vmem:[#allocation4_spill] sm:$0xff] }
 0x131   : > { %v1658_v19 = vsel %vm1638_vm2, %v3779_v35, %v1654_v16  ;;  %vm1223_vm13 = vcmp.eq.f32.partialorder %v3618_v29, 1.0  ;;  %2165 = vmatpush3.bf16.msra.mxu0 %v1248_v60  ;;  %v1661_v61 = vsel %vm1633_vm1, %v3717_v47, %v1657_v15  ;;  %vm1226_vm9 = vcmp.eq.f32.partialorder %v3616_v14, 2.0  ;;  %v4919_v16 = vld [vmem:[#allocation10_spill] sm:$0xff] }
 0x132   : > { %v1662_v63 = vsel %vm1634_vm6, %v3721_v4, %v1658_v19  ;;  %vm1227_vm0 = vcmp.eq.f32.partialorder %v3618_v29, 2.0  ;;  %v1560_v8 = vmul.f32 %v2335_v56, %v3812_v38  ;;  %2166 = vmatprep.subr.bf16.mxu0 %v1345_v18  ;;  %v1238_v60 = vsel %vm1226_vm9, %v3661_v33, %v3859_v22 }
 0x133   : > { %v1665_v51 = vpack.c.bf16 %v1662_v63, %v1661_v61  ;;  %v1239_v5 = vsel %vm1227_vm0, %v3663_v48, %v4916_v31  ;;  %v1242_v36 = vsel %vm1222_vm5, %v3691_v46, %v1238_v60  ;;  %vm1743_vm6 = vcmp.eq.f32.partialorder %v3841_v17, 7.0 }
 0x134   : > { %v1243_v38 = vsel %vm1223_vm13, %v3694_v43, %v1239_v5  ;;  %vm1744_vm1 = vcmp.eq.f32.partialorder %v3861_v32, 7.0  ;;  %v1562_v45 = vpack.c.bf16 %v1560_v8, %v1559_v25  ;;  %v1246_v22 = vsel %vm1218_vm4, %v3650_v44, %v1242_v36 }
 0x135   : > { %v1247_v11 = vsel %vm1219_vm15, %v3652_v62, %v1243_v38  ;;  %v1747_v26 = vsel %vm1743_vm6, %v3899_v1, 0.0  ;;  %v1748_v42 = vsel %vm1744_vm1, %v3904_v50, 0.0  ;;  %vm4918_vm4 = vcmp.eq.f32.partialorder %v3510_v54, 8.0 }
 0x136   : > { %v1249_v9 = vpack.c.bf16 %v1247_v11, %v1246_v22  ;;  %v1751_v55 = vsel %vm4730_vm14, %v3902_v24, %v1747_v26  ;;  %v1352_v18 = vsel %vm4918_vm4, %v4917_v34, 0.0  ;;  %2188 = vmatpush3.bf16.msra.mxu1 %v1562_v45  ;;  %v1752_v49 = vsel %vm4735_vm12, %v3913_v13, %v1748_v42  ;;  %v4927_v45 = vld [vmem:[#allocation12_spill] sm:$0xff] }
 0x137   : > { %v1755_v28 = vsel %vm4733_vm10, %v3959_v37, %v1751_v55  ;;  %vm4920_vm15 = vcmp.eq.f32.partialorder %v3518_v7, 8.0  ;;  %vm4921_vm14 = vcmp.eq.f32.partialorder %v3510_v54, 7.0  ;;  %2189 = vmatprep.subr.bf16.mxu1 %v1761_v53  ;;  %v1756_v19 = vsel %vm4731_vm7, %v3965_v27, %v1752_v49 }
 0x138   : > { %v1353_v25 = vsel %vm4920_vm15, %v4919_v16, 0.0  ;;  %v1356_v15 = vsel %vm4921_vm14, %v3561_v23, %v1352_v18  ;;  %2167 = vmatpush3.bf16.msra.mxu0 %v1249_v9  ;;  %v1759_v56 = vsel %vm4732_vm8, %v3892_v52, %v1755_v28  ;;  %vm4922_vm4 = vcmp.eq.f32.partialorder %v3518_v7, 7.0 }
 0x139   : > { %v1357_v61 = vsel %vm4922_vm4, %v3574_v3, %v1353_v25  ;;  %vm1635_vm15 = vcmp.eq.f32.partialorder %v3841_v17, 0.0  ;;  %v1760_v63 = vsel %vm4734_vm3, %v3895_v39, %v1756_v19  ;;  %vm4923_vm14 = vcmp.eq.f32.partialorder %v3510_v54, 6.0 }
 0x13a   : > { %v1360_v53 = vsel %vm4923_vm14, %v3600_v40, %v1356_v15  ;;  %vm4924_vm7 = vcmp.eq.f32.partialorder %v3518_v7, 6.0  ;;  %vm1636_vm8 = vcmp.eq.f32.partialorder %v3861_v32, 0.0  ;;  %v1762_v60 = vpack.c.bf16 %v1760_v63, %v1759_v56  ;;  %2190 = vmatpush3.bf16.msra.mxu1 %v1665_v51 }
 0x13b   : > { %v1361_v8 = vsel %vm4924_vm7, %v3606_v6, %v1357_v61  ;;  %vm4925_vm4 = vcmp.eq.f32.partialorder %v3510_v54, 5.0  ;;  %vm4926_vm10 = vcmp.eq.f32.partialorder %v3518_v7, 5.0  ;;  %vm1639_vm3 = vcmp.eq.f32.partialorder %v3841_v17, 1.0 }
 0x13c   : > { %v1364_v31 = vsel %vm4925_vm4, %v3548_v10, %v1360_v53  ;;  %v1365_v5 = vsel %vm4926_vm10, %v3551_v59, %v1361_v8  ;;  %vm4737_vm14 = vcmp.eq.f32.partialorder %v3861_v32, 1.0  ;;  %vm1643_vm12 = vcmp.eq.f32.partialorder %v3841_v17, 2.0  ;;  %2191 = vmatprep.subr.bf16.mxu1 %v1762_v60  ;;  %v4937_v53 = vld [vmem:[#allocation13_spill] sm:$0xff] }
 0x13d   : > { %v1368_v36 = vpack.c.bf16 %v1365_v5, %v1364_v31  ;;  %vm4736_vm7 = vcmp.eq.f32.partialorder %v3861_v32, 2.0  ;;  %v1655_v38 = vsel %vm1643_vm12, %v3902_v24, %v3919_v0  ;;  %vm4928_vm10 = vcmp.eq.f32.partialorder %v3510_v54, 4.0 }
 0x13e   : > { %v1656_v22 = vsel %vm4736_vm7, %v3913_v13, %v4927_v45  ;;  %v1256_v51 = vsel %vm4928_vm10, %v4917_v34, 0.0  ;;  %vm4929_vm4 = vcmp.eq.f32.partialorder %v3518_v7, 4.0  ;;  %v1659_v26 = vsel %vm1639_vm3, %v3959_v37, %v1655_v38 }
 0x13f   : > { %v1257_v11 = vsel %vm4929_vm4, %v4919_v16, 0.0  ;;  %2168 = vmatprep.subr.bf16.mxu0 %v1368_v36  ;;  %v1660_v0 = vsel %vm4737_vm14, %v3965_v27, %v1656_v22  ;;  %vm4930_vm7 = vcmp.eq.f32.partialorder %v3510_v54, 3.0  ;;  %vm4931_vm10 = vcmp.eq.f32.partialorder %v3518_v7, 3.0 }
 0x140   : > { %v1260_v9 = vsel %vm4930_vm7, %v3561_v23, %v1256_v51  ;;  %v1261_v42 = vsel %vm4931_vm10, %v3574_v3, %v1257_v11  ;;  %v1663_v55 = vsel %vm1635_vm15, %v3892_v52, %v1659_v26  ;;  %v1664_v18 = vsel %vm1636_vm8, %v3895_v39, %v1660_v0 }
 0x141   : > { %vm4932_vm4 = vcmp.eq.f32.partialorder %v3510_v54, 2.0  ;;  %vm4933_vm14 = vcmp.eq.f32.partialorder %v3518_v7, 2.0  ;;  %v1666_v25 = vpack.c.bf16 %v1664_v18, %v1663_v55  ;;  %vm4934_vm7 = vcmp.eq.f32.partialorder %v3510_v54, 1.0 }
 0x142   : > { %v1264_v49 = vsel %vm4932_vm4, %v3600_v40, %v1260_v9  ;;  %v1265_v28 = vsel %vm4933_vm14, %v3606_v6, %v1261_v42  ;;  %vm4935_vm15 = vcmp.eq.f32.partialorder %v3518_v7, 1.0  ;;  %vm4739_vm10 = vcmp.eq.f32.partialorder %v3674_v58, 8.0 }
 0x143   : > { %v1268_v15 = vsel %vm4934_vm7, %v3548_v10, %v1264_v49  ;;  %v1269_v19 = vsel %vm4935_vm15, %v3551_v59, %v1265_v28  ;;  %vm4738_vm8 = vcmp.eq.f32.partialorder %v3676_v30, 8.0  ;;  %v1769_v61 = vsel %vm4739_vm10, %v3723_v41, 0.0  ;;  %2192 = vmatpush3.bf16.msra.mxu1 %v1666_v25 }
 0x144   : > { %v1272_v56 = vpack.c.bf16 %v1269_v19, %v1268_v15  ;;  %vm4936_vm14 = vcmp.eq.f32.partialorder %v3616_v14, 8.0  ;;  %v1770_v8 = vsel %vm4738_vm8, %v4937_v53, 0.0  ;;  %vm4938_vm4 = vcmp.eq.f32.partialorder %v3674_v58, 7.0 }
 0x145   : > { %v1354_v63 = vsel %vm4936_vm14, %v3656_v2, 0.0  ;;  %v1773_v60 = vsel %vm4938_vm4, %v3726_v21, %v1769_v61  ;;  %vm4939_vm7 = vcmp.eq.f32.partialorder %v3618_v29, 8.0  ;;  %vm4940_vm15 = vcmp.eq.f32.partialorder %v3616_v14, 7.0 }
 0x146   : > { %v1355_v31 = vsel %vm4939_vm7, %v3658_v20, 0.0  ;;  %v1358_v5 = vsel %vm4940_vm15, %v3661_v33, %v1354_v63  ;;  %2169 = vmatpush3.bf16.msra.mxu0 %v1272_v56  ;;  %vm4941_vm14 = vcmp.eq.f32.partialorder %v3676_v30, 7.0  ;;  %vm4942_vm8 = vcmp.eq.f32.partialorder %v3674_v58, 6.0 }
 0x147   : > { %v1774_v36 = vsel %vm4941_vm14, %v3738_v57, %v1770_v8  ;;  %v1777_v38 = vsel %vm4942_vm8, %v3769_v12, %v1773_v60  ;;  %vm4943_vm4 = vcmp.eq.f32.partialorder %v3618_v29, 7.0  ;;  %vm4944_vm7 = vcmp.eq.f32.partialorder %v3616_v14, 6.0 }
 0x148   : > { %v1359_v45 = vsel %vm4943_vm4, %v3663_v48, %v1355_v31  ;;  %v1362_v22 = vsel %vm4944_vm7, %v3691_v46, %v1358_v5  ;;  %vm4945_vm15 = vcmp.eq.f32.partialorder %v3676_v30, 6.0  ;;  %vm4946_vm10 = vcmp.eq.f32.partialorder %v3674_v58, 5.0 }
 0x149   : > { %v1778_v51 = vsel %vm4945_vm15, %v3779_v35, %v1774_v36  ;;  %v1781_v11 = vsel %vm4946_vm10, %v3717_v47, %v1777_v38  ;;  %vm4947_vm14 = vcmp.eq.f32.partialorder %v3618_v29, 6.0  ;;  %vm4948_vm8 = vcmp.eq.f32.partialorder %v3616_v14, 5.0 }
 0x14a   : > { %v1363_v26 = vsel %vm4947_vm14, %v3694_v43, %v1359_v45  ;;  %v1366_v0 = vsel %vm4948_vm8, %v3650_v44, %v1362_v22  ;;  %vm4949_vm4 = vcmp.eq.f32.partialorder %v3676_v30, 5.0  ;;  %vm4950_vm7 = vcmp.eq.f32.partialorder %v3618_v29, 5.0 }
 0x14b   : > { %v1782_v9 = vsel %vm4949_vm4, %v3721_v4, %v1778_v51  ;;  %v1367_v42 = vsel %vm4950_vm7, %v3652_v62, %v1363_v26  ;;  %vm4951_vm15 = vcmp.eq.f32.partialorder %v3674_v58, 4.0  ;;  %vm4952_vm10 = vcmp.eq.f32.partialorder %v3676_v30, 4.0 }
 0x14c   : > { %v1673_v55 = vsel %vm4951_vm15, %v3723_v41, 0.0  ;;  %v1674_v18 = vsel %vm4952_vm10, %v4937_v53, 0.0  ;;  %v1785_v49 = vpack.c.bf16 %v1782_v9, %v1781_v11  ;;  %v1369_v28 = vpack.c.bf16 %v1367_v42, %v1366_v0 }
 0x14d   : > { %vm4953_vm14 = vcmp.eq.f32.partialorder %v3674_v58, 3.0  ;;  %vm4954_vm8 = vcmp.eq.f32.partialorder %v3676_v30, 3.0  ;;  %vm4955_vm4 = vcmp.eq.f32.partialorder %v3674_v58, 2.0  ;;  %vm4956_vm7 = vcmp.eq.f32.partialorder %v3676_v30, 2.0 }
 0x14e   : > { %v1677_v25 = vsel %vm4953_vm14, %v3726_v21, %v1673_v55  ;;  %v1678_v15 = vsel %vm4954_vm8, %v3738_v57, %v1674_v18  ;;  %vm4957_vm15 = vcmp.eq.f32.partialorder %v3616_v14, 4.0  ;;  %vm4958_vm10 = vcmp.eq.f32.partialorder %v3618_v29, 4.0  ;;  %2193 = vmatprep.subr.bf16.mxu1 %v1785_v49  ;;  %2170 = vmatprep.subr.bf16.mxu0 %v1369_v28 }
 0x14f   : > { %v1681_v19 = vsel %vm4955_vm4, %v3769_v12, %v1677_v25  ;;  %v1682_v56 = vsel %vm4956_vm7, %v3779_v35, %v1678_v15  ;;  %v1258_v61 = vsel %vm4957_vm15, %v3656_v2, 0.0  ;;  %v1259_v63 = vsel %vm4958_vm10, %v3658_v20, 0.0 }
 0x150   : > { %vm4959_vm14 = vcmp.eq.f32.partialorder %v3674_v58, 1.0  ;;  %v1686_v60 = vsel %vm1638_vm2, %v3721_v4, %v1682_v56  ;;  %vm4960_vm8 = vcmp.eq.f32.partialorder %v3616_v14, 3.0  ;;  %vm1767_vm4 = vcmp.eq.f32.partialorder %v3841_v17, 8.0 }
 0x151   : > { %v1685_v8 = vsel %vm4959_vm14, %v3717_v47, %v1681_v19  ;;  %v1262_v31 = vsel %vm4960_vm8, %v3661_v33, %v1258_v61  ;;  %vm4961_vm7 = vcmp.eq.f32.partialorder %v3618_v29, 3.0  ;;  %vm1768_vm15 = vcmp.eq.f32.partialorder %v3861_v32, 8.0 }
 0x152   : > { %v1689_v5 = vpack.c.bf16 %v1686_v60, %v1685_v8  ;;  %v1263_v36 = vsel %vm4961_vm7, %v3663_v48, %v1259_v63  ;;  %v1266_v38 = vsel %vm1226_vm9, %v3691_v46, %v1262_v31  ;;  %v1771_v51 = vsel %vm1767_vm4, %v3899_v1, 0.0 }
 0x153   : > { %v1267_v45 = vsel %vm1227_vm0, %v3694_v43, %v1263_v36  ;;  %v1270_v22 = vsel %vm1222_vm5, %v3650_v44, %v1266_v38  ;;  %v1772_v11 = vsel %vm1768_vm15, %v3904_v50, 0.0  ;;  %v1775_v0 = vsel %vm1743_vm6, %v3902_v24, %v1771_v51 }
 0x154   : > { %2194 = vmatpush3.bf16.msra.mxu1 %v1689_v5  ;;  %v1271_v26 = vsel %vm1223_vm13, %v3652_v62, %v1267_v45  ;;  %v1776_v9 = vsel %vm1744_vm1, %v3913_v13, %v1772_v11  ;;  %vm4962_vm2 = vcmp.eq.f32.partialorder %v3510_v54, 9.0  ;;  %vm4963_vm5 = vcmp.eq.f32.partialorder %v3841_v17, 6.0  ;;  %v4345_v45 = vpop.f32.mrb[0].mxu1 }
 0x155   : > { %v1376_v42 = vsel %vm4962_vm2, %v4917_v34, 0.0  ;;  %v1273_v55 = vpack.c.bf16 %v1271_v26, %v1270_v22  ;;  %v1779_v18 = vsel %vm4963_vm5, %v3959_v37, %v1775_v0  ;;  %vm4964_vm13 = vcmp.eq.f32.partialorder %v3861_v32, 6.0  ;;  %v2216_v0 = vpop.f32.mrb[1].mxu1 }
 0x156   : > { %v1780_v49 = vsel %vm4964_vm13, %v3965_v27, %v1776_v9  ;;  %vm4965_vm10 = vcmp.eq.f32.partialorder %v3518_v7, 9.0  ;;  %vm4966_vm14 = vcmp.eq.f32.partialorder %v3841_v17, 5.0  ;;  %vm4967_vm8 = vcmp.eq.f32.partialorder %v3861_v32, 5.0 }
 0x157   : > { %v1377_v28 = vsel %vm4965_vm10, %v4919_v16, 0.0  ;;  %v1783_v25 = vsel %vm4966_vm14, %v3892_v52, %v1779_v18  ;;  %v1784_v15 = vsel %vm4967_vm8, %v3895_v39, %v1780_v49  ;;  %vm4968_vm7 = vcmp.eq.f32.partialorder %v3510_v54, 8.0  ;;  %2171 = vmatpush3.bf16.msra.mxu0 %v1273_v55  ;;  %v4368_v49 = vpop.f32.mrb[2].mxu1 }
 0x158   : > { %v1380_v19 = vsel %vm4968_vm7, %v3561_v23, %v1376_v42  ;;  %vm4969_vm2 = vcmp.eq.f32.partialorder %v3518_v7, 8.0  ;;  %v1786_v61 = vpack.c.bf16 %v1784_v15, %v1783_v25  ;;  %vm4970_vm5 = vcmp.eq.f32.partialorder %v3510_v54, 7.0 }
 0x159   : > { %v1381_v56 = vsel %vm4969_vm2, %v3574_v3, %v1377_v28  ;;  %v1384_v63 = vsel %vm4970_vm5, %v3600_v40, %v1380_v19  ;;  %vm4971_vm13 = vcmp.eq.f32.partialorder %v3518_v7, 7.0  ;;  %vm4972_vm10 = vcmp.eq.f32.partialorder %v3841_v17, 4.0 }
 0x15a   : > { %v1385_v8 = vsel %vm4971_vm13, %v3606_v6, %v1381_v56  ;;  %v1675_v60 = vsel %vm4972_vm10, %v3899_v1, 0.0  ;;  %vm4973_vm14 = vcmp.eq.f32.partialorder %v3510_v54, 6.0  ;;  %vm4974_vm8 = vcmp.eq.f32.partialorder %v3518_v7, 6.0  ;;  %2195 = vmatprep.subr.bf16.mxu1 %v1786_v61 }
 0x15b   : > { %v1388_v31 = vsel %vm4973_vm14, %v3548_v10, %v1384_v63  ;;  %v1389_v5 = vsel %vm4974_vm8, %v3551_v59, %v1385_v8  ;;  %vm4975_vm7 = vcmp.eq.f32.partialorder %v3861_v32, 4.0  ;;  %vm4976_vm2 = vcmp.eq.f32.partialorder %v3841_v17, 3.0 }
 0x15c   : > { %v1676_v36 = vsel %vm4975_vm7, %v3904_v50, 0.0  ;;  %v1679_v38 = vsel %vm4976_vm2, %v3902_v24, %v1675_v60  ;;  %v1392_v22 = vpack.c.bf16 %v1389_v5, %v1388_v31  ;;  %vm4977_vm5 = vcmp.eq.f32.partialorder %v3861_v32, 3.0 }
 0x15d   : > { %v1680_v51 = vsel %vm4977_vm5, %v3913_v13, %v1676_v36  ;;  %v1683_v11 = vsel %vm1643_vm12, %v3959_v37, %v1679_v38  ;;  %vm4978_vm13 = vcmp.eq.f32.partialorder %v3510_v54, 5.0  ;;  %vm4979_vm10 = vcmp.eq.f32.partialorder %v3861_v32, 2.0 }
 0x15e   : > { %v1280_v26 = vsel %vm4978_vm13, %v4917_v34, 0.0  ;;  %v1684_v9 = vsel %vm4979_vm10, %v3965_v27, %v1680_v51  ;;  %v1687_v42 = vsel %vm1639_vm3, %v3892_v52, %v1683_v11  ;;  %vm4980_vm14 = vcmp.eq.f32.partialorder %v3518_v7, 5.0  ;;  %2172 = vmatprep.subr.bf16.mxu0 %v1392_v22 }
 0x15f   : > { %v1281_v55 = vsel %vm4980_vm14, %v4919_v16, 0.0  ;;  %vm4981_vm8 = vcmp.eq.f32.partialorder %v3510_v54, 4.0  ;;  %vm4982_vm7 = vcmp.eq.f32.partialorder %v3861_v32, 1.0  ;;  %vm4983_vm2 = vcmp.eq.f32.partialorder %v3518_v7, 4.0  ;;  %v2217_v16 = vpop.f32.mrb[3].mxu1 }
 0x160   : > { %v1284_v18 = vsel %vm4981_vm8, %v3561_v23, %v1280_v26  ;;  %v1688_v34 = vsel %vm4982_vm7, %v3895_v39, %v1684_v9  ;;  %v1285_v28 = vsel %vm4983_vm2, %v3574_v3, %v1281_v55  ;;  %vm4984_vm3 = vcmp.eq.f32.partialorder %v3510_v54, 3.0 }
 0x161   : > { %v1288_v25 = vsel %vm4984_vm3, %v3600_v40, %v1284_v18  ;;  %vm1789_vm5 = vcmp.eq.f32.partialorder %v3674_v58, 9.0  ;;  %v1690_v15 = vpack.c.bf16 %v1688_v34, %v1687_v42  ;;  %vm4985_vm13 = vcmp.eq.f32.partialorder %v3518_v7, 3.0 }
 0x162   : > { %v1289_v23 = vsel %vm4985_vm13, %v3606_v6, %v1285_v28  ;;  %vm4986_vm10 = vcmp.eq.f32.partialorder %v3510_v54, 2.0  ;;  %vm1790_vm14 = vcmp.eq.f32.partialorder %v3676_v30, 9.0  ;;  %vm4987_vm8 = vcmp.eq.f32.partialorder %v3518_v7, 2.0 }
 0x163   : > { %v1292_v19 = vsel %vm4986_vm10, %v3548_v10, %v1288_v25  ;;  %v1293_v3 = vsel %vm4987_vm8, %v3551_v59, %v1289_v23  ;;  %v1793_v40 = vsel %vm1789_vm5, %v3723_v41, 0.0  ;;  %v1794_v56 = vsel %vm1790_vm14, %v4937_v53, 0.0  ;;  %2196 = vmatpush3.bf16.msra.mxu1 %v1690_v15 }
 0x164   : > { %vm4988_vm7 = vcmp.eq.f32.partialorder %v3616_v14, 9.0  ;;  %v1296_v54 = vpack.c.bf16 %v1293_v3, %v1292_v19  ;;  %vm4989_vm2 = vcmp.eq.f32.partialorder %v3674_v58, 8.0  ;;  %vm4990_vm3 = vcmp.eq.f32.partialorder %v3676_v30, 8.0 }
 0x165   : > { %v1378_v6 = vsel %vm4988_vm7, %v3656_v2, 0.0  ;;  %v1797_v10 = vsel %vm4989_vm2, %v3726_v21, %v1793_v40  ;;  %v1798_v7 = vsel %vm4990_vm3, %v3738_v57, %v1794_v56  ;;  %vm4991_vm13 = vcmp.eq.f32.partialorder %v3618_v29, 9.0 }
 0x166   : > { %v1379_v59 = vsel %vm4991_vm13, %v3658_v20, 0.0  ;;  %vm4992_vm10 = vcmp.eq.f32.partialorder %v3674_v58, 7.0  ;;  %vm4993_vm8 = vcmp.eq.f32.partialorder %v3676_v30, 7.0  ;;  %vm4994_vm7 = vcmp.eq.f32.partialorder %v3616_v14, 8.0  ;;  %2173 = vmatpush3.bf16.msra.mxu0 %v1296_v54 }
 0x167   : > { %v1801_v61 = vsel %vm4992_vm10, %v3769_v12, %v1797_v10  ;;  %v1802_v63 = vsel %vm4993_vm8, %v3779_v35, %v1798_v7  ;;  %v1382_v8 = vsel %vm4994_vm7, %v3661_v33, %v1378_v6  ;;  %vm4995_vm2 = vcmp.eq.f32.partialorder %v3618_v29, 8.0 }
 0x168   : > { %v1383_v60 = vsel %vm4995_vm2, %v3663_v48, %v1379_v59  ;;  %vm4996_vm3 = vcmp.eq.f32.partialorder %v3674_v58, 6.0  ;;  %vm4997_vm13 = vcmp.eq.f32.partialorder %v3676_v30, 6.0  ;;  %vm4998_vm10 = vcmp.eq.f32.partialorder %v3616_v14, 7.0 }
 0x169   : > { %v1805_v31 = vsel %vm4996_vm3, %v3717_v47, %v1801_v61  ;;  %v1806_v5 = vsel %vm4997_vm13, %v3721_v4, %v1802_v63  ;;  %v1386_v36 = vsel %vm4998_vm10, %v3691_v46, %v1382_v8  ;;  %vm4999_vm8 = vcmp.eq.f32.partialorder %v3618_v29, 7.0 }
 0x16a   : > { %v1387_v38 = vsel %vm4999_vm8, %v3694_v43, %v1383_v60  ;;  %v1809_v22 = vpack.c.bf16 %v1806_v5, %v1805_v31  ;;  %vm5000_vm7 = vcmp.eq.f32.partialorder %v3616_v14, 6.0  ;;  %vm5001_vm2 = vcmp.eq.f32.partialorder %v3618_v29, 6.0 }
 0x16b   : > { %v1390_v51 = vsel %vm5000_vm7, %v3650_v44, %v1386_v36  ;;  %v1391_v11 = vsel %vm5001_vm2, %v3652_v62, %v1387_v38  ;;  %vm5002_vm3 = vcmp.eq.f32.partialorder %v3674_v58, 5.0  ;;  %vm5003_vm13 = vcmp.eq.f32.partialorder %v3676_v30, 5.0  ;;  %v2339_v38 = vld [vmem:[%s4608_s1] ss:$12 sps:$4 sm:$0xff]  }
 0x16c   : > { %v1697_v26 = vsel %vm5002_vm3, %v3723_v41, 0.0  ;;  %v1393_v0 = vpack.c.bf16 %v1391_v11, %v1390_v51  ;;  %v1698_v9 = vsel %vm5003_vm13, %v4937_v53, 0.0  ;;  %vm5004_vm10 = vcmp.eq.f32.partialorder %v3674_v58, 4.0  ;;  %2197 = vmatprep.subr.bf16.mxu1 %v1809_v22 }
 0x16d   : > { %v1701_v42 = vsel %vm5004_vm10, %v3726_v21, %v1697_v26  ;;  %vm5005_vm8 = vcmp.eq.f32.partialorder %v3616_v14, 5.0  ;;  %vm5006_vm7 = vcmp.eq.f32.partialorder %v3676_v30, 4.0  ;;  %vm5007_vm2 = vcmp.eq.f32.partialorder %v3674_v58, 3.0 }
 0x16e   : > { %v1282_v55 = vsel %vm5005_vm8, %v3656_v2, 0.0  ;;  %v1702_v18 = vsel %vm5006_vm7, %v3738_v57, %v1698_v9  ;;  %v1705_v34 = vsel %vm5007_vm2, %v3769_v12, %v1701_v42  ;;  %vm5008_vm3 = vcmp.eq.f32.partialorder %v3618_v29, 5.0  ;;  %2174 = vmatprep.subr.bf16.mxu0 %v1393_v0 }
 0x16f   : > { %v1283_v28 = vsel %vm5008_vm3, %v3658_v20, 0.0  ;;  %vm5009_vm13 = vcmp.eq.f32.partialorder %v3616_v14, 4.0  ;;  %vm5010_vm10 = vcmp.eq.f32.partialorder %v3676_v30, 3.0  ;;  %vm5011_vm8 = vcmp.eq.f32.partialorder %v3674_v58, 2.0 }
 0x170   : > { %v1286_v25 = vsel %vm5009_vm13, %v3661_v33, %v1282_v55  ;;  %v1706_v2 = vsel %vm5010_vm10, %v3779_v35, %v1702_v18  ;;  %v1709_v16 = vsel %vm5011_vm8, %v3717_v47, %v1705_v34  ;;  %vm5012_vm7 = vcmp.eq.f32.partialorder %v3618_v29, 4.0 }
 0x171   : > { %v1287_v15 = vsel %vm5012_vm7, %v3663_v48, %v1283_v28  ;;  %vm5013_vm2 = vcmp.eq.f32.partialorder %v3616_v14, 3.0  ;;  %vm5014_vm3 = vcmp.eq.f32.partialorder %v3676_v30, 2.0  ;;  %vm5015_vm13 = vcmp.eq.f32.partialorder %v3618_v29, 3.0 }
 0x172   : > { %v1290_v20 = vsel %vm5013_vm2, %v3691_v46, %v1286_v25  ;;  %v1710_v33 = vsel %vm5014_vm3, %v3721_v4, %v1706_v2  ;;  %v1291_v23 = vsel %vm5015_vm13, %v3694_v43, %v1287_v15  ;;  %vm1791_vm10 = vcmp.eq.f32.partialorder %v3841_v17, 9.0 }
 0x173   : > { %v1294_v19 = vsel %vm1226_vm9, %v3650_v44, %v1290_v20  ;;  %v1713_v3 = vpack.c.bf16 %v1710_v33, %v1709_v16  ;;  %v1295_v48 = vsel %vm1227_vm0, %v3652_v62, %v1291_v23  ;;  %vm1792_vm8 = vcmp.eq.f32.partialorder %v3861_v32, 9.0 }
 0x174   : > { %v1795_v46 = vsel %vm1791_vm10, %v3899_v1, 0.0  ;;  %v1297_v40 = vpack.c.bf16 %v1295_v48, %v1294_v19  ;;  %v1796_v43 = vsel %vm1792_vm8, %v3904_v50, 0.0  ;;  %vm5016_vm9 = vcmp.eq.f32.partialorder %v3841_v17, 5.0 }
 0x175   : > { %v1799_v14 = vsel %vm1767_vm4, %v3902_v24, %v1795_v46  ;;  %v1699_v29 = vsel %vm5016_vm9, %v3899_v1, 0.0  ;;  %2198 = vmatpush3.bf16.msra.mxu1 %v1713_v3  ;;  %v1800_v44 = vsel %vm1768_vm15, %v3913_v13, %v1796_v43  ;;  %vm5017_vm0 = vcmp.eq.f32.partialorder %v3861_v32, 5.0 }
 0x176   : > { %v1803_v62 = vsel %vm1743_vm6, %v3959_v37, %v1799_v14  ;;  %v1700_v56 = vsel %vm5017_vm0, %v3904_v50, 0.0  ;;  %vm5018_vm7 = vcmp.eq.f32.partialorder %v3841_v17, 4.0  ;;  %2175 = vmatpush3.bf16.msra.mxu0 %v1297_v40  ;;  %v1804_v54 = vsel %vm1744_vm1, %v3965_v27, %v1800_v44 }
 0x177   : > { %v1703_v6 = vsel %vm5018_vm7, %v3902_v24, %v1699_v29  ;;  %vm5019_vm2 = vcmp.eq.f32.partialorder %v3841_v17, 6.0  ;;  %vm5020_vm3 = vcmp.eq.f32.partialorder %v3861_v32, 4.0  ;;  %vm5021_vm13 = vcmp.eq.f32.partialorder %v3841_v17, 3.0 }
 0x178   : > { %v1807_v10 = vsel %vm5019_vm2, %v3892_v52, %v1803_v62  ;;  %v1704_v7 = vsel %vm5020_vm3, %v3913_v13, %v1700_v56  ;;  %v1707_v59 = vsel %vm5021_vm13, %v3959_v37, %v1703_v6  ;;  %vm5022_vm9 = vcmp.eq.f32.partialorder %v3861_v32, 6.0 }
 0x179   : > { %v1808_v61 = vsel %vm5022_vm9, %v3895_v39, %v1804_v54  ;;  %vm5023_vm0 = vcmp.eq.f32.partialorder %v3861_v32, 3.0  ;;  %v1711_v8 = vsel %vm1643_vm12, %v3892_v52, %v1707_v59  ;;  %v5024_v60 = vmov 0.0   ;;  %1477 = vmatmul.mubr.bf16.vlgmr.msra.gmra.mrb[8].mxu0 %v2339_v38 }
 0x17a   : > { %v1708_v63 = vsel %vm5023_vm0, %v3965_v27, %v1704_v7  ;;  %2234 = vmatprep.subr.bf16.mxu0 %v5024_v60  ;;  %vm1813_vm7 = vcmp.eq.f32.partialorder %v3674_v58, 10.0  ;;  %v1810_v31 = vpack.c.bf16 %v1808_v61, %v1807_v10  ;;  %vm5025_vm2 = vcmp.eq.f32.partialorder %v3861_v32, 2.0  ;;  %2238 = vmatprep.mubr.msk.bf16.mxu0 %vm4882_vm11, %v5024_v60 }
 0x17b   : > { %v1712_v5 = vsel %vm5025_vm2, %v3895_v39, %v1708_v63  ;;  %vm1814_vm3 = vcmp.eq.f32.partialorder %v3676_v30, 10.0  ;;  %v1817_v36 = vsel %vm1813_vm7, %v3723_v41, 0.0  ;;  %vm1815_vm12 = vcmp.eq.f32.partialorder %v3841_v17, 10.0 }
 0x17c   : > { %v1714_v22 = vpack.c.bf16 %v1712_v5, %v1711_v8  ;;  %v1818_v51 = vsel %vm1814_vm3, %v4937_v53, 0.0  ;;  %v1821_v11 = vsel %vm1789_vm5, %v3726_v21, %v1817_v36  ;;  %2199 = vmatprep.subr.bf16.mxu1 %v1810_v31  ;;  %vm5026_vm13 = vcmp.eq.f32.partialorder %v3674_v58, 8.0 }
 0x17d   : > { %v1822_v26 = vsel %vm1790_vm14, %v3738_v57, %v1818_v51  ;;  %v1825_v41 = vsel %vm5026_vm13, %v3769_v12, %v1821_v11  ;;  %vm1816_vm9 = vcmp.eq.f32.partialorder %v3861_v32, 10.0  ;;  %v1819_v0 = vsel %vm1815_vm12, %v3899_v1, 0.0 }
 0x17e   : > { %2200 = vmatpush3.bf16.msra.mxu1 %v1714_v22  ;;  %vm5027_vm5 = vcmp.eq.f32.partialorder %v3676_v30, 8.0  ;;  %vm5028_vm0 = vcmp.eq.f32.partialorder %v3674_v58, 7.0  ;;  %v1820_v53 = vsel %vm1816_vm9, %v3904_v50, 0.0  ;;  %v1823_v12 = vsel %vm1791_vm10, %v3902_v24, %v1819_v0  ;;  %v5030_v50 = vld [vmem:[#allocation14_spill] sm:$0xff] }
 0x17f   : > { %v1826_v21 = vsel %vm5027_vm5, %v3779_v35, %v1822_v26  ;;  %v1829_v57 = vsel %vm5028_vm0, %v3717_v47, %v1825_v41  ;;  %vm5029_vm14 = vcmp.eq.f32.partialorder %v3676_v30, 7.0  ;;  %v1824_v9 = vsel %vm1792_vm8, %v3913_v13, %v1820_v53 }
 0x180   : > { %v1830_v1 = vsel %vm5029_vm14, %v3721_v4, %v1826_v21  ;;  %v1827_v35 = vsel %vm1767_vm4, %v3959_v37, %v1823_v12  ;;  %v1828_v47 = vsel %vm1768_vm15, %v3965_v27, %v1824_v9 }
 0x181   : > { %v1833_v58 = vpack.c.bf16 %v1830_v1, %v1829_v57  ;;  %v1831_v24 = vsel %vm1743_vm6, %v3892_v52, %v1827_v35  ;;  %1894 = vmatmul.mubr.bf16.vlgmr.msra.gmra.mrb[12].mxu1 %v2339_v38  ;;  %v1832_v30 = vsel %vm1744_vm1, %v3895_v39, %v1828_v47 }
 0x182   : > { %v1834_v4 = vpack.c.bf16 %v1832_v30, %v1831_v24 }
 0x183   : > { %2235 = vmatpush3.bf16.msra.mxu0 %v1833_v58 }
 0x184   : > { %2236 = vmatprep.subr.bf16.mxu0 %v5024_v60 }
 0x187   : > { %2237 = vmatpush3.bf16.msra.mxu0 %v1834_v4 }
 0x18a   : > { %2239 = vmatmul.mubr.bf16.vlgmr.msra.gmra.mrb[12].mxu0 %v5030_v50 }
 0x19f   : > { %v2126_v13 = vpop.f32.mrb[0].mxu0 }
 0x1a0   : > { %v2127_v37 = vpop.f32.mrb[1].mxu0 }
 0x1a1   : > { %v2128_v42 = vadd.f32 %v2127_v37, %v2126_v13  ;;  %v2129_v27 = vpop.f32.mrb[2].mxu0 }
 0x1a2   : > { %v2130_v55 = vpop.f32.mrb[3].mxu0 }
 0x1a3   : > { %v688_v17 = vadd.f32 %v2128_v42, %v4345_v45  ;;  %v2131_v52 = vadd.f32 %v2130_v55, %v2129_v27 }
 0x1a4   : > { %v2151_v18 = vpop.f32.mrb[4].mxu1 }
 0x1a5   : > { %v2152_v34 = vpop.f32.mrb[5].mxu1  ;;  %v691_v32 = vadd.f32 %v2131_v52, %v4368_v49 }
 0x1a6   : > { %v2153_v39 = vadd.f32 %v2152_v34, %v2151_v18  ;;  %v2154_v28 = vpop.f32.mrb[6].mxu1 }
 0x1a7   : > { %v2155_v25 = vpop.f32.mrb[7].mxu1 }
 0x1a8   : > { %v2156_v2 = vadd.f32 %v2155_v25, %v2154_v28 }
 0x1ad   : > { %v1102_v16 = vpop.f32.mrb[4].mxu0 }
 0x1ae   : > { %v1103_v15 = vadd.f32 %v2153_v39, %v1102_v16  ;;  %v2224_v20 = vpop.f32.mrb[5].mxu0 }
 0x1af   : > { %v1105_v33 = vpop.f32.mrb[6].mxu0 }
 0x1b0   : > { %v1109_v23 = vmax.f32 %v688_v17, %v1103_v15  ;;  %v1106_v19 = vadd.f32 %v2156_v2, %v1105_v33  ;;  %v2225_v3 = vpop.f32.mrb[7].mxu0 }
 0x1b2   : > { %v1110_v48 = vmax.f32 %v691_v32, %v1106_v19 }
 0x1d0   : > { %v1519_v46 = vpop.f32.mrb[8].mxu1 }
 0x1d1   : > { %v2232_v40 = vpop.f32.mrb[9].mxu1 }
 0x1d2   : > { %v1522_v45 = vpop.f32.mrb[10].mxu1 }
 0x1d3   : > { %v2233_v43 = vpop.f32.mrb[11].mxu1 }
 0x24c   : > { %v2176_v14 = vpop.f32.mrb[8].mxu0 }
 0x24d   : > { %v2177_v29 = vpop.f32.mrb[9].mxu0 }
 0x24e   : > { %v2178_v49 = vadd.f32 %v2177_v29, %v2176_v14  ;;  %v2179_v44 = vpop.f32.mrb[10].mxu0 }
 0x24f   : > { %v2180_v62 = vpop.f32.mrb[11].mxu0 }
 0x250   : > { %v1520_v56 = vadd.f32 %v2178_v49, %v1519_v46  ;;  %v2181_v6 = vadd.f32 %v2180_v62, %v2179_v44 }
 0x252   : > { %v1523_v10 = vadd.f32 %v2181_v6, %v1522_v45  ;;  %v1526_v59 = vmax.f32 %v1109_v23, %v1520_v56 }
 0x254   : > { %v2201_v54 = vpop.f32.mrb[12].mxu1  ;;  %v1527_v60 = vmax.f32 %v1110_v48, %v1523_v10 }
 0x255   : > { %v2202_v7 = vpop.f32.mrb[13].mxu1 }
 0x256   : > { %v2203_v61 = vadd.f32 %v2202_v7, %v2201_v54  ;;  %v2204_v63 = vpop.f32.mrb[14].mxu1 }
 0x257   : > { %v2205_v8 = vpop.f32.mrb[15].mxu1 }
 0x258   : > { %v2206_v31 = vadd.f32 %v2205_v8, %v2204_v63 }
 0x25d   : > { %v1936_v5 = vpop.f32.mrb[12].mxu0 }
 0x25e   : > { %v1937_v36 = vadd.f32 %v2203_v61, %v1936_v5  ;;  %v2240_v38 = vpop.f32.mrb[13].mxu0 }
 0x25f   : > { %v1939_v22 = vpop.f32.mrb[14].mxu0 }
 0x260   : > { %v1943_v51 = vmax.f32 %v1526_v59, %v1937_v36  ;;  %v1940_v11 = vadd.f32 %v2206_v31, %v1939_v22  ;;  %v2241_v26 = vpop.f32.mrb[15].mxu0 }
 0x262   : > { %v1944_v41 = vmax.f32 %v1527_v60, %v1940_v11 }
 0x264   : > { %v2101_v0 = vpack.c.bf16 %v1944_v41, %v1943_v51 }
 0x266   : > { %2102 = vst [vmem:[%s245_s19] sm:$0xff] %v2101_v0  }
 0x267 PF: > { %p9_p9 = scmp.ge.s32.totalorder %s2398_s13, 5   ;;  %s5031_s9 = smov %s2358_s10 }
 0x268   : > { %s5032_s10 = smov %s2407_s16  ;;  %s5033_s11 = smov %s2398_s13 }
 0x269   :  { %11 = sbr.rel (!%p9_p9) target bundleno = 2 (0x2), region = 108 }

// kernel: kanc_mlp_medium_forward.3
= control target key start
LH: loop header
LB: loop body
LE: loop exit
PB: predicated region body
PF: predicated region fallthrough
CT: control target
= control target key end

     0   :  { %s5978_s0 = inlined_call_operand.vmem [shape: bf16[4,1,48,128], index: 0, kind: input, shape index: {}]   ;;  %s5979_s1 = inlined_call_operand.vmem [shape: bf16[16,512], index: 1, kind: input, shape index: {}]   ;;  %s5980_s2 = inlined_call_operand.vmem [shape: bf16[1,16,128], index: 2, kind: output, shape index: {}]  }
   0x1   :  { %v2478_v0 = vld [vmem:[%s5978_s0 + $0x10] sm:$0xff]   ;;  %v2481_v1 = vld [vmem:[%s5978_s0 + $0x28] sm:$0xff]   ;;  %v2425_v2 = vld [vmem:[%s5978_s0] sm:$0xff]  }
   0x2   :  { %v2708_v3 = vunpack.c.l.bf16 %v2478_v0  ;;  %v2710_v4 = vunpack.c.h.bf16 %v2478_v0  ;;  %v2712_v5 = vunpack.c.l.bf16 %v2481_v1  ;;  %v2714_v6 = vunpack.c.h.bf16 %v2481_v1  ;;  %v2479_v18 = vld [vmem:[%s5978_s0 + $0x18] sm:$0xff]   ;;  %v2738_v25 = vld [vmem:[%s5978_s0 + $0x8] sm:$0xff]  }
   0x3   :  { %v2716_v7 = vunpack.c.l.bf16 %v2425_v2  ;;  %v2718_v8 = vunpack.c.h.bf16 %v2425_v2  ;;  %v2746_v29 = vunpack.c.l.bf16 %v2479_v18  ;;  %v2750_v32 = vunpack.c.h.bf16 %v2479_v18 }
   0x4   :  { %v2378_v9 = vadd.f32 2.2, %v2708_v3  ;;  %v2379_v10 = vadd.f32 2.2, %v2710_v4  ;;  %v2394_v11 = vadd.f32 2.2, %v2712_v5  ;;  %v2755_v35 = vunpack.c.l.bf16 %v2738_v25 }
   0x5   :  { %v2395_v12 = vadd.f32 2.2, %v2714_v6  ;;  %v39_v13 = vsub.f32 0.0, %v2716_v7  ;;  %v2374_v14 = vadd.f32 2.2, %v2716_v7  ;;  %v40_v20 = vsub.f32 0.0, %v2718_v8 }
   0x6   :  { %v91_v15 = vmul.f32 2.5, %v2378_v9  ;;  %v92_v16 = vmul.f32 2.5, %v2379_v10  ;;  %v688_v17 = vmul.f32 2.5, %v2394_v11  ;;  %v2375_v22 = vadd.f32 2.2, %v2718_v8 }
   0x7   :  { %v689_v19 = vmul.f32 2.5, %v2395_v12  ;;  %v45_v21 = vmul.f32 1.442695, %v39_v13  ;;  %v2744_v28 = vmul.f32 2.5, %v2374_v14  ;;  %v47_v33 = vmul.f32 1.442695, %v40_v20 }
   0x8   :  { %v2731_v23 = vfloor.f32 %v91_v15  ;;  %v2733_v24 = vfloor.f32 %v92_v16  ;;  %v2740_v26 = vfloor.f32 %v688_v17  ;;  %v2752_v34 = vmul.f32 2.5, %v2375_v22 }
   0x9   :  { %v2742_v27 = vfloor.f32 %v689_v19  ;;  %2583 = vpow2.f32 %v45_v21  ;;  %v2760_v42 = vfloor.f32 %v2744_v28  ;;  %v636_v43 = vsub.f32 0.0, %v2746_v29 }
   0xa   :  { %6355 = vst [vmem:[#allocation3_spill] sm:$0xff] %v2740_v26  ;;  %v103_v30 = vsub.f32 %v91_v15, %v2731_v23  ;;  %v104_v31 = vsub.f32 %v92_v16, %v2733_v24  ;;  %v700_v40 = vsub.f32 %v688_v17, %v2740_v26  ;;  %vm6049_vm0 = vcmp.eq.f32.partialorder %v2731_v23, 3.0 }
   0xb   :  { %6356 = vst [vmem:[#allocation4_spill] sm:$0xff] %v2742_v27  ;;  %v701_v41 = vsub.f32 %v689_v19, %v2742_v27  ;;  %vm5997_vm1 = vcmp.eq.f32.partialorder %v2733_v24, 3.0  ;;  %vm193_vm2 = vcmp.eq.f32.partialorder %v2731_v23, 1.0  ;;  %vm6048_vm3 = vcmp.eq.f32.partialorder %v2731_v23, 4.0 }
   0xc   :  { %v109_v36 = vmul.f32 %v103_v30, %v103_v30  ;;  %v110_v37 = vmul.f32 %v104_v31, %v104_v31  ;;  %v121_v38 = vsub.f32 1.0, %v103_v30  ;;  %v122_v39 = vsub.f32 1.0, %v104_v31 }
   0xd   :  { %v706_v48 = vmul.f32 %v700_v40, %v700_v40  ;;  %v707_v49 = vmul.f32 %v701_v41, %v701_v41  ;;  %v718_v50 = vsub.f32 1.0, %v700_v40  ;;  %v719_v53 = vsub.f32 1.0, %v701_v41 }
   0xe   :  { %v115_v44 = vmul.f32 %v109_v36, %v103_v30  ;;  %v116_v45 = vmul.f32 %v110_v37, %v104_v31  ;;  %v151_v46 = vmul.f32 %v121_v38, %v121_v38  ;;  %v152_v47 = vmul.f32 %v122_v39, %v122_v39 }
   0xf   :  { %vm6050_vm4 = vcmp.eq.f32.partialorder %v2733_v24, 4.0  ;;  %v748_v59 = vmul.f32 %v718_v50, %v718_v50  ;;  %v712_v62 = vmul.f32 %v706_v48, %v700_v40  ;;  %v713_v63 = vmul.f32 %v707_v49, %v701_v41 }
  0x10   :  { %v133_v51 = vmul.f32 0.5, %v115_v44  ;;  %v134_v52 = vmul.f32 0.5, %v116_v45  ;;  %v157_v54 = vmul.f32 %v151_v46, %v121_v38  ;;  %v158_v55 = vmul.f32 %v152_v47, %v122_v39 }
  0x11   :  { %v2768_v56 = vmul.f32 0.16666667, %v115_v44  ;;  %v749_v2 = vmul.f32 %v719_v53, %v719_v53  ;;  %v754_v9 = vmul.f32 %v748_v59, %v718_v50  ;;  %v2778_v11 = vmul.f32 0.16666667, %v116_v45 }
  0x12   :  { %v139_v57 = vsub.f32 %v133_v51, %v109_v36  ;;  %v140_v58 = vsub.f32 %v134_v52, %v110_v37  ;;  %v2770_v60 = vmul.f32 0.16666667, %v157_v54  ;;  %v2772_v61 = vmul.f32 0.16666667, %v158_v55 }
  0x13   :  { %6357 = vst [vmem:[#allocation5_spill] sm:$0xff] %v2768_v56  ;;  %v2584_v10 = vpop.eup %2583  ;;  %6362 = vst [vmem:[#allocation10_spill] sm:$0xff] %v2778_v11  ;;  %2585 = vpow2.f32 %v47_v33  ;;  %vm5996_vm5 = vcmp.eq.f32.partialorder %v2731_v23, 2.0  ;;  %vm5994_vm6 = vcmp.eq.f32.partialorder %v2733_v24, 2.0  ;;  %v730_v20 = vmul.f32 0.5, %v712_v62 }
  0x14   :  { %6358 = vst [vmem:[#allocation6_spill] sm:$0xff] %v2770_v60  ;;  %6359 = vst [vmem:[#allocation7_spill] sm:$0xff] %v2772_v61  ;;  %v2774_v0 = vadd.f32 0.6666667, %v139_v57  ;;  %v2776_v1 = vadd.f32 0.6666667, %v140_v58  ;;  %v755_v22 = vmul.f32 %v749_v2, %v719_v53 }
  0x15   :  { %v169_v12 = vsub.f32 1.0, %v2770_v60  ;;  %v170_v13 = vsub.f32 1.0, %v2772_v61  ;;  %v247_v14 = vsel %vm6048_vm3, %v2770_v60, 0.0  ;;  %v248_v15 = vsel %vm6050_vm4, %v2772_v61, 0.0 }
  0x16   :  { %6360 = vst [vmem:[#allocation8_spill] sm:$0xff] %v2774_v0  ;;  %6361 = vst [vmem:[#allocation9_spill] sm:$0xff] %v2776_v1  ;;  %v253_v18 = vsel %vm6049_vm0, %v2774_v0, %v247_v14  ;;  %v254_v19 = vsel %vm5997_vm1, %v2776_v1, %v248_v15  ;;  %v731_v21 = vmul.f32 0.5, %v713_v63  ;;  %v2798_v30 = vmul.f32 0.16666667, %v754_v9 }
  0x17   :  { %v175_v16 = vsub.f32 %v169_v12, %v2774_v0  ;;  %v176_v17 = vsub.f32 %v170_v13, %v2776_v1  ;;  %vm194_vm7 = vcmp.eq.f32.partialorder %v2733_v24, 1.0  ;;  %v211_v36 = vsel %vm6049_vm0, %v2770_v60, 0.0 }
  0x18   :  { %6363 = vst [vmem:[#allocation11_spill] sm:$0xff] %v2798_v30  ;;  %v736_v37 = vsub.f32 %v730_v20, %v706_v48  ;;  %v737_v38 = vsub.f32 %v731_v21, %v707_v49  ;;  %v2810_v39 = vmul.f32 0.16666667, %v755_v22  ;;  %v766_v40 = vsub.f32 1.0, %v2798_v30 }
  0x19   :  { %v2801_v31 = vsub.f32 %v175_v16, %v2768_v56  ;;  %v2804_v33 = vsub.f32 %v176_v17, %v2778_v11  ;;  %v2819_v45 = vmul.f32 0.16666667, %v712_v62  ;;  %v2821_v46 = vmul.f32 0.16666667, %v713_v63  ;;  %v2577_v63 = vld [vmem:[%s5979_s1 + $0x4] ss:$16 sps:$4 sm:$0xff]  }
  0x1a   :  { %6366 = vst [vmem:[#allocation14_spill] sm:$0xff] %v2810_v39  ;;  %v2829_v49 = vadd.f32 0.6666667, %v736_v37  ;;  %v2831_v50 = vadd.f32 0.6666667, %v737_v38  ;;  %v212_v51 = vsel %vm5997_vm1, %v2772_v61, 0.0  ;;  %v2839_v52 = vsel %vm5996_vm5, %v2774_v0, %v211_v36  ;;  %573 = vmatprep.mubr.bf16.mxu1 %v2577_v63  ;;  %1150 = vmatprep.mubr.bf16.mxu0 %v2577_v63 }
  0x1b   :  { %6364 = vst [vmem:[#allocation12_spill] sm:$0xff] %v2801_v31  ;;  %6365 = vst [vmem:[#allocation13_spill] sm:$0xff] %v2804_v33  ;;  %v259_v41 = vsel %vm5996_vm5, %v2801_v31, %v253_v18  ;;  %v260_v44 = vsel %vm5994_vm6, %v2804_v33, %v254_v19  ;;  %v767_v54 = vsub.f32 1.0, %v2810_v39  ;;  %vm790_vm8 = vcmp.eq.f32.partialorder %v2740_v26, 1.0 }
  0x1c   :  { %6367 = vst [vmem:[#allocation15_spill] sm:$0xff] %v2819_v45  ;;  %6368 = vst [vmem:[#allocation16_spill] sm:$0xff] %v2821_v46  ;;  %v265_v47 = vsel %vm193_vm2, %v2768_v56, %v259_v41  ;;  %v266_v48 = vsel %vm194_vm7, %v2778_v11, %v260_v44  ;;  %v772_v55 = vsub.f32 %v766_v40, %v2829_v49  ;;  %vm5992_vm9 = vcmp.eq.f32.partialorder %v2740_v26, 3.0 }
  0x1d   :  { %6369 = vst [vmem:[#allocation17_spill] sm:$0xff] %v2829_v49  ;;  %6370 = vst [vmem:[#allocation18_spill] sm:$0xff] %v2831_v50  ;;  %v269_v53 = vpack.c.bf16 %v266_v48, %v265_v47  ;;  %vm5995_vm10 = vcmp.eq.f32.partialorder %v2740_v26, 4.0  ;;  %v2586_v57 = vpop.eup %2585  ;;  %v773_v58 = vsub.f32 %v767_v54, %v2831_v50  ;;  %vm5982_vm11 = vcmp.eq.f32.partialorder %v2740_v26, 2.0 }
  0x1e   :  { %vm5983_vm12 = vcmp.eq.f32.partialorder %v2742_v27, 3.0  ;;  %vm5993_vm13 = vcmp.eq.f32.partialorder %v2742_v27, 4.0  ;;  %v2851_v59 = vsub.f32 %v772_v55, %v2819_v45  ;;  %vm791_vm14 = vcmp.eq.f32.partialorder %v2742_v27, 1.0 }
  0x1f   :  { %2488 = vmatprep.subr.bf16.mxu1 %v269_v53  ;;  %vm5981_vm15 = vcmp.eq.f32.partialorder %v2742_v27, 2.0  ;;  %v844_v62 = vsel %vm5995_vm10, %v2798_v30, 0.0  ;;  %v2862_v2 = vsub.f32 %v773_v58, %v2821_v46  ;;  %v845_v9 = vsel %vm5993_vm13, %v2810_v39, 0.0 }
  0x20   :  { %6371 = vst [vmem:[#allocation19_spill] sm:$0xff] %v2851_v59  ;;  %v850_v12 = vsel %vm5992_vm9, %v2829_v49, %v844_v62  ;;  %v57_v13 = vadd.f32 1.0, %v2584_v10  ;;  %v2873_v14 = vsel %vm5994_vm6, %v2776_v1, %v212_v51  ;;  %v851_v15 = vsel %vm5983_vm12, %v2831_v50, %v845_v9 }
  0x21   :  { %6372 = vst [vmem:[#allocation20_spill] sm:$0xff] %v2862_v2  ;;  %v856_v16 = vsel %vm5982_vm11, %v2851_v59, %v850_v12  ;;  %v58_v17 = vadd.f32 1.0, %v2586_v57  ;;  %v808_v10 = vsel %vm5992_vm9, %v2798_v30, 0.0  ;;  %v857_v18 = vsel %vm5981_vm15, %v2862_v2, %v851_v15 }
  0x22   :  { %v862_v19 = vsel %vm790_vm8, %v2819_v45, %v856_v16  ;;  %2587 = vrcp.f32 %v57_v13  ;;  %v863_v20 = vsel %vm791_vm14, %v2821_v46, %v857_v18  ;;  %v2894_v21 = vfloor.f32 %v2752_v34 }
  0x23   :  { %2589 = vrcp.f32 %v58_v17  ;;  %v99_v22 = vsub.f32 %v2744_v28, %v2760_v42  ;;  %v866_v36 = vpack.c.bf16 %v863_v20, %v862_v19  ;;  %v637_v37 = vsub.f32 0.0, %v2750_v32 }
  0x24   :  { %6373 = vst [vmem:[#allocation21_spill] sm:$0xff] %v2894_v21  ;;  %v642_v38 = vmul.f32 1.442695, %v636_v43  ;;  %v2390_v40 = vadd.f32 2.2, %v2746_v29  ;;  %v100_v41 = vsub.f32 %v2752_v34, %v2894_v21  ;;  %v809_v51 = vsel %vm5983_vm12, %v2810_v39, 0.0 }
  0x25   :  { %v105_v44 = vmul.f32 %v99_v22, %v99_v22  ;;  %v117_v47 = vsub.f32 1.0, %v99_v22  ;;  %v2391_v48 = vadd.f32 2.2, %v2750_v32  ;;  %2510 = vmatprep.subr.bf16.mxu0 %v866_v36  ;;  %v644_v28 = vmul.f32 1.442695, %v637_v37 }
  0x26   :  { %2591 = vpow2.f32 %v642_v38  ;;  %v684_v53 = vmul.f32 2.5, %v2390_v40  ;;  %v106_v54 = vmul.f32 %v100_v41, %v100_v41  ;;  %v118_v43 = vsub.f32 1.0, %v100_v41 }
  0x27   :  { %v111_v55 = vmul.f32 %v105_v44, %v99_v22  ;;  %v147_v57 = vmul.f32 %v117_v47, %v117_v47  ;;  %v2911_v34 = vsel %vm5982_vm11, %v2829_v49, %v808_v10  ;;  %2593 = vpow2.f32 %v644_v28 }
  0x28   :  { %v685_v58 = vmul.f32 2.5, %v2391_v48  ;;  %v2913_v62 = vfloor.f32 %v684_v53  ;;  %v2918_v63 = vsel %vm5981_vm15, %v2831_v50, %v809_v51  ;;  %v112_v9 = vmul.f32 %v106_v54, %v100_v41 }
  0x29   :  { %v129_v12 = vmul.f32 0.5, %v111_v55  ;;  %v148_v13 = vmul.f32 %v118_v43, %v118_v43  ;;  %v2920_v15 = vmul.f32 0.16666667, %v111_v55  ;;  %v153_v16 = vmul.f32 %v147_v57, %v117_v47 }
  0x2a   :  { %6374 = vst [vmem:[#allocation22_spill] sm:$0xff] %v2913_v62  ;;  %v2922_v17 = vfloor.f32 %v685_v58  ;;  %v696_v10 = vsub.f32 %v684_v53, %v2913_v62  ;;  %v2925_v18 = vmul.f32 0.16666667, %v112_v9  ;;  %v130_v19 = vmul.f32 0.5, %v112_v9 }
  0x2b   :  { %6375 = vst [vmem:[#allocation23_spill] sm:$0xff] %v2920_v15  ;;  %v135_v20 = vsub.f32 %v129_v12, %v105_v44  ;;  %v154_v22 = vmul.f32 %v148_v13, %v118_v43  ;;  %v2927_v37 = vmul.f32 0.16666667, %v153_v16  ;;  %vm6004_vm15 = vcmp.eq.f32.partialorder %v2760_v42, 3.0 }
  0x2c   :  { %6376 = vst [vmem:[#allocation24_spill] sm:$0xff] %v2922_v17  ;;  %6377 = vst [vmem:[#allocation25_spill] sm:$0xff] %v2925_v18  ;;  %v2588_v36 = vpop.eup %2587  ;;  %v697_v38 = vsub.f32 %v685_v58, %v2922_v17  ;;  %v702_v40 = vmul.f32 %v696_v10, %v696_v10  ;;  %v714_v41 = vsub.f32 1.0, %v696_v10  ;;  %v136_v47 = vsub.f32 %v130_v19, %v106_v54 }
  0x2d   :  { %6378 = vst [vmem:[#allocation26_spill] sm:$0xff] %v2927_v37  ;;  %v2590_v48 = vpop.eup %2589  ;;  %v69_v51 = vmul.f32 %v2588_v36, %v2716_v7  ;;  %v2931_v28 = vadd.f32 0.6666667, %v135_v20  ;;  %v2933_v55 = vmul.f32 0.16666667, %v154_v22  ;;  %v165_v12 = vsub.f32 1.0, %v2927_v37 }
  0x2e   :  { %v70_v53 = vmul.f32 %v2590_v48, %v2718_v8  ;;  %v703_v57 = vmul.f32 %v697_v38, %v697_v38  ;;  %v708_v44 = vmul.f32 %v702_v40, %v696_v10  ;;  %v715_v43 = vsub.f32 1.0, %v697_v38 }
  0x2f   :  { %6379 = vst [vmem:[#allocation27_spill] sm:$0xff] %v2931_v28  ;;  %6380 = vst [vmem:[#allocation28_spill] sm:$0xff] %v2933_v55  ;;  %v2937_v9 = vadd.f32 0.6666667, %v136_v47  ;;  %v744_v58 = vmul.f32 %v714_v41, %v714_v41  ;;  %v166_v13 = vsub.f32 1.0, %v2933_v55  ;;  %vm6003_vm11 = vcmp.eq.f32.partialorder %v2760_v42, 2.0 }
  0x30   :  { %vm196_vm12 = vcmp.eq.f32.partialorder %v2894_v21, 2.0  ;;  %v2592_v7 = vpop.eup %2591  ;;  %v75_v54 = vpack.c.bf16 %v70_v53, %v69_v51  ;;  %v709_v16 = vmul.f32 %v703_v57, %v697_v38  ;;  %v2943_v8 = vmul.f32 0.16666667, %v708_v44 }
  0x31   :  { %6381 = vst [vmem:[#allocation29_spill] sm:$0xff] %v2937_v9  ;;  %v726_v10 = vmul.f32 0.5, %v708_v44  ;;  %v654_v19 = vadd.f32 1.0, %v2592_v7  ;;  %v745_v20 = vmul.f32 %v715_v43, %v715_v43  ;;  %v750_v22 = vmul.f32 %v744_v58, %v714_v41  ;;  %v2594_v48 = vpop.eup %2593 }
  0x32   :  { %6382 = vst [vmem:[#allocation30_spill] sm:$0xff] %v2943_v8  ;;  %v171_v36 = vsub.f32 %v165_v12, %v2931_v28  ;;  %2489 = vmatpush3.bf16.msra.mxu1 %v75_v54  ;;  %v2946_v47 = vmul.f32 0.16666667, %v709_v16  ;;  %v727_v46 = vmul.f32 0.5, %v709_v16  ;;  %v172_v50 = vsub.f32 %v166_v13, %v2937_v9 }
  0x33   :  { %v732_v45 = vsub.f32 %v726_v10, %v702_v40  ;;  %v655_v11 = vadd.f32 1.0, %v2594_v48  ;;  %2595 = vrcp.f32 %v654_v19  ;;  %v751_v51 = vmul.f32 %v745_v20, %v715_v43 }
  0x34   :  { %6383 = vst [vmem:[#allocation31_spill] sm:$0xff] %v2946_v47  ;;  %v2949_v38 = vmul.f32 0.16666667, %v750_v22  ;;  %v733_v53 = vsub.f32 %v727_v46, %v703_v57  ;;  %v2954_v41 = vsub.f32 %v171_v36, %v2920_v15  ;;  %v2957_v58 = vsub.f32 %v172_v50, %v2925_v18 }
  0x35   :  { %v2951_v44 = vadd.f32 0.6666667, %v732_v45  ;;  %2597 = vrcp.f32 %v655_v11  ;;  %v2959_v12 = vmul.f32 0.16666667, %v751_v51  ;;  %vm6002_vm9 = vcmp.eq.f32.partialorder %v2894_v21, 3.0 }
  0x36   :  { %6384 = vst [vmem:[#allocation32_spill] sm:$0xff] %v2949_v38  ;;  %6386 = vst [vmem:[#allocation34_spill] sm:$0xff] %v2954_v41  ;;  %vm6000_vm13 = vcmp.eq.f32.partialorder %v2760_v42, 4.0  ;;  %v2963_v40 = vadd.f32 0.6666667, %v733_v53  ;;  %vm5999_vm6 = vcmp.eq.f32.partialorder %v2894_v21, 4.0  ;;  %v3011_v48 = vunpack.c.h.bf16 %v2738_v25 }
  0x37   :  { %6385 = vst [vmem:[#allocation33_spill] sm:$0xff] %v2951_v44  ;;  %6387 = vst [vmem:[#allocation35_spill] sm:$0xff] %v2957_v58  ;;  %vm5998_vm10 = vcmp.eq.f32.partialorder %v2760_v42, 5.0  ;;  %vm6001_vm5 = vcmp.eq.f32.partialorder %v2894_v21, 5.0  ;;  %v762_v46 = vsub.f32 1.0, %v2949_v38  ;;  %v763_v50 = vsub.f32 1.0, %v2959_v12 }
  0x38   :  { %6388 = vst [vmem:[#allocation36_spill] sm:$0xff] %v2959_v12  ;;  %6389 = vst [vmem:[#allocation37_spill] sm:$0xff] %v2963_v40  ;;  %v279_v45 = vsel %vm5998_vm10, %v2927_v37, 0.0  ;;  %v280_v11 = vsel %vm6001_vm5, %v2933_v55, 0.0  ;;  %vm6093_vm1 = vcmp.eq.f32.partialorder %v2913_v62, 2.0  ;;  %vm6035_vm10 = vcmp.eq.f32.partialorder %v2922_v17, 2.0 }
  0x39   :  { %v285_v57 = vsel %vm6000_vm13, %v2931_v28, %v279_v45  ;;  %v286_v43 = vsel %vm5999_vm6, %v2937_v9, %v280_v11  ;;  %v768_v54 = vsub.f32 %v762_v46, %v2951_v44  ;;  %v769_v16 = vsub.f32 %v763_v50, %v2963_v40 }
  0x3a   :  { %v291_v13 = vsel %vm6004_vm15, %v2954_v41, %v285_v57  ;;  %v292_v7 = vsel %vm6002_vm9, %v2957_v58, %v286_v43  ;;  %vm798_vm6 = vcmp.eq.f32.partialorder %v2913_v62, 3.0  ;;  %vm799_vm13 = vcmp.eq.f32.partialorder %v2922_v17, 3.0 }
  0x3b   :  { %v297_v10 = vsel %vm6003_vm11, %v2920_v15, %v291_v13  ;;  %v298_v19 = vsel %vm196_vm12, %v2925_v18, %v292_v7  ;;  %v3001_v22 = vsub.f32 %v768_v54, %v2943_v8  ;;  %v3004_v36 = vsub.f32 %v769_v16, %v2946_v47 }
  0x3c   :  { %v303_v20 = vpack.c.bf16 %v298_v19, %v297_v10  ;;  %vm6030_vm5 = vcmp.eq.f32.partialorder %v2913_v62, 4.0  ;;  %vm6027_vm9 = vcmp.eq.f32.partialorder %v2922_v17, 4.0  ;;  %vm6034_vm11 = vcmp.eq.f32.partialorder %v2913_v62, 5.0  ;;  %v2480_v10 = vld [vmem:[%s5978_s0 + $0x20] sm:$0xff]  }
  0x3d   :  { %6390 = vst [vmem:[#allocation38_spill] sm:$0xff] %v3001_v22  ;;  %6391 = vst [vmem:[#allocation39_spill] sm:$0xff] %v3004_v36  ;;  %vm6033_vm15 = vcmp.eq.f32.partialorder %v2922_v17, 5.0  ;;  %v2596_v51 = vpop.eup %2595  ;;  %v876_v53 = vsel %vm6034_vm11, %v2949_v38, 0.0  ;;  %v41_v11 = vsub.f32 0.0, %v2755_v35  ;;  %v42_v43 = vsub.f32 0.0, %v3011_v48 }
  0x3e   :  { %2490 = vmatprep.subr.bf16.mxu1 %v303_v20  ;;  %v877_v45 = vsel %vm6033_vm15, %v2959_v12, 0.0  ;;  %v2376_v46 = vadd.f32 2.2, %v2755_v35  ;;  %v666_v50 = vmul.f32 %v2596_v51, %v2746_v29  ;;  %v882_v25 = vsel %vm6030_vm5, %v2951_v44, %v876_v53 }
  0x3f   :  { %v883_v57 = vsel %vm6027_vm9, %v2963_v40, %v877_v45  ;;  %v2598_v13 = vpop.eup %2597  ;;  %v888_v7 = vsel %vm798_vm6, %v3001_v22, %v882_v25  ;;  %v49_v29 = vmul.f32 1.442695, %v41_v11  ;;  %v2377_v16 = vadd.f32 2.2, %v3011_v48 }
  0x40   :  { %v889_v54 = vsel %vm799_vm13, %v3004_v36, %v883_v57  ;;  %v667_v19 = vmul.f32 %v2598_v13, %v2750_v32  ;;  %v894_v20 = vsel %vm6093_vm1, %v2943_v8, %v888_v7  ;;  %v51_v53 = vmul.f32 1.442695, %v42_v43 }
  0x41   :  { %v895_v51 = vsel %vm6035_vm10, %v2946_v47, %v889_v54  ;;  %2599 = vpow2.f32 %v49_v29  ;;  %v89_v11 = vmul.f32 2.5, %v2376_v46  ;;  %v90_v25 = vmul.f32 2.5, %v2377_v16 }
  0x42   :  { %v900_v45 = vpack.c.bf16 %v895_v51, %v894_v20  ;;  %v672_v57 = vpack.c.bf16 %v667_v19, %v666_v50  ;;  %2601 = vpow2.f32 %v51_v53  ;;  %v3046_v36 = vunpack.c.l.bf16 %v2480_v10 }
  0x43   :  { %v3048_v22 = vunpack.c.h.bf16 %v2480_v10  ;;  %v3054_v32 = vsel %vm193_vm2, %v2801_v31, %v2839_v52  ;;  %v3060_v43 = vsel %vm194_vm7, %v2804_v33, %v2873_v14  ;;  %v3062_v46 = vfloor.f32 %v89_v11 }
  0x44   :  { %6392 = vst [vmem:[#allocation40_spill] sm:$0xff] %v3054_v32  ;;  %6393 = vst [vmem:[#allocation41_spill] sm:$0xff] %v3060_v43  ;;  %v3064_v50 = vfloor.f32 %v90_v25  ;;  %2511 = vmatpush3.bf16.msra.mxu0 %v672_v57  ;;  %v638_v13 = vsub.f32 0.0, %v3046_v36  ;;  %v2392_v54 = vadd.f32 2.2, %v3046_v36  ;;  %v3074_v29 = vsel %vm790_vm8, %v2851_v59, %v2911_v34 }
  0x45   :  { %v639_v7 = vsub.f32 0.0, %v3048_v22  ;;  %v2393_v52 = vadd.f32 2.2, %v3048_v22  ;;  %6394 = vst [vmem:[#allocation42_spill] sm:$0xff] %v3074_v29  ;;  %v3080_v14 = vsel %vm791_vm14, %v2862_v2, %v2918_v63  ;;  %2512 = vmatprep.subr.bf16.mxu0 %v900_v45  ;;  %v101_v16 = vsub.f32 %v89_v11, %v3062_v46 }
  0x46   :  { %6395 = vst [vmem:[#allocation43_spill] sm:$0xff] %v3080_v14  ;;  %v102_v10 = vsub.f32 %v90_v25, %v3064_v50  ;;  %v646_v19 = vmul.f32 1.442695, %v638_v13  ;;  %v686_v51 = vmul.f32 2.5, %v2392_v54  ;;  %vm203_vm2 = vcmp.eq.f32.partialorder %v3062_v46, 3.0 }
  0x47   :  { %v648_v20 = vmul.f32 1.442695, %v639_v7  ;;  %v687_v53 = vmul.f32 2.5, %v2393_v52  ;;  %v107_v57 = vmul.f32 %v101_v16, %v101_v16  ;;  %v119_v32 = vsub.f32 1.0, %v101_v16 }
  0x48   :  { %v108_v43 = vmul.f32 %v102_v10, %v102_v10  ;;  %v120_v34 = vsub.f32 1.0, %v102_v10  ;;  %2603 = vpow2.f32 %v646_v19  ;;  %v3084_v29 = vfloor.f32 %v686_v51 }
  0x49   :  { %v3086_v47 = vfloor.f32 %v687_v53  ;;  %v113_v45 = vmul.f32 %v107_v57, %v101_v16  ;;  %v149_v11 = vmul.f32 %v119_v32, %v119_v32  ;;  %2605 = vpow2.f32 %v648_v20 }
  0x4a   :  { %6396 = vst [vmem:[#allocation44_spill] sm:$0xff] %v3084_v29  ;;  %v114_v14 = vmul.f32 %v108_v43, %v102_v10  ;;  %v150_v8 = vmul.f32 %v120_v34, %v120_v34  ;;  %v698_v25 = vsub.f32 %v686_v51, %v3084_v29  ;;  %vm6040_vm7 = vcmp.eq.f32.partialorder %v3062_v46, 2.0 }
  0x4b   :  { %6397 = vst [vmem:[#allocation45_spill] sm:$0xff] %v3086_v47  ;;  %v699_v13 = vsub.f32 %v687_v53, %v3086_v47  ;;  %v2600_v54 = vpop.eup %2599  ;;  %v3092_v52 = vmul.f32 0.16666667, %v113_v45  ;;  %v131_v40 = vmul.f32 0.5, %v113_v45  ;;  %v155_v16 = vmul.f32 %v149_v11, %v119_v32 }
  0x4c   :  { %v3094_v19 = vmul.f32 0.16666667, %v114_v14  ;;  %v132_v44 = vmul.f32 0.5, %v114_v14  ;;  %v2602_v12 = vpop.eup %2601  ;;  %v59_v63 = vadd.f32 1.0, %v2600_v54  ;;  %v156_v10 = vmul.f32 %v150_v8, %v120_v34 }
  0x4d   :  { %6398 = vst [vmem:[#allocation46_spill] sm:$0xff] %v3092_v52  ;;  %v704_v38 = vmul.f32 %v698_v25, %v698_v25  ;;  %v60_v18 = vadd.f32 1.0, %v2602_v12  ;;  %v137_v20 = vsub.f32 %v131_v40, %v107_v57  ;;  %v705_v51 = vmul.f32 %v699_v13, %v699_v13 }
  0x4e   :  { %6399 = vst [vmem:[#allocation47_spill] sm:$0xff] %v3094_v19  ;;  %v138_v15 = vsub.f32 %v132_v44, %v108_v43  ;;  %2607 = vrcp.f32 %v59_v63  ;;  %v3096_v53 = vmul.f32 0.16666667, %v155_v16  ;;  %v3098_v7 = vmul.f32 0.16666667, %v156_v10 }
  0x4f   :  { %v710_v58 = vmul.f32 %v704_v38, %v698_v25  ;;  %2609 = vrcp.f32 %v60_v18  ;;  %v3101_v45 = vadd.f32 0.6666667, %v137_v20  ;;  %v711_v32 = vmul.f32 %v705_v51, %v699_v13 }
  0x50   :  { %v3103_v14 = vadd.f32 0.6666667, %v138_v15  ;;  %vm6042_vm8 = vcmp.eq.f32.partialorder %v3064_v50, 3.0  ;;  %v716_v8 = vsub.f32 1.0, %v698_v25  ;;  %v717_v44 = vsub.f32 1.0, %v699_v13 }
  0x51   :  { %v3107_v12 = vmul.f32 0.16666667, %v710_v58  ;;  %v728_v40 = vmul.f32 0.5, %v710_v58  ;;  %vm6041_vm14 = vcmp.eq.f32.partialorder %v3064_v50, 2.0  ;;  %v3110_v43 = vmul.f32 0.16666667, %v711_v32 }
  0x52   :  { %6400 = vst [vmem:[#allocation48_spill] sm:$0xff] %v3103_v14  ;;  %v729_v57 = vmul.f32 0.5, %v711_v32  ;;  %v167_v18 = vsub.f32 1.0, %v3096_v53  ;;  %v168_v15 = vsub.f32 1.0, %v3098_v7  ;;  %v2604_v34 = vpop.eup %2603  ;;  %v746_v11 = vmul.f32 %v716_v8, %v716_v8 }
  0x53   :  { %6401 = vst [vmem:[#allocation49_spill] sm:$0xff] %v3107_v12  ;;  %6402 = vst [vmem:[#allocation50_spill] sm:$0xff] %v3110_v43  ;;  %v734_v63 = vsub.f32 %v728_v40, %v704_v38  ;;  %v747_v54 = vmul.f32 %v717_v44, %v717_v44  ;;  %vm6038_vm9 = vcmp.eq.f32.partialorder %v3062_v46, 4.0  ;;  %v656_v25 = vadd.f32 1.0, %v2604_v34  ;;  %v2606_v10 = vpop.eup %2605 }
  0x54   :  { %v735_v13 = vsub.f32 %v729_v57, %v705_v51  ;;  %v173_v16 = vsub.f32 %v167_v18, %v3101_v45  ;;  %v174_v58 = vsub.f32 %v168_v15, %v3103_v14  ;;  %v752_v32 = vmul.f32 %v746_v11, %v716_v8 }
  0x55   :  { %v3117_v20 = vadd.f32 0.6666667, %v734_v63  ;;  %v753_v17 = vmul.f32 %v747_v54, %v717_v44  ;;  %vm6037_vm5 = vcmp.eq.f32.partialorder %v3064_v50, 4.0  ;;  %v657_v41 = vadd.f32 1.0, %v2606_v10 }
  0x56   :  { %2611 = vrcp.f32 %v656_v25  ;;  %v3120_v38 = vadd.f32 0.6666667, %v735_v13  ;;  %v3123_v40 = vsub.f32 %v173_v16, %v3092_v52  ;;  %v3125_v34 = vmul.f32 0.16666667, %v752_v32 }
  0x57   :  { %6403 = vst [vmem:[#allocation51_spill] sm:$0xff] %v3117_v20  ;;  %v3127_v51 = vmul.f32 0.16666667, %v753_v17  ;;  %v3130_v57 = vsub.f32 %v174_v58, %v3094_v19  ;;  %vm6039_vm15 = vcmp.eq.f32.partialorder %v3062_v46, 5.0  ;;  %2613 = vrcp.f32 %v657_v41 }
  0x58   :  { %6404 = vst [vmem:[#allocation52_spill] sm:$0xff] %v3120_v38  ;;  %6405 = vst [vmem:[#allocation53_spill] sm:$0xff] %v3123_v40  ;;  %vm6036_vm11 = vcmp.eq.f32.partialorder %v3064_v50, 5.0  ;;  %v281_v8 = vsel %vm6039_vm15, %v3096_v53, 0.0  ;;  %vm794_vm10 = vcmp.eq.f32.partialorder %v3084_v29, 2.0  ;;  %v2608_v44 = vpop.eup %2607  ;;  %v764_v15 = vsub.f32 1.0, %v3125_v34 }
  0x59   :  { %6406 = vst [vmem:[#allocation54_spill] sm:$0xff] %v3125_v34  ;;  %6407 = vst [vmem:[#allocation55_spill] sm:$0xff] %v3127_v51  ;;  %v282_v17 = vsel %vm6036_vm11, %v3098_v7, 0.0  ;;  %v287_v18 = vsel %vm6038_vm9, %v3101_v45, %v281_v8  ;;  %v765_v41 = vsub.f32 1.0, %v3127_v51  ;;  %v2610_v63 = vpop.eup %2609  ;;  %v71_v11 = vmul.f32 %v2608_v44, %v2755_v35 }
  0x5a   :  { %6408 = vst [vmem:[#allocation56_spill] sm:$0xff] %v3130_v57  ;;  %v288_v54 = vsel %vm6037_vm5, %v3103_v14, %v282_v17  ;;  %v293_v25 = vsel %vm203_vm2, %v3123_v40, %v287_v18  ;;  %vm6054_vm11 = vcmp.eq.f32.partialorder %v3086_v47, 2.0  ;;  %v72_v13 = vmul.f32 %v2610_v63, %v3011_v48 }
  0x5b   :  { %v294_v16 = vsel %vm6042_vm8, %v3130_v57, %v288_v54  ;;  %v299_v35 = vsel %vm6040_vm7, %v3092_v52, %v293_v25  ;;  %v770_v58 = vsub.f32 %v764_v15, %v3117_v20  ;;  %v771_v32 = vsub.f32 %v765_v41, %v3120_v38 }
  0x5c   :  { %v300_v10 = vsel %vm6041_vm14, %v3094_v19, %v294_v16  ;;  %vm800_vm5 = vcmp.eq.f32.partialorder %v3084_v29, 3.0  ;;  %vm801_vm9 = vcmp.eq.f32.partialorder %v3086_v47, 3.0  ;;  %v76_v48 = vpack.c.bf16 %v72_v13, %v71_v11 }
  0x5d   :  { %v304_v8 = vpack.c.bf16 %v300_v10, %v299_v35  ;;  %v3169_v44 = vsub.f32 %v770_v58, %v3107_v12  ;;  %vm6044_vm15 = vcmp.eq.f32.partialorder %v3084_v29, 4.0  ;;  %v3173_v17 = vsub.f32 %v771_v32, %v3110_v43 }
  0x5e   :  { %vm6043_vm7 = vcmp.eq.f32.partialorder %v3086_v47, 4.0  ;;  %vm6053_vm14 = vcmp.eq.f32.partialorder %v3084_v29, 5.0  ;;  %vm6045_vm8 = vcmp.eq.f32.partialorder %v3086_v47, 5.0  ;;  %2491 = vmatpush3.bf16.msra.mxu1 %v76_v48  ;;  %v6411_v41 = vsub.f32 0.0, %v2708_v3 }
  0x5f   :  { %6409 = vst [vmem:[#allocation57_spill] sm:$0xff] %v3169_v44  ;;  %6410 = vst [vmem:[#allocation58_spill] sm:$0xff] %v3173_v17  ;;  %v878_v18 = vsel %vm6053_vm14, %v3125_v34, 0.0  ;;  %v879_v15 = vsel %vm6045_vm8, %v3127_v51, 0.0  ;;  %v6412_v11 = vsub.f32 0.0, %v2710_v4  ;;  %2492 = vmatprep.subr.bf16.mxu1 %v304_v8  ;;  %v640_v35 = vsub.f32 0.0, %v2712_v5 }
  0x60   :  { %v53_v63 = vmul.f32 1.442695, %v6411_v41  ;;  %v2612_v25 = vpop.eup %2611  ;;  %v884_v13 = vsel %vm6044_vm15, %v3117_v20, %v878_v18  ;;  %v885_v16 = vsel %vm6043_vm7, %v3120_v38, %v879_v15  ;;  %v641_v58 = vsub.f32 0.0, %v2714_v6 }
  0x61   :  { %v55_v54 = vmul.f32 1.442695, %v6412_v11  ;;  %v668_v10 = vmul.f32 %v2612_v25, %v3046_v36  ;;  %v890_v32 = vsel %vm800_vm5, %v3169_v44, %v884_v13  ;;  %v891_v48 = vsel %vm801_vm9, %v3173_v17, %v885_v16  ;;  %v2614_v8 = vpop.eup %2613 }
  0x62   :  { %2615 = vpow2.f32 %v53_v63  ;;  %v896_v18 = vsel %vm794_vm10, %v3107_v12, %v890_v32  ;;  %v897_v15 = vsel %vm6054_vm11, %v3110_v43, %v891_v48  ;;  %v650_v36 = vmul.f32 1.442695, %v640_v35 }
  0x63   :  { %2617 = vpow2.f32 %v55_v54  ;;  %v669_v41 = vmul.f32 %v2614_v8, %v3048_v22  ;;  %v901_v11 = vpack.c.bf16 %v897_v15, %v896_v18  ;;  %v652_v25 = vmul.f32 1.442695, %v641_v58  ;;  %v6416_v18 = vld [vmem:[#allocation10_spill] sm:$0xff] }
  0x64   :  { %vm6046_vm7 = vcmp.eq.f32.partialorder %v2731_v23, 5.0  ;;  %2619 = vpow2.f32 %v650_v36  ;;  %vm6047_vm15 = vcmp.eq.f32.partialorder %v2733_v24, 5.0  ;;  %vm6052_vm8 = vcmp.eq.f32.partialorder %v2740_v26, 5.0  ;;  %v6418_v36 = vld [vmem:[#allocation18_spill] sm:$0xff] }
  0x65   :  { %v283_v63 = vsel %vm6046_vm7, %v2770_v60, 0.0  ;;  %v673_v13 = vpack.c.bf16 %v669_v41, %v668_v10  ;;  %2621 = vpow2.f32 %v652_v25  ;;  %v284_v54 = vsel %vm6047_vm15, %v2772_v61, 0.0  ;;  %v6437_v61 = vld [vmem:[#allocation37_spill] sm:$0xff] }
  0x66   :  { %v289_v22 = vsel %vm6048_vm3, %v2774_v0, %v283_v63  ;;  %v290_v16 = vsel %vm6050_vm4, %v2776_v1, %v284_v54  ;;  %vm6051_vm7 = vcmp.eq.f32.partialorder %v2742_v27, 5.0  ;;  %v880_v58 = vsel %vm6052_vm8, %v2798_v30, 0.0  ;;  %v6429_v63 = vld [vmem:[#allocation34_spill] sm:$0xff]  ;;  %v6435_v1 = vld [vmem:[#allocation36_spill] sm:$0xff]  ;;  %v6436_v0 = vld [vmem:[#allocation33_spill] sm:$0xff] }
  0x67   :  { %v295_v35 = vsel %vm6049_vm0, %v2801_v31, %v289_v22  ;;  %2513 = vmatpush3.bf16.msra.mxu0 %v673_v13  ;;  %vm6413_vm15 = vcmp.eq.f32.partialorder %v2733_v24, 3.0  ;;  %vm6414_vm3 = vcmp.eq.f32.partialorder %v2731_v23, 2.0  ;;  %v881_v48 = vsel %vm6051_vm7, %v2810_v39, 0.0  ;;  %v6422_v13 = vld [vmem:[#allocation15_spill] sm:$0xff]  ;;  %v6424_v22 = vld [vmem:[#allocation16_spill] sm:$0xff] }
  0x68   :  { %v296_v10 = vsel %vm6413_vm15, %v2804_v33, %v290_v16  ;;  %v3238_v32 = vsel %vm6414_vm3, %v2768_v56, %v295_v35  ;;  %vm6415_vm0 = vcmp.eq.f32.partialorder %v2740_v26, 4.0  ;;  %2514 = vmatprep.subr.bf16.mxu0 %v901_v11  ;;  %vm6417_vm4 = vcmp.eq.f32.partialorder %v2733_v24, 2.0 }
  0x69   :  { %v886_v8 = vsel %vm6415_vm0, %v2829_v49, %v880_v58  ;;  %v3249_v15 = vsel %vm6417_vm4, %v6416_v18, %v296_v10  ;;  %vm6419_vm15 = vcmp.eq.f32.partialorder %v2742_v27, 4.0  ;;  %vm6420_vm3 = vcmp.eq.f32.partialorder %v2740_v26, 3.0 }
  0x6a   :  { %v887_v41 = vsel %vm6419_vm15, %v6418_v36, %v881_v48  ;;  %v892_v25 = vsel %vm6420_vm3, %v2851_v59, %v886_v8  ;;  %vm183_vm7 = vcmp.eq.f32.partialorder %v2760_v42, 0.0  ;;  %vm6421_vm0 = vcmp.eq.f32.partialorder %v2742_v27, 3.0  ;;  %v6431_v36 = vld [vmem:[#allocation35_spill] sm:$0xff] }
  0x6b   :  { %v893_v11 = vsel %vm6421_vm0, %v2862_v2, %v887_v41  ;;  %vm6423_vm4 = vcmp.eq.f32.partialorder %v2740_v26, 2.0  ;;  %vm184_vm15 = vcmp.eq.f32.partialorder %v2894_v21, 0.0  ;;  %vm6425_vm8 = vcmp.eq.f32.partialorder %v2742_v27, 2.0  ;;  %v6430_v2 = vld [vmem:[#allocation24_spill] sm:$0xff] }
  0x6c   :  { %v3266_v54 = vsel %vm6423_vm4, %v6422_v13, %v892_v25  ;;  %v3272_v16 = vsel %vm6425_vm8, %v6424_v22, %v893_v11  ;;  %vm189_vm3 = vcmp.eq.f32.partialorder %v2760_v42, 1.0  ;;  %vm6077_vm14 = vcmp.eq.f32.partialorder %v2894_v21, 1.0  ;;  %v2616_v58 = vpop.eup %2615 }
  0x6d   :  { %vm6426_vm11 = vcmp.eq.f32.partialorder %v2760_v42, 3.0  ;;  %vm6427_vm0 = vcmp.eq.f32.partialorder %v2894_v21, 3.0  ;;  %vm6428_vm8 = vcmp.eq.f32.partialorder %v2760_v42, 2.0  ;;  %vm780_vm4 = vcmp.eq.f32.partialorder %v2913_v62, 0.0  ;;  %v2618_v41 = vpop.eup %2617 }
  0x6e   :  { %v207_v35 = vsel %vm6426_vm11, %v2927_v37, 0.0  ;;  %v208_v48 = vsel %vm6427_vm0, %v2933_v55, 0.0  ;;  %v61_v25 = vadd.f32 1.0, %v2616_v58  ;;  %vm781_vm11 = vcmp.eq.f32.partialorder %v6430_v2, 0.0  ;;  %v2620_v58 = vpop.eup %2619 }
  0x6f   :  { %v213_v8 = vsel %vm6428_vm8, %v2931_v28, %v207_v35  ;;  %v214_v11 = vsel %vm196_vm12, %v2937_v9, %v208_v48  ;;  %v62_v59 = vadd.f32 1.0, %v2618_v41  ;;  %v6432_v35 = vld [vmem:[#allocation23_spill] sm:$0xff]  ;;  %vm6091_vm0 = vcmp.eq.f32.partialorder %v2913_v62, 1.0  ;;  %v6433_v48 = vld [vmem:[#allocation25_spill] sm:$0xff]  ;;  %v6434_v41 = vld [vmem:[#allocation32_spill] sm:$0xff]  ;;  %v2622_v39 = vpop.eup %2621 }
  0x70   :  { %v219_v10 = vsel %vm189_vm3, %v6429_v63, %v213_v8  ;;  %v220_v33 = vsel %vm6077_vm14, %v6431_v36, %v214_v11  ;;  %2623 = vrcp.f32 %v61_v25  ;;  %vm6081_vm8 = vcmp.eq.f32.partialorder %v6430_v2, 1.0 }
  0x71   :  { %v3301_v49 = vsel %vm183_vm7, %v6432_v35, %v219_v10  ;;  %v3307_v8 = vsel %vm184_vm15, %v6433_v48, %v220_v33  ;;  %v804_v11 = vsel %vm798_vm6, %v6434_v41, 0.0  ;;  %2625 = vrcp.f32 %v62_v59  ;;  %v6439_v59 = vld [vmem:[#allocation38_spill] sm:$0xff]  ;;  %v6440_v10 = vld [vmem:[#allocation39_spill] sm:$0xff] }
  0x72   :  { %v658_v31 = vadd.f32 1.0, %v2620_v58  ;;  %v805_v25 = vsel %vm799_vm13, %v6435_v1, 0.0  ;;  %v659_v30 = vadd.f32 1.0, %v2622_v39  ;;  %v810_v33 = vsel %vm6093_vm1, %v6436_v0, %v804_v11  ;;  %v6441_v39 = vld [vmem:[#allocation30_spill] sm:$0xff] }
  0x73   :  { %vm6438_vm7 = vcmp.eq.f32.partialorder %v6430_v2, 2.0  ;;  %vm6078_vm15 = vcmp.eq.f32.partialorder %v2760_v42, 6.0  ;;  %v816_v58 = vsel %vm6091_vm0, %v6439_v59, %v810_v33  ;;  %vm6082_vm14 = vcmp.eq.f32.partialorder %v2894_v21, 6.0 }
  0x74   :  { %v811_v60 = vsel %vm6438_vm7, %v6437_v61, %v805_v25  ;;  %2627 = vrcp.f32 %v658_v31  ;;  %v3335_v11 = vsel %vm780_vm4, %v6441_v39, %v816_v58  ;;  %v6442_v25 = vld [vmem:[#allocation31_spill] sm:$0xff]  ;;  %v315_v33 = vsel %vm6078_vm15, %v2927_v37, 0.0 }
  0x75   :  { %v817_v22 = vsel %vm6081_vm8, %v6440_v10, %v811_v60  ;;  %2629 = vrcp.f32 %v659_v30  ;;  %v316_v30 = vsel %vm6082_vm14, %v2933_v55, 0.0  ;;  %vm6443_vm4 = vcmp.eq.f32.partialorder %v2760_v42, 5.0 }
  0x76   :  { %v3340_v31 = vsel %vm781_vm11, %v6442_v25, %v817_v22  ;;  %v321_v58 = vsel %vm6443_vm4, %v2931_v28, %v315_v33  ;;  %vm6086_vm7 = vcmp.eq.f32.partialorder %v2913_v62, 6.0  ;;  %vm6444_vm11 = vcmp.eq.f32.partialorder %v2894_v21, 5.0 }
  0x77   :  { %v322_v22 = vsel %vm6444_vm11, %v2937_v9, %v316_v30  ;;  %vm6445_vm15 = vcmp.eq.f32.partialorder %v2760_v42, 4.0  ;;  %vm6088_vm8 = vcmp.eq.f32.partialorder %v6430_v2, 6.0  ;;  %v912_v60 = vsel %vm6086_vm7, %v6434_v41, 0.0 }
  0x78   :  { %v327_v37 = vsel %vm6445_vm15, %v6429_v63, %v321_v58  ;;  %vm6446_vm14 = vcmp.eq.f32.partialorder %v2894_v21, 4.0  ;;  %vm6447_vm4 = vcmp.eq.f32.partialorder %v2760_v42, 3.0  ;;  %v913_v30 = vsel %vm6088_vm8, %v6435_v1, 0.0 }
  0x79   :  { %v328_v33 = vsel %vm6446_vm14, %v6431_v36, %v322_v22  ;;  %v3370_v28 = vsel %vm6447_vm4, %v6432_v35, %v327_v37  ;;  %vm6448_vm15 = vcmp.eq.f32.partialorder %v2913_v62, 5.0  ;;  %vm6449_vm11 = vcmp.eq.f32.partialorder %v2894_v21, 3.0 }
  0x7a   :  { %v918_v58 = vsel %vm6448_vm15, %v6436_v0, %v912_v60  ;;  %v334_v41 = vsel %vm6449_vm11, %v6433_v48, %v328_v33  ;;  %vm6450_vm14 = vcmp.eq.f32.partialorder %v6430_v2, 5.0  ;;  %vm6451_vm4 = vcmp.eq.f32.partialorder %v2913_v62, 4.0 }
  0x7b   :  { %v919_v22 = vsel %vm6450_vm14, %v6437_v61, %v913_v30  ;;  %v924_v37 = vsel %vm6451_vm4, %v6439_v59, %v918_v58  ;;  %vm185_vm7 = vcmp.eq.f32.partialorder %v3062_v46, 0.0  ;;  %v339_v1 = vpack.c.bf16 %v334_v41, %v3370_v28  ;;  %v2624_v30 = vpop.eup %2623 }
  0x7c   :  { %vm6452_vm8 = vcmp.eq.f32.partialorder %v6430_v2, 4.0  ;;  %v3395_v33 = vsel %vm798_vm6, %v6441_v39, %v924_v37  ;;  %vm186_vm15 = vcmp.eq.f32.partialorder %v3064_v50, 0.0  ;;  %vm191_vm11 = vcmp.eq.f32.partialorder %v3062_v46, 1.0  ;;  %v2626_v41 = vpop.eup %2625 }
  0x7d   :  { %v925_v60 = vsel %vm6452_vm8, %v6440_v10, %v919_v22  ;;  %vm6095_vm14 = vcmp.eq.f32.partialorder %v3064_v50, 1.0  ;;  %v209_v28 = vsel %vm203_vm2, %v3096_v53, 0.0  ;;  %v73_v22 = vmul.f32 %v2624_v30, %v2708_v3 }
  0x7e   :  { %v3401_v58 = vsel %vm799_vm13, %v6442_v25, %v925_v60  ;;  %vm6453_vm8 = vcmp.eq.f32.partialorder %v3064_v50, 3.0  ;;  %vm6454_vm4 = vcmp.eq.f32.partialorder %v3062_v46, 2.0  ;;  %v74_v25 = vmul.f32 %v2626_v41, %v2710_v4 }
  0x7f   :  { %v936_v37 = vpack.c.bf16 %v3401_v58, %v3395_v33  ;;  %v210_v39 = vsel %vm6453_vm8, %v3098_v7, 0.0  ;;  %v215_v60 = vsel %vm6454_vm4, %v3101_v45, %v209_v28  ;;  %vm6455_vm0 = vcmp.eq.f32.partialorder %v3064_v50, 2.0  ;;  %v2628_v33 = vpop.eup %2627 }
  0x80   :  { %v216_v10 = vsel %vm6455_vm0, %v3103_v14, %v210_v39  ;;  %v221_v3 = vsel %vm191_vm11, %v3123_v40, %v215_v60  ;;  %vm782_vm1 = vcmp.eq.f32.partialorder %v3084_v29, 0.0  ;;  %vm783_vm8 = vcmp.eq.f32.partialorder %v3086_v47, 0.0  ;;  %v2630_v4 = vpop.eup %2629 }
  0x81   :  { %v222_v30 = vsel %vm6095_vm14, %v3130_v57, %v216_v10  ;;  %v227_v58 = vsel %vm185_vm7, %v3092_v52, %v221_v3  ;;  %vm788_vm4 = vcmp.eq.f32.partialorder %v3084_v29, 1.0  ;;  %v77_v39 = vpack.c.bf16 %v74_v25, %v73_v22 }
  0x82   :  { %v670_v28 = vmul.f32 %v2628_v33, %v2712_v5  ;;  %v228_v41 = vsel %vm186_vm15, %v3094_v19, %v222_v30  ;;  %vm6098_vm0 = vcmp.eq.f32.partialorder %v3086_v47, 1.0  ;;  %v671_v10 = vmul.f32 %v2630_v4, %v2714_v6 }
  0x83   :  { %v232_v60 = vpack.c.bf16 %v228_v41, %v227_v58  ;;  %v806_v3 = vsel %vm800_vm5, %v3125_v34, 0.0  ;;  %v807_v59 = vsel %vm801_vm9, %v3127_v51, 0.0  ;;  %2493 = vmatpush3.bf16.msra.mxu1 %v77_v39  ;;  %vm6456_vm7 = vcmp.eq.f32.partialorder %v3086_v47, 2.0 }
  0x84   :  { %v812_v5 = vsel %vm794_vm10, %v3117_v20, %v806_v3  ;;  %v813_v25 = vsel %vm6456_vm7, %v3120_v38, %v807_v59  ;;  %vm6096_vm15 = vcmp.eq.f32.partialorder %v3062_v46, 6.0  ;;  %vm6097_vm14 = vcmp.eq.f32.partialorder %v3064_v50, 6.0 }
  0x85   :  { %v674_v6 = vpack.c.bf16 %v671_v10, %v670_v28  ;;  %v6457_v22 = vpack.c.bf16 %v3249_v15, %v3238_v32  ;;  %v818_v33 = vsel %vm788_vm4, %v3169_v44, %v812_v5  ;;  %v819_v30 = vsel %vm6098_vm0, %v3173_v17, %v813_v25 }
  0x86   :  { %v317_v59 = vsel %vm6096_vm15, %v3096_v53, 0.0  ;;  %v824_v58 = vsel %vm782_vm1, %v3107_v12, %v818_v33  ;;  %v825_v32 = vsel %vm783_vm8, %v3110_v43, %v819_v30  ;;  %v318_v15 = vsel %vm6097_vm14, %v3098_v7, 0.0 }
  0x87   :  { %2494 = vmatprep.subr.bf16.mxu1 %v6457_v22  ;;  %vm6458_vm7 = vcmp.eq.f32.partialorder %v3062_v46, 5.0  ;;  %2515 = vmatpush3.bf16.msra.mxu0 %v674_v6  ;;  %v829_v39 = vpack.c.bf16 %v825_v32, %v824_v58  ;;  %vm6459_vm15 = vcmp.eq.f32.partialorder %v3064_v50, 5.0  ;;  %vm6460_vm1 = vcmp.eq.f32.partialorder %v3062_v46, 4.0  ;;  %v6470_v58 = vld [vmem:[#allocation40_spill] sm:$0xff] }
  0x88   :  { %v323_v4 = vsel %vm6458_vm7, %v3101_v45, %v317_v59  ;;  %v324_v28 = vsel %vm6459_vm15, %v3103_v14, %v318_v15  ;;  %vm6099_vm8 = vcmp.eq.f32.partialorder %v3084_v29, 6.0  ;;  %v6461_v10 = vpack.c.bf16 %v3272_v16, %v3266_v54  ;;  %v6471_v15 = vld [vmem:[#allocation41_spill] sm:$0xff] }
  0x89   :  { %v329_v41 = vsel %vm6460_vm1, %v3123_v40, %v323_v4  ;;  %v6462_v3 = vpack.c.bf16 %v3307_v8, %v3301_v49  ;;  %vm6463_vm7 = vcmp.eq.f32.partialorder %v3064_v50, 4.0  ;;  %vm6100_vm15 = vcmp.eq.f32.partialorder %v3086_v47, 6.0 }
  0x8a   :  { %2516 = vmatprep.subr.bf16.mxu0 %v6461_v10  ;;  %v330_v5 = vsel %vm6463_vm7, %v3130_v57, %v324_v28  ;;  %v335_v25 = vsel %vm203_vm2, %v3092_v52, %v329_v41  ;;  %v914_v6 = vsel %vm6099_vm8, %v3125_v34, 0.0  ;;  %vm6464_vm1 = vcmp.eq.f32.partialorder %v3064_v50, 3.0  ;;  %v6472_v41 = vld [vmem:[#allocation42_spill] sm:$0xff] }
  0x8b   :  { %2495 = vmatpush3.bf16.msra.mxu1 %v6462_v3  ;;  %v336_v49 = vsel %vm6464_vm1, %v3094_v19, %v330_v5  ;;  %v915_v54 = vsel %vm6100_vm15, %v3127_v51, 0.0  ;;  %vm6465_vm7 = vcmp.eq.f32.partialorder %v3084_v29, 5.0  ;;  %vm187_vm14 = vcmp.eq.f32.partialorder %v2731_v23, 0.0  ;;  %v6473_v3 = vld [vmem:[#allocation43_spill] sm:$0xff]  ;;  %v6474_v5 = vld [vmem:[#allocation16_spill] sm:$0xff] }
  0x8c   :  { %2496 = vmatprep.subr.bf16.mxu1 %v339_v1  ;;  %v920_v16 = vsel %vm6465_vm7, %v3117_v20, %v914_v6  ;;  %v340_v8 = vpack.c.bf16 %v336_v49, %v335_v25  ;;  %vm6466_vm0 = vcmp.eq.f32.partialorder %v3086_v47, 5.0  ;;  %vm6467_vm8 = vcmp.eq.f32.partialorder %v3084_v29, 4.0  ;;  %v6476_v49 = vld [vmem:[#allocation7_spill] sm:$0xff] }
  0x8d   :  { %v921_v22 = vsel %vm6466_vm0, %v3120_v38, %v915_v54  ;;  %v926_v1 = vsel %vm6467_vm8, %v3169_v44, %v920_v16  ;;  %vm188_vm1 = vcmp.eq.f32.partialorder %v2733_v24, 0.0  ;;  %v6468_v33 = vpack.c.bf16 %v3340_v31, %v3335_v11  ;;  %v6477_v16 = vld [vmem:[#allocation8_spill] sm:$0xff] }
  0x8e   :  { %vm6469_vm7 = vcmp.eq.f32.partialorder %v3086_v47, 4.0  ;;  %v932_v59 = vsel %vm800_vm5, %v3107_v12, %v926_v1  ;;  %v229_v32 = vsel %vm187_vm14, %v2768_v56, %v6470_v58  ;;  %v230_v4 = vsel %vm188_vm1, %v6416_v18, %v6471_v15  ;;  %v6484_v58 = vld [vmem:[#allocation14_spill] sm:$0xff]  ;;  %v6485_v15 = vld [vmem:[#allocation17_spill] sm:$0xff] }
  0x8f   :  { %2517 = vmatpush3.bf16.msra.mxu0 %v6468_v33  ;;  %v927_v30 = vsel %vm6469_vm7, %v3173_v17, %v921_v22  ;;  %2497 = vmatpush3.bf16.msra.mxu1 %v232_v60  ;;  %v233_v31 = vpack.c.bf16 %v230_v4, %v229_v32  ;;  %vm784_vm0 = vcmp.eq.f32.partialorder %v2740_v26, 0.0  ;;  %vm785_vm8 = vcmp.eq.f32.partialorder %v2742_v27, 0.0  ;;  %v6475_v60 = vld [vmem:[#allocation6_spill] sm:$0xff]  ;;  %v6479_v22 = vld [vmem:[#allocation11_spill] sm:$0xff]  ;;  %v6480_v33 = vld [vmem:[#allocation9_spill] sm:$0xff] }
  0x90   :  { %2518 = vmatprep.subr.bf16.mxu0 %v936_v37  ;;  %v933_v11 = vsel %vm801_vm9, %v3110_v43, %v927_v30  ;;  %2498 = vmatprep.subr.bf16.mxu1 %v340_v8  ;;  %v826_v10 = vsel %vm784_vm0, %v6422_v13, %v6472_v41  ;;  %v827_v25 = vsel %vm785_vm8, %v6474_v5, %v6473_v3  ;;  %vm6101_vm14 = vcmp.eq.f32.partialorder %v2731_v23, 6.0  ;;  %v6482_v30 = vld [vmem:[#allocation12_spill] sm:$0xff]  ;;  %v6490_v41 = vld [vmem:[#allocation18_spill] sm:$0xff]  ;;  %v6492_v3 = vld [vmem:[#allocation19_spill] sm:$0xff] }
  0x91   :  { %v937_v28 = vpack.c.bf16 %v933_v11, %v932_v59  ;;  %v830_v37 = vpack.c.bf16 %v827_v25, %v826_v10  ;;  %vm6103_vm1 = vcmp.eq.f32.partialorder %v2733_v24, 6.0  ;;  %v319_v6 = vsel %vm6101_vm14, %v6475_v60, 0.0  ;;  %v6487_v11 = vld [vmem:[#allocation13_spill] sm:$0xff] }
  0x92   :  { %vm6102_vm7 = vcmp.eq.f32.partialorder %v2740_v26, 6.0  ;;  %v320_v54 = vsel %vm6103_vm1, %v6476_v49, 0.0  ;;  %vm6478_vm0 = vcmp.eq.f32.partialorder %v2731_v23, 5.0  ;;  %vm6104_vm8 = vcmp.eq.f32.partialorder %v2742_v27, 6.0 }
  0x93   :  { %2519 = vmatpush3.bf16.msra.mxu0 %v829_v39  ;;  %v325_v8 = vsel %vm6478_vm0, %v6477_v16, %v319_v6  ;;  %v916_v1 = vsel %vm6102_vm7, %v6479_v22, 0.0  ;;  %2499 = vmatpush3.bf16.msra.mxu1 %v233_v31  ;;  %vm6481_vm15 = vcmp.eq.f32.partialorder %v2733_v24, 5.0  ;;  %vm6483_vm14 = vcmp.eq.f32.partialorder %v2731_v23, 4.0 }
  0x94   :  { %2520 = vmatprep.subr.bf16.mxu0 %v937_v28  ;;  %v326_v39 = vsel %vm6481_vm15, %v6480_v33, %v320_v54  ;;  %v331_v59 = vsel %vm6483_vm14, %v6482_v30, %v325_v8  ;;  %v917_v32 = vsel %vm6104_vm8, %v6484_v58, 0.0  ;;  %vm6486_vm0 = vcmp.eq.f32.partialorder %v2740_v26, 5.0  ;;  %v6495_v54 = vld [vmem:[#allocation20_spill] sm:$0xff] }
  0x95   :  { %v922_v4 = vsel %vm6486_vm0, %v6485_v15, %v916_v1  ;;  %vm6488_vm7 = vcmp.eq.f32.partialorder %v2733_v24, 4.0  ;;  %vm6489_vm1 = vcmp.eq.f32.partialorder %v2731_v23, 3.0  ;;  %vm6491_vm15 = vcmp.eq.f32.partialorder %v2742_v27, 5.0 }
  0x96   :  { %v332_v31 = vsel %vm6488_vm7, %v6487_v11, %v326_v39  ;;  %v337_v28 = vsel %vm6489_vm1, %v2768_v56, %v331_v59  ;;  %v923_v10 = vsel %vm6491_vm15, %v6490_v41, %v917_v32  ;;  %vm6493_vm14 = vcmp.eq.f32.partialorder %v2740_v26, 4.0  ;;  %v6498_v39 = vld [vmem:[#allocation26_spill] sm:$0xff] }
  0x97   :  { %v928_v25 = vsel %vm6493_vm14, %v6492_v3, %v922_v4  ;;  %vm6494_vm8 = vcmp.eq.f32.partialorder %v2733_v24, 3.0  ;;  %vm6496_vm0 = vcmp.eq.f32.partialorder %v2742_v27, 4.0  ;;  %vm6497_vm7 = vcmp.eq.f32.partialorder %v2740_v26, 3.0  ;;  %2521 = vmatpush3.bf16.msra.mxu0 %v830_v37  ;;  %v6502_v3 = vld [vmem:[#allocation27_spill] sm:$0xff] }
  0x98   :  { %v338_v6 = vsel %vm6494_vm8, %v6416_v18, %v332_v31  ;;  %v929_v8 = vsel %vm6496_vm0, %v6495_v54, %v923_v10  ;;  %v934_v1 = vsel %vm6497_vm7, %v6422_v13, %v928_v25  ;;  %vm6499_vm1 = vcmp.eq.f32.partialorder %v2760_v42, 4.0  ;;  %v6513_v13 = vld [vmem:[#allocation39_spill] sm:$0xff] }
  0x99   :  { %v243_v59 = vsel %vm6499_vm1, %v6498_v39, 0.0  ;;  %v341_v32 = vpack.c.bf16 %v338_v6, %v337_v28  ;;  %vm6500_vm15 = vcmp.eq.f32.partialorder %v2742_v27, 3.0  ;;  %vm6501_vm8 = vcmp.eq.f32.partialorder %v2894_v21, 4.0  ;;  %v6506_v28 = vld [vmem:[#allocation32_spill] sm:$0xff] }
  0x9a   :  { %v935_v4 = vsel %vm6500_vm15, %v6474_v5, %v929_v8  ;;  %v244_v31 = vsel %vm6501_vm8, %v2933_v55, 0.0  ;;  %vm6503_vm14 = vcmp.eq.f32.partialorder %v2760_v42, 3.0  ;;  %vm6504_vm0 = vcmp.eq.f32.partialorder %v2894_v21, 3.0 }
  0x9b   :  { %v249_v10 = vsel %vm6503_vm14, %v6502_v3, %v243_v59  ;;  %v938_v54 = vpack.c.bf16 %v935_v4, %v934_v1  ;;  %v250_v25 = vsel %vm6504_vm0, %v2937_v9, %v244_v31  ;;  %vm6505_vm7 = vcmp.eq.f32.partialorder %v2760_v42, 2.0  ;;  %2500 = vmatprep.subr.bf16.mxu1 %v341_v32  ;;  %v6508_v59 = vld [vmem:[#allocation36_spill] sm:$0xff] }
  0x9c   :  { %v255_v37 = vsel %vm6505_vm7, %v6429_v63, %v249_v10  ;;  %vm6507_vm1 = vcmp.eq.f32.partialorder %v2913_v62, 4.0  ;;  %v256_v8 = vsel %vm196_vm12, %v6431_v36, %v250_v25  ;;  %vm6509_vm15 = vcmp.eq.f32.partialorder %v6430_v2, 4.0  ;;  %v6511_v25 = vld [vmem:[#allocation38_spill] sm:$0xff] }
  0x9d   :  { %v840_v6 = vsel %vm6507_vm1, %v6506_v28, 0.0  ;;  %v261_v1 = vsel %vm189_vm3, %v6432_v35, %v255_v37  ;;  %v841_v4 = vsel %vm6509_vm15, %v6508_v59, 0.0  ;;  %2522 = vmatprep.subr.bf16.mxu0 %v938_v54  ;;  %vm6510_vm8 = vcmp.eq.f32.partialorder %v2894_v21, 1.0  ;;  %v6515_v54 = vld [vmem:[#allocation30_spill] sm:$0xff] }
  0x9e   :  { %v846_v31 = vsel %vm798_vm6, %v6436_v0, %v840_v6  ;;  %v262_v32 = vsel %vm6510_vm8, %v6433_v48, %v256_v8  ;;  %v847_v10 = vsel %vm799_vm13, %v6437_v61, %v841_v4  ;;  %vm6512_vm12 = vcmp.eq.f32.partialorder %v2913_v62, 2.0  ;;  %v6517_v8 = vld [vmem:[#allocation31_spill] sm:$0xff] }
  0x9f   :  { %v852_v37 = vsel %vm6512_vm12, %v6511_v25, %v846_v31  ;;  %vm6171_vm3 = vcmp.eq.f32.partialorder %v2760_v42, 7.0  ;;  %v267_v5 = vpack.c.bf16 %v262_v32, %v261_v1  ;;  %vm6514_vm14 = vcmp.eq.f32.partialorder %v6430_v2, 2.0 }
  0xa0   :  { %v853_v6 = vsel %vm6514_vm14, %v6513_v13, %v847_v10  ;;  %vm6516_vm6 = vcmp.eq.f32.partialorder %v2913_v62, 1.0  ;;  %vm6170_vm0 = vcmp.eq.f32.partialorder %v2894_v21, 7.0  ;;  %vm6518_vm13 = vcmp.eq.f32.partialorder %v6430_v2, 1.0 }
  0xa1   :  { %v858_v41 = vsel %vm6516_vm6, %v6515_v54, %v852_v37  ;;  %v859_v4 = vsel %vm6518_vm13, %v6517_v8, %v853_v6  ;;  %v351_v31 = vsel %vm6171_vm3, %v6498_v39, 0.0  ;;  %v352_v1 = vsel %vm6170_vm0, %v2933_v55, 0.0  ;;  %2501 = vmatpush3.bf16.msra.mxu1 %v267_v5 }
  0xa2   :  { %vm6155_vm7 = vcmp.eq.f32.partialorder %v2913_v62, 7.0  ;;  %v864_v32 = vpack.c.bf16 %v859_v4, %v858_v41  ;;  %vm6519_vm1 = vcmp.eq.f32.partialorder %v2760_v42, 6.0  ;;  %vm6520_vm15 = vcmp.eq.f32.partialorder %v2894_v21, 6.0 }
  0xa3   :  { %v357_v10 = vsel %vm6519_vm1, %v6502_v3, %v351_v31  ;;  %v358_v37 = vsel %vm6520_vm15, %v2937_v9, %v352_v1  ;;  %vm6152_vm8 = vcmp.eq.f32.partialorder %v6430_v2, 7.0  ;;  %vm6521_vm12 = vcmp.eq.f32.partialorder %v2760_v42, 5.0 }
  0xa4   :  { %v363_v6 = vsel %vm6521_vm12, %v6429_v63, %v357_v10  ;;  %vm6522_vm14 = vcmp.eq.f32.partialorder %v2894_v21, 5.0  ;;  %v948_v5 = vsel %vm6155_vm7, %v6506_v28, 0.0  ;;  %v949_v41 = vsel %vm6152_vm8, %v6508_v59, 0.0  ;;  %2523 = vmatpush3.bf16.msra.mxu0 %v864_v32 }
  0xa5   :  { %v364_v15 = vsel %vm6522_vm14, %v6431_v36, %v358_v37  ;;  %vm6523_vm6 = vcmp.eq.f32.partialorder %v2760_v42, 4.0  ;;  %vm6524_vm13 = vcmp.eq.f32.partialorder %v2894_v21, 4.0  ;;  %vm6525_vm1 = vcmp.eq.f32.partialorder %v2913_v62, 6.0 }
  0xa6   :  { %v369_v4 = vsel %vm6523_vm6, %v6432_v35, %v363_v6  ;;  %v370_v31 = vsel %vm6524_vm13, %v6433_v48, %v364_v15  ;;  %v954_v1 = vsel %vm6525_vm1, %v6436_v0, %v948_v5  ;;  %vm6526_vm15 = vcmp.eq.f32.partialorder %v6430_v2, 6.0 }
  0xa7   :  { %v955_v10 = vsel %vm6526_vm15, %v6437_v61, %v949_v41  ;;  %v375_v37 = vpack.c.bf16 %v370_v31, %v369_v4  ;;  %vm6527_vm12 = vcmp.eq.f32.partialorder %v2913_v62, 5.0  ;;  %vm6528_vm14 = vcmp.eq.f32.partialorder %v6430_v2, 5.0 }
  0xa8   :  { %v960_v32 = vsel %vm6527_vm12, %v6511_v25, %v954_v1  ;;  %v961_v6 = vsel %vm6528_vm14, %v6513_v13, %v955_v10  ;;  %vm6529_vm6 = vcmp.eq.f32.partialorder %v3062_v46, 4.0  ;;  %vm6530_vm13 = vcmp.eq.f32.partialorder %v2913_v62, 4.0 }
  0xa9   :  { %v245_v15 = vsel %vm6529_vm6, %v3096_v53, 0.0  ;;  %v966_v5 = vsel %vm6530_vm13, %v6515_v54, %v960_v32  ;;  %vm6531_vm1 = vcmp.eq.f32.partialorder %v6430_v2, 4.0  ;;  %vm6532_vm15 = vcmp.eq.f32.partialorder %v3064_v50, 4.0  ;;  %2502 = vmatprep.subr.bf16.mxu1 %v375_v37 }
  0xaa   :  { %v967_v41 = vsel %vm6531_vm1, %v6517_v8, %v961_v6  ;;  %v246_v4 = vsel %vm6532_vm15, %v3098_v7, 0.0  ;;  %v251_v31 = vsel %vm203_vm2, %v3101_v45, %v245_v15  ;;  %vm6533_vm12 = vcmp.eq.f32.partialorder %v3064_v50, 3.0  ;;  %v2484_v8 = vld [vmem:[%s5978_s0 + $0x40] sm:$0xff]  }
  0xab   :  { %v972_v1 = vpack.c.bf16 %v967_v41, %v966_v5  ;;  %v252_v10 = vsel %vm6533_vm12, %v3103_v14, %v246_v4  ;;  %vm6534_vm14 = vcmp.eq.f32.partialorder %v3062_v46, 2.0  ;;  %vm6535_vm6 = vcmp.eq.f32.partialorder %v3084_v29, 4.0 }
  0xac   :  { %v257_v32 = vsel %vm6534_vm14, %v3123_v40, %v251_v31  ;;  %v842_v6 = vsel %vm6535_vm6, %v3125_v34, 0.0  ;;  %vm6536_vm2 = vcmp.eq.f32.partialorder %v3064_v50, 2.0  ;;  %vm6537_vm13 = vcmp.eq.f32.partialorder %v3086_v47, 4.0 }
  0xad   :  { %v258_v37 = vsel %vm6536_vm2, %v3130_v57, %v252_v10  ;;  %v263_v15 = vsel %vm191_vm11, %v3092_v52, %v257_v32  ;;  %v843_v5 = vsel %vm6537_vm13, %v3127_v51, 0.0  ;;  %v848_v41 = vsel %vm800_vm5, %v3117_v20, %v842_v6  ;;  %2524 = vmatprep.subr.bf16.mxu0 %v972_v1 }
  0xae   :  { %vm6538_vm1 = vcmp.eq.f32.partialorder %v3064_v50, 1.0  ;;  %v849_v31 = vsel %vm801_vm9, %v3120_v38, %v843_v5  ;;  %v854_v10 = vsel %vm794_vm10, %v3169_v44, %v848_v41  ;;  %vm6539_vm11 = vcmp.eq.f32.partialorder %v3086_v47, 2.0 }
  0xaf   :  { %v264_v4 = vsel %vm6538_vm1, %v3094_v19, %v258_v37  ;;  %v855_v54 = vsel %vm6539_vm11, %v3173_v17, %v849_v31  ;;  %v860_v1 = vsel %vm788_vm4, %v3107_v12, %v854_v10  ;;  %v3739_v6 = vunpack.c.l.bf16 %v2484_v8  ;;  %v2482_v37 = vld [vmem:[%s5978_s0 + $0x30] sm:$0xff]  }
  0xb0   :  { %v268_v32 = vpack.c.bf16 %v264_v4, %v263_v15  ;;  %vm6540_vm5 = vcmp.eq.f32.partialorder %v3086_v47, 1.0  ;;  %v3750_v15 = vld [vmem:[%s5979_s1] ss:$16 sps:$4 sm:$0xff]   ;;  %v3752_v41 = vunpack.c.h.bf16 %v2484_v8  ;;  %vm6158_vm9 = vcmp.eq.f32.partialorder %v3062_v46, 7.0 }
  0xb1   :  { %v861_v5 = vsel %vm6540_vm5, %v3110_v43, %v855_v54  ;;  %6541 = vst [vmem:[#allocation25_spill] sm:$0xff] %v3750_v15  ;;  %vm6156_vm10 = vcmp.eq.f32.partialorder %v3064_v50, 7.0  ;;  %v2406_v31 = vadd.f32 2.2, %v3739_v6  ;;  %v353_v10 = vsel %vm6158_vm9, %v3096_v53, 0.0 }
  0xb2   :  { %2503 = vmatpush3.bf16.msra.mxu1 %v268_v32  ;;  %v865_v4 = vpack.c.bf16 %v861_v5, %v860_v1  ;;  %v354_v54 = vsel %vm6156_vm10, %v3098_v7, 0.0  ;;  %v6112_v13 = vmov 0   ;;  %v2407_v8 = vadd.f32 2.2, %v3752_v41 }
  0xb3   :  { %582 = vmatprep.subr.bf16.mxu1 %v6112_v13  ;;  %vm6542_vm4 = vcmp.eq.f32.partialorder %v3062_v46, 6.0  ;;  %vm6543_vm15 = vcmp.eq.f32.partialorder %v3064_v50, 6.0  ;;  %v3771_v5 = vunpack.c.l.bf16 %v2482_v37  ;;  %v1267_v25 = vmul.f32 2.5, %v2406_v31 }
  0xb4   :  { %v359_v32 = vsel %vm6542_vm4, %v3101_v45, %v353_v10  ;;  %v360_v1 = vsel %vm6543_vm15, %v3103_v14, %v354_v54  ;;  %2525 = vmatpush3.bf16.msra.mxu0 %v865_v4  ;;  %vm6544_vm12 = vcmp.eq.f32.partialorder %v3062_v46, 5.0  ;;  %vm6545_vm14 = vcmp.eq.f32.partialorder %v3064_v50, 5.0 }
  0xb5   :  { %v365_v61 = vsel %vm6544_vm12, %v3123_v40, %v359_v32  ;;  %v366_v13 = vsel %vm6545_vm14, %v3130_v57, %v360_v1  ;;  %v3779_v0 = vunpack.c.h.bf16 %v2482_v37  ;;  %574 = vmatmul.mubr.bf16.vlgmr.msra.gmra.mrb[0].mxu1 %v3750_v15  ;;  %v1268_v10 = vmul.f32 2.5, %v2407_v8 }
  0xb6   :  { %vm6546_vm6 = vcmp.eq.f32.partialorder %v3062_v46, 4.0  ;;  %vm6547_vm2 = vcmp.eq.f32.partialorder %v3064_v50, 4.0  ;;  %v1215_v31 = vsub.f32 0.0, %v3771_v5  ;;  %v3789_v32 = vfloor.f32 %v1267_v25 }
  0xb7   :  { %v371_v54 = vsel %vm6546_vm6, %v3092_v52, %v365_v61  ;;  %v372_v4 = vsel %vm6547_vm2, %v3094_v19, %v366_v13  ;;  %v3791_v28 = vfloor.f32 %v1268_v10  ;;  %1151 = vmatmul.mubr.bf16.vlgmr.msra.gmra.mrb[0].mxu0 %v3750_v15  ;;  %v1216_v37 = vsub.f32 0.0, %v3779_v0  ;;  %v3801_v13 = vld [vmem:[%s5979_s1 + $0x4] ss:$16 sps:$4 sm:$0xff]  }
  0xb8   :  { %6548 = vst [vmem:[#allocation40_spill] sm:$0xff] %v3789_v32  ;;  %v376_v59 = vpack.c.bf16 %v372_v4, %v371_v54  ;;  %v1221_v8 = vmul.f32 1.442695, %v1215_v31  ;;  %v1279_v1 = vsub.f32 %v1267_v25, %v3789_v32  ;;  %v2402_v61 = vadd.f32 2.2, %v3771_v5  ;;  %6550 = vst [vmem:[#allocation42_spill] sm:$0xff] %v3801_v13  ;;  %1729 = vmatprep.mubr.bf16.mxu0 %v3801_v13 }
  0xb9   :  { %6549 = vst [vmem:[#allocation41_spill] sm:$0xff] %v3791_v28  ;;  %v2403_v2 = vadd.f32 2.2, %v3779_v0  ;;  %v1280_v54 = vsub.f32 %v1268_v10, %v3791_v28  ;;  %v6551_v4 = vmov 0   ;;  %vm6191_vm13 = vcmp.eq.f32.partialorder %v3789_v32, 3.0 }
  0xba   :  { %583 = vmatpush1.bf16.msra.mxu1 %v376_v59  ;;  %v1285_v62 = vmul.f32 %v1279_v1, %v1279_v1  ;;  %v1297_v31 = vsub.f32 1.0, %v1279_v1  ;;  %vm6161_vm1 = vcmp.eq.f32.partialorder %v3789_v32, 2.0  ;;  %2631 = vpow2.f32 %v1221_v8 }
  0xbb   :  { %584 = vmatprep.subr.bf16.mxu1 %v6551_v4  ;;  %v1286_v59 = vmul.f32 %v1280_v54, %v1280_v54  ;;  %v1298_v25 = vsub.f32 1.0, %v1280_v54  ;;  %v1223_v58 = vmul.f32 1.442695, %v1216_v37  ;;  %v1263_v26 = vmul.f32 2.5, %v2402_v61 }
  0xbc   :  { %v1291_v22 = vmul.f32 %v1285_v62, %v1279_v1  ;;  %v1327_v27 = vmul.f32 %v1297_v31, %v1297_v31  ;;  %v1264_v43 = vmul.f32 2.5, %v2403_v2  ;;  %vm6162_vm11 = vcmp.eq.f32.partialorder %v3791_v28, 3.0 }
  0xbd   :  { %v1292_v12 = vmul.f32 %v1286_v59, %v1280_v54  ;;  %v1328_v17 = vmul.f32 %v1298_v25, %v1298_v25  ;;  %2633 = vpow2.f32 %v1223_v58  ;;  %vm1369_vm5 = vcmp.eq.f32.partialorder %v3789_v32, 1.0 }
  0xbe   :  { %v1309_v10 = vmul.f32 0.5, %v1291_v22  ;;  %v1333_v44 = vmul.f32 %v1327_v27, %v1297_v31  ;;  %vm6192_vm4 = vcmp.eq.f32.partialorder %v3789_v32, 4.0  ;;  %v3811_v38 = vfloor.f32 %v1263_v26 }
  0xbf   :  { %v1310_v20 = vmul.f32 0.5, %v1292_v12  ;;  %v1334_v8 = vmul.f32 %v1328_v17, %v1298_v25  ;;  %vm1370_vm15 = vcmp.eq.f32.partialorder %v3791_v28, 1.0  ;;  %vm6190_vm12 = vcmp.eq.f32.partialorder %v3791_v28, 4.0 }
  0xc0   :  { %6552 = vst [vmem:[#allocation43_spill] sm:$0xff] %v3811_v38  ;;  %v3815_v2 = vfloor.f32 %v1264_v43  ;;  %v3817_v37 = vmul.f32 0.16666667, %v1291_v22  ;;  %v1315_v1 = vsub.f32 %v1309_v10, %v1285_v62  ;;  %v3819_v58 = vmul.f32 0.16666667, %v1333_v44 }
  0xc1   :  { %v1275_v27 = vsub.f32 %v1263_v26, %v3811_v38  ;;  %v3822_v61 = vmul.f32 0.16666667, %v1292_v12  ;;  %v1316_v54 = vsub.f32 %v1310_v20, %v1286_v59  ;;  %v3824_v31 = vmul.f32 0.16666667, %v1334_v8 }
  0xc2   :  { %6553 = vst [vmem:[#allocation13_spill] sm:$0xff] %v3815_v2  ;;  %6554 = vst [vmem:[#allocation59_spill] sm:$0xff] %v3817_v37  ;;  %v1276_v17 = vsub.f32 %v1264_v43, %v3815_v2  ;;  %v3827_v25 = vadd.f32 0.6666667, %v1315_v1  ;;  %v1345_v51 = vsub.f32 1.0, %v3819_v58  ;;  %v1387_v22 = vsel %vm6191_vm13, %v3819_v58, 0.0 }
  0xc3   :  { %6555 = vst [vmem:[#allocation60_spill] sm:$0xff] %v3819_v58  ;;  %6556 = vst [vmem:[#allocation61_spill] sm:$0xff] %v3822_v61  ;;  %v1423_v62 = vsel %vm6192_vm4, %v3819_v58, 0.0  ;;  %v3836_v26 = vadd.f32 0.6666667, %v1316_v54  ;;  %v1346_v12 = vsub.f32 1.0, %v3824_v31  ;;  %v1281_v10 = vmul.f32 %v1275_v27, %v1275_v27 }
  0xc4   :  { %6557 = vst [vmem:[#allocation62_spill] sm:$0xff] %v3824_v31  ;;  %6558 = vst [vmem:[#allocation63_spill] sm:$0xff] %v3827_v25  ;;  %v1388_v43 = vsel %vm6162_vm11, %v3824_v31, 0.0  ;;  %v1424_v20 = vsel %vm6190_vm12, %v3824_v31, 0.0  ;;  %v1351_v44 = vsub.f32 %v1345_v51, %v3827_v25  ;;  %vm6160_vm14 = vcmp.eq.f32.partialorder %v3791_v28, 2.0  ;;  %v2632_v8 = vpop.eup %2631 }
  0xc5   :  { %6559 = vst [vmem:[#allocation64_spill] sm:$0xff] %v3836_v26  ;;  %v1393_v59 = vsel %vm6161_vm1, %v3827_v25, %v1387_v22  ;;  %v1352_v1 = vsub.f32 %v1346_v12, %v3836_v26  ;;  %v1394_v54 = vsel %vm6160_vm14, %v3836_v26, %v1388_v43  ;;  %v1429_v34 = vsel %vm6191_vm13, %v3827_v25, %v1423_v62 }
  0xc6   :  { %v1282_v47 = vmul.f32 %v1276_v17, %v1276_v17  ;;  %v3858_v51 = vsub.f32 %v1351_v44, %v3817_v37  ;;  %v1430_v22 = vsel %vm6162_vm11, %v3836_v26, %v1424_v20  ;;  %v1233_v29 = vadd.f32 1.0, %v2632_v8 }
  0xc7   :  { %v1287_v13 = vmul.f32 %v1281_v10, %v1275_v27  ;;  %v2634_v15 = vpop.eup %2633  ;;  %v3864_v12 = vsub.f32 %v1352_v1, %v3822_v61  ;;  %v1293_v43 = vsub.f32 1.0, %v1275_v27  ;;  %v1294_v52 = vsub.f32 1.0, %v1276_v17 }
  0xc8   :  { %6560 = vst [vmem:[#allocation65_spill] sm:$0xff] %v3858_v51  ;;  %v1288_v19 = vmul.f32 %v1282_v47, %v1276_v17  ;;  %v3869_v62 = vsel %vm1369_vm5, %v3858_v51, %v1393_v59  ;;  %v1435_v44 = vsel %vm6161_vm1, %v3858_v51, %v1429_v34  ;;  %v1234_v57 = vadd.f32 1.0, %v2634_v15 }
  0xc9   :  { %6561 = vst [vmem:[#allocation66_spill] sm:$0xff] %v3864_v12  ;;  %6562 = vst [vmem:[#allocation67_spill] sm:$0xff] %v3869_v62  ;;  %2635 = vrcp.f32 %v1233_v29  ;;  %v3877_v20 = vsel %vm1370_vm15, %v3864_v12, %v1394_v54  ;;  %v1436_v27 = vsel %vm6160_vm14, %v3864_v12, %v1430_v22  ;;  %v1441_v17 = vsel %vm1369_vm5, %v3817_v37, %v1435_v44 }
  0xca   :  { %6563 = vst [vmem:[#allocation68_spill] sm:$0xff] %v3877_v20  ;;  %vm6157_vm6 = vcmp.eq.f32.partialorder %v2731_v23, 7.0  ;;  %v1442_v34 = vsel %vm1370_vm15, %v3822_v61, %v1436_v27  ;;  %2637 = vrcp.f32 %v1234_v57  ;;  %v1305_v29 = vmul.f32 0.5, %v1287_v13 }
  0xcb   :  { %vm6159_vm2 = vcmp.eq.f32.partialorder %v2733_v24, 7.0  ;;  %v1445_v15 = vpack.c.bf16 %v1442_v34, %v1441_v17  ;;  %v1306_v59 = vmul.f32 0.5, %v1288_v19  ;;  %v1323_v8 = vmul.f32 %v1293_v43, %v1293_v43 }
  0xcc   :  { %v1324_v1 = vmul.f32 %v1294_v52, %v1294_v52  ;;  %v3890_v54 = vmul.f32 0.16666667, %v1287_v13  ;;  %v1311_v22 = vsub.f32 %v1305_v29, %v1281_v10  ;;  %vm6175_vm8 = vcmp.eq.f32.partialorder %v3811_v38, 3.0 }
  0xcd   :  { %2532 = vmatprep.subr.bf16.mxu0 %v1445_v15  ;;  %v3893_v44 = vmul.f32 0.16666667, %v1288_v19  ;;  %v1312_v20 = vsub.f32 %v1306_v59, %v1282_v47  ;;  %v1329_v62 = vmul.f32 %v1323_v8, %v1293_v43  ;;  %vm1371_vm5 = vcmp.eq.f32.partialorder %v3811_v38, 2.0  ;;  %v2483_v47 = vld [vmem:[%s5978_s0 + $0x38] sm:$0xff]  }
  0xce   :  { %6564 = vst [vmem:[#allocation69_spill] sm:$0xff] %v3890_v54  ;;  %v1330_v40 = vmul.f32 %v1324_v1, %v1294_v52  ;;  %v3896_v57 = vadd.f32 0.6666667, %v1311_v22  ;;  %vm1372_vm15 = vcmp.eq.f32.partialorder %v3815_v2, 2.0  ;;  %vm6174_vm7 = vcmp.eq.f32.partialorder %v3815_v2, 3.0 }
  0xcf   :  { %6565 = vst [vmem:[#allocation70_spill] sm:$0xff] %v3893_v44  ;;  %v355_v13 = vsel %vm6157_vm6, %v6475_v60, 0.0  ;;  %v356_v19 = vsel %vm6159_vm2, %v6476_v49, 0.0  ;;  %v3909_v52 = vadd.f32 0.6666667, %v1312_v20  ;;  %vm6570_vm10 = vcmp.eq.f32.partialorder %v2731_v23, 6.0 }
  0xd0   :  { %6566 = vst [vmem:[#allocation71_spill] sm:$0xff] %v3896_v57  ;;  %v3911_v10 = vmul.f32 0.16666667, %v1329_v62  ;;  %v3913_v43 = vmul.f32 0.16666667, %v1330_v40  ;;  %v361_v27 = vsel %vm6570_vm10, %v6477_v16, %v355_v13  ;;  %vm6179_vm6 = vcmp.eq.f32.partialorder %v3811_v38, 4.0 }
  0xd1   :  { %6567 = vst [vmem:[#allocation72_spill] sm:$0xff] %v3909_v52  ;;  %vm6178_vm9 = vcmp.eq.f32.partialorder %v3815_v2, 4.0  ;;  %vm6199_vm2 = vcmp.eq.f32.partialorder %v3811_v38, 5.0  ;;  %vm6200_vm14 = vcmp.eq.f32.partialorder %v3815_v2, 5.0  ;;  %vm6571_vm1 = vcmp.eq.f32.partialorder %v2733_v24, 6.0 }
  0xd2   :  { %6568 = vst [vmem:[#allocation73_spill] sm:$0xff] %v3911_v10  ;;  %6569 = vst [vmem:[#allocation74_spill] sm:$0xff] %v3913_v43  ;;  %v1341_v17 = vsub.f32 1.0, %v3911_v10  ;;  %v1342_v20 = vsub.f32 1.0, %v3913_v43  ;;  %v362_v40 = vsel %vm6571_vm1, %v6480_v33, %v356_v19  ;;  %vm6572_vm11 = vcmp.eq.f32.partialorder %v2731_v23, 5.0 }
  0xd3   :  { %v367_v62 = vsel %vm6572_vm11, %v6482_v30, %v361_v27  ;;  %v2636_v34 = vpop.eup %2635  ;;  %v1383_v29 = vsel %vm6175_vm8, %v3911_v10, 0.0  ;;  %v1384_v15 = vsel %vm6174_vm7, %v3913_v43, 0.0  ;;  %v3936_v59 = vunpack.c.l.bf16 %v2483_v47 }
  0xd4   :  { %v3938_v8 = vunpack.c.h.bf16 %v2483_v47  ;;  %v1245_v1 = vmul.f32 %v2636_v34, %v3771_v5  ;;  %v1347_v22 = vsub.f32 %v1341_v17, %v3896_v57  ;;  %v1348_v13 = vsub.f32 %v1342_v20, %v3909_v52  ;;  %v2638_v27 = vpop.eup %2637 }
  0xd5   :  { %v1419_v19 = vsel %vm6179_vm6, %v3911_v10, 0.0  ;;  %v1420_v30 = vsel %vm6178_vm9, %v3913_v43, 0.0  ;;  %v1455_v47 = vsel %vm6199_vm2, %v3911_v10, 0.0  ;;  %v1456_v5 = vsel %vm6200_vm14, %v3913_v43, 0.0 }
  0xd6   :  { %vm6573_vm10 = vcmp.eq.f32.partialorder %v2733_v24, 5.0  ;;  %v1246_v20 = vmul.f32 %v2638_v27, %v3779_v0  ;;  %v3960_v34 = vsub.f32 %v1347_v22, %v3890_v54  ;;  %v3963_v33 = vsub.f32 %v1348_v13, %v3893_v44 }
  0xd7   :  { %v368_v17 = vsel %vm6573_vm10, %v6487_v11, %v362_v40  ;;  %v1461_v16 = vsel %vm6179_vm6, %v3896_v57, %v1455_v47  ;;  %v1462_v49 = vsel %vm6178_vm9, %v3909_v52, %v1456_v5  ;;  %vm6576_vm1 = vcmp.eq.f32.partialorder %v2731_v23, 4.0 }
  0xd8   :  { %6574 = vst [vmem:[#allocation75_spill] sm:$0xff] %v3960_v34  ;;  %6575 = vst [vmem:[#allocation76_spill] sm:$0xff] %v3963_v33  ;;  %v373_v40 = vsel %vm6576_vm1, %v2768_v56, %v367_v62  ;;  %vm6577_vm11 = vcmp.eq.f32.partialorder %v2733_v24, 4.0  ;;  %v1217_v22 = vsub.f32 0.0, %v3936_v59  ;;  %v1251_v13 = vpack.c.bf16 %v1246_v20, %v1245_v1 }
  0xd9   :  { %v374_v0 = vsel %vm6577_vm11, %v6416_v18, %v368_v17  ;;  %v1425_v27 = vsel %vm6175_vm8, %v3896_v57, %v1419_v19  ;;  %v1426_v47 = vsel %vm6174_vm7, %v3909_v52, %v1420_v30  ;;  %v1467_v5 = vsel %vm6175_vm8, %v3960_v34, %v1461_v16 }
  0xda   :  { %v1468_v62 = vsel %vm6174_vm7, %v3963_v33, %v1462_v49  ;;  %v1473_v1 = vsel %vm1371_vm5, %v3890_v54, %v1467_v5  ;;  %v377_v17 = vpack.c.bf16 %v374_v0, %v373_v40  ;;  %v1218_v20 = vsub.f32 0.0, %v3938_v8  ;;  %2533 = vmatpush3.bf16.msra.mxu0 %v1251_v13 }
  0xdb   :  { %v1474_v30 = vsel %vm1372_vm15, %v3893_v44, %v1468_v62  ;;  %v1225_v19 = vmul.f32 1.442695, %v1217_v22  ;;  %v2404_v18 = vadd.f32 2.2, %v3936_v59  ;;  %v2405_v16 = vadd.f32 2.2, %v3938_v8 }
  0xdc   :  { %v1479_v56 = vpack.c.bf16 %v1474_v30, %v1473_v1  ;;  %585 = vmatpush1.bf16.msra.mxu1 %v377_v17  ;;  %v1227_v49 = vmul.f32 1.442695, %v1218_v20  ;;  %vm6173_vm10 = vcmp.eq.f32.partialorder %v2760_v42, 8.0  ;;  %vm6172_vm1 = vcmp.eq.f32.partialorder %v2894_v21, 8.0 }
  0xdd   :  { %2639 = vpow2.f32 %v1225_v19  ;;  %v1265_v40 = vmul.f32 2.5, %v2404_v18  ;;  %v1266_v0 = vmul.f32 2.5, %v2405_v16  ;;  %586 = vmatprep.subr.bf16.mxu1 %v6551_v4  ;;  %v387_v22 = vsel %vm6173_vm10, %v6498_v39, 0.0 }
  0xde   :  { %2534 = vmatprep.subr.bf16.mxu0 %v1479_v56  ;;  %2641 = vpow2.f32 %v1227_v49  ;;  %v388_v13 = vsel %vm6172_vm1, %v2933_v55, 0.0  ;;  %v393_v5 = vsel %vm6171_vm3, %v6502_v3, %v387_v22  ;;  %v1219_v62 = vsub.f32 0.0, %v3739_v6 }
  0xdf   :  { %v4012_v18 = vfloor.f32 %v1265_v40  ;;  %v4014_v1 = vfloor.f32 %v1266_v0  ;;  %v394_v17 = vsel %vm6170_vm0, %v2937_v9, %v388_v13  ;;  %vm6580_vm11 = vcmp.eq.f32.partialorder %v2760_v42, 6.0 }
  0xe0   :  { %v399_v56 = vsel %vm6580_vm11, %v6429_v63, %v393_v5  ;;  %v4025_v20 = vsel %vm1371_vm5, %v3896_v57, %v1383_v29  ;;  %v1229_v30 = vmul.f32 1.442695, %v1219_v62  ;;  %v4030_v19 = vsel %vm1372_vm15, %v3909_v52, %v1384_v15 }
  0xe1   :  { %6578 = vst [vmem:[#allocation77_spill] sm:$0xff] %v4012_v18  ;;  %6579 = vst [vmem:[#allocation78_spill] sm:$0xff] %v4014_v1  ;;  %v1277_v16 = vsub.f32 %v1265_v40, %v4012_v18  ;;  %v1278_v49 = vsub.f32 %v1266_v0, %v4014_v1  ;;  %vm6581_vm0 = vcmp.eq.f32.partialorder %v2894_v21, 6.0  ;;  %v4040_v13 = vsel %vm1371_vm5, %v3960_v34, %v1425_v27 }
  0xe2   :  { %v400_v22 = vsel %vm6581_vm0, %v6431_v36, %v394_v17  ;;  %6582 = vst [vmem:[#allocation79_spill] sm:$0xff] %v4040_v13  ;;  %v4045_v29 = vsel %vm1372_vm15, %v3963_v33, %v1426_v47  ;;  %vm6584_vm11 = vcmp.eq.f32.partialorder %v2760_v42, 5.0  ;;  %v1220_v40 = vsub.f32 0.0, %v3752_v41 }
  0xe3   :  { %6583 = vst [vmem:[#allocation80_spill] sm:$0xff] %v4045_v29  ;;  %v405_v15 = vsel %vm6584_vm11, %v6432_v35, %v399_v56  ;;  %v1283_v0 = vmul.f32 %v1277_v16, %v1277_v16  ;;  %v1284_v5 = vmul.f32 %v1278_v49, %v1278_v49  ;;  %v1295_v62 = vsub.f32 1.0, %v1277_v16 }
  0xe4   :  { %v1296_v17 = vsub.f32 1.0, %v1278_v49  ;;  %vm1379_vm0 = vcmp.eq.f32.partialorder %v4012_v18, 3.0  ;;  %vm1380_vm5 = vcmp.eq.f32.partialorder %v4014_v1, 3.0  ;;  %vm1373_vm3 = vcmp.eq.f32.partialorder %v4012_v18, 2.0 }
  0xe5   :  { %vm1374_vm1 = vcmp.eq.f32.partialorder %v4014_v1, 2.0  ;;  %vm6210_vm15 = vcmp.eq.f32.partialorder %v4012_v18, 4.0  ;;  %vm6207_vm10 = vcmp.eq.f32.partialorder %v4014_v1, 4.0  ;;  %vm6220_vm11 = vcmp.eq.f32.partialorder %v4012_v18, 5.0 }
  0xe6   :  { %vm6215_vm7 = vcmp.eq.f32.partialorder %v4014_v1, 5.0  ;;  %vm6585_vm8 = vcmp.eq.f32.partialorder %v2894_v21, 5.0  ;;  %2643 = vpow2.f32 %v1229_v30  ;;  %v1289_v47 = vmul.f32 %v1283_v0, %v1277_v16 }
  0xe7   :  { %v406_v27 = vsel %vm6585_vm8, %v6433_v48, %v400_v22  ;;  %v1290_v56 = vmul.f32 %v1284_v5, %v1278_v49  ;;  %v1325_v29 = vmul.f32 %v1295_v62, %v1295_v62  ;;  %v1326_v13 = vmul.f32 %v1296_v17, %v1296_v17  ;;  %v2640_v63 = vpop.eup %2639  ;;  %v4071_v49 = vld [vmem:[%s5979_s1 + $0xc] ss:$16 sps:$4 sm:$0xff]  }
  0xe8   :  { %v411_v35 = vpack.c.bf16 %v406_v27, %v405_v15  ;;  %v1231_v36 = vmul.f32 1.442695, %v1220_v40  ;;  %vm6198_vm9 = vcmp.eq.f32.partialorder %v3789_v32, 5.0  ;;  %vm6195_vm6 = vcmp.eq.f32.partialorder %v3791_v28, 5.0  ;;  %v2642_v21 = vpop.eup %2641  ;;  %6588 = vst [vmem:[#allocation83_spill] sm:$0xff] %v4071_v49  ;;  %614 = vmatprep.mubr.bf16.mxu1 %v4071_v49 }
  0xe9   :  { %v4064_v9 = vmul.f32 0.16666667, %v1289_v47  ;;  %v4066_v3 = vmul.f32 0.16666667, %v1290_v56  ;;  %v1307_v55 = vmul.f32 0.5, %v1289_v47  ;;  %v1308_v39 = vmul.f32 0.5, %v1290_v56 }
  0xea   :  { %v1235_v22 = vadd.f32 1.0, %v2640_v63  ;;  %v1331_v30 = vmul.f32 %v1325_v29, %v1295_v62  ;;  %v1332_v16 = vmul.f32 %v1326_v13, %v1296_v17  ;;  %587 = vmatpush1.bf16.msra.mxu1 %v411_v35  ;;  %2645 = vpow2.f32 %v1231_v36 }
  0xeb   :  { %6586 = vst [vmem:[#allocation81_spill] sm:$0xff] %v4064_v9  ;;  %6587 = vst [vmem:[#allocation82_spill] sm:$0xff] %v4066_v3  ;;  %v1236_v15 = vadd.f32 1.0, %v2642_v21  ;;  %v1313_v40 = vsub.f32 %v1307_v55, %v1283_v0  ;;  %v1314_v27 = vsub.f32 %v1308_v39, %v1284_v5  ;;  %588 = vmatprep.subr.bf16.mxu1 %v6551_v4  ;;  %v1459_v47 = vsel %vm6198_vm9, %v3819_v58, 0.0 }
  0xec   :  { %2647 = vrcp.f32 %v1235_v22  ;;  %v4077_v63 = vmul.f32 0.16666667, %v1331_v30  ;;  %v4079_v13 = vmul.f32 0.16666667, %v1332_v16  ;;  %v1460_v36 = vsel %vm6195_vm6, %v3824_v31, 0.0 }
  0xed   :  { %2649 = vrcp.f32 %v1236_v15  ;;  %v4085_v21 = vadd.f32 0.6666667, %v1313_v40  ;;  %v4087_v55 = vadd.f32 0.6666667, %v1314_v27  ;;  %v1465_v35 = vsel %vm6192_vm4, %v3827_v25, %v1459_v47 }
  0xee   :  { %6589 = vst [vmem:[#allocation84_spill] sm:$0xff] %v4077_v63  ;;  %6590 = vst [vmem:[#allocation85_spill] sm:$0xff] %v4079_v13  ;;  %v1343_v39 = vsub.f32 1.0, %v4077_v63  ;;  %v1344_v29 = vsub.f32 1.0, %v4079_v13  ;;  %v1385_v0 = vsel %vm1379_vm0, %v4077_v63, 0.0  ;;  %v1386_v5 = vsel %vm1380_vm5, %v4079_v13, 0.0 }
  0xef   :  { %6591 = vst [vmem:[#allocation86_spill] sm:$0xff] %v4085_v21  ;;  %6592 = vst [vmem:[#allocation87_spill] sm:$0xff] %v4087_v55  ;;  %v4103_v62 = vsel %vm1373_vm3, %v4085_v21, %v1385_v0  ;;  %v4108_v17 = vsel %vm1374_vm1, %v4087_v55, %v1386_v5  ;;  %v1421_v56 = vsel %vm6210_vm15, %v4077_v63, 0.0  ;;  %v1422_v22 = vsel %vm6207_vm10, %v4079_v13, 0.0 }
  0xf0   :  { %v2644_v30 = vpop.eup %2643  ;;  %v1349_v16 = vsub.f32 %v1343_v39, %v4085_v21  ;;  %v1350_v15 = vsub.f32 %v1344_v29, %v4087_v55  ;;  %v1427_v40 = vsel %vm1379_vm0, %v4085_v21, %v1421_v56  ;;  %v1428_v27 = vsel %vm1380_vm5, %v4087_v55, %v1422_v22 }
  0xf1   :  { %v1457_v47 = vsel %vm6220_vm11, %v4077_v63, 0.0  ;;  %v1458_v0 = vsel %vm6215_vm7, %v4079_v13, 0.0  ;;  %v1237_v5 = vadd.f32 1.0, %v2644_v30  ;;  %v1466_v39 = vsel %vm6190_vm12, %v3836_v26, %v1460_v36 }
  0xf2   :  { %v4134_v29 = vsub.f32 %v1349_v16, %v4064_v9  ;;  %v4137_v56 = vsub.f32 %v1350_v15, %v4066_v3  ;;  %v1463_v22 = vsel %vm6210_vm15, %v4085_v21, %v1457_v47  ;;  %v1464_v49 = vsel %vm6207_vm10, %v4087_v55, %v1458_v0 }
  0xf3   :  { %2651 = vrcp.f32 %v1237_v5  ;;  %v1471_v30 = vsel %vm6191_vm13, %v3858_v51, %v1465_v35  ;;  %vm6595_vm8 = vcmp.eq.f32.partialorder %v3791_v28, 3.0  ;;  %vm6193_vm12 = vcmp.eq.f32.partialorder %v3062_v46, 8.0 }
  0xf4   :  { %6593 = vst [vmem:[#allocation88_spill] sm:$0xff] %v4134_v29  ;;  %6594 = vst [vmem:[#allocation89_spill] sm:$0xff] %v4137_v56  ;;  %v1472_v36 = vsel %vm6595_vm8, %v3864_v12, %v1466_v39  ;;  %v2646_v16 = vpop.eup %2645  ;;  %v4155_v15 = vsel %vm1373_vm3, %v4134_v29, %v1427_v40  ;;  %v4160_v47 = vsel %vm1374_vm1, %v4137_v56, %v1428_v27  ;;  %vm6598_vm8 = vcmp.eq.f32.partialorder %v3789_v32, 2.0 }
  0xf5   :  { %6596 = vst [vmem:[#allocation90_spill] sm:$0xff] %v4155_v15  ;;  %6597 = vst [vmem:[#allocation91_spill] sm:$0xff] %v4160_v47  ;;  %v1469_v35 = vsel %vm1379_vm0, %v4134_v29, %v1463_v22  ;;  %v1470_v0 = vsel %vm1380_vm5, %v4137_v56, %v1464_v49  ;;  %v1238_v39 = vadd.f32 1.0, %v2646_v16  ;;  %v4177_v27 = vsel %vm6598_vm8, %v3817_v37, %v1471_v30 }
  0xf6   :  { %v1475_v5 = vsel %vm1373_vm3, %v4064_v9, %v1469_v35  ;;  %v1476_v40 = vsel %vm1374_vm1, %v4066_v3, %v1470_v0  ;;  %v2648_v47 = vpop.eup %2647  ;;  %vm6599_vm13 = vcmp.eq.f32.partialorder %v3791_v28, 2.0  ;;  %vm6194_vm4 = vcmp.eq.f32.partialorder %v3064_v50, 8.0 }
  0xf7   :  { %v1480_v22 = vpack.c.bf16 %v1476_v40, %v1475_v5  ;;  %v4182_v49 = vsel %vm6599_vm13, %v3822_v61, %v1472_v36  ;;  %v389_v35 = vsel %vm6193_vm12, %v3096_v53, 0.0  ;;  %v2650_v0 = vpop.eup %2649  ;;  %v1247_v16 = vmul.f32 %v2648_v47, %v3936_v59  ;;  %v6602_v59 = vld [vmem:[#allocation53_spill] sm:$0xff] }
  0xf8   :  { %2653 = vrcp.f32 %v1238_v39  ;;  %v390_v5 = vsel %vm6194_vm4, %v3098_v7, 0.0  ;;  %v1248_v36 = vmul.f32 %v2650_v0, %v3938_v8  ;;  %vm6600_vm3 = vcmp.eq.f32.partialorder %v3062_v46, 7.0  ;;  %v6604_v39 = vld [vmem:[#allocation56_spill] sm:$0xff] }
  0xf9   :  { %v395_v40 = vsel %vm6600_vm3, %v3101_v45, %v389_v35  ;;  %vm6601_vm13 = vcmp.eq.f32.partialorder %v3064_v50, 7.0  ;;  %vm1359_vm1 = vcmp.eq.f32.partialorder %v3811_v38, 0.0  ;;  %vm6603_vm8 = vcmp.eq.f32.partialorder %v3062_v46, 6.0  ;;  %v6606_v35 = vld [vmem:[#allocation46_spill] sm:$0xff] }
  0xfa   :  { %v396_v15 = vsel %vm6601_vm13, %v3103_v14, %v390_v5  ;;  %v401_v47 = vsel %vm6603_vm8, %v6602_v59, %v395_v40  ;;  %vm6605_vm12 = vcmp.eq.f32.partialorder %v3064_v50, 6.0  ;;  %vm1360_vm4 = vcmp.eq.f32.partialorder %v3815_v2, 0.0  ;;  %v6608_v5 = vld [vmem:[#allocation47_spill] sm:$0xff] }
  0xfb   :  { %v402_v30 = vsel %vm6605_vm12, %v6604_v39, %v396_v15  ;;  %vm1365_vm6 = vcmp.eq.f32.partialorder %v3811_v38, 1.0  ;;  %v1252_v8 = vpack.c.bf16 %v1248_v36, %v1247_v16  ;;  %vm6607_vm3 = vcmp.eq.f32.partialorder %v3062_v46, 5.0 }
  0xfc   :  { %v407_v0 = vsel %vm6607_vm3, %v6606_v35, %v401_v47  ;;  %vm6609_vm13 = vcmp.eq.f32.partialorder %v3064_v50, 5.0  ;;  %vm1366_vm9 = vcmp.eq.f32.partialorder %v3815_v2, 1.0  ;;  %v1395_v15 = vsel %vm1365_vm6, %v3960_v34, %v4025_v20 }
  0xfd   :  { %v408_v14 = vsel %vm6609_vm13, %v6608_v5, %v402_v30  ;;  %v1396_v16 = vsel %vm1366_vm9, %v3963_v33, %v4030_v19  ;;  %vm6223_vm12 = vcmp.eq.f32.partialorder %v3811_v38, 6.0  ;;  %2535 = vmatpush3.bf16.msra.mxu0 %v1252_v8  ;;  %v4227_v36 = vsel %vm1359_vm1, %v3890_v54, %v1395_v15  ;;  %v2652_v20 = vpop.eup %2651 }
  0xfe   :  { %v412_v40 = vpack.c.bf16 %v408_v14, %v407_v0  ;;  %v4230_v30 = vsel %vm1360_vm4, %v3893_v44, %v1396_v16  ;;  %vm6206_vm8 = vcmp.eq.f32.partialorder %v3815_v2, 6.0  ;;  %v1491_v14 = vsel %vm6223_vm12, %v3911_v10, 0.0  ;;  %2536 = vmatprep.subr.bf16.mxu0 %v1480_v22 }
  0xff   :  { %v1407_v19 = vpack.c.bf16 %v4230_v30, %v4227_v36  ;;  %v1492_v47 = vsel %vm6206_vm8, %v3913_v43, 0.0  ;;  %v1497_v8 = vsel %vm6199_vm2, %v3896_v57, %v1491_v14  ;;  %vm6204_vm4 = vcmp.eq.f32.partialorder %v2731_v23, 8.0  ;;  %v6613_v36 = vld [vmem:[#allocation7_spill] sm:$0xff] }
 0x100   :  { %589 = vmatpush1.bf16.msra.mxu1 %v412_v40  ;;  %v1249_v0 = vmul.f32 %v2652_v20, %v3739_v6  ;;  %v1498_v22 = vsel %vm6200_vm14, %v3909_v52, %v1492_v47  ;;  %vm6610_vm1 = vcmp.eq.f32.partialorder %v3811_v38, 4.0  ;;  %vm6205_vm3 = vcmp.eq.f32.partialorder %v2733_v24, 8.0  ;;  %v6615_v20 = vld [vmem:[#allocation8_spill] sm:$0xff] }
 0x101   :  { %590 = vmatprep.subr.bf16.mxu1 %v6551_v4  ;;  %v1503_v40 = vsel %vm6610_vm1, %v3960_v34, %v1497_v8  ;;  %vm6611_vm13 = vcmp.eq.f32.partialorder %v3815_v2, 4.0  ;;  %vm6612_vm2 = vcmp.eq.f32.partialorder %v3811_v38, 3.0  ;;  %v391_v16 = vsel %vm6204_vm4, %v6475_v60, 0.0  ;;  %v6617_v8 = vld [vmem:[#allocation9_spill] sm:$0xff] }
 0x102   :  { %v1504_v15 = vsel %vm6611_vm13, %v3963_v33, %v1498_v22  ;;  %v1509_v6 = vsel %vm6612_vm2, %v3890_v54, %v1503_v40  ;;  %v392_v30 = vsel %vm6205_vm3, %v6613_v36, 0.0  ;;  %vm6614_vm1 = vcmp.eq.f32.partialorder %v3815_v2, 3.0  ;;  %v2654_v40 = vpop.eup %2653  ;;  %v6619_v33 = vld [vmem:[#allocation12_spill] sm:$0xff] }
 0x103   :  { %v1510_v14 = vsel %vm6614_vm1, %v3893_v44, %v1504_v15  ;;  %vm6616_vm14 = vcmp.eq.f32.partialorder %v2731_v23, 7.0  ;;  %vm6618_vm13 = vcmp.eq.f32.partialorder %v2733_v24, 7.0  ;;  %vm1361_vm2 = vcmp.eq.f32.partialorder %v4012_v18, 0.0 }
 0x104   :  { %v397_v47 = vsel %vm6616_vm14, %v6615_v20, %v391_v16  ;;  %v398_v22 = vsel %vm6618_vm13, %v6617_v8, %v392_v30  ;;  %v1515_v60 = vpack.c.bf16 %v1510_v14, %v1509_v6  ;;  %vm6620_vm4 = vcmp.eq.f32.partialorder %v2731_v23, 6.0  ;;  %v6622_v20 = vld [vmem:[#allocation5_spill] sm:$0xff]  ;;  %v6624_v8 = vld [vmem:[#allocation10_spill] sm:$0xff] }
 0x105   :  { %v403_v36 = vsel %vm6620_vm4, %v6619_v33, %v397_v47  ;;  %vm6621_vm3 = vcmp.eq.f32.partialorder %v2733_v24, 6.0  ;;  %vm1362_vm1 = vcmp.eq.f32.partialorder %v4014_v1, 0.0  ;;  %v1250_v16 = vmul.f32 %v2654_v40, %v3752_v41 }
 0x106   :  { %v404_v15 = vsel %vm6621_vm3, %v6487_v11, %v398_v22  ;;  %vm6623_vm14 = vcmp.eq.f32.partialorder %v2731_v23, 5.0  ;;  %vm6625_vm13 = vcmp.eq.f32.partialorder %v2733_v24, 5.0  ;;  %vm1367_vm8 = vcmp.eq.f32.partialorder %v4012_v18, 1.0 }
 0x107   :  { %v409_v30 = vsel %vm6623_vm14, %v6622_v20, %v403_v36  ;;  %v410_v6 = vsel %vm6625_vm13, %v6624_v8, %v404_v15  ;;  %vm1368_vm4 = vcmp.eq.f32.partialorder %v4014_v1, 1.0  ;;  %v1397_v47 = vsel %vm1367_vm8, %v4134_v29, %v4103_v62 }
 0x108   :  { %v413_v14 = vpack.c.bf16 %v410_v6, %v409_v30  ;;  %vm6267_vm3 = vcmp.eq.f32.partialorder %v4012_v18, 6.0  ;;  %v1253_v41 = vpack.c.bf16 %v1250_v16, %v1249_v0  ;;  %v1398_v36 = vsel %vm1368_vm4, %v4137_v56, %v4108_v17  ;;  %v6626_v30 = vld [vmem:[#allocation21_spill] sm:$0xff] }
 0x109   :  { %v1403_v22 = vsel %vm1361_vm2, %v4064_v9, %v1397_v47  ;;  %vm6266_vm14 = vcmp.eq.f32.partialorder %v4014_v1, 6.0  ;;  %v1404_v40 = vsel %vm1362_vm1, %v4066_v3, %v1398_v36  ;;  %v1493_v62 = vsel %vm6267_vm3, %v4077_v63, 0.0  ;;  %v6721_v18 = vld [vmem:[#allocation57_spill] sm:$0xff] }
 0x10a   :  { %591 = vmatpush1.bf16.msra.mxu1 %v413_v14  ;;  %v1494_v0 = vsel %vm6266_vm14, %v4079_v13, 0.0  ;;  %vm417_vm13 = vcmp.eq.f32.partialorder %v2760_v42, 9.0  ;;  %2537 = vmatpush3.bf16.msra.mxu0 %v1253_v41  ;;  %v1408_v17 = vpack.c.bf16 %v1404_v40, %v1403_v22  ;;  %v1499_v15 = vsel %vm6220_vm11, %v4085_v21, %v1493_v62  ;;  %v6628_v41 = vld [vmem:[#allocation26_spill] sm:$0xff]  ;;  %v6629_v22 = vld [vmem:[#allocation28_spill] sm:$0xff]  ;;  %v6630_v62 = vld [vmem:[#allocation27_spill] sm:$0xff] }
 0x10b   :  { %592 = vmatprep.subr.bf16.mxu1 %v6551_v4  ;;  %v1500_v16 = vsel %vm6215_vm7, %v4087_v55, %v1494_v0  ;;  %vm418_vm2 = vcmp.eq.f32.partialorder %v6626_v30, 9.0  ;;  %v6627_v6 = vpack.c.bf16 %v4182_v49, %v4177_v27  ;;  %v1505_v14 = vsel %vm6210_vm15, %v4134_v29, %v1499_v15  ;;  %v6632_v15 = vld [vmem:[#allocation29_spill] sm:$0xff]  ;;  %v6636_v55 = vld [vmem:[#allocation35_spill] sm:$0xff]  ;;  %v6642_v21 = vld [vmem:[#allocation68_spill] sm:$0xff] }
 0x10c   :  { %v1506_v47 = vsel %vm6207_vm10, %v4137_v56, %v1500_v16  ;;  %v423_v36 = vsel %vm417_vm13, %v6628_v41, 0.0  ;;  %v424_v40 = vsel %vm418_vm2, %v6629_v22, 0.0  ;;  %v1511_v27 = vsel %vm1379_vm0, %v4064_v9, %v1505_v14  ;;  %v6634_v56 = vld [vmem:[#allocation34_spill] sm:$0xff] }
 0x10d   :  { %2538 = vmatprep.subr.bf16.mxu0 %v6627_v6  ;;  %v1512_v49 = vsel %vm1380_vm5, %v4066_v3, %v1506_v47  ;;  %vm6631_vm1 = vcmp.eq.f32.partialorder %v2760_v42, 8.0  ;;  %vm6633_vm10 = vcmp.eq.f32.partialorder %v6626_v30, 8.0  ;;  %vm6635_vm15 = vcmp.eq.f32.partialorder %v2760_v42, 7.0  ;;  %v6638_v47 = vld [vmem:[#allocation23_spill] sm:$0xff] }
 0x10e   :  { %v429_v0 = vsel %vm6631_vm1, %v6630_v62, %v423_v36  ;;  %v430_v16 = vsel %vm6633_vm10, %v6632_v15, %v424_v40  ;;  %v1516_v6 = vpack.c.bf16 %v1512_v49, %v1511_v27  ;;  %vm6637_vm0 = vcmp.eq.f32.partialorder %v6626_v30, 7.0  ;;  %2539 = vmatpush3.bf16.msra.mxu0 %v1407_v19  ;;  %v6641_v27 = vld [vmem:[#allocation67_spill] sm:$0xff] }
 0x10f   :  { %v435_v29 = vsel %vm6635_vm15, %v6634_v56, %v429_v0  ;;  %v436_v14 = vsel %vm6637_vm0, %v6636_v55, %v430_v16  ;;  %vm1363_vm7 = vcmp.eq.f32.partialorder %v3789_v32, 0.0  ;;  %vm6639_vm5 = vcmp.eq.f32.partialorder %v2760_v42, 6.0  ;;  %2540 = vmatprep.subr.bf16.mxu0 %v1515_v60 }
 0x110   :  { %v441_v36 = vsel %vm6639_vm5, %v6638_v47, %v435_v29  ;;  %vm6640_vm1 = vcmp.eq.f32.partialorder %v6626_v30, 6.0  ;;  %vm1364_vm10 = vcmp.eq.f32.partialorder %v3791_v28, 0.0  ;;  %v1405_v49 = vsel %vm1363_vm7, %v3817_v37, %v6641_v27 }
 0x111   :  { %v442_v40 = vsel %vm6640_vm1, %v6433_v48, %v436_v14  ;;  %v1406_v16 = vsel %vm1364_vm10, %v3822_v61, %v6642_v21  ;;  %vm6219_vm15 = vcmp.eq.f32.partialorder %v3789_v32, 6.0  ;;  %vm6218_vm0 = vcmp.eq.f32.partialorder %v3791_v28, 6.0 }
 0x112   :  { %v447_v0 = vpack.c.bf16 %v442_v40, %v441_v36  ;;  %v1409_v19 = vpack.c.bf16 %v1406_v16, %v1405_v49  ;;  %v1495_v29 = vsel %vm6219_vm15, %v3819_v58, 0.0  ;;  %v1496_v14 = vsel %vm6218_vm0, %v3824_v31, 0.0  ;;  %2541 = vmatpush3.bf16.msra.mxu0 %v1408_v17 }
 0x113   :  { %vm419_vm7 = vcmp.eq.f32.partialorder %v3062_v46, 9.0  ;;  %vm6643_vm5 = vcmp.eq.f32.partialorder %v3789_v32, 5.0  ;;  %vm6644_vm1 = vcmp.eq.f32.partialorder %v3791_v28, 5.0  ;;  %vm420_vm10 = vcmp.eq.f32.partialorder %v3064_v50, 9.0  ;;  %2542 = vmatprep.subr.bf16.mxu0 %v1516_v6 }
 0x114   :  { %593 = vmatpush1.bf16.msra.mxu1 %v447_v0  ;;  %v1501_v60 = vsel %vm6643_vm5, %v3827_v25, %v1495_v29  ;;  %v1502_v21 = vsel %vm6644_vm1, %v3836_v26, %v1496_v14  ;;  %v425_v36 = vsel %vm419_vm7, %v3096_v53, 0.0  ;;  %vm6645_vm0 = vcmp.eq.f32.partialorder %v3789_v32, 4.0  ;;  %v6650_v29 = vld [vmem:[#allocation48_spill] sm:$0xff] }
 0x115   :  { %594 = vmatprep.subr.bf16.mxu1 %v6551_v4  ;;  %v1507_v40 = vsel %vm6645_vm0, %v3858_v51, %v1501_v60  ;;  %vm6646_vm5 = vcmp.eq.f32.partialorder %v3791_v28, 4.0  ;;  %v426_v49 = vsel %vm420_vm10, %v3098_v7, 0.0  ;;  %vm6647_vm1 = vcmp.eq.f32.partialorder %v3062_v46, 8.0 }
 0x116   :  { %v1508_v27 = vsel %vm6646_vm5, %v3864_v12, %v1502_v21  ;;  %v431_v0 = vsel %vm6647_vm1, %v3101_v45, %v425_v36  ;;  %vm6648_vm15 = vcmp.eq.f32.partialorder %v3789_v32, 3.0  ;;  %vm6649_vm0 = vcmp.eq.f32.partialorder %v3791_v28, 3.0  ;;  %2543 = vmatpush3.bf16.msra.mxu0 %v1409_v19 }
 0x117   :  { %v1513_v17 = vsel %vm6648_vm15, %v3817_v37, %v1507_v40  ;;  %v1514_v16 = vsel %vm6649_vm0, %v3822_v61, %v1508_v27  ;;  %vm6651_vm5 = vcmp.eq.f32.partialorder %v3064_v50, 8.0  ;;  %vm6652_vm11 = vcmp.eq.f32.partialorder %v3062_v46, 7.0  ;;  %v6655_v40 = vld [vmem:[#allocation79_spill] sm:$0xff]  ;;  %v6657_v61 = vld [vmem:[#allocation80_spill] sm:$0xff] }
 0x118   :  { %v432_v14 = vsel %vm6651_vm5, %v6650_v29, %v426_v49  ;;  %v437_v60 = vsel %vm6652_vm11, %v6602_v59, %v431_v0  ;;  %v1517_v21 = vpack.c.bf16 %v1514_v16, %v1513_v17  ;;  %vm6653_vm1 = vcmp.eq.f32.partialorder %v3064_v50, 7.0 }
 0x119   :  { %v438_v6 = vsel %vm6653_vm1, %v6604_v39, %v432_v14  ;;  %vm6654_vm15 = vcmp.eq.f32.partialorder %v3062_v46, 6.0  ;;  %v1437_v27 = vsel %vm1365_vm6, %v3890_v54, %v6655_v40  ;;  %vm6656_vm0 = vcmp.eq.f32.partialorder %v3064_v50, 6.0  ;;  %v6662_v40 = vld [vmem:[#allocation6_spill] sm:$0xff] }
 0x11a   :  { %v443_v36 = vsel %vm6654_vm15, %v6606_v35, %v437_v60  ;;  %v444_v49 = vsel %vm6656_vm0, %v6608_v5, %v438_v6  ;;  %v1438_v0 = vsel %vm1366_vm9, %v3893_v44, %v6657_v61  ;;  %vm6265_vm11 = vcmp.eq.f32.partialorder %v3811_v38, 7.0  ;;  %2544 = vmatprep.subr.bf16.mxu0 %v1517_v21 }
 0x11b   :  { %vm6228_vm5 = vcmp.eq.f32.partialorder %v3815_v2, 7.0  ;;  %v448_v17 = vpack.c.bf16 %v444_v49, %v443_v36  ;;  %v1443_v16 = vpack.c.bf16 %v1438_v0, %v1437_v27  ;;  %v1527_v14 = vsel %vm6265_vm11, %v3911_v10, 0.0  ;;  %v6660_v36 = vld [vmem:[#allocation76_spill] sm:$0xff]  ;;  %v6663_v49 = vld [vmem:[#allocation7_spill] sm:$0xff] }
 0x11c   :  { %v1528_v60 = vsel %vm6228_vm5, %v3913_v43, 0.0  ;;  %v1533_v61 = vsel %vm6223_vm12, %v3896_v57, %v1527_v14  ;;  %vm6658_vm9 = vcmp.eq.f32.partialorder %v3815_v2, 6.0  ;;  %vm421_vm6 = vcmp.eq.f32.partialorder %v2731_v23, 9.0 }
 0x11d   :  { %v1534_v6 = vsel %vm6658_vm9, %v3909_v52, %v1528_v60  ;;  %vm422_vm1 = vcmp.eq.f32.partialorder %v2733_v24, 9.0  ;;  %595 = vmatpush1.bf16.msra.mxu1 %v448_v17  ;;  %vm6659_vm15 = vcmp.eq.f32.partialorder %v3811_v38, 5.0  ;;  %vm6661_vm0 = vcmp.eq.f32.partialorder %v3815_v2, 5.0  ;;  %v2487_v17 = vld [vmem:[%s5978_s0 + $0x58] sm:$0xff]   ;;  %2545 = vmatpush3.bf16.msra.mxu0 %v1443_v16 }
 0x11e   :  { %v1539_v19 = vsel %vm6659_vm15, %v3960_v34, %v1533_v61  ;;  %v1540_v21 = vsel %vm6661_vm0, %v6660_v36, %v1534_v6  ;;  %v427_v27 = vsel %vm421_vm6, %v6662_v40, 0.0  ;;  %v428_v0 = vsel %vm422_vm1, %v6663_v49, 0.0  ;;  %596 = vmatprep.subr.bf16.mxu1 %v6551_v4  ;;  %v6666_v61 = vld [vmem:[#allocation8_spill] sm:$0xff]  ;;  %v6668_v36 = vld [vmem:[#allocation9_spill] sm:$0xff] }
 0x11f   :  { %vm6664_vm9 = vcmp.eq.f32.partialorder %v3811_v38, 4.0  ;;  %vm6665_vm15 = vcmp.eq.f32.partialorder %v3815_v2, 4.0  ;;  %vm6667_vm0 = vcmp.eq.f32.partialorder %v2731_v23, 8.0  ;;  %vm6669_vm12 = vcmp.eq.f32.partialorder %v2733_v24, 8.0 }
 0x120   :  { %v1545_v14 = vsel %vm6664_vm9, %v3890_v54, %v1539_v19  ;;  %v1546_v60 = vsel %vm6665_vm15, %v3893_v44, %v1540_v21  ;;  %v433_v6 = vsel %vm6667_vm0, %v6666_v61, %v427_v27  ;;  %v434_v34 = vsel %vm6669_vm12, %v6668_v36, %v428_v0  ;;  %v6672_v54 = vld [vmem:[#allocation90_spill] sm:$0xff]  ;;  %v2485_v27 = vld [vmem:[%s5978_s0 + $0x48] sm:$0xff]  }
 0x121   :  { %v1551_v52 = vpack.c.bf16 %v1546_v60, %v1545_v14  ;;  %vm6670_vm5 = vcmp.eq.f32.partialorder %v2731_v23, 7.0  ;;  %vm6671_vm9 = vcmp.eq.f32.partialorder %v2733_v24, 7.0  ;;  %v1439_v21 = vsel %vm1367_vm8, %v4064_v9, %v6672_v54  ;;  %v6675_v14 = vld [vmem:[#allocation91_spill] sm:$0xff] }
 0x122   :  { %v439_v57 = vsel %vm6670_vm5, %v6619_v33, %v433_v6  ;;  %v440_v19 = vsel %vm6671_vm9, %v6487_v11, %v434_v34  ;;  %vm6673_vm12 = vcmp.eq.f32.partialorder %v2731_v23, 6.0  ;;  %vm6674_vm5 = vcmp.eq.f32.partialorder %v2733_v24, 6.0 }
 0x123   :  { %v445_v16 = vsel %vm6673_vm12, %v6622_v20, %v439_v57  ;;  %v446_v0 = vsel %vm6674_vm5, %v6624_v8, %v440_v19  ;;  %v1440_v34 = vsel %vm1368_vm4, %v4066_v3, %v6675_v14  ;;  %v4494_v60 = vunpack.c.l.bf16 %v2487_v17  ;;  %2546 = vmatprep.subr.bf16.mxu0 %v1551_v52 }
 0x124   :  { %v449_v54 = vpack.c.bf16 %v446_v0, %v445_v16  ;;  %v1444_v6 = vpack.c.bf16 %v1440_v34, %v1439_v21  ;;  %v4496_v44 = vunpack.c.h.bf16 %v2487_v17  ;;  %vm453_vm8 = vcmp.eq.f32.partialorder %v2760_v42, 10.0 }
 0x125   :  { %v2418_v57 = vadd.f32 2.2, %v4494_v60  ;;  %vm454_vm15 = vcmp.eq.f32.partialorder %v6626_v30, 10.0  ;;  %v459_v19 = vsel %vm453_vm8, %v6628_v41, 0.0  ;;  %v4502_v43 = vunpack.c.l.bf16 %v2485_v27 }
 0x126   :  { %597 = vmatpush1.bf16.msra.mxu1 %v449_v54  ;;  %2547 = vmatpush3.bf16.msra.mxu0 %v1444_v6  ;;  %v2419_v14 = vadd.f32 2.2, %v4496_v44  ;;  %v460_v52 = vsel %vm454_vm15, %v6629_v22, 0.0  ;;  %v465_v17 = vsel %vm417_vm13, %v6630_v62, %v459_v19  ;;  %v4509_v21 = vunpack.c.h.bf16 %v2485_v27 }
 0x127   :  { %598 = vmatprep.subr.bf16.mxu1 %v6551_v4  ;;  %v1846_v16 = vmul.f32 2.5, %v2418_v57  ;;  %v466_v41 = vsel %vm418_vm2, %v6632_v15, %v460_v52  ;;  %vm6676_vm4 = vcmp.eq.f32.partialorder %v2760_v42, 8.0  ;;  %v1794_v34 = vsub.f32 0.0, %v4502_v43  ;;  %v6681_v52 = vld [vmem:[#allocation42_spill] sm:$0xff] }
 0x128   :  { %v471_v0 = vsel %vm6676_vm4, %v6634_v56, %v465_v17  ;;  %v1847_v22 = vmul.f32 2.5, %v2419_v14  ;;  %vm6677_vm0 = vcmp.eq.f32.partialorder %v6626_v30, 8.0  ;;  %vm6678_vm13 = vcmp.eq.f32.partialorder %v2760_v42, 7.0  ;;  %v6680_v56 = vld [vmem:[#allocation25_spill] sm:$0xff] }
 0x129   :  { %v472_v62 = vsel %vm6677_vm0, %v6636_v55, %v466_v41  ;;  %v477_v27 = vsel %vm6678_vm13, %v6638_v47, %v471_v0  ;;  %v1795_v54 = vsub.f32 0.0, %v4509_v21  ;;  %v4526_v6 = vfloor.f32 %v1846_v16  ;;  %1730 = vmatmul.mubr.bf16.vlgmr.msra.gmra.mrb[4].mxu0 %v6680_v56 }
 0x12a   :  { %vm6679_vm2 = vcmp.eq.f32.partialorder %v6626_v30, 7.0  ;;  %v4532_v57 = vfloor.f32 %v1847_v22  ;;  %v1800_v14 = vmul.f32 1.442695, %v1794_v34  ;;  %v2414_v55 = vadd.f32 2.2, %v4502_v43  ;;  %2308 = vmatprep.mubr.bf16.mxu0 %v6681_v52 }
 0x12b   :  { %v478_v15 = vsel %vm6679_vm2, %v6433_v48, %v472_v62  ;;  %v1858_v42 = vsub.f32 %v1846_v16, %v4526_v6  ;;  %v1802_v47 = vmul.f32 1.442695, %v1795_v54  ;;  %v2415_v17 = vadd.f32 2.2, %v4509_v21 }
 0x12c   :  { %v483_v19 = vpack.c.bf16 %v478_v15, %v477_v27  ;;  %v1859_v41 = vsub.f32 %v1847_v22, %v4532_v57  ;;  %vm6271_vm9 = vcmp.eq.f32.partialorder %v4526_v6, 3.0  ;;  %vm6269_vm12 = vcmp.eq.f32.partialorder %v4526_v6, 2.0 }
 0x12d   :  { %v1864_v30 = vmul.f32 %v1858_v42, %v1858_v42  ;;  %v1876_v48 = vsub.f32 1.0, %v1858_v42  ;;  %2655 = vpow2.f32 %v1800_v14  ;;  %v1842_v62 = vmul.f32 2.5, %v2414_v55 }
 0x12e   :  { %599 = vmatpush1.bf16.msra.mxu1 %v483_v19  ;;  %v1865_v0 = vmul.f32 %v1859_v41, %v1859_v41  ;;  %v1877_v34 = vsub.f32 1.0, %v1859_v41  ;;  %vm6268_vm5 = vcmp.eq.f32.partialorder %v4532_v57, 2.0  ;;  %2657 = vpow2.f32 %v1802_v47 }
 0x12f   :  { %600 = vmatprep.subr.bf16.mxu1 %v6551_v4  ;;  %v1870_v27 = vmul.f32 %v1864_v30, %v1858_v42  ;;  %v1906_v16 = vmul.f32 %v1876_v48, %v1876_v48  ;;  %v1843_v54 = vmul.f32 2.5, %v2415_v17  ;;  %vm6270_vm8 = vcmp.eq.f32.partialorder %v4532_v57, 3.0 }
 0x130   :  { %v1871_v22 = vmul.f32 %v1865_v0, %v1859_v41  ;;  %v1907_v15 = vmul.f32 %v1877_v34, %v1877_v34  ;;  %v4544_v56 = vfloor.f32 %v1842_v62  ;;  %vm1948_vm15 = vcmp.eq.f32.partialorder %v4526_v6, 1.0 }
 0x131   :  { %v1888_v19 = vmul.f32 0.5, %v1870_v27  ;;  %v1912_v52 = vmul.f32 %v1906_v16, %v1876_v48  ;;  %vm6282_vm4 = vcmp.eq.f32.partialorder %v4526_v6, 4.0  ;;  %v4548_v14 = vfloor.f32 %v1843_v54 }
 0x132   :  { %v1889_v55 = vmul.f32 0.5, %v1871_v22  ;;  %v1913_v42 = vmul.f32 %v1907_v15, %v1877_v34  ;;  %vm1949_vm0 = vcmp.eq.f32.partialorder %v4532_v57, 1.0  ;;  %vm6281_vm13 = vcmp.eq.f32.partialorder %v4532_v57, 4.0 }
 0x133   :  { %v1854_v47 = vsub.f32 %v1842_v62, %v4544_v56  ;;  %v4553_v17 = vmul.f32 0.16666667, %v1870_v27  ;;  %v1894_v41 = vsub.f32 %v1888_v19, %v1864_v30  ;;  %v4555_v10 = vmul.f32 0.16666667, %v1912_v52 }
 0x134   :  { %v1855_v48 = vsub.f32 %v1843_v54, %v4548_v14  ;;  %v4558_v16 = vmul.f32 0.16666667, %v1871_v22  ;;  %v1895_v2 = vsub.f32 %v1889_v55, %v1865_v0  ;;  %v4560_v38 = vmul.f32 0.16666667, %v1913_v42 }
 0x135   :  { %v1860_v37 = vmul.f32 %v1854_v47, %v1854_v47  ;;  %v4562_v34 = vadd.f32 0.6666667, %v1894_v41  ;;  %v1924_v15 = vsub.f32 1.0, %v4555_v10  ;;  %v1966_v62 = vsel %vm6271_vm9, %v4555_v10, 0.0 }
 0x136   :  { %6682 = vst [vmem:[#allocation53_spill] sm:$0xff] %v4558_v16  ;;  %v2002_v30 = vsel %vm6282_vm4, %v4555_v10, 0.0  ;;  %v4571_v27 = vadd.f32 0.6666667, %v1895_v2  ;;  %v1925_v54 = vsub.f32 1.0, %v4560_v38  ;;  %v1967_v0 = vsel %vm6270_vm8, %v4560_v38, 0.0 }
 0x137   :  { %v2003_v22 = vsel %vm6281_vm13, %v4560_v38, 0.0  ;;  %v1930_v19 = vsub.f32 %v1924_v15, %v4562_v34  ;;  %v1972_v52 = vsel %vm6269_vm12, %v4562_v34, %v1966_v62  ;;  %v1861_v55 = vmul.f32 %v1855_v48, %v1855_v48  ;;  %v2656_v2 = vpop.eup %2655 }
 0x138   :  { %v1872_v42 = vsub.f32 1.0, %v1854_v47  ;;  %v1931_v41 = vsub.f32 %v1925_v54, %v4571_v27  ;;  %v1973_v12 = vsel %vm6268_vm5, %v4571_v27, %v1967_v0  ;;  %v2008_v51 = vsel %vm6271_vm9, %v4562_v34, %v2002_v30  ;;  %v2658_v25 = vpop.eup %2657 }
 0x139   :  { %v1866_v26 = vmul.f32 %v1860_v37, %v1854_v47  ;;  %v4592_v15 = vsub.f32 %v1930_v19, %v4553_v17  ;;  %v2009_v62 = vsel %vm6270_vm8, %v4571_v27, %v2003_v22  ;;  %v1812_v31 = vadd.f32 1.0, %v2656_v2 }
 0x13a   :  { %v1867_v58 = vmul.f32 %v1861_v55, %v1855_v48  ;;  %v4598_v54 = vsub.f32 %v1931_v41, %v4558_v16  ;;  %v1813_v28 = vadd.f32 1.0, %v2658_v25  ;;  %v1873_v0 = vsub.f32 1.0, %v1855_v48 }
 0x13b   :  { %6683 = vst [vmem:[#allocation56_spill] sm:$0xff] %v4592_v15  ;;  %v1884_v32 = vmul.f32 0.5, %v1866_v26  ;;  %v4603_v47 = vsel %vm1948_vm15, %v4592_v15, %v1972_v52  ;;  %v2014_v30 = vsel %vm6269_vm12, %v4592_v15, %v2008_v51  ;;  %2659 = vrcp.f32 %v1812_v31 }
 0x13c   :  { %6684 = vst [vmem:[#allocation46_spill] sm:$0xff] %v4598_v54  ;;  %v4611_v22 = vsel %vm1949_vm0, %v4598_v54, %v1973_v12  ;;  %v2015_v25 = vsel %vm6268_vm5, %v4598_v54, %v2009_v62  ;;  %v2020_v48 = vsel %vm1948_vm15, %v4553_v17, %v2014_v30  ;;  %2661 = vrcp.f32 %v1813_v28 }
 0x13d   :  { %v2021_v19 = vsel %vm1949_vm0, %v4558_v16, %v2015_v25  ;;  %v1885_v51 = vmul.f32 0.5, %v1867_v58  ;;  %v1890_v31 = vsub.f32 %v1884_v32, %v1860_v37  ;;  %v1902_v52 = vmul.f32 %v1872_v42, %v1872_v42  ;;  %v2486_v32 = vld [vmem:[%s5978_s0 + $0x50] sm:$0xff]  }
 0x13e   :  { %v2024_v2 = vpack.c.bf16 %v2021_v19, %v2020_v48  ;;  %v1903_v41 = vmul.f32 %v1873_v0, %v1873_v0  ;;  %vm455_vm2 = vcmp.eq.f32.partialorder %v3062_v46, 10.0  ;;  %v4623_v12 = vmul.f32 0.16666667, %v1866_v26 }
 0x13f   :  { %v4625_v3 = vmul.f32 0.16666667, %v1867_v58  ;;  %v1891_v62 = vsub.f32 %v1885_v51, %v1861_v55  ;;  %v1908_v9 = vmul.f32 %v1902_v52, %v1872_v42  ;;  %vm1950_vm15 = vcmp.eq.f32.partialorder %v4544_v56, 2.0 }
 0x140   :  { %6685 = vst [vmem:[#allocation47_spill] sm:$0xff] %v4623_v12  ;;  %2554 = vmatprep.subr.bf16.mxu0 %v2024_v2  ;;  %v1909_v28 = vmul.f32 %v1903_v41, %v1873_v0  ;;  %vm1951_vm11 = vcmp.eq.f32.partialorder %v4548_v14, 2.0  ;;  %vm6279_vm0 = vcmp.eq.f32.partialorder %v4544_v56, 3.0  ;;  %vm6303_vm14 = vcmp.eq.f32.partialorder %v4544_v56, 5.0 }
 0x141   :  { %v4634_v37 = vadd.f32 0.6666667, %v1890_v31  ;;  %v4636_v58 = vmul.f32 0.16666667, %v1908_v9  ;;  %vm6278_vm3 = vcmp.eq.f32.partialorder %v4548_v14, 3.0  ;;  %vm456_vm5 = vcmp.eq.f32.partialorder %v3064_v50, 10.0 }
 0x142   :  { %v4640_v26 = vadd.f32 0.6666667, %v1891_v62  ;;  %v4642_v55 = vmul.f32 0.16666667, %v1909_v28  ;;  %vm6291_vm12 = vcmp.eq.f32.partialorder %v4544_v56, 4.0  ;;  %vm6280_vm8 = vcmp.eq.f32.partialorder %v4548_v14, 4.0 }
 0x143   :  { %6686 = vst [vmem:[#allocation12_spill] sm:$0xff] %v4634_v37  ;;  %6687 = vst [vmem:[#allocation5_spill] sm:$0xff] %v4636_v58  ;;  %v1920_v42 = vsub.f32 1.0, %v4636_v58  ;;  %vm6292_vm9 = vcmp.eq.f32.partialorder %v4548_v14, 5.0  ;;  %v2034_v9 = vsel %vm6303_vm14, %v4636_v58, 0.0  ;;  %v461_v0 = vsel %vm455_vm2, %v3096_v53, 0.0 }
 0x144   :  { %6688 = vst [vmem:[#allocation10_spill] sm:$0xff] %v4640_v26  ;;  %6689 = vst [vmem:[#allocation21_spill] sm:$0xff] %v4642_v55  ;;  %v1921_v30 = vsub.f32 1.0, %v4642_v55  ;;  %v1962_v25 = vsel %vm6279_vm0, %v4636_v58, 0.0  ;;  %v462_v48 = vsel %vm456_vm5, %v3098_v7, 0.0  ;;  %v4659_v19 = vunpack.c.l.bf16 %v2486_v32 }
 0x145   :  { %v2660_v51 = vpop.eup %2659  ;;  %v1926_v31 = vsub.f32 %v1920_v42, %v4634_v37  ;;  %v1963_v52 = vsel %vm6278_vm3, %v4642_v55, 0.0  ;;  %v1998_v53 = vsel %vm6291_vm12, %v4636_v58, 0.0  ;;  %v1999_v2 = vsel %vm6280_vm8, %v4642_v55, 0.0 }
 0x146   :  { %v2662_v41 = vpop.eup %2661  ;;  %v1824_v7 = vmul.f32 %v2660_v51, %v4502_v43  ;;  %v1927_v62 = vsub.f32 %v1921_v30, %v4640_v26  ;;  %v2035_v28 = vsel %vm6292_vm9, %v4642_v55, 0.0  ;;  %v2040_v42 = vsel %vm6291_vm12, %v4634_v37, %v2034_v9 }
 0x147   :  { %v1825_v13 = vmul.f32 %v2662_v41, %v4509_v21  ;;  %v4681_v63 = vsub.f32 %v1926_v31, %v4623_v12  ;;  %v2041_v1 = vsel %vm6280_vm8, %v4640_v26, %v2035_v28  ;;  %v467_v43 = vsel %vm419_vm7, %v3101_v45, %v461_v0 }
 0x148   :  { %v4690_v30 = vsub.f32 %v1927_v62, %v4625_v3  ;;  %v468_v9 = vsel %vm420_vm10, %v6650_v29, %v462_v48  ;;  %vm6692_vm5 = vcmp.eq.f32.partialorder %v3062_v46, 8.0  ;;  %v4698_v51 = vunpack.c.h.bf16 %v2486_v32 }
 0x149   :  { %6690 = vst [vmem:[#allocation26_spill] sm:$0xff] %v4681_v63  ;;  %v473_v21 = vsel %vm6692_vm5, %v6602_v59, %v467_v43  ;;  %v1830_v31 = vpack.c.bf16 %v1825_v13, %v1824_v7  ;;  %v2004_v41 = vsel %vm6279_vm0, %v4634_v37, %v1998_v53  ;;  %v2046_v45 = vsel %vm6279_vm0, %v4681_v63, %v2040_v42 }
 0x14a   :  { %6691 = vst [vmem:[#allocation28_spill] sm:$0xff] %v4690_v30  ;;  %vm6693_vm7 = vcmp.eq.f32.partialorder %v3064_v50, 8.0  ;;  %v2005_v29 = vsel %vm6278_vm3, %v4640_v26, %v1999_v2  ;;  %v2047_v13 = vsel %vm6278_vm3, %v4690_v30, %v2041_v1  ;;  %v2052_v59 = vsel %vm1950_vm15, %v4623_v12, %v2046_v45 }
 0x14b   :  { %v474_v0 = vsel %vm6693_vm7, %v6604_v39, %v468_v9  ;;  %vm6694_vm10 = vcmp.eq.f32.partialorder %v3062_v46, 7.0  ;;  %2555 = vmatpush3.bf16.msra.mxu0 %v1830_v31  ;;  %v2053_v39 = vsel %vm1951_vm11, %v4625_v3, %v2047_v13  ;;  %vm6695_vm2 = vcmp.eq.f32.partialorder %v3064_v50, 7.0 }
 0x14c   :  { %v479_v32 = vsel %vm6694_vm10, %v6606_v35, %v473_v21  ;;  %v480_v48 = vsel %vm6695_vm2, %v6608_v5, %v474_v0  ;;  %v1796_v53 = vsub.f32 0.0, %v4659_v19  ;;  %v1797_v1 = vsub.f32 0.0, %v4698_v51 }
 0x14d   :  { %v2058_v2 = vpack.c.bf16 %v2053_v39, %v2052_v59  ;;  %v484_v7 = vpack.c.bf16 %v480_v48, %v479_v32  ;;  %v2416_v62 = vadd.f32 2.2, %v4659_v19  ;;  %v2417_v46 = vadd.f32 2.2, %v4698_v51 }
 0x14e   :  { %v1804_v35 = vmul.f32 1.442695, %v1796_v53  ;;  %v1806_v28 = vmul.f32 1.442695, %v1797_v1  ;;  %vm457_vm5 = vcmp.eq.f32.partialorder %v2731_v23, 10.0  ;;  %vm458_vm7 = vcmp.eq.f32.partialorder %v2733_v24, 10.0 }
 0x14f   :  { %2556 = vmatprep.subr.bf16.mxu0 %v2058_v2  ;;  %601 = vmatpush1.bf16.msra.mxu1 %v484_v7  ;;  %v1844_v50 = vmul.f32 2.5, %v2416_v62  ;;  %v1845_v5 = vmul.f32 2.5, %v2417_v46  ;;  %v463_v42 = vsel %vm457_vm5, %v6662_v40, 0.0  ;;  %v464_v43 = vsel %vm458_vm7, %v6663_v49, 0.0  ;;  %v4793_v46 = vld [vmem:[%s5979_s1 + $0x8] ss:$16 sps:$4 sm:$0xff]  }
 0x150   :  { %2663 = vpow2.f32 %v1804_v35  ;;  %602 = vmatprep.subr.bf16.mxu1 %v6551_v4  ;;  %v469_v9 = vsel %vm421_vm6, %v6666_v61, %v463_v42  ;;  %v470_v21 = vsel %vm422_vm1, %v6668_v36, %v464_v43  ;;  %v1798_v31 = vsub.f32 0.0, %v4494_v60  ;;  %6700 = vst [vmem:[#allocation27_spill] sm:$0xff] %v4793_v46 }
 0x151   :  { %2665 = vpow2.f32 %v1806_v28  ;;  %v4743_v45 = vfloor.f32 %v1844_v50  ;;  %v4745_v0 = vfloor.f32 %v1845_v5  ;;  %vm6696_vm10 = vcmp.eq.f32.partialorder %v2731_v23, 8.0 }
 0x152   :  { %v475_v40 = vsel %vm6696_vm10, %v6619_v33, %v469_v9  ;;  %v4753_v49 = vsel %vm1950_vm15, %v4634_v37, %v1962_v25  ;;  %v1808_v61 = vmul.f32 1.442695, %v1798_v31  ;;  %v4758_v36 = vsel %vm1951_vm11, %v4640_v26, %v1963_v52 }
 0x153   :  { %v1856_v13 = vsub.f32 %v1844_v50, %v4743_v45  ;;  %v1857_v59 = vsub.f32 %v1845_v5, %v4745_v0  ;;  %vm6697_vm6 = vcmp.eq.f32.partialorder %v2733_v24, 8.0  ;;  %v4768_v33 = vsel %vm1950_vm15, %v4681_v63, %v2004_v41 }
 0x154   :  { %v476_v32 = vsel %vm6697_vm6, %v6487_v11, %v470_v21  ;;  %v4773_v25 = vsel %vm1951_vm11, %v4690_v30, %v2005_v29  ;;  %vm6698_vm1 = vcmp.eq.f32.partialorder %v2731_v23, 7.0  ;;  %v1799_v39 = vsub.f32 0.0, %v4496_v44 }
 0x155   :  { %v481_v52 = vsel %vm6698_vm1, %v6622_v20, %v475_v40  ;;  %v1862_v48 = vmul.f32 %v1856_v13, %v1856_v13  ;;  %v1863_v53 = vmul.f32 %v1857_v59, %v1857_v59  ;;  %v1874_v1 = vsub.f32 1.0, %v1856_v13 }
 0x156   :  { %v1875_v11 = vsub.f32 1.0, %v1857_v59  ;;  %vm1958_vm2 = vcmp.eq.f32.partialorder %v4743_v45, 3.0  ;;  %vm1952_vm15 = vcmp.eq.f32.partialorder %v4743_v45, 2.0  ;;  %vm6290_vm5 = vcmp.eq.f32.partialorder %v4745_v0, 3.0 }
 0x157   :  { %vm6304_vm7 = vcmp.eq.f32.partialorder %v4743_v45, 4.0  ;;  %vm6305_vm11 = vcmp.eq.f32.partialorder %v4745_v0, 4.0  ;;  %vm6315_vm10 = vcmp.eq.f32.partialorder %v4743_v45, 5.0  ;;  %vm6310_vm6 = vcmp.eq.f32.partialorder %v4745_v0, 5.0 }
 0x158   :  { %vm6699_vm1 = vcmp.eq.f32.partialorder %v2733_v24, 7.0  ;;  %2667 = vpow2.f32 %v1808_v61  ;;  %v1868_v20 = vmul.f32 %v1862_v48, %v1856_v13  ;;  %v1869_v41 = vmul.f32 %v1863_v53, %v1857_v59 }
 0x159   :  { %v482_v23 = vsel %vm6699_vm1, %v6624_v8, %v476_v32  ;;  %v1904_v29 = vmul.f32 %v1874_v1, %v1874_v1  ;;  %v1905_v2 = vmul.f32 %v1875_v11, %v1875_v11  ;;  %vm1953_vm3 = vcmp.eq.f32.partialorder %v4745_v0, 2.0 }
 0x15a   :  { %v485_v7 = vpack.c.bf16 %v482_v23, %v481_v52  ;;  %v1810_v62 = vmul.f32 1.442695, %v1799_v39  ;;  %vm6289_vm0 = vcmp.eq.f32.partialorder %v4526_v6, 5.0  ;;  %vm6283_vm8 = vcmp.eq.f32.partialorder %v4532_v57, 5.0  ;;  %v2664_v50 = vpop.eup %2663 }
 0x15b   :  { %v4797_v24 = vmul.f32 0.16666667, %v1868_v20  ;;  %v4799_v8 = vmul.f32 0.16666667, %v1869_v41  ;;  %v1886_v35 = vmul.f32 0.5, %v1868_v20  ;;  %v1887_v28 = vmul.f32 0.5, %v1869_v41  ;;  %v2666_v9 = vpop.eup %2665 }
 0x15c   :  { %v1910_v5 = vmul.f32 %v1904_v29, %v1874_v1  ;;  %v1911_v42 = vmul.f32 %v1905_v2, %v1875_v11  ;;  %603 = vmatpush1.bf16.msra.mxu1 %v485_v7  ;;  %2669 = vpow2.f32 %v1810_v62  ;;  %v2038_v43 = vsel %vm6289_vm0, %v4555_v10, 0.0  ;;  %v6704_v20 = vld [vmem:[#allocation83_spill] sm:$0xff] }
 0x15d   :  { %v1814_v21 = vadd.f32 1.0, %v2664_v50  ;;  %v1892_v31 = vsub.f32 %v1886_v35, %v1862_v48  ;;  %v1893_v40 = vsub.f32 %v1887_v28, %v1863_v53  ;;  %1159 = vmatprep.subr.bf16.mxu1 %v6551_v4  ;;  %v2039_v61 = vsel %vm6283_vm8, %v4560_v38, 0.0 }
 0x15e   :  { %v1815_v13 = vadd.f32 1.0, %v2666_v9  ;;  %v4808_v59 = vmul.f32 0.16666667, %v1910_v5  ;;  %v4810_v32 = vmul.f32 0.16666667, %v1911_v42  ;;  %v2044_v52 = vsel %vm6282_vm4, %v4562_v34, %v2038_v43 }
 0x15f   :  { %2671 = vrcp.f32 %v1814_v21  ;;  %v4815_v39 = vadd.f32 0.6666667, %v1892_v31  ;;  %v4817_v48 = vadd.f32 0.6666667, %v1893_v40  ;;  %615 = vmatmul.mubr.bf16.vlgmr.msra.gmra.mrb[4].mxu1 %v4793_v46  ;;  %v2045_v53 = vsel %vm6281_vm13, %v4571_v27, %v2039_v61 }
 0x160   :  { %6701 = vst [vmem:[#allocation29_spill] sm:$0xff] %v4810_v32  ;;  %2673 = vrcp.f32 %v1815_v13  ;;  %v1922_v1 = vsub.f32 1.0, %v4808_v59  ;;  %v1923_v11 = vsub.f32 1.0, %v4810_v32  ;;  %v1964_v23 = vsel %vm1958_vm2, %v4808_v59, 0.0  ;;  %1191 = vmatprep.mubr.bf16.mxu1 %v6704_v20 }
 0x161   :  { %6702 = vst [vmem:[#allocation34_spill] sm:$0xff] %v4815_v39  ;;  %6703 = vst [vmem:[#allocation35_spill] sm:$0xff] %v4817_v48  ;;  %v1965_v41 = vsel %vm6290_vm5, %v4810_v32, 0.0  ;;  %v4835_v29 = vsel %vm1952_vm15, %v4815_v39, %v1964_v23  ;;  %v2000_v2 = vsel %vm6304_vm7, %v4808_v59, 0.0  ;;  %v2001_v7 = vsel %vm6305_vm11, %v4810_v32, 0.0  ;;  %v6709_v23 = vld [vmem:[#allocation44_spill] sm:$0xff] }
 0x162   :  { %v2668_v62 = vpop.eup %2667  ;;  %v1928_v35 = vsub.f32 %v1922_v1, %v4815_v39  ;;  %v1929_v28 = vsub.f32 %v1923_v11, %v4817_v48  ;;  %v4848_v50 = vsel %vm1953_vm3, %v4817_v48, %v1965_v41  ;;  %v2006_v5 = vsel %vm1958_vm2, %v4815_v39, %v2000_v2 }
 0x163   :  { %v2007_v42 = vsel %vm6290_vm5, %v4817_v48, %v2001_v7  ;;  %v2036_v43 = vsel %vm6315_vm10, %v4808_v59, 0.0  ;;  %v2037_v9 = vsel %vm6310_vm6, %v4810_v32, 0.0  ;;  %v1816_v21 = vadd.f32 1.0, %v2668_v62 }
 0x164   :  { %v4863_v31 = vsub.f32 %v1928_v35, %v4797_v24  ;;  %v4866_v40 = vsub.f32 %v1929_v28, %v4799_v8  ;;  %v2042_v61 = vsel %vm6304_vm7, %v4815_v39, %v2036_v43  ;;  %v2043_v13 = vsel %vm6305_vm11, %v4817_v48, %v2037_v9  ;;  %v6714_v43 = vld [vmem:[#allocation45_spill] sm:$0xff]  ;;  %v6715_v9 = vld [vmem:[#allocation54_spill] sm:$0xff] }
 0x165   :  { %2675 = vrcp.f32 %v1816_v21  ;;  %vm6707_vm1 = vcmp.eq.f32.partialorder %v4526_v6, 3.0  ;;  %vm6708_vm13 = vcmp.eq.f32.partialorder %v4532_v57, 3.0  ;;  %vm6288_vm4 = vcmp.eq.f32.partialorder %v6709_v23, 7.0 }
 0x166   :  { %6705 = vst [vmem:[#allocation23_spill] sm:$0xff] %v4863_v31  ;;  %6706 = vst [vmem:[#allocation67_spill] sm:$0xff] %v4866_v40  ;;  %v2050_v1 = vsel %vm6707_vm1, %v4592_v15, %v2044_v52  ;;  %v2051_v11 = vsel %vm6708_vm13, %v4598_v54, %v2045_v53  ;;  %v2670_v20 = vpop.eup %2669  ;;  %v4884_v41 = vsel %vm1952_vm15, %v4863_v31, %v2006_v5  ;;  %vm6712_vm13 = vcmp.eq.f32.partialorder %v4526_v6, 2.0 }
 0x167   :  { %6710 = vst [vmem:[#allocation68_spill] sm:$0xff] %v4884_v41  ;;  %v4889_v2 = vsel %vm1953_vm3, %v4866_v40, %v2007_v42  ;;  %v2048_v52 = vsel %vm1958_vm2, %v4863_v31, %v2042_v61  ;;  %v2049_v53 = vsel %vm6290_vm5, %v4866_v40, %v2043_v13  ;;  %v1817_v35 = vadd.f32 1.0, %v2670_v20  ;;  %v6716_v20 = vld [vmem:[#allocation55_spill] sm:$0xff] }
 0x168   :  { %6711 = vst [vmem:[#allocation48_spill] sm:$0xff] %v4889_v2  ;;  %v2054_v7 = vsel %vm1952_vm15, %v4797_v24, %v2048_v52  ;;  %v2055_v62 = vsel %vm1953_vm3, %v4799_v8, %v2049_v53  ;;  %v4906_v28 = vsel %vm6712_vm13, %v4553_v17, %v2050_v1  ;;  %vm6713_vm1 = vcmp.eq.f32.partialorder %v4532_v57, 2.0  ;;  %v6717_v52 = vld [vmem:[#allocation51_spill] sm:$0xff]  ;;  %v6723_v2 = vld [vmem:[#allocation58_spill] sm:$0xff] }
 0x169   :  { %v2059_v5 = vpack.c.bf16 %v2055_v62, %v2054_v7  ;;  %v4911_v42 = vsel %vm6713_vm1, %v4558_v16, %v2051_v11  ;;  %vm6287_vm8 = vcmp.eq.f32.partialorder %v6714_v43, 7.0  ;;  %v950_v21 = vsel %vm6288_vm4, %v6715_v9, 0.0  ;;  %v2672_v61 = vpop.eup %2671  ;;  %v6719_v62 = vld [vmem:[#allocation52_spill] sm:$0xff] }
 0x16a   :  { %2677 = vrcp.f32 %v1817_v35  ;;  %v951_v1 = vsel %vm6287_vm8, %v6716_v20, 0.0  ;;  %vm6718_vm3 = vcmp.eq.f32.partialorder %v6709_v23, 6.0  ;;  %v2674_v53 = vpop.eup %2673  ;;  %v1826_v7 = vmul.f32 %v2672_v61, %v4659_v19  ;;  %v6727_v61 = vld [vmem:[#allocation50_spill] sm:$0xff] }
 0x16b   :  { %v956_v11 = vsel %vm6718_vm3, %v6717_v52, %v950_v21  ;;  %vm6720_vm15 = vcmp.eq.f32.partialorder %v6714_v43, 6.0  ;;  %vm6722_vm13 = vcmp.eq.f32.partialorder %v6709_v23, 5.0  ;;  %vm1938_vm1 = vcmp.eq.f32.partialorder %v4544_v56, 0.0  ;;  %v6725_v21 = vld [vmem:[#allocation49_spill] sm:$0xff] }
 0x16c   :  { %v957_v46 = vsel %vm6720_vm15, %v6719_v62, %v951_v1  ;;  %v962_v35 = vsel %vm6722_vm13, %v6721_v18, %v956_v11  ;;  %v1827_v13 = vmul.f32 %v2674_v53, %v4698_v51  ;;  %vm6724_vm8 = vcmp.eq.f32.partialorder %v6714_v43, 5.0 }
 0x16d   :  { %v963_v41 = vsel %vm6724_vm8, %v6723_v2, %v957_v46  ;;  %vm6726_vm3 = vcmp.eq.f32.partialorder %v6709_v23, 4.0  ;;  %vm1939_vm4 = vcmp.eq.f32.partialorder %v4548_v14, 0.0  ;;  %vm6728_vm15 = vcmp.eq.f32.partialorder %v6714_v43, 4.0 }
 0x16e   :  { %v968_v19 = vsel %vm6726_vm3, %v6725_v21, %v962_v35  ;;  %v969_v1 = vsel %vm6728_vm15, %v6727_v61, %v963_v41  ;;  %vm1944_vm13 = vcmp.eq.f32.partialorder %v4544_v56, 1.0  ;;  %vm1945_vm0 = vcmp.eq.f32.partialorder %v4548_v14, 1.0 }
 0x16f   :  { %vm6322_vm5 = vcmp.eq.f32.partialorder %v4544_v56, 6.0  ;;  %v1831_v51 = vpack.c.bf16 %v1827_v13, %v1826_v7  ;;  %v973_v11 = vpack.c.bf16 %v969_v1, %v968_v19  ;;  %v1974_v46 = vsel %vm1944_vm13, %v4681_v63, %v4753_v49  ;;  %v2676_v7 = vpop.eup %2675  ;;  %v6729_v1 = vld [vmem:[#allocation3_spill] sm:$0xff] }
 0x170   :  { %v1975_v53 = vsel %vm1945_vm0, %v4690_v30, %v4758_v36  ;;  %v4956_v41 = vsel %vm1938_vm1, %v4623_v12, %v1974_v46  ;;  %vm6321_vm8 = vcmp.eq.f32.partialorder %v4548_v14, 6.0  ;;  %v2070_v13 = vsel %vm6322_vm5, %v4636_v58, 0.0 }
 0x171   :  { %v4959_v35 = vsel %vm1939_vm4, %v4625_v3, %v1975_v53  ;;  %2557 = vmatpush3.bf16.msra.mxu0 %v1831_v51  ;;  %1160 = vmatpush1.bf16.msra.mxu1 %v973_v11  ;;  %v2071_v36 = vsel %vm6321_vm8, %v4642_v55, 0.0  ;;  %v2076_v19 = vsel %vm6303_vm14, %v4634_v37, %v2070_v13  ;;  %vm6299_vm4 = vcmp.eq.f32.partialorder %v6729_v1, 7.0  ;;  %v6730_v53 = vld [vmem:[#allocation4_spill] sm:$0xff]  ;;  %v6734_v13 = vld [vmem:[#allocation14_spill] sm:$0xff] }
 0x172   :  { %v1986_v49 = vpack.c.bf16 %v4959_v35, %v4956_v41  ;;  %2558 = vmatprep.subr.bf16.mxu0 %v2059_v5  ;;  %v1828_v46 = vmul.f32 %v2676_v7, %v4494_v60  ;;  %1161 = vmatprep.subr.bf16.mxu1 %v6551_v4  ;;  %v2077_v51 = vsel %vm6292_vm9, %v4640_v26, %v2071_v36  ;;  %vm6302_vm1 = vcmp.eq.f32.partialorder %v6730_v53, 7.0  ;;  %v6733_v5 = vld [vmem:[#allocation11_spill] sm:$0xff]  ;;  %v6742_v37 = vld [vmem:[#allocation20_spill] sm:$0xff] }
 0x173   :  { %v2082_v11 = vsel %vm6291_vm12, %v4681_v63, %v2076_v19  ;;  %vm6731_vm3 = vcmp.eq.f32.partialorder %v4548_v14, 4.0  ;;  %vm6732_vm15 = vcmp.eq.f32.partialorder %v4544_v56, 3.0  ;;  %v952_v35 = vsel %vm6299_vm4, %v6733_v5, 0.0  ;;  %v6736_v19 = vld [vmem:[#allocation17_spill] sm:$0xff]  ;;  %v6740_v26 = vld [vmem:[#allocation19_spill] sm:$0xff] }
 0x174   :  { %v2083_v41 = vsel %vm6731_vm3, %v4690_v30, %v2077_v51  ;;  %v2088_v60 = vsel %vm6732_vm15, %v4623_v12, %v2082_v11  ;;  %v953_v7 = vsel %vm6302_vm1, %v6734_v13, 0.0  ;;  %vm6735_vm12 = vcmp.eq.f32.partialorder %v4548_v14, 3.0  ;;  %v6738_v30 = vld [vmem:[#allocation18_spill] sm:$0xff]  ;;  %v2678_v63 = vpop.eup %2677 }
 0x175   :  { %v2089_v36 = vsel %vm6735_vm12, %v4625_v3, %v2083_v41  ;;  %vm6737_vm9 = vcmp.eq.f32.partialorder %v6729_v1, 6.0  ;;  %vm6739_vm3 = vcmp.eq.f32.partialorder %v6730_v53, 6.0  ;;  %vm1940_vm15 = vcmp.eq.f32.partialorder %v4743_v45, 0.0 }
 0x176   :  { %v958_v51 = vsel %vm6737_vm9, %v6736_v19, %v952_v35  ;;  %v959_v11 = vsel %vm6739_vm3, %v6738_v30, %v953_v7  ;;  %v2094_v5 = vpack.c.bf16 %v2089_v36, %v2088_v60  ;;  %vm6741_vm4 = vcmp.eq.f32.partialorder %v6729_v1, 5.0  ;;  %v6744_v19 = vld [vmem:[#allocation15_spill] sm:$0xff]  ;;  %v6746_v30 = vld [vmem:[#allocation16_spill] sm:$0xff] }
 0x177   :  { %v964_v13 = vsel %vm6741_vm4, %v6740_v26, %v958_v51  ;;  %vm6743_vm1 = vcmp.eq.f32.partialorder %v6730_v53, 5.0  ;;  %vm1941_vm12 = vcmp.eq.f32.partialorder %v4745_v0, 0.0  ;;  %v1829_v35 = vmul.f32 %v2678_v63, %v4496_v44 }
 0x178   :  { %v965_v41 = vsel %vm6743_vm1, %v6742_v37, %v959_v11  ;;  %vm6745_vm9 = vcmp.eq.f32.partialorder %v6729_v1, 4.0  ;;  %vm6747_vm3 = vcmp.eq.f32.partialorder %v6730_v53, 4.0  ;;  %vm1946_vm14 = vcmp.eq.f32.partialorder %v4743_v45, 1.0 }
 0x179   :  { %v970_v7 = vsel %vm6745_vm9, %v6744_v19, %v964_v13  ;;  %v971_v60 = vsel %vm6747_vm3, %v6746_v30, %v965_v41  ;;  %vm1947_vm4 = vcmp.eq.f32.partialorder %v4745_v0, 1.0  ;;  %v1976_v51 = vsel %vm1946_vm14, %v4863_v31, %v4835_v29  ;;  %v6748_v41 = vld [vmem:[#allocation22_spill] sm:$0xff] }
 0x17a   :  { %v974_v36 = vpack.c.bf16 %v971_v60, %v970_v7  ;;  %vm6326_vm1 = vcmp.eq.f32.partialorder %v4743_v45, 6.0  ;;  %v1832_v44 = vpack.c.bf16 %v1829_v35, %v1828_v46  ;;  %v1977_v63 = vsel %vm1947_vm4, %v4866_v40, %v4848_v50  ;;  %v6749_v60 = vld [vmem:[#allocation24_spill] sm:$0xff] }
 0x17b   :  { %v1982_v13 = vsel %vm1940_vm15, %v4797_v24, %v1976_v51  ;;  %vm2067_vm9 = vcmp.eq.f32.partialorder %v4745_v0, 6.0  ;;  %v1983_v11 = vsel %vm1941_vm12, %v4799_v8, %v1977_v63  ;;  %v2072_v29 = vsel %vm6326_vm1, %v4808_v59, 0.0  ;;  %v6751_v63 = vld [vmem:[#allocation32_spill] sm:$0xff] }
 0x17c   :  { %1162 = vmatpush1.bf16.msra.mxu1 %v974_v36  ;;  %v2073_v46 = vsel %vm2067_vm9, %v4810_v32, 0.0  ;;  %vm978_vm3 = vcmp.eq.f32.partialorder %v6748_v41, 8.0  ;;  %2559 = vmatpush3.bf16.msra.mxu0 %v1832_v44  ;;  %v1987_v50 = vpack.c.bf16 %v1983_v11, %v1982_v13  ;;  %v2078_v35 = vsel %vm6315_vm10, %v4815_v39, %v2072_v29  ;;  %v6752_v11 = vld [vmem:[#allocation36_spill] sm:$0xff]  ;;  %v6760_v39 = vld [vmem:[#allocation39_spill] sm:$0xff] }
 0x17d   :  { %1163 = vmatprep.subr.bf16.mxu1 %v6551_v4  ;;  %v2079_v7 = vsel %vm6310_vm6, %v4817_v48, %v2073_v46  ;;  %vm979_vm15 = vcmp.eq.f32.partialorder %v6749_v60, 8.0  ;;  %v6750_v36 = vpack.c.bf16 %v4911_v42, %v4906_v28  ;;  %v2084_v51 = vsel %vm6304_vm7, %v4863_v31, %v2078_v35  ;;  %v6754_v46 = vld [vmem:[#allocation33_spill] sm:$0xff]  ;;  %v6758_v31 = vld [vmem:[#allocation38_spill] sm:$0xff]  ;;  %v6764_v32 = vld [vmem:[#allocation31_spill] sm:$0xff] }
 0x17e   :  { %v2085_v44 = vsel %vm6305_vm11, %v4866_v40, %v2079_v7  ;;  %v984_v13 = vsel %vm978_vm3, %v6751_v63, 0.0  ;;  %v985_v29 = vsel %vm979_vm15, %v6752_v11, 0.0  ;;  %v2090_v28 = vsel %vm1958_vm2, %v4797_v24, %v2084_v51  ;;  %v6756_v7 = vld [vmem:[#allocation37_spill] sm:$0xff] }
 0x17f   :  { %2560 = vmatprep.subr.bf16.mxu0 %v6750_v36  ;;  %vm6753_vm12 = vcmp.eq.f32.partialorder %v4745_v0, 3.0  ;;  %vm6755_vm7 = vcmp.eq.f32.partialorder %v6748_v41, 7.0  ;;  %vm6757_vm11 = vcmp.eq.f32.partialorder %v6749_v60, 7.0  ;;  %vm6759_vm6 = vcmp.eq.f32.partialorder %v6748_v41, 6.0 }
 0x180   :  { %v2091_v42 = vsel %vm6753_vm12, %v4799_v8, %v2085_v44  ;;  %v990_v35 = vsel %vm6755_vm7, %v6754_v46, %v984_v13  ;;  %v991_v36 = vsel %vm6757_vm11, %v6756_v7, %v985_v29  ;;  %vm6761_vm2 = vcmp.eq.f32.partialorder %v6749_v60, 6.0  ;;  %2561 = vmatpush3.bf16.msra.mxu0 %v1986_v49  ;;  %v6762_v44 = vld [vmem:[#allocation30_spill] sm:$0xff] }
 0x181   :  { %v2095_v40 = vpack.c.bf16 %v2091_v42, %v2090_v28  ;;  %v996_v48 = vsel %vm6759_vm6, %v6758_v31, %v990_v35  ;;  %v997_v51 = vsel %vm6761_vm2, %v6760_v39, %v991_v36  ;;  %vm1942_vm10 = vcmp.eq.f32.partialorder %v4526_v6, 0.0  ;;  %2562 = vmatprep.subr.bf16.mxu0 %v2094_v5 }
 0x182   :  { %vm6763_vm12 = vcmp.eq.f32.partialorder %v6748_v41, 5.0  ;;  %vm6765_vm7 = vcmp.eq.f32.partialorder %v6749_v60, 5.0  ;;  %vm1943_vm11 = vcmp.eq.f32.partialorder %v4532_v57, 0.0  ;;  %v1984_v28 = vsel %vm1942_vm10, %v4553_v17, %v4603_v47 }
 0x183   :  { %v1002_v13 = vsel %vm6763_vm12, %v6762_v44, %v996_v48  ;;  %v1003_v29 = vsel %vm6765_vm7, %v6764_v32, %v997_v51  ;;  %v1985_v35 = vsel %vm1943_vm11, %v4558_v16, %v4611_v22  ;;  %vm6319_vm6 = vcmp.eq.f32.partialorder %v4526_v6, 6.0 }
 0x184   :  { %v1008_v42 = vpack.c.bf16 %v1003_v29, %v1002_v13  ;;  %vm6318_vm2 = vcmp.eq.f32.partialorder %v4532_v57, 6.0  ;;  %v1988_v49 = vpack.c.bf16 %v1985_v35, %v1984_v28  ;;  %v2074_v48 = vsel %vm6319_vm6, %v4555_v10, 0.0  ;;  %2563 = vmatpush3.bf16.msra.mxu0 %v1987_v50 }
 0x185   :  { %v2075_v36 = vsel %vm6318_vm2, %v4560_v38, 0.0  ;;  %vm6328_vm10 = vcmp.eq.f32.partialorder %v6709_v23, 8.0  ;;  %vm6766_vm12 = vcmp.eq.f32.partialorder %v4526_v6, 5.0  ;;  %vm6767_vm7 = vcmp.eq.f32.partialorder %v4532_v57, 5.0  ;;  %2564 = vmatprep.subr.bf16.mxu0 %v2095_v40 }
 0x186   :  { %1164 = vmatpush1.bf16.msra.mxu1 %v1008_v42  ;;  %v2080_v47 = vsel %vm6766_vm12, %v4562_v34, %v2074_v48  ;;  %v2081_v22 = vsel %vm6767_vm7, %v4571_v27, %v2075_v36  ;;  %vm6320_vm11 = vcmp.eq.f32.partialorder %v6714_v43, 8.0  ;;  %v986_v5 = vsel %vm6328_vm10, %v6715_v9, 0.0 }
 0x187   :  { %1165 = vmatprep.subr.bf16.mxu1 %v6551_v4  ;;  %vm6768_vm2 = vcmp.eq.f32.partialorder %v4526_v6, 4.0  ;;  %vm6769_vm12 = vcmp.eq.f32.partialorder %v4532_v57, 4.0  ;;  %v987_v29 = vsel %vm6320_vm11, %v6716_v20, 0.0  ;;  %vm6770_vm7 = vcmp.eq.f32.partialorder %v6709_v23, 7.0 }
 0x188   :  { %v2086_v51 = vsel %vm6768_vm2, %v4592_v15, %v2080_v47  ;;  %v2087_v13 = vsel %vm6769_vm12, %v4598_v54, %v2081_v22  ;;  %v992_v28 = vsel %vm6770_vm7, %v6717_v52, %v986_v5  ;;  %vm6771_vm6 = vcmp.eq.f32.partialorder %v4526_v6, 3.0  ;;  %2565 = vmatpush3.bf16.msra.mxu0 %v1988_v49  ;;  %v6780_v49 = vld [vmem:[#allocation26_spill] sm:$0xff] }
 0x189   :  { %v2092_v50 = vsel %vm6771_vm6, %v4553_v17, %v2086_v51  ;;  %vm6772_vm2 = vcmp.eq.f32.partialorder %v4532_v57, 3.0  ;;  %vm6773_vm12 = vcmp.eq.f32.partialorder %v6714_v43, 7.0  ;;  %vm6774_vm11 = vcmp.eq.f32.partialorder %v6709_v23, 6.0 }
 0x18a   :  { %v2093_v42 = vsel %vm6772_vm2, %v4558_v16, %v2087_v13  ;;  %v993_v35 = vsel %vm6773_vm12, %v6719_v62, %v987_v29  ;;  %v998_v48 = vsel %vm6774_vm11, %v6721_v18, %v992_v28  ;;  %vm6775_vm7 = vcmp.eq.f32.partialorder %v6714_v43, 6.0 }
 0x18b   :  { %v2096_v36 = vpack.c.bf16 %v2093_v42, %v2092_v50  ;;  %v999_v40 = vsel %vm6775_vm7, %v6723_v2, %v993_v35  ;;  %vm6776_vm6 = vcmp.eq.f32.partialorder %v6709_v23, 5.0  ;;  %v2016_v22 = vsel %vm1944_vm13, %v4623_v12, %v4768_v33  ;;  %v6778_v50 = vld [vmem:[#allocation12_spill] sm:$0xff]  ;;  %v6779_v42 = vld [vmem:[#allocation10_spill] sm:$0xff] }
 0x18c   :  { %v1004_v47 = vsel %vm6776_vm6, %v6725_v21, %v998_v48  ;;  %vm6777_vm2 = vcmp.eq.f32.partialorder %v6714_v43, 5.0  ;;  %v2017_v51 = vsel %vm1945_vm0, %v4625_v3, %v4773_v25  ;;  %vm6341_vm11 = vcmp.eq.f32.partialorder %v4544_v56, 7.0 }
 0x18d   :  { %v1005_v5 = vsel %vm6777_vm2, %v6727_v61, %v999_v40  ;;  %vm6342_vm12 = vcmp.eq.f32.partialorder %v4548_v14, 7.0  ;;  %v2022_v29 = vpack.c.bf16 %v2017_v51, %v2016_v22  ;;  %v2106_v33 = vsel %vm6341_vm11, %v4636_v58, 0.0  ;;  %2566 = vmatprep.subr.bf16.mxu0 %v2096_v36  ;;  %v6782_v40 = vld [vmem:[#allocation28_spill] sm:$0xff] }
 0x18e   :  { %v1009_v13 = vpack.c.bf16 %v1005_v5, %v1004_v47  ;;  %v2107_v28 = vsel %vm6342_vm12, %v4642_v55, 0.0  ;;  %v2112_v25 = vsel %vm6322_vm5, %v6778_v50, %v2106_v33  ;;  %vm6334_vm0 = vcmp.eq.f32.partialorder %v6729_v1, 8.0  ;;  %v6784_v47 = vld [vmem:[#allocation11_spill] sm:$0xff]  ;;  %v6785_v5 = vld [vmem:[#allocation14_spill] sm:$0xff] }
 0x18f   :  { %v2113_v35 = vsel %vm6321_vm8, %v6779_v42, %v2107_v28  ;;  %vm6333_vm13 = vcmp.eq.f32.partialorder %v6730_v53, 8.0  ;;  %vm6781_vm7 = vcmp.eq.f32.partialorder %v4544_v56, 5.0  ;;  %vm6783_vm6 = vcmp.eq.f32.partialorder %v4548_v14, 5.0  ;;  %v6788_v28 = vld [vmem:[#allocation17_spill] sm:$0xff]  ;;  %2567 = vmatpush3.bf16.msra.mxu0 %v2022_v29 }
 0x190   :  { %1166 = vmatpush1.bf16.msra.mxu1 %v1009_v13  ;;  %v2118_v48 = vsel %vm6781_vm7, %v6780_v49, %v2112_v25  ;;  %v2119_v36 = vsel %vm6783_vm6, %v6782_v40, %v2113_v35  ;;  %v988_v22 = vsel %vm6334_vm0, %v6784_v47, 0.0  ;;  %v989_v51 = vsel %vm6333_vm13, %v6785_v5, 0.0  ;;  %v6790_v35 = vld [vmem:[#allocation18_spill] sm:$0xff] }
 0x191   :  { %1167 = vmatprep.subr.bf16.mxu1 %v6551_v4  ;;  %vm6786_vm2 = vcmp.eq.f32.partialorder %v4544_v56, 4.0  ;;  %vm6787_vm7 = vcmp.eq.f32.partialorder %v4548_v14, 4.0  ;;  %vm6789_vm6 = vcmp.eq.f32.partialorder %v6729_v1, 7.0  ;;  %vm6791_vm8 = vcmp.eq.f32.partialorder %v6730_v53, 7.0 }
 0x192   :  { %v2124_v13 = vsel %vm6786_vm2, %v4623_v12, %v2118_v48  ;;  %v2125_v33 = vsel %vm6787_vm7, %v4625_v3, %v2119_v36  ;;  %v994_v25 = vsel %vm6789_vm6, %v6788_v28, %v988_v22  ;;  %v995_v40 = vsel %vm6791_vm8, %v6790_v35, %v989_v51  ;;  %v6794_v12 = vld [vmem:[#allocation68_spill] sm:$0xff] }
 0x193   :  { %v2130_v49 = vpack.c.bf16 %v2125_v33, %v2124_v13  ;;  %vm6792_vm5 = vcmp.eq.f32.partialorder %v6729_v1, 6.0  ;;  %vm6793_vm2 = vcmp.eq.f32.partialorder %v6730_v53, 6.0  ;;  %v2018_v36 = vsel %vm1946_vm14, %v4797_v24, %v6794_v12  ;;  %v6797_v51 = vld [vmem:[#allocation48_spill] sm:$0xff] }
 0x194   :  { %v1000_v42 = vsel %vm6792_vm5, %v6740_v26, %v994_v25  ;;  %v1001_v48 = vsel %vm6793_vm2, %v6742_v37, %v995_v40  ;;  %vm6795_vm7 = vcmp.eq.f32.partialorder %v6729_v1, 5.0  ;;  %vm6796_vm8 = vcmp.eq.f32.partialorder %v6730_v53, 5.0 }
 0x195   :  { %v1006_v22 = vsel %vm6795_vm7, %v6744_v19, %v1000_v42  ;;  %v1007_v29 = vsel %vm6796_vm8, %v6746_v30, %v1001_v48  ;;  %v2019_v13 = vsel %vm1947_vm4, %v4799_v8, %v6797_v51  ;;  %vm1014_vm5 = vcmp.eq.f32.partialorder %v6748_v41, 9.0  ;;  %2568 = vmatprep.subr.bf16.mxu0 %v2130_v49 }
 0x196   :  { %v1010_v40 = vpack.c.bf16 %v1007_v29, %v1006_v22  ;;  %v2023_v33 = vpack.c.bf16 %v2019_v13, %v2018_v36  ;;  %vm1015_vm14 = vcmp.eq.f32.partialorder %v6749_v60, 9.0  ;;  %v1020_v12 = vsel %vm1014_vm5, %v6751_v63, 0.0  ;;  %v6799_v22 = vld [vmem:[#allocation29_spill] sm:$0xff] }
 0x197   :  { %v1021_v42 = vsel %vm1015_vm14, %v6752_v11, 0.0  ;;  %v1026_v25 = vsel %vm978_vm3, %v6754_v46, %v1020_v12  ;;  %vm6346_vm4 = vcmp.eq.f32.partialorder %v4743_v45, 7.0  ;;  %vm6325_vm6 = vcmp.eq.f32.partialorder %v4745_v0, 7.0 }
 0x198   :  { %1168 = vmatpush1.bf16.msra.mxu1 %v1010_v40  ;;  %2569 = vmatpush3.bf16.msra.mxu0 %v2023_v33  ;;  %v1027_v49 = vsel %vm979_vm15, %v6756_v7, %v1021_v42  ;;  %vm6798_vm2 = vcmp.eq.f32.partialorder %v6748_v41, 7.0  ;;  %v2108_v36 = vsel %vm6346_vm4, %v4808_v59, 0.0  ;;  %v2109_v29 = vsel %vm6325_vm6, %v6799_v22, 0.0  ;;  %v6802_v40 = vld [vmem:[#allocation34_spill] sm:$0xff]  ;;  %v6804_v42 = vld [vmem:[#allocation35_spill] sm:$0xff] }
 0x199   :  { %v1032_v48 = vsel %vm6798_vm2, %v6758_v31, %v1026_v25  ;;  %1169 = vmatprep.subr.bf16.mxu1 %v6551_v4  ;;  %2317 = vmatprep.subr.bf16.mxu0 %v6551_v4  ;;  %vm6800_vm7 = vcmp.eq.f32.partialorder %v6749_v60, 7.0  ;;  %vm6801_vm8 = vcmp.eq.f32.partialorder %v6748_v41, 6.0  ;;  %v2114_v33 = vsel %vm6326_vm1, %v6802_v40, %v2108_v36  ;;  %v6805_v22 = vld [vmem:[#allocation23_spill] sm:$0xff] }
 0x19a   :  { %v1033_v51 = vsel %vm6800_vm7, %v6760_v39, %v1027_v49  ;;  %v1038_v13 = vsel %vm6801_vm8, %v6762_v44, %v1032_v48  ;;  %vm6330_vm2 = vcmp.eq.f32.partialorder %v6709_v23, 9.0  ;;  %vm6803_vm6 = vcmp.eq.f32.partialorder %v6749_v60, 6.0  ;;  %v2680_v36 = vld [vmem:[%s5979_s1] ss:$16 sps:$4 sm:$0xff]  }
 0x19b   :  { %v1039_v12 = vsel %vm6803_vm6, %v6764_v32, %v1033_v51  ;;  %v2115_v25 = vsel %vm2067_vm9, %v6804_v42, %v2109_v29  ;;  %vm6806_vm7 = vcmp.eq.f32.partialorder %v4743_v45, 5.0  ;;  %vm6329_vm8 = vcmp.eq.f32.partialorder %v6714_v43, 9.0  ;;  %2309 = vmatmul.mubr.bf16.vlgmr.msra.gmra.mrb[8].mxu0 %v2680_v36  ;;  %v6807_v40 = vld [vmem:[#allocation67_spill] sm:$0xff] }
 0x19c   :  { %v2120_v49 = vsel %vm6806_vm7, %v6805_v22, %v2114_v33  ;;  %v1044_v48 = vpack.c.bf16 %v1039_v12, %v1038_v13  ;;  %vm6808_vm1 = vcmp.eq.f32.partialorder %v4745_v0, 5.0  ;;  %vm6809_vm6 = vcmp.eq.f32.partialorder %v4743_v45, 4.0 }
 0x19d   :  { %v2121_v51 = vsel %vm6808_vm1, %v6807_v40, %v2115_v25  ;;  %v2126_v29 = vsel %vm6809_vm6, %v4797_v24, %v2120_v49  ;;  %v1022_v33 = vsel %vm6330_vm2, %v6715_v9, 0.0  ;;  %vm6810_vm7 = vcmp.eq.f32.partialorder %v4745_v0, 4.0  ;;  %v5289_v49 = vld [vmem:[%s5979_s1 + $0xc] ss:$16 sps:$4 sm:$0xff]  }
 0x19e   :  { %v2127_v13 = vsel %vm6810_vm7, %v4799_v8, %v2121_v51  ;;  %v1023_v12 = vsel %vm6329_vm8, %v6716_v20, 0.0  ;;  %v1028_v25 = vsel %vm6328_vm10, %v6717_v52, %v1022_v33  ;;  %vm6332_vm1 = vcmp.eq.f32.partialorder %v4526_v6, 7.0  ;;  %6811 = vst [vmem:[#allocation79_spill] sm:$0xff] %v5289_v49  ;;  %2349 = vmatprep.mubr.bf16.mxu0 %v5289_v49  ;;  %1170 = vmatpush1.bf16.msra.mxu1 %v1044_v48 }
 0x19f   :  { %v2131_v36 = vpack.c.bf16 %v2127_v13, %v2126_v29  ;;  %vm6812_vm6 = vcmp.eq.f32.partialorder %v6714_v43, 8.0  ;;  %vm6813_vm7 = vcmp.eq.f32.partialorder %v6709_v23, 7.0  ;;  %vm6331_vm10 = vcmp.eq.f32.partialorder %v4532_v57, 7.0  ;;  %1171 = vmatprep.subr.bf16.mxu1 %v6551_v4 }
 0x1a0   :  { %v1029_v51 = vsel %vm6812_vm6, %v6719_v62, %v1023_v12  ;;  %v1034_v20 = vsel %vm6813_vm7, %v6721_v18, %v1028_v25  ;;  %vm6814_vm8 = vcmp.eq.f32.partialorder %v6714_v43, 7.0  ;;  %vm6815_vm2 = vcmp.eq.f32.partialorder %v6709_v23, 6.0 }
 0x1a1   :  { %v1035_v33 = vsel %vm6814_vm8, %v6723_v2, %v1029_v51  ;;  %v1040_v48 = vsel %vm6815_vm2, %v6725_v21, %v1034_v20  ;;  %v2110_v29 = vsel %vm6332_vm1, %v4555_v10, 0.0  ;;  %v2111_v13 = vsel %vm6331_vm10, %v4560_v38, 0.0  ;;  %2318 = vmatpush1.bf16.msra.mxu0 %v2131_v36 }
 0x1a2   :  { %vm6816_vm6 = vcmp.eq.f32.partialorder %v6714_v43, 6.0  ;;  %vm6817_vm8 = vcmp.eq.f32.partialorder %v4526_v6, 6.0  ;;  %vm6818_vm2 = vcmp.eq.f32.partialorder %v4532_v57, 6.0  ;;  %vm1018_vm7 = vcmp.eq.f32.partialorder %v6729_v1, 9.0  ;;  %2319 = vmatprep.subr.bf16.mxu0 %v6551_v4 }
 0x1a3   :  { %v1041_v12 = vsel %vm6816_vm6, %v6727_v61, %v1035_v33  ;;  %v2116_v25 = vsel %vm6817_vm8, %v4562_v34, %v2110_v29  ;;  %v2117_v20 = vsel %vm6818_vm2, %v4571_v27, %v2111_v13  ;;  %vm6819_vm10 = vcmp.eq.f32.partialorder %v4526_v6, 5.0 }
 0x1a4   :  { %v1045_v51 = vpack.c.bf16 %v1041_v12, %v1040_v48  ;;  %v2122_v36 = vsel %vm6819_vm10, %v4592_v15, %v2116_v25  ;;  %vm6820_vm6 = vcmp.eq.f32.partialorder %v4532_v57, 5.0  ;;  %vm1019_vm1 = vcmp.eq.f32.partialorder %v6730_v53, 9.0 }
 0x1a5   :  { %v2123_v33 = vsel %vm6820_vm6, %v4598_v54, %v2117_v20  ;;  %vm6821_vm8 = vcmp.eq.f32.partialorder %v4526_v6, 4.0  ;;  %vm6822_vm2 = vcmp.eq.f32.partialorder %v4532_v57, 4.0  ;;  %v1024_v48 = vsel %vm1018_vm7, %v6784_v47, 0.0 }
 0x1a6   :  { %v2128_v29 = vsel %vm6821_vm8, %v4553_v17, %v2122_v36  ;;  %v2129_v13 = vsel %vm6822_vm2, %v4558_v16, %v2123_v33  ;;  %v1025_v12 = vsel %vm1019_vm1, %v6785_v5, 0.0  ;;  %1172 = vmatpush1.bf16.msra.mxu1 %v1045_v51  ;;  %v1030_v20 = vsel %vm6334_vm0, %v6788_v28, %v1024_v48 }
 0x1a7   :  { %v2132_v25 = vpack.c.bf16 %v2129_v13, %v2128_v29  ;;  %v1031_v36 = vsel %vm6333_vm13, %v6790_v35, %v1025_v12  ;;  %vm2136_vm10 = vcmp.eq.f32.partialorder %v4544_v56, 8.0  ;;  %1173 = vmatprep.subr.bf16.mxu1 %v6551_v4  ;;  %vm6823_vm6 = vcmp.eq.f32.partialorder %v6729_v1, 7.0 }
 0x1a8   :  { %v1036_v33 = vsel %vm6823_vm6, %v6740_v26, %v1030_v20  ;;  %vm6824_vm8 = vcmp.eq.f32.partialorder %v6730_v53, 7.0  ;;  %vm2137_vm2 = vcmp.eq.f32.partialorder %v4548_v14, 8.0  ;;  %v2142_v29 = vsel %vm2136_vm10, %v4636_v58, 0.0 }
 0x1a9   :  { %v1037_v51 = vsel %vm6824_vm8, %v6742_v37, %v1031_v36  ;;  %2320 = vmatpush1.bf16.msra.mxu0 %v2132_v25  ;;  %vm6825_vm13 = vcmp.eq.f32.partialorder %v6729_v1, 6.0  ;;  %vm6826_vm0 = vcmp.eq.f32.partialorder %v6730_v53, 6.0  ;;  %v2143_v12 = vsel %vm2137_vm2, %v4642_v55, 0.0  ;;  %v6827_v25 = vld [vmem:[#allocation10_spill] sm:$0xff]  ;;  %v6832_v55 = vld [vmem:[#allocation47_spill] sm:$0xff] }
 0x1aa   :  { %v1042_v13 = vsel %vm6825_vm13, %v6744_v19, %v1036_v33  ;;  %v1043_v48 = vsel %vm6826_vm0, %v6746_v30, %v1037_v51  ;;  %v2148_v20 = vsel %vm6341_vm11, %v6778_v50, %v2142_v29  ;;  %2321 = vmatprep.subr.bf16.mxu0 %v6551_v4  ;;  %v2149_v49 = vsel %vm6342_vm12, %v6827_v25, %v2143_v12  ;;  %v6828_v33 = vld [vmem:[#allocation26_spill] sm:$0xff]  ;;  %v6830_v51 = vld [vmem:[#allocation28_spill] sm:$0xff] }
 0x1ab   :  { %v1046_v36 = vpack.c.bf16 %v1043_v48, %v1042_v13  ;;  %vm6829_vm13 = vcmp.eq.f32.partialorder %v4544_v56, 6.0  ;;  %vm1050_vm0 = vcmp.eq.f32.partialorder %v6748_v41, 10.0  ;;  %vm6831_vm6 = vcmp.eq.f32.partialorder %v4548_v14, 6.0 }
 0x1ac   :  { %v2154_v58 = vsel %vm6829_vm13, %v6828_v33, %v2148_v20  ;;  %v2155_v30 = vsel %vm6831_vm6, %v6830_v51, %v2149_v49  ;;  %vm6833_vm8 = vcmp.eq.f32.partialorder %v4544_v56, 5.0  ;;  %vm1051_vm11 = vcmp.eq.f32.partialorder %v6749_v60, 10.0  ;;  %v5396_v49 = vpop.f32.mrb[0].mxu1 }
 0x1ad   :  { %v2160_v29 = vsel %vm6833_vm8, %v6832_v55, %v2154_v58  ;;  %v1056_v13 = vsel %vm1050_vm0, %v6751_v63, 0.0  ;;  %1174 = vmatpush1.bf16.msra.mxu1 %v1046_v36  ;;  %vm6834_vm12 = vcmp.eq.f32.partialorder %v4548_v14, 5.0  ;;  %v1057_v12 = vsel %vm1051_vm11, %v6752_v11, 0.0  ;;  %6835 = vst [vmem:[#allocation80_spill] sm:$0xff] %v5396_v49  ;;  %v5406_v11 = vpop.f32.mrb[1].mxu1  ;;  %v6919_v49 = vld [vmem:[#allocation71_spill] sm:$0xff] }
 0x1ae   :  { %v2161_v48 = vsel %vm6834_vm12, %v4625_v3, %v2155_v30  ;;  %v1062_v20 = vsel %vm1014_vm5, %v6754_v46, %v1056_v13  ;;  %vm2138_vm13 = vcmp.eq.f32.partialorder %v4743_v45, 8.0  ;;  %1175 = vmatprep.subr.bf16.mxu1 %v6551_v4  ;;  %v1063_v63 = vsel %vm1015_vm14, %v6756_v7, %v1057_v12  ;;  %6836 = vst [vmem:[#allocation6_spill] sm:$0xff] %v5406_v11  ;;  %v5420_v13 = vpop.f32.mrb[2].mxu1  ;;  %v6842_v12 = vld [vmem:[#allocation34_spill] sm:$0xff]  ;;  %v6917_v11 = vld [vmem:[#allocation73_spill] sm:$0xff] }
 0x1af   :  { %v2166_v58 = vpack.c.bf16 %v2161_v48, %v2160_v29  ;;  %v1068_v30 = vsel %vm978_vm3, %v6758_v31, %v1062_v20  ;;  %vm2139_vm11 = vcmp.eq.f32.partialorder %v4745_v0, 8.0  ;;  %v1069_v46 = vsel %vm979_vm15, %v6760_v39, %v1063_v63  ;;  %v6838_v29 = vld [vmem:[#allocation29_spill] sm:$0xff]  ;;  %6839 = vst [vmem:[#allocation7_spill] sm:$0xff] %v5420_v13  ;;  %v5422_v48 = vpop.f32.mrb[0].mxu0  ;;  %v5434_v20 = vpop.f32.mrb[3].mxu1 }
 0x1b0   :  { %vm6837_vm12 = vcmp.eq.f32.partialorder %v6748_v41, 7.0  ;;  %v2144_v7 = vsel %vm2138_vm13, %v4808_v59, 0.0  ;;  %v2145_v31 = vsel %vm2139_vm11, %v6838_v29, 0.0  ;;  %6840 = vst [vmem:[#allocation8_spill] sm:$0xff] %v5422_v48  ;;  %vm6841_vm3 = vcmp.eq.f32.partialorder %v6749_v60, 7.0  ;;  %6844 = vst [vmem:[#allocation9_spill] sm:$0xff] %v5434_v20 }
 0x1b1   :  { %v1074_v36 = vsel %vm6837_vm12, %v6762_v44, %v1068_v30  ;;  %2322 = vmatpush1.bf16.msra.mxu0 %v2166_v58  ;;  %v1075_v39 = vsel %vm6841_vm3, %v6764_v32, %v1069_v46  ;;  %v2150_v41 = vsel %vm6346_vm4, %v6842_v12, %v2144_v7  ;;  %vm6843_vm15 = vcmp.eq.f32.partialorder %v4745_v0, 7.0  ;;  %v5436_v63 = vpop.f32.mrb[1].mxu0  ;;  %v6911_v48 = vld [vmem:[#allocation43_spill] sm:$0xff]  ;;  %v6914_v13 = vld [vmem:[#allocation13_spill] sm:$0xff] }
 0x1b2   :  { %v2151_v44 = vsel %vm6843_vm15, %v6804_v42, %v2145_v31  ;;  %vm1052_vm5 = vcmp.eq.f32.partialorder %v6709_v23, 10.0  ;;  %6845 = vst [vmem:[#allocation90_spill] sm:$0xff] %v5436_v63  ;;  %2323 = vmatprep.subr.bf16.mxu0 %v6551_v4  ;;  %v1080_v58 = vpack.c.bf16 %v1075_v39, %v1074_v36  ;;  %vm6846_vm14 = vcmp.eq.f32.partialorder %v4743_v45, 6.0  ;;  %v5446_v30 = vpop.f32.mrb[2].mxu0  ;;  %v6850_v31 = vld [vmem:[#allocation55_spill] sm:$0xff] }
 0x1b3   :  { %v2156_v32 = vsel %vm6846_vm14, %v6805_v22, %v2150_v41  ;;  %v2157_v60 = vsel %vm2067_vm9, %v6807_v40, %v2151_v44  ;;  %vm1053_vm0 = vcmp.eq.f32.partialorder %v6714_v43, 10.0  ;;  %6847 = vst [vmem:[#allocation91_spill] sm:$0xff] %v5446_v30  ;;  %vm6848_vm6 = vcmp.eq.f32.partialorder %v4743_v45, 5.0  ;;  %v5456_v41 = vpop.f32.mrb[3].mxu0 }
 0x1b4   :  { %v2162_v46 = vsel %vm6848_vm6, %v4797_v24, %v2156_v32  ;;  %vm6849_vm8 = vcmp.eq.f32.partialorder %v4745_v0, 5.0  ;;  %v1058_v7 = vsel %vm1052_vm5, %v6715_v9, 0.0  ;;  %v1059_v39 = vsel %vm1053_vm0, %v6850_v31, 0.0  ;;  %6851 = vst [vmem:[#allocation25_spill] sm:$0xff] %v5456_v41  ;;  %1176 = vmatpush1.bf16.msra.mxu1 %v1080_v58 }
 0x1b5   :  { %v2163_v36 = vsel %vm6849_vm8, %v4799_v8, %v2157_v60  ;;  %vm6852_vm12 = vcmp.eq.f32.partialorder %v6709_v23, 9.0  ;;  %vm6853_vm3 = vcmp.eq.f32.partialorder %v6714_v43, 9.0  ;;  %vm6348_vm15 = vcmp.eq.f32.partialorder %v4526_v6, 8.0  ;;  %1177 = vmatprep.subr.bf16.mxu1 %v6551_v4 }
 0x1b6   :  { %v2167_v44 = vpack.c.bf16 %v2163_v36, %v2162_v46  ;;  %v1064_v30 = vsel %vm6852_vm12, %v6717_v52, %v1058_v7  ;;  %v1065_v32 = vsel %vm6853_vm3, %v6719_v62, %v1059_v39  ;;  %vm6854_vm5 = vcmp.eq.f32.partialorder %v6709_v23, 8.0 }
 0x1b7   :  { %v1070_v9 = vsel %vm6854_vm5, %v6721_v18, %v1064_v30  ;;  %vm6855_vm14 = vcmp.eq.f32.partialorder %v6714_v43, 8.0  ;;  %vm6349_vm0 = vcmp.eq.f32.partialorder %v4532_v57, 8.0  ;;  %v2146_v52 = vsel %vm6348_vm15, %v4555_v10, 0.0 }
 0x1b8   :  { %v1071_v58 = vsel %vm6855_vm14, %v6723_v2, %v1065_v32  ;;  %2324 = vmatpush1.bf16.msra.mxu0 %v2167_v44  ;;  %vm6856_vm6 = vcmp.eq.f32.partialorder %v6709_v23, 7.0  ;;  %vm6857_vm8 = vcmp.eq.f32.partialorder %v6714_v43, 7.0  ;;  %v2147_v18 = vsel %vm6349_vm0, %v4560_v38, 0.0  ;;  %v6867_v32 = vld [vmem:[#allocation5_spill] sm:$0xff] }
 0x1b9   :  { %v1076_v62 = vsel %vm6856_vm6, %v6725_v21, %v1070_v9  ;;  %v1077_v60 = vsel %vm6857_vm8, %v6727_v61, %v1071_v58  ;;  %vm6858_vm12 = vcmp.eq.f32.partialorder %v4526_v6, 7.0  ;;  %2325 = vmatprep.subr.bf16.mxu0 %v6551_v4  ;;  %vm6859_vm3 = vcmp.eq.f32.partialorder %v4532_v57, 7.0  ;;  %v6868_v58 = vld [vmem:[#allocation21_spill] sm:$0xff] }
 0x1ba   :  { %v2152_v2 = vsel %vm6858_vm12, %v4562_v34, %v2146_v52  ;;  %v1081_v30 = vpack.c.bf16 %v1077_v60, %v1076_v62  ;;  %v2153_v23 = vsel %vm6859_vm3, %v4571_v27, %v2147_v18  ;;  %vm6860_vm5 = vcmp.eq.f32.partialorder %v4526_v6, 6.0  ;;  %v6874_v18 = vld [vmem:[#allocation78_spill] sm:$0xff] }
 0x1bb   :  { %v2158_v43 = vsel %vm6860_vm5, %v4592_v15, %v2152_v2  ;;  %vm1054_vm14 = vcmp.eq.f32.partialorder %v6729_v1, 10.0  ;;  %vm6861_vm6 = vcmp.eq.f32.partialorder %v4532_v57, 6.0  ;;  %vm6862_vm8 = vcmp.eq.f32.partialorder %v4526_v6, 5.0 }
 0x1bc   :  { %v2159_v21 = vsel %vm6861_vm6, %v4598_v54, %v2153_v23  ;;  %v2164_v61 = vsel %vm6862_vm8, %v4553_v17, %v2158_v43  ;;  %vm1055_vm12 = vcmp.eq.f32.partialorder %v6730_v53, 10.0  ;;  %v1060_v46 = vsel %vm1054_vm14, %v6784_v47, 0.0  ;;  %1178 = vmatpush1.bf16.msra.mxu1 %v1081_v30  ;;  %v6877_v23 = vld [vmem:[#allocation84_spill] sm:$0xff] }
 0x1bd   :  { %vm6863_vm3 = vcmp.eq.f32.partialorder %v4532_v57, 5.0  ;;  %v1061_v7 = vsel %vm1055_vm12, %v6785_v5, 0.0  ;;  %v1066_v31 = vsel %vm1018_vm7, %v6788_v28, %v1060_v46  ;;  %vm2172_vm5 = vcmp.eq.f32.partialorder %v4544_v56, 9.0  ;;  %1179 = vmatprep.subr.bf16.mxu1 %v6551_v4 }
 0x1be   :  { %v2165_v36 = vsel %vm6863_vm3, %v4558_v16, %v2159_v21  ;;  %v1067_v47 = vsel %vm1019_vm1, %v6790_v35, %v1061_v7  ;;  %vm6864_vm14 = vcmp.eq.f32.partialorder %v6729_v1, 8.0  ;;  %vm2173_vm6 = vcmp.eq.f32.partialorder %v4548_v14, 9.0  ;;  %v6878_v21 = vld [vmem:[#allocation85_spill] sm:$0xff] }
 0x1bf   :  { %v2168_v39 = vpack.c.bf16 %v2165_v36, %v2164_v61  ;;  %v1072_v44 = vsel %vm6864_vm14, %v6740_v26, %v1066_v31  ;;  %vm6865_vm8 = vcmp.eq.f32.partialorder %v6730_v53, 8.0  ;;  %vm6866_vm7 = vcmp.eq.f32.partialorder %v6729_v1, 7.0  ;;  %v6869_v26 = vld [vmem:[#allocation16_spill] sm:$0xff]  ;;  %v6879_v36 = vld [vmem:[#allocation86_spill] sm:$0xff]  ;;  %v6881_v31 = vld [vmem:[#allocation87_spill] sm:$0xff] }
 0x1c0   :  { %v1073_v5 = vsel %vm6865_vm8, %v6742_v37, %v1067_v47  ;;  %v1078_v28 = vsel %vm6866_vm7, %v6744_v19, %v1072_v44  ;;  %v2178_v9 = vsel %vm2172_vm5, %v6867_v32, 0.0  ;;  %v2179_v35 = vsel %vm2173_vm6, %v6868_v58, 0.0  ;;  %v6871_v19 = vld [vmem:[#allocation77_spill] sm:$0xff]  ;;  %v6883_v47 = vld [vmem:[#allocation88_spill] sm:$0xff] }
 0x1c1   :  { %2326 = vmatpush1.bf16.msra.mxu0 %v2168_v39  ;;  %vm6870_vm1 = vcmp.eq.f32.partialorder %v6730_v53, 7.0  ;;  %v2184_v37 = vsel %vm2136_vm10, %v6778_v50, %v2178_v9  ;;  %v2185_v1 = vsel %vm2137_vm2, %v6827_v25, %v2179_v35  ;;  %vm6344_vm12 = vcmp.eq.f32.partialorder %v6871_v19, 7.0  ;;  %v6887_v35 = vld [vmem:[#allocation81_spill] sm:$0xff] }
 0x1c2   :  { %v1079_v52 = vsel %vm6870_vm1, %v6869_v26, %v1073_v5  ;;  %2327 = vmatprep.subr.bf16.mxu0 %v6551_v4  ;;  %vm6872_vm3 = vcmp.eq.f32.partialorder %v4544_v56, 7.0  ;;  %vm6873_vm14 = vcmp.eq.f32.partialorder %v4548_v14, 7.0  ;;  %vm6343_vm8 = vcmp.eq.f32.partialorder %v6874_v18, 7.0  ;;  %v6885_v5 = vld [vmem:[#allocation89_spill] sm:$0xff] }
 0x1c3   :  { %v1082_v62 = vpack.c.bf16 %v1079_v52, %v1078_v28  ;;  %v2190_v60 = vsel %vm6872_vm3, %v6828_v33, %v2184_v37  ;;  %v2191_v53 = vsel %vm6873_vm14, %v6830_v51, %v2185_v1  ;;  %vm6875_vm7 = vcmp.eq.f32.partialorder %v4544_v56, 6.0  ;;  %v6889_v52 = vld [vmem:[#allocation82_spill] sm:$0xff] }
 0x1c4   :  { %v2196_v2 = vsel %vm6875_vm7, %v6832_v55, %v2190_v60  ;;  %vm6876_vm1 = vcmp.eq.f32.partialorder %v4548_v14, 6.0  ;;  %v1529_v43 = vsel %vm6344_vm12, %v6877_v23, 0.0  ;;  %v1530_v61 = vsel %vm6343_vm8, %v6878_v21, 0.0  ;;  %v6891_v60 = vld [vmem:[#allocation27_spill] sm:$0xff] }
 0x1c5   :  { %v2197_v30 = vsel %vm6876_vm1, %v4625_v3, %v2191_v53  ;;  %1180 = vmatpush1.bf16.msra.mxu1 %v1082_v62  ;;  %vm6880_vm3 = vcmp.eq.f32.partialorder %v6871_v19, 6.0  ;;  %vm6882_vm14 = vcmp.eq.f32.partialorder %v6874_v18, 6.0  ;;  %vm2174_vm7 = vcmp.eq.f32.partialorder %v4743_v45, 9.0 }
 0x1c6   :  { %v2202_v46 = vpack.c.bf16 %v2197_v30, %v2196_v2  ;;  %v1535_v7 = vsel %vm6880_vm3, %v6879_v36, %v1529_v43  ;;  %v1536_v39 = vsel %vm6882_vm14, %v6881_v31, %v1530_v61  ;;  %1738 = vmatprep.subr.bf16.mxu1 %v6551_v4  ;;  %vm6884_vm1 = vcmp.eq.f32.partialorder %v6871_v19, 5.0  ;;  %v6892_v43 = vld [vmem:[#allocation40_spill] sm:$0xff] }
 0x1c7   :  { %v1541_v44 = vsel %vm6884_vm1, %v6883_v47, %v1535_v7  ;;  %vm6886_vm8 = vcmp.eq.f32.partialorder %v6874_v18, 5.0  ;;  %vm2175_vm12 = vcmp.eq.f32.partialorder %v4745_v0, 9.0  ;;  %v2180_v9 = vsel %vm2174_vm7, %v4808_v59, 0.0  ;;  %v6895_v7 = vld [vmem:[#allocation41_spill] sm:$0xff] }
 0x1c8   :  { %v1542_v28 = vsel %vm6886_vm8, %v6885_v5, %v1536_v39  ;;  %2328 = vmatpush1.bf16.msra.mxu0 %v2202_v46  ;;  %vm6888_vm3 = vcmp.eq.f32.partialorder %v6871_v19, 4.0  ;;  %vm6890_vm14 = vcmp.eq.f32.partialorder %v6874_v18, 4.0  ;;  %v2181_v1 = vsel %vm2175_vm12, %v6838_v29, 0.0  ;;  %1192 = vmatmul.mubr.bf16.vlgmr.msra.gmra.mrb[8].mxu1 %v6891_v60  ;;  %v6896_v39 = vld [vmem:[#allocation60_spill] sm:$0xff] }
 0x1c9   :  { %v1547_v26 = vsel %vm6888_vm3, %v6887_v35, %v1541_v44  ;;  %v1548_v37 = vsel %vm6890_vm14, %v6889_v52, %v1542_v28  ;;  %v2186_v62 = vsel %vm2138_vm13, %v6842_v12, %v2180_v9  ;;  %2329 = vmatprep.subr.bf16.mxu0 %v6551_v4  ;;  %v2187_v2 = vsel %vm2139_vm11, %v6804_v42, %v2181_v1  ;;  %v6897_v28 = vld [vmem:[#allocation79_spill] sm:$0xff] }
 0x1ca   :  { %v1552_v53 = vpack.c.bf16 %v1548_v37, %v1547_v26  ;;  %v2192_v30 = vsel %vm6346_vm4, %v6805_v22, %v2186_v62  ;;  %vm6345_vm8 = vcmp.eq.f32.partialorder %v6892_v43, 7.0  ;;  %vm6893_vm1 = vcmp.eq.f32.partialorder %v4745_v0, 7.0  ;;  %1770 = vmatprep.mubr.bf16.mxu1 %v6897_v28  ;;  %v6898_v26 = vld [vmem:[#allocation62_spill] sm:$0xff]  ;;  %v6899_v1 = vld [vmem:[#allocation63_spill] sm:$0xff] }
 0x1cb   :  { %v2193_v61 = vsel %vm6893_vm1, %v6807_v40, %v2187_v2  ;;  %vm6894_vm3 = vcmp.eq.f32.partialorder %v4743_v45, 6.0  ;;  %vm6347_vm14 = vcmp.eq.f32.partialorder %v6895_v7, 7.0  ;;  %v1531_v44 = vsel %vm6345_vm8, %v6896_v39, 0.0  ;;  %v6901_v2 = vld [vmem:[#allocation64_spill] sm:$0xff]  ;;  %v6905_v28 = vld [vmem:[#allocation66_spill] sm:$0xff] }
 0x1cc   :  { %v2198_v46 = vsel %vm6894_vm3, %v4797_v24, %v2192_v30  ;;  %1739 = vmatpush1.bf16.msra.mxu1 %v1552_v53  ;;  %v2199_v9 = vsel %vm2067_vm9, %v4799_v8, %v2193_v61  ;;  %v1532_v37 = vsel %vm6347_vm14, %v6898_v26, 0.0  ;;  %vm6900_vm1 = vcmp.eq.f32.partialorder %v6892_v43, 6.0  ;;  %v6903_v30 = vld [vmem:[#allocation65_spill] sm:$0xff] }
 0x1cd   :  { %v1537_v62 = vsel %vm6900_vm1, %v6899_v1, %v1531_v44  ;;  %vm2176_vm3 = vcmp.eq.f32.partialorder %v4526_v6, 9.0  ;;  %v2203_v60 = vpack.c.bf16 %v2199_v9, %v2198_v46  ;;  %1740 = vmatprep.subr.bf16.mxu1 %v6551_v4  ;;  %vm6902_vm8 = vcmp.eq.f32.partialorder %v6895_v7, 6.0  ;;  %v6907_v44 = vld [vmem:[#allocation59_spill] sm:$0xff] }
 0x1ce   :  { %v1538_v53 = vsel %vm6902_vm8, %v6901_v2, %v1532_v37  ;;  %vm6904_vm9 = vcmp.eq.f32.partialorder %v6892_v43, 5.0  ;;  %vm2177_vm4 = vcmp.eq.f32.partialorder %v4532_v57, 9.0  ;;  %vm6906_vm14 = vcmp.eq.f32.partialorder %v6895_v7, 5.0 }
 0x1cf   :  { %v1543_v61 = vsel %vm6904_vm9, %v6903_v30, %v1537_v62  ;;  %v1544_v41 = vsel %vm6906_vm14, %v6905_v28, %v1538_v53  ;;  %vm6908_vm1 = vcmp.eq.f32.partialorder %v6892_v43, 4.0  ;;  %v2182_v9 = vsel %vm2176_vm3, %v4555_v10, 0.0  ;;  %2330 = vmatpush1.bf16.msra.mxu0 %v2203_v60  ;;  %v6909_v62 = vld [vmem:[#allocation61_spill] sm:$0xff] }
 0x1d0   :  { %v1549_v46 = vsel %vm6908_vm1, %v6907_v44, %v1543_v61  ;;  %v2183_v37 = vsel %vm2177_vm4, %v4560_v38, 0.0  ;;  %vm6910_vm8 = vcmp.eq.f32.partialorder %v6895_v7, 4.0  ;;  %v2188_v53 = vsel %vm6348_vm15, %v4562_v34, %v2182_v9  ;;  %2331 = vmatprep.subr.bf16.mxu0 %v6551_v4 }
 0x1d1   :  { %v1550_v63 = vsel %vm6910_vm8, %v6909_v62, %v1544_v41  ;;  %v2189_v61 = vsel %vm6349_vm0, %v4571_v27, %v2183_v37  ;;  %vm6354_vm14 = vcmp.eq.f32.partialorder %v6911_v48, 8.0  ;;  %vm6912_vm9 = vcmp.eq.f32.partialorder %v4526_v6, 7.0 }
 0x1d2   :  { %v1553_v20 = vpack.c.bf16 %v1550_v63, %v1549_v46  ;;  %v2194_v60 = vsel %vm6912_vm9, %v4592_v15, %v2188_v53  ;;  %vm6913_vm1 = vcmp.eq.f32.partialorder %v4532_v57, 7.0  ;;  %vm6353_vm8 = vcmp.eq.f32.partialorder %v6914_v13, 8.0  ;;  %v6918_v46 = vld [vmem:[#allocation74_spill] sm:$0xff]  ;;  %v6921_v15 = vld [vmem:[#allocation72_spill] sm:$0xff] }
 0x1d3   :  { %v2195_v41 = vsel %vm6913_vm1, %v4598_v54, %v2189_v61  ;;  %vm6915_vm15 = vcmp.eq.f32.partialorder %v4526_v6, 6.0  ;;  %vm6916_vm0 = vcmp.eq.f32.partialorder %v4532_v57, 6.0  ;;  %v1563_v63 = vsel %vm6354_vm14, %v6917_v11, 0.0  ;;  %v6925_v11 = vld [vmem:[#allocation76_spill] sm:$0xff] }
 0x1d4   :  { %v2200_v9 = vsel %vm6915_vm15, %v4553_v17, %v2194_v60  ;;  %v2201_v37 = vsel %vm6916_vm0, %v4558_v16, %v2195_v41  ;;  %v1564_v53 = vsel %vm6353_vm8, %v6918_v46, 0.0  ;;  %1741 = vmatpush1.bf16.msra.mxu1 %v1553_v20  ;;  %vm6920_vm9 = vcmp.eq.f32.partialorder %v6911_v48, 7.0  ;;  %v6923_v41 = vld [vmem:[#allocation75_spill] sm:$0xff] }
 0x1d5   :  { %v2204_v61 = vpack.c.bf16 %v2201_v37, %v2200_v9  ;;  %v1569_v54 = vsel %vm6920_vm9, %v6919_v49, %v1563_v63  ;;  %vm6922_vm15 = vcmp.eq.f32.partialorder %v6914_v13, 7.0  ;;  %vm2208_vm0 = vcmp.eq.f32.partialorder %v4544_v56, 10.0  ;;  %1742 = vmatprep.subr.bf16.mxu1 %v6551_v4  ;;  %v6927_v37 = vld [vmem:[#allocation69_spill] sm:$0xff] }
 0x1d6   :  { %v1570_v60 = vsel %vm6922_vm15, %v6921_v15, %v1564_v53  ;;  %vm6924_vm1 = vcmp.eq.f32.partialorder %v6911_v48, 6.0  ;;  %vm6926_vm8 = vcmp.eq.f32.partialorder %v6914_v13, 6.0  ;;  %vm2209_vm14 = vcmp.eq.f32.partialorder %v4548_v14, 10.0  ;;  %v6929_v53 = vld [vmem:[#allocation70_spill] sm:$0xff] }
 0x1d7   :  { %v1575_v16 = vsel %vm6924_vm1, %v6923_v41, %v1569_v54  ;;  %v1576_v20 = vsel %vm6926_vm8, %v6925_v11, %v1570_v60  ;;  %v2214_v9 = vsel %vm2208_vm0, %v6867_v32, 0.0  ;;  %2332 = vmatpush1.bf16.msra.mxu0 %v2204_v61  ;;  %vm6928_vm9 = vcmp.eq.f32.partialorder %v6911_v48, 5.0 }
 0x1d8   :  { %v1581_v63 = vsel %vm6928_vm9, %v6927_v37, %v1575_v16  ;;  %vm6930_vm15 = vcmp.eq.f32.partialorder %v6914_v13, 5.0  ;;  %v2215_v49 = vsel %vm2209_vm14, %v6868_v58, 0.0  ;;  %v2220_v54 = vsel %vm2172_vm5, %v6778_v50, %v2214_v9  ;;  %2333 = vmatprep.subr.bf16.mxu0 %v6551_v4 }
 0x1d9   :  { %v1582_v15 = vsel %vm6930_vm15, %v6929_v53, %v1576_v20  ;;  %v2221_v32 = vsel %vm2173_vm6, %v6827_v25, %v2215_v49  ;;  %v2226_v16 = vsel %vm2136_vm10, %v6828_v33, %v2220_v54  ;;  %vm1559_vm8 = vcmp.eq.f32.partialorder %v6871_v19, 8.0 }
 0x1da   :  { %v1587_v60 = vpack.c.bf16 %v1582_v15, %v1581_v63  ;;  %v2227_v58 = vsel %vm2137_vm2, %v6830_v51, %v2221_v32  ;;  %vm6931_vm5 = vcmp.eq.f32.partialorder %v4544_v56, 7.0  ;;  %vm1560_vm14 = vcmp.eq.f32.partialorder %v6874_v18, 8.0 }
 0x1db   :  { %v2232_v50 = vsel %vm6931_vm5, %v6832_v55, %v2226_v16  ;;  %v1565_v15 = vsel %vm1559_vm8, %v6877_v23, 0.0  ;;  %vm6932_vm10 = vcmp.eq.f32.partialorder %v4548_v14, 7.0  ;;  %v1566_v33 = vsel %vm1560_vm14, %v6878_v21, 0.0 }
 0x1dc   :  { %1743 = vmatpush1.bf16.msra.mxu1 %v1587_v60  ;;  %v2233_v25 = vsel %vm6932_vm10, %v4625_v3, %v2227_v58  ;;  %vm6933_vm2 = vcmp.eq.f32.partialorder %v6871_v19, 7.0  ;;  %vm2210_vm6 = vcmp.eq.f32.partialorder %v4743_v45, 10.0  ;;  %vm6934_vm0 = vcmp.eq.f32.partialorder %v6874_v18, 7.0 }
 0x1dd   :  { %v1571_v56 = vsel %vm6933_vm2, %v6879_v36, %v1565_v15  ;;  %v2238_v55 = vpack.c.bf16 %v2233_v25, %v2232_v50  ;;  %1744 = vmatprep.subr.bf16.mxu1 %v6551_v4  ;;  %v1572_v51 = vsel %vm6934_vm0, %v6881_v31, %v1566_v33  ;;  %vm6935_vm1 = vcmp.eq.f32.partialorder %v6871_v19, 6.0 }
 0x1de   :  { %v1577_v3 = vsel %vm6935_vm1, %v6883_v47, %v1571_v56  ;;  %vm2211_vm9 = vcmp.eq.f32.partialorder %v4745_v0, 10.0  ;;  %vm6936_vm15 = vcmp.eq.f32.partialorder %v6874_v18, 6.0  ;;  %vm6937_vm5 = vcmp.eq.f32.partialorder %v6871_v19, 5.0  ;;  %v6947_v56 = vld [vmem:[#allocation56_spill] sm:$0xff] }
 0x1df   :  { %v1578_v14 = vsel %vm6936_vm15, %v6885_v5, %v1572_v51  ;;  %v1583_v49 = vsel %vm6937_vm5, %v6887_v35, %v1577_v3  ;;  %v2216_v61 = vsel %vm2210_vm6, %v4808_v59, 0.0  ;;  %v2217_v20 = vsel %vm2211_vm9, %v6838_v29, 0.0  ;;  %2334 = vmatpush1.bf16.msra.mxu0 %v2238_v55  ;;  %v6949_v51 = vld [vmem:[#allocation46_spill] sm:$0xff]  ;;  %v6952_v3 = vld [vmem:[#allocation73_spill] sm:$0xff] }
 0x1e0   :  { %vm6938_vm10 = vcmp.eq.f32.partialorder %v6874_v18, 5.0  ;;  %v2222_v63 = vsel %vm2174_vm7, %v6842_v12, %v2216_v61  ;;  %v2223_v54 = vsel %vm2175_vm12, %v6804_v42, %v2217_v20  ;;  %vm1561_vm2 = vcmp.eq.f32.partialorder %v6892_v43, 8.0  ;;  %2335 = vmatprep.subr.bf16.mxu0 %v6551_v4  ;;  %v6955_v20 = vld [vmem:[#allocation71_spill] sm:$0xff] }
 0x1e1   :  { %v1584_v9 = vsel %vm6938_vm10, %v6889_v52, %v1578_v14  ;;  %v2228_v29 = vsel %vm2138_vm13, %v6805_v22, %v2222_v63  ;;  %v2229_v60 = vsel %vm2139_vm11, %v6807_v40, %v2223_v54  ;;  %vm1562_vm6 = vcmp.eq.f32.partialorder %v6895_v7, 8.0  ;;  %v6953_v14 = vld [vmem:[#allocation53_spill] sm:$0xff] }
 0x1e2   :  { %v1588_v59 = vpack.c.bf16 %v1584_v9, %v1583_v49  ;;  %vm6939_vm7 = vcmp.eq.f32.partialorder %v4743_v45, 7.0  ;;  %vm6940_vm12 = vcmp.eq.f32.partialorder %v4745_v0, 7.0  ;;  %v1567_v32 = vsel %vm1561_vm2, %v6896_v39, 0.0  ;;  %v6957_v9 = vld [vmem:[#allocation72_spill] sm:$0xff] }
 0x1e3   :  { %v2234_v12 = vsel %vm6939_vm7, %v4797_v24, %v2228_v29  ;;  %v2235_v42 = vsel %vm6940_vm12, %v4799_v8, %v2229_v60  ;;  %v1568_v22 = vsel %vm1562_vm6, %v6898_v26, 0.0  ;;  %vm6941_vm13 = vcmp.eq.f32.partialorder %v6892_v43, 7.0 }
 0x1e4   :  { %1745 = vmatpush1.bf16.msra.mxu1 %v1588_v59  ;;  %v2239_v40 = vpack.c.bf16 %v2235_v42, %v2234_v12  ;;  %v1573_v16 = vsel %vm6941_vm13, %v6899_v1, %v1567_v32  ;;  %vm6942_vm11 = vcmp.eq.f32.partialorder %v6895_v7, 7.0  ;;  %vm2212_vm0 = vcmp.eq.f32.partialorder %v4526_v6, 10.0 }
 0x1e5   :  { %v1574_v45 = vsel %vm6942_vm11, %v6901_v2, %v1568_v22  ;;  %1746 = vmatprep.subr.bf16.mxu1 %v6551_v4  ;;  %vm6943_vm1 = vcmp.eq.f32.partialorder %v6892_v43, 6.0  ;;  %vm6944_vm9 = vcmp.eq.f32.partialorder %v6895_v7, 6.0  ;;  %vm2213_vm15 = vcmp.eq.f32.partialorder %v4532_v57, 10.0 }
 0x1e6   :  { %v1579_v0 = vsel %vm6943_vm1, %v6903_v30, %v1573_v16  ;;  %v1580_v24 = vsel %vm6944_vm9, %v6905_v28, %v1574_v45  ;;  %v2218_v8 = vsel %vm2212_vm0, %v4555_v10, 0.0  ;;  %2336 = vmatpush1.bf16.msra.mxu0 %v2239_v40  ;;  %vm6945_vm5 = vcmp.eq.f32.partialorder %v6892_v43, 5.0 }
 0x1e7   :  { %v1585_v58 = vsel %vm6945_vm5, %v6907_v44, %v1579_v0  ;;  %vm6946_vm10 = vcmp.eq.f32.partialorder %v6895_v7, 5.0  ;;  %v2219_v15 = vsel %vm2213_vm15, %v4560_v38, 0.0  ;;  %v2224_v25 = vsel %vm2176_vm3, %v4562_v34, %v2218_v8  ;;  %2337 = vmatprep.subr.bf16.mxu0 %v6551_v4 }
 0x1e8   :  { %v1586_v50 = vsel %vm6946_vm10, %v6909_v62, %v1580_v24  ;;  %v2225_v10 = vsel %vm2177_vm4, %v4571_v27, %v2219_v15  ;;  %vm6948_vm7 = vcmp.eq.f32.partialorder %v4526_v6, 8.0  ;;  %vm1593_vm12 = vcmp.eq.f32.partialorder %v6911_v48, 9.0 }
 0x1e9   :  { %v1589_v33 = vpack.c.bf16 %v1586_v50, %v1585_v58  ;;  %v2230_v55 = vsel %vm6948_vm7, %v6947_v56, %v2224_v25  ;;  %vm6950_vm13 = vcmp.eq.f32.partialorder %v4532_v57, 8.0  ;;  %vm6951_vm3 = vcmp.eq.f32.partialorder %v4526_v6, 7.0  ;;  %v2682_v58 = vld [vmem:[%s5979_s1 + $0x8] ss:$16 sps:$4 sm:$0xff]  }
 0x1ea   :  { %v2231_v38 = vsel %vm6950_vm13, %v6949_v51, %v2225_v10  ;;  %v2236_v34 = vsel %vm6951_vm3, %v4553_v17, %v2230_v55  ;;  %vm1594_vm11 = vcmp.eq.f32.partialorder %v6914_v13, 9.0  ;;  %v1599_v27 = vsel %vm1593_vm12, %v6952_v3, 0.0 }
 0x1eb   :  { %1747 = vmatpush1.bf16.msra.mxu1 %v1589_v33  ;;  %vm6954_vm4 = vcmp.eq.f32.partialorder %v4532_v57, 7.0  ;;  %v1600_v61 = vsel %vm1594_vm11, %v6918_v46, 0.0  ;;  %vm6956_vm0 = vcmp.eq.f32.partialorder %v6911_v48, 8.0  ;;  %vm1595_vm1 = vcmp.eq.f32.partialorder %v6871_v19, 9.0 }
 0x1ec   :  { %v2237_v49 = vsel %vm6954_vm4, %v6953_v14, %v2231_v38  ;;  %v1605_v6 = vsel %vm6956_vm0, %v6955_v20, %v1599_v27  ;;  %1748 = vmatprep.subr.bf16.mxu1 %v6551_v4  ;;  %vm6958_vm9 = vcmp.eq.f32.partialorder %v6914_v13, 8.0  ;;  %vm6959_vm15 = vcmp.eq.f32.partialorder %v6911_v48, 7.0 }
 0x1ed   :  { %v2240_v17 = vpack.c.bf16 %v2237_v49, %v2236_v34  ;;  %v1606_v63 = vsel %vm6958_vm9, %v6957_v9, %v1600_v61  ;;  %v1611_v57 = vsel %vm6959_vm15, %v6923_v41, %v1605_v6  ;;  %vm1596_vm5 = vcmp.eq.f32.partialorder %v6874_v18, 9.0  ;;  %v6976_v6 = vld [vmem:[#allocation6_spill] sm:$0xff] }
 0x1ee   :  { %vm6960_vm10 = vcmp.eq.f32.partialorder %v6914_v13, 7.0  ;;  %vm6961_vm7 = vcmp.eq.f32.partialorder %v6911_v48, 6.0  ;;  %v1601_v29 = vsel %vm1595_vm1, %v6877_v23, 0.0  ;;  %v1602_v60 = vsel %vm1596_vm5, %v6878_v21, 0.0 }
 0x1ef   :  { %v1612_v54 = vsel %vm6960_vm10, %v6925_v11, %v1606_v63  ;;  %v1617_v59 = vsel %vm6961_vm7, %v6927_v37, %v1611_v57  ;;  %2338 = vmatpush1.bf16.msra.mxu0 %v2240_v17  ;;  %vm6962_vm13 = vcmp.eq.f32.partialorder %v6914_v13, 6.0  ;;  %v1607_v42 = vsel %vm1559_vm8, %v6879_v36, %v1601_v29  ;;  %v6981_v57 = vld [vmem:[#allocation8_spill] sm:$0xff] }
 0x1f0   :  { %v1618_v12 = vsel %vm6962_vm13, %v6929_v53, %v1612_v54  ;;  %v1608_v32 = vsel %vm1560_vm14, %v6881_v31, %v1602_v60  ;;  %vm1597_vm3 = vcmp.eq.f32.partialorder %v6892_v43, 9.0  ;;  %vm6963_vm4 = vcmp.eq.f32.partialorder %v6871_v19, 7.0  ;;  %v6982_v54 = vld [vmem:[#allocation90_spill] sm:$0xff] }
 0x1f1   :  { %v1623_v22 = vpack.c.bf16 %v1618_v12, %v1617_v59  ;;  %v1613_v40 = vsel %vm6963_vm4, %v6883_v47, %v1607_v42  ;;  %vm6964_vm0 = vcmp.eq.f32.partialorder %v6874_v18, 7.0  ;;  %vm1598_vm9 = vcmp.eq.f32.partialorder %v6895_v7, 9.0 }
 0x1f2   :  { %v1614_v16 = vsel %vm6964_vm0, %v6885_v5, %v1608_v32  ;;  %vm6965_vm15 = vcmp.eq.f32.partialorder %v6871_v19, 6.0  ;;  %vm6966_vm10 = vcmp.eq.f32.partialorder %v6874_v18, 6.0  ;;  %v1603_v24 = vsel %vm1597_vm3, %v6896_v39, 0.0  ;;  %2350 = vmatmul.mubr.bf16.vlgmr.msra.gmra.mrb[12].mxu0 %v2682_v58 }
 0x1f3   :  { %v1619_v45 = vsel %vm6965_vm15, %v6887_v35, %v1613_v40  ;;  %v1620_v0 = vsel %vm6966_vm10, %v6889_v52, %v1614_v16  ;;  %v1604_v8 = vsel %vm1598_vm9, %v6898_v26, 0.0  ;;  %1749 = vmatpush1.bf16.msra.mxu1 %v1623_v22  ;;  %v1609_v15 = vsel %vm1561_vm2, %v6899_v1, %v1603_v24 }
 0x1f4   :  { %v1624_v50 = vpack.c.bf16 %v1620_v0, %v1619_v45  ;;  %v1610_v25 = vsel %vm1562_vm6, %v6901_v2, %v1604_v8  ;;  %vm1629_vm7 = vcmp.eq.f32.partialorder %v6911_v48, 10.0  ;;  %1750 = vmatprep.subr.bf16.mxu1 %v6551_v4  ;;  %vm6967_vm13 = vcmp.eq.f32.partialorder %v6892_v43, 7.0 }
 0x1f5   :  { %v1615_v33 = vsel %vm6967_vm13, %v6903_v30, %v1609_v15  ;;  %vm6968_vm4 = vcmp.eq.f32.partialorder %v6895_v7, 7.0  ;;  %vm1630_vm0 = vcmp.eq.f32.partialorder %v6914_v13, 10.0  ;;  %v1635_v56 = vsel %vm1629_vm7, %v6952_v3, 0.0 }
 0x1f6   :  { %v1616_v10 = vsel %vm6968_vm4, %v6905_v28, %v1610_v25  ;;  %vm6969_vm15 = vcmp.eq.f32.partialorder %v6892_v43, 6.0  ;;  %vm6970_vm10 = vcmp.eq.f32.partialorder %v6895_v7, 6.0  ;;  %v1636_v38 = vsel %vm1630_vm0, %v6918_v46, 0.0 }
 0x1f7   :  { %v1621_v55 = vsel %vm6969_vm15, %v6907_v44, %v1615_v33  ;;  %v1622_v51 = vsel %vm6970_vm10, %v6909_v62, %v1616_v10  ;;  %v1641_v34 = vsel %vm1593_vm12, %v6955_v20, %v1635_v56  ;;  %v1642_v14 = vsel %vm1594_vm11, %v6957_v9, %v1636_v38  ;;  %1751 = vmatpush1.bf16.msra.mxu1 %v1624_v50  ;;  %v6980_v9 = vld [vmem:[#allocation9_spill] sm:$0xff] }
 0x1f8   :  { %v1625_v27 = vpack.c.bf16 %v1622_v51, %v1621_v55  ;;  %vm6971_vm7 = vcmp.eq.f32.partialorder %v6911_v48, 8.0  ;;  %vm1631_vm13 = vcmp.eq.f32.partialorder %v6871_v19, 10.0  ;;  %vm6972_vm4 = vcmp.eq.f32.partialorder %v6914_v13, 8.0  ;;  %1752 = vmatprep.subr.bf16.mxu1 %v6551_v4 }
 0x1f9   :  { %v1647_v3 = vsel %vm6971_vm7, %v6923_v41, %v1641_v34  ;;  %v1648_v46 = vsel %vm6972_vm4, %v6925_v11, %v1642_v14  ;;  %vm6973_vm0 = vcmp.eq.f32.partialorder %v6911_v48, 7.0  ;;  %vm1632_vm12 = vcmp.eq.f32.partialorder %v6874_v18, 10.0 }
 0x1fa   :  { %v1653_v49 = vsel %vm6973_vm0, %v6927_v37, %v1647_v3  ;;  %v1637_v61 = vsel %vm1631_vm13, %v6877_v23, 0.0  ;;  %vm6974_vm11 = vcmp.eq.f32.partialorder %v6914_v13, 7.0  ;;  %v1638_v20 = vsel %vm1632_vm12, %v6878_v21, 0.0 }
 0x1fb   :  { %v1654_v41 = vsel %vm6974_vm11, %v6929_v53, %v1648_v46  ;;  %v1643_v11 = vsel %vm1595_vm1, %v6879_v36, %v1637_v61  ;;  %vm1633_vm15 = vcmp.eq.f32.partialorder %v6892_v43, 10.0  ;;  %v1644_v48 = vsel %vm1596_vm5, %v6881_v31, %v1638_v20  ;;  %1753 = vmatpush1.bf16.msra.mxu1 %v1625_v27  ;;  %v6975_v53 = vld [vmem:[#allocation80_spill] sm:$0xff] }
 0x1fc   :  { %v1649_v23 = vsel %vm1559_vm8, %v6883_v47, %v1643_v11  ;;  %vm1634_vm10 = vcmp.eq.f32.partialorder %v6895_v7, 10.0  ;;  %v1650_v13 = vsel %vm1560_vm14, %v6885_v5, %v1644_v48  ;;  %v1639_v21 = vsel %vm1633_vm15, %v6896_v39, 0.0  ;;  %1754 = vmatprep.subr.bf16.mxu1 %v6551_v4  ;;  %v2548_v60 = vpop.f32.mrb[4].mxu0 }
 0x1fd   :  { %v1640_v36 = vsel %vm1634_vm10, %v6898_v26, 0.0  ;;  %v1659_v37 = vpack.c.bf16 %v1654_v41, %v1653_v49  ;;  %v1645_v31 = vsel %vm1597_vm3, %v6899_v1, %v1639_v21  ;;  %v2506_v17 = vadd.f32 %v6976_v6, %v6975_v53  ;;  %v6979_v26 = vld [vmem:[#allocation7_spill] sm:$0xff]  ;;  %v2549_v12 = vpop.f32.mrb[5].mxu0 }
 0x1fe   :  { %v1646_v47 = vsel %vm1598_vm9, %v6901_v2, %v1640_v36  ;;  %vm6977_vm8 = vcmp.eq.f32.partialorder %v6871_v19, 7.0  ;;  %vm6978_vm14 = vcmp.eq.f32.partialorder %v6874_v18, 7.0  ;;  %v2509_v1 = vadd.f32 %v6980_v9, %v6979_v26  ;;  %v6983_v19 = vld [vmem:[#allocation91_spill] sm:$0xff]  ;;  %v2551_v32 = vpop.f32.mrb[6].mxu0 }
 0x1ff   :  { %v1655_v5 = vsel %vm6977_vm8, %v6887_v35, %v1649_v23  ;;  %v1656_v39 = vsel %vm6978_vm14, %v6889_v52, %v1650_v13  ;;  %v1651_v2 = vsel %vm1561_vm2, %v6903_v30, %v1645_v31  ;;  %v1652_v63 = vsel %vm1562_vm6, %v6905_v28, %v1646_v47  ;;  %v6984_v35 = vld [vmem:[#allocation25_spill] sm:$0xff]  ;;  %1755 = vmatpush1.bf16.msra.mxu1 %v1659_v37  ;;  %v2552_v22 = vpop.f32.mrb[7].mxu0 }
 0x200   :  { %v2528_v59 = vadd.f32 %v6982_v54, %v6981_v57  ;;  %v2531_v29 = vadd.f32 %v6984_v35, %v6983_v19  ;;  %v1660_v18 = vpack.c.bf16 %v1656_v39, %v1655_v5  ;;  %1756 = vmatprep.subr.bf16.mxu1 %v6551_v4  ;;  %vm6985_vm1 = vcmp.eq.f32.partialorder %v6892_v43, 7.0 }
 0x201   :  { %v1657_v52 = vsel %vm6985_vm1, %v6907_v44, %v1651_v2  ;;  %vm6986_vm2 = vcmp.eq.f32.partialorder %v6895_v7, 7.0  ;;  %v2550_v42 = vadd.f32 %v2549_v12, %v2548_v60  ;;  %v2553_v40 = vadd.f32 %v2552_v22, %v2551_v32 }
 0x202   :  { %v1658_v30 = vsel %vm6986_vm2, %v6909_v62, %v1652_v63 }
 0x203   :  { %1757 = vmatpush1.bf16.msra.mxu1 %v1660_v18  ;;  %v1661_v28 = vpack.c.bf16 %v1658_v30, %v1657_v52 }
 0x204   :  { %1758 = vmatprep.subr.bf16.mxu1 %v6551_v4 }
 0x207   :  { %1759 = vmatpush1.bf16.msra.mxu1 %v1661_v28 }
 0x20a   :  { %1771 = vmatmul.mubr.bf16.vlgmr.msra.gmra.mrb[12].mxu1 %v2682_v58 }
 0x232   :  { %v616_v16 = vpop.f32.mrb[4].mxu1 }
 0x233   :  { %v617_v45 = vadd.f32 %v2506_v17, %v616_v16  ;;  %v618_v43 = vpop.f32.mrb[5].mxu1 }
 0x234   :  { %v619_v44 = vpop.f32.mrb[6].mxu1 }
 0x235   :  { %v620_v0 = vadd.f32 %v2509_v1, %v619_v44  ;;  %v621_v24 = vpop.f32.mrb[7].mxu1 }
 0x26e   :  { %v2570_v7 = vpop.f32.mrb[8].mxu0 }
 0x26f   :  { %v2571_v62 = vpop.f32.mrb[9].mxu0 }
 0x270   :  { %v2572_v8 = vadd.f32 %v2571_v62, %v2570_v7  ;;  %v2573_v50 = vpop.f32.mrb[10].mxu0 }
 0x271   :  { %v2574_v15 = vpop.f32.mrb[11].mxu0 }
 0x272   :  { %v2575_v4 = vadd.f32 %v2574_v15, %v2573_v50 }
 0x29b   :  { %v1193_v25 = vpop.f32.mrb[8].mxu1 }
 0x29c   :  { %v1194_v58 = vadd.f32 %v2528_v59, %v1193_v25  ;;  %v1195_v33 = vpop.f32.mrb[9].mxu1 }
 0x29d   :  { %v1196_v10 = vpop.f32.mrb[10].mxu1 }
 0x29e   :  { %v1200_v56 = vmax.f32 %v617_v45, %v1194_v58  ;;  %v1197_v55 = vadd.f32 %v2531_v29, %v1196_v10  ;;  %v1198_v51 = vpop.f32.mrb[11].mxu1 }
 0x2a0   :  { %v1201_v38 = vmax.f32 %v620_v0, %v1197_v55 }
 0x2c5   :  { %v2351_v34 = vpop.f32.mrb[12].mxu0 }
 0x2c6   :  { %v2352_v27 = vadd.f32 %v2572_v8, %v2351_v34  ;;  %v2353_v14 = vpop.f32.mrb[13].mxu0 }
 0x2c7   :  { %v2354_v3 = vpop.f32.mrb[14].mxu0 }
 0x2c8   :  { %v2355_v46 = vadd.f32 %v2575_v4, %v2354_v3  ;;  %v2356_v49 = vpop.f32.mrb[15].mxu0 }
 0x2dd   :  { %v1772_v61 = vpop.f32.mrb[12].mxu1 }
 0x2de   :  { %v1773_v41 = vadd.f32 %v2550_v42, %v1772_v61  ;;  %v1774_v20 = vpop.f32.mrb[13].mxu1 }
 0x2df   :  { %v1775_v11 = vpop.f32.mrb[14].mxu1 }
 0x2e0   :  { %v1779_v48 = vmax.f32 %v1200_v56, %v1773_v41  ;;  %v1776_v23 = vadd.f32 %v2553_v40, %v1775_v11  ;;  %v1777_v13 = vpop.f32.mrb[15].mxu1 }
 0x2e2   :  { %v2358_v21 = vmax.f32 %v1779_v48, %v2352_v27  ;;  %v1780_v36 = vmax.f32 %v1201_v38, %v1776_v23 }
 0x2e4   :  { %v2359_v37 = vmax.f32 %v1780_v36, %v2355_v46 }
 0x2e6   :  { %v2475_v31 = vpack.c.bf16 %v2359_v37, %v2358_v21 }
 0x2e8   :  { %2476 = vst [vmem:[%s5980_s2] sm:$0xff] %v2475_v31  }

</bundles_post_ra>
